<compile_context>
chip_gen: v6e
topology: v6e:2x2x1
jax: 0.10.0
libtpu: 0.0.40
codegen_flags: <defaults>
</compile_context>

<pallas_src>
import functools

import numpy as np
import jax
import jax.numpy as jnp
from jax.experimental import pallas as pl
from jax.experimental.pallas import tpu as pltpu

EPS = 1e-5
CH = 64            # ResNet feature width
NUM_CONVS = 5      # stem + 2 residual blocks * 2 convs


# ----------------------------------------------------------------------------
# Fused Pallas kernel: one batch element per grid step, everything in VMEM
# ----------------------------------------------------------------------------
def _global_fused_kernel(x_ref, w_ref, s_ref, b_ref, m_ref, head_ref, o_ref, *, hw, width):
    """Fused ResNet feature extractor + 1x1 head for ONE batch element.

    x_ref:    (1, CH, HW)       f32  channel-major input (in-channels zero-padded to CH)
    w_ref:    (5, CH, 9*CH)     bf16 conv weights, column index = tap*CH + cin
    s_ref:    (5, CH, 1)        f32  BN scale (gamma / sqrt(var + eps))
    b_ref:    (5, CH, 1)        f32  BN bias  (beta - mean * scale)
    m_ref:    (9, 1, HW)        f32  0/1 halo-validity mask per tap (output-position indexed)
    head_ref: (CH, 1)           f32  1x1-conv head weight
    o_ref:    (1, 1, HW)        f32  flattened output row
    """
    # Flattened-index offset of each of the 9 taps (ky, kx); spatial layout is row-major.
    offs = [(ky - 1) * width + (kx - 1) for ky in range(3) for kx in range(3)]

    def conv_bn_relu(x, layer, residual=None):
        # x: (CH, HW) f32  ->  (CH, HW) f32
        cols = []
        for t, off in enumerate(offs):
            if off == 0:
                tap = x                                   # centre tap: no shift, mask all-ones
            else:
                # tap[:, p] = x[:, p + off]; the halo mask kills wrap-around positions.
                tap = pltpu.roll(x, shift=(-off) % hw, axis=1) * m_ref[t]
            cols.append(tap.astype(jnp.bfloat16))
        patches = jnp.concatenate(cols, axis=0)           # (9*CH, HW) bf16, in-VMEM im2col
        y = jnp.dot(w_ref[layer], patches,
                    preferred_element_type=jnp.float32)   # one MXU matmul per layer
        y = y * s_ref[layer] + b_ref[layer]               # BN (eval), f32
        if residual is not None:
            y = y + residual
        return jnp.maximum(y, 0.0)

    h0 = conv_bn_relu(x_ref[0], 0)                              # stem
    h1 = conv_bn_relu(conv_bn_relu(h0, 1), 2, residual=h0)      # basic block 1
    h2 = conv_bn_relu(conv_bn_relu(h1, 3), 4, residual=h1)      # basic block 2
    # 1x1 conv (64 -> 1) + flatten: per-channel scale + sublane (XLU) reduction, f32.
    o_ref[0] = jnp.sum(h2 * head_ref[...], axis=0, keepdims=True)


# ----------------------------------------------------------------------------
# One-time parameter packing (BN fold, weight layout, halo masks)
# ----------------------------------------------------------------------------
def prepare_params(p, h, w):
    def pack_conv(w_hwio):
        cin = w_hwio.shape[2]
        wf = w_hwio
        if cin < CH:                                       # stem: zero-pad cin -> CH
            wf = jnp.pad(wf, ((0, 0), (0, 0), (0, CH - cin), (0, 0)))
        # (3,3,CH,CH) -> (cout, ky, kx, cin) -> (CH, 9*CH): column = tap*CH + cin
        return jnp.transpose(wf, (3, 0, 1, 2)).reshape(CH, 9 * CH)

    w_all = jnp.stack([
        pack_conv(p["stem_w"]),
        pack_conv(p["b1a_w"]),
        pack_conv(p["b1b_w"]),
        pack_conv(p["b2a_w"]),
        pack_conv(p["b2b_w"]),
    ]).astype(jnp.bfloat16)                                # (5, CH, 9*CH) bf16 MXU operand

    s_all = jnp.stack([p["stem_s"], p["b1a_s"], p["b1b_s"], p["b2a_s"], p["b2b_s"]]
                      ).reshape(NUM_CONVS, CH, 1).astype(jnp.float32)
    b_all = jnp.stack([p["stem_b"], p["b1a_b"], p["b1b_b"], p["b2a_b"], p["b2b_b"]]
                      ).reshape(NUM_CONVS, CH, 1).astype(jnp.float32)

    # 0/1 halo masks per tap, indexed by flattened *output* position p = hi*W + wi.
    hh, ww = np.meshgrid(np.arange(h), np.arange(w), indexing="ij")
    hh = hh.reshape(1, -1)
    ww = ww.reshape(1, -1)
    masks = []
    for ky in range(3):
        for kx in range(3):
            valid = ((hh + ky - 1 >= 0) & (hh + ky - 1 < h) &
                     (ww + kx - 1 >= 0) & (ww + kx - 1 < w))
            masks.append(valid.astype(np.float32))
    masks = jnp.asarray(np.stack(masks), dtype=jnp.float32)   # (9, 1, h*w)

    head = p["head_w"].reshape(CH, 1).astype(jnp.float32)
    return {"w": w_all, "s": s_all, "b": b_all, "m": masks, "head": head}


# ----------------------------------------------------------------------------
# `Global` forward
# ----------------------------------------------------------------------------
@jax.jit
def global_forward(x_nchw, packed):
    n, cin, h, w = x_nchw.shape
    hw = h * w
    x = x_nchw.reshape(n, cin, hw)                         # NCHW is already channel-major
    if cin < CH:
        x = jnp.pad(x, ((0, 0), (0, CH - cin), (0, 0)))    # zero-pad channels to CH

    kernel = functools.partial(_global_fused_kernel, hw=hw, width=w)
    out = pl.pallas_call(
        kernel,
        out_shape=jax.ShapeDtypeStruct((n, 1, hw), jnp.float32),
        grid=(n,),
        in_specs=[
            pl.BlockSpec((1, CH, hw), lambda i: (i, 0, 0)),             # per-batch input
            pl.BlockSpec((NUM_CONVS, CH, 9 * CH), lambda i: (0, 0, 0)),  # weights (bf16)
            pl.BlockSpec((NUM_CONVS, CH, 1), lambda i: (0, 0, 0)),       # BN scale
            pl.BlockSpec((NUM_CONVS, CH, 1), lambda i: (0, 0, 0)),       # BN bias
            pl.BlockSpec((9, 1, hw), lambda i: (0, 0, 0)),               # halo masks
            pl.BlockSpec((CH, 1), lambda i: (0, 0)),                     # head weight
        ],
        out_specs=pl.BlockSpec((1, 1, hw), lambda i: (i, 0, 0)),
        compiler_params=pltpu.CompilerParams(
            dimension_semantics=("parallel",)),             # megacore / v7x dual-TC
    )(x, packed["w"], packed["s"], packed["b"], packed["m"], packed["head"])
    return out.reshape(n, hw)


# ----------------------------------------------------------------------------
# Pure-JAX reference (silent numerical sanity check)
# ----------------------------------------------------------------------------
def _ref_forward(x_nchw, p):
    def conv(x, w):
        return jax.lax.conv_general_dilated(
            x, w, (1, 1), "SAME", dimension_numbers=("NHWC", "HWIO", "NHWC"))

    x = jnp.transpose(x_nchw, (0, 2, 3, 1))
    h = jax.nn.relu(conv(x, p["stem_w"]) * p["stem_s"] + p["stem_b"])
    t = jax.nn.relu(conv(h, p["b1a_w"]) * p["b1a_s"] + p["b1a_b"])
    h = jax.nn.relu(conv(t, p["b1b_w"]) * p["b1b_s"] + p["b1b_b"] + h)
    t = jax.nn.relu(conv(h, p["b2a_w"]) * p["b2a_s"] + p["b2a_b"])
    h = jax.nn.relu(conv(t, p["b2b_w"]) * p["b2b_s"] + p["b2b_b"] + h)
    y = conv(h, p["head_w"].reshape(1, 1, -1, 1))
    return y.reshape(y.shape[0], -1)


# ----------------------------------------------------------------------------
# Deterministic parameter construction (PyTorch-default BN stats => eval BN)
# ----------------------------------------------------------------------------
def _make_conv_bn(key, cin, cout):
    w = jax.random.normal(key, (3, 3, cin, cout), jnp.float32) * jnp.sqrt(2.0 / (9 * cin))
    # Store conv weights at bf16 precision (the kernel feeds them to the MXU as bf16),
    # so the f32 reference sees exactly the same weight values.
    w = w.astype(jnp.bfloat16).astype(jnp.float32)
    gamma = jnp.ones((cout,), jnp.float32)
    beta = jnp.zeros((cout,), jnp.float32)
    mean = jnp.zeros((cout,), jnp.float32)
    var = jnp.ones((cout,), jnp.float32)
    scale = gamma / jnp.sqrt(var + EPS)
    bias = beta - mean * scale
    return w, scale, bias


if __name__ == "__main__":
    key = jax.random.PRNGKey(0)
    N, Cin, H, W = 2, 4, 16, 16

    keys = jax.random.split(key, 7)
    x_nchw = jax.random.normal(keys[0], (N, Cin, H, W), jnp.float32)

    params = {}
    params["stem_w"], params["stem_s"], params["stem_b"] = _make_conv_bn(keys[1], Cin, CH)
    params["b1a_w"], params["b1a_s"], params["b1a_b"] = _make_conv_bn(keys[2], CH, CH)
    params["b1b_w"], params["b1b_s"], params["b1b_b"] = _make_conv_bn(keys[3], CH, CH)
    params["b2a_w"], params["b2a_s"], params["b2a_b"] = _make_conv_bn(keys[4], CH, CH)
    params["b2b_w"], params["b2b_s"], params["b2b_b"] = _make_conv_bn(keys[5], CH, CH)
    # nn.Conv2d(64, 1, 1, 1, bias=False): weight (1, 64, 1, 1) -> stored as (64,)
    params["head_w"] = jax.random.normal(keys[6], (CH,), jnp.float32) * jnp.sqrt(2.0 / CH)

    packed = prepare_params(params, H, W)

    out = jax.block_until_ready(global_forward(x_nchw, packed))
    assert out.shape == (N, H * W), out.shape

    ref = jax.block_until_ready(_ref_forward(x_nchw, params))
    # Tolerance covers bf16 rounding of the MXU activation inputs
    # (weights are stored at bf16 precision for both paths).
    assert jnp.allclose(out, ref, atol=1e-1, rtol=5e-2), float(jnp.max(jnp.abs(out - ref)))

    print("KERNEL_OK")
</pallas_src>

<mosaic_0001>
module attributes {stable_mosaic.version = 11 : i64} {
  func.func @_global_fused_kernel(%arg0: i32, %arg1: memref<1x64x256xf32, #tpu.memory_space<vmem>>, %arg2: memref<5x64x576xbf16, #tpu.memory_space<vmem>>, %arg3: memref<5x64x1xf32, #tpu.memory_space<vmem>>, %arg4: memref<5x64x1xf32, #tpu.memory_space<vmem>>, %arg5: memref<9x1x256xf32, #tpu.memory_space<vmem>>, %arg6: memref<64x1xf32, #tpu.memory_space<vmem>>, %arg7: memref<1x1x256xf32, #tpu.memory_space<vmem>>) attributes {dimension_semantics = [#tpu.dimension_semantics<parallel>], iteration_bounds = array<i64: 2>, scalar_prefetch = 0 : i64, scratch_operands = 0 : i64, tpu.core_type = #tpu.core_type<tc>, window_params = [{transform_indices = @transform_0, window_bounds = array<i64: 1, 64, 256>}, {pipeline_mode = #tpu.pipeline_mode<synchronous>, transform_indices = @transform_1, window_bounds = array<i64: 5, 64, 576>}, {pipeline_mode = #tpu.pipeline_mode<synchronous>, transform_indices = @transform_2, window_bounds = array<i64: 5, 64, 1>}, {pipeline_mode = #tpu.pipeline_mode<synchronous>, transform_indices = @transform_3, window_bounds = array<i64: 5, 64, 1>}, {pipeline_mode = #tpu.pipeline_mode<synchronous>, transform_indices = @transform_4, window_bounds = array<i64: 9, 1, 256>}, {pipeline_mode = #tpu.pipeline_mode<synchronous>, transform_indices = @transform_5, window_bounds = array<i64: 64, 1>}, {transform_indices = @transform_6, window_bounds = array<i64: 1, 1, 256>}]} {
    %c0 = arith.constant 0 : index
    %c0_0 = arith.constant 0 : index
    %c0_1 = arith.constant 0 : index
    %0 = vector.load %arg1[%c0, %c0_0, %c0_1] : memref<1x64x256xf32, #tpu.memory_space<vmem>>, vector<1x64x256xf32>
    %1 = vector.shape_cast %0 : vector<1x64x256xf32> to vector<64x256xf32>
    %c17_i32 = arith.constant 17 : i32
    %2 = tpu.dynamic_rotate %1 by %c17_i32 dim 1 : vector<64x256xf32>, i32 -> vector<64x256xf32>
    %c0_2 = arith.constant 0 : index
    %c0_3 = arith.constant 0 : index
    %c0_4 = arith.constant 0 : index
    %3 = vector.load %arg5[%c0_2, %c0_3, %c0_4] : memref<9x1x256xf32, #tpu.memory_space<vmem>>, vector<1x1x256xf32>
    %4 = vector.shape_cast %3 : vector<1x1x256xf32> to vector<1x256xf32>
    %5 = vector.broadcast %4 : vector<1x256xf32> to vector<64x256xf32>
    %6 = arith.mulf %2, %5 : vector<64x256xf32>
    %7 = arith.truncf %6 : vector<64x256xf32> to vector<64x256xbf16>
    %c16_i32 = arith.constant 16 : i32
    %8 = tpu.dynamic_rotate %1 by %c16_i32 dim 1 : vector<64x256xf32>, i32 -> vector<64x256xf32>
    %c1 = arith.constant 1 : index
    %c0_5 = arith.constant 0 : index
    %c0_6 = arith.constant 0 : index
    %9 = vector.load %arg5[%c1, %c0_5, %c0_6] : memref<9x1x256xf32, #tpu.memory_space<vmem>>, vector<1x1x256xf32>
    %10 = vector.shape_cast %9 : vector<1x1x256xf32> to vector<1x256xf32>
    %11 = vector.broadcast %10 : vector<1x256xf32> to vector<64x256xf32>
    %12 = arith.mulf %8, %11 : vector<64x256xf32>
    %13 = arith.truncf %12 : vector<64x256xf32> to vector<64x256xbf16>
    %c15_i32 = arith.constant 15 : i32
    %14 = tpu.dynamic_rotate %1 by %c15_i32 dim 1 : vector<64x256xf32>, i32 -> vector<64x256xf32>
    %c2 = arith.constant 2 : index
    %c0_7 = arith.constant 0 : index
    %c0_8 = arith.constant 0 : index
    %15 = vector.load %arg5[%c2, %c0_7, %c0_8] : memref<9x1x256xf32, #tpu.memory_space<vmem>>, vector<1x1x256xf32>
    %16 = vector.shape_cast %15 : vector<1x1x256xf32> to vector<1x256xf32>
    %17 = vector.broadcast %16 : vector<1x256xf32> to vector<64x256xf32>
    %18 = arith.mulf %14, %17 : vector<64x256xf32>
    %19 = arith.truncf %18 : vector<64x256xf32> to vector<64x256xbf16>
    %c1_i32 = arith.constant 1 : i32
    %20 = tpu.dynamic_rotate %1 by %c1_i32 dim 1 : vector<64x256xf32>, i32 -> vector<64x256xf32>
    %c3 = arith.constant 3 : index
    %c0_9 = arith.constant 0 : index
    %c0_10 = arith.constant 0 : index
    %21 = vector.load %arg5[%c3, %c0_9, %c0_10] : memref<9x1x256xf32, #tpu.memory_space<vmem>>, vector<1x1x256xf32>
    %22 = vector.shape_cast %21 : vector<1x1x256xf32> to vector<1x256xf32>
    %23 = vector.broadcast %22 : vector<1x256xf32> to vector<64x256xf32>
    %24 = arith.mulf %20, %23 : vector<64x256xf32>
    %25 = arith.truncf %24 : vector<64x256xf32> to vector<64x256xbf16>
    %26 = arith.truncf %1 : vector<64x256xf32> to vector<64x256xbf16>
    %c255_i32 = arith.constant 255 : i32
    %27 = tpu.dynamic_rotate %1 by %c255_i32 dim 1 : vector<64x256xf32>, i32 -> vector<64x256xf32>
    %c5 = arith.constant 5 : index
    %c0_11 = arith.constant 0 : index
    %c0_12 = arith.constant 0 : index
    %28 = vector.load %arg5[%c5, %c0_11, %c0_12] : memref<9x1x256xf32, #tpu.memory_space<vmem>>, vector<1x1x256xf32>
    %29 = vector.shape_cast %28 : vector<1x1x256xf32> to vector<1x256xf32>
    %30 = vector.broadcast %29 : vector<1x256xf32> to vector<64x256xf32>
    %31 = arith.mulf %27, %30 : vector<64x256xf32>
    %32 = arith.truncf %31 : vector<64x256xf32> to vector<64x256xbf16>
    %c241_i32 = arith.constant 241 : i32
    %33 = tpu.dynamic_rotate %1 by %c241_i32 dim 1 : vector<64x256xf32>, i32 -> vector<64x256xf32>
    %c6 = arith.constant 6 : index
    %c0_13 = arith.constant 0 : index
    %c0_14 = arith.constant 0 : index
    %34 = vector.load %arg5[%c6, %c0_13, %c0_14] : memref<9x1x256xf32, #tpu.memory_space<vmem>>, vector<1x1x256xf32>
    %35 = vector.shape_cast %34 : vector<1x1x256xf32> to vector<1x256xf32>
    %36 = vector.broadcast %35 : vector<1x256xf32> to vector<64x256xf32>
    %37 = arith.mulf %33, %36 : vector<64x256xf32>
    %38 = arith.truncf %37 : vector<64x256xf32> to vector<64x256xbf16>
    %c240_i32 = arith.constant 240 : i32
    %39 = tpu.dynamic_rotate %1 by %c240_i32 dim 1 : vector<64x256xf32>, i32 -> vector<64x256xf32>
    %c7 = arith.constant 7 : index
    %c0_15 = arith.constant 0 : index
    %c0_16 = arith.constant 0 : index
    %40 = vector.load %arg5[%c7, %c0_15, %c0_16] : memref<9x1x256xf32, #tpu.memory_space<vmem>>, vector<1x1x256xf32>
    %41 = vector.shape_cast %40 : vector<1x1x256xf32> to vector<1x256xf32>
    %42 = vector.broadcast %41 : vector<1x256xf32> to vector<64x256xf32>
    %43 = arith.mulf %39, %42 : vector<64x256xf32>
    %44 = arith.truncf %43 : vector<64x256xf32> to vector<64x256xbf16>
    %c239_i32 = arith.constant 239 : i32
    %45 = tpu.dynamic_rotate %1 by %c239_i32 dim 1 : vector<64x256xf32>, i32 -> vector<64x256xf32>
    %c8 = arith.constant 8 : index
    %c0_17 = arith.constant 0 : index
    %c0_18 = arith.constant 0 : index
    %46 = vector.load %arg5[%c8, %c0_17, %c0_18] : memref<9x1x256xf32, #tpu.memory_space<vmem>>, vector<1x1x256xf32>
    %47 = vector.shape_cast %46 : vector<1x1x256xf32> to vector<1x256xf32>
    %48 = vector.broadcast %47 : vector<1x256xf32> to vector<64x256xf32>
    %49 = arith.mulf %45, %48 : vector<64x256xf32>
    %50 = arith.truncf %49 : vector<64x256xf32> to vector<64x256xbf16>
    %51 = tpu.concatenate %7, %13, %19, %25, %26, %32, %38, %44, %50 in 0 : vector<64x256xbf16>, vector<64x256xbf16>, vector<64x256xbf16>, vector<64x256xbf16>, vector<64x256xbf16>, vector<64x256xbf16>, vector<64x256xbf16>, vector<64x256xbf16>, vector<64x256xbf16> -> vector<576x256xbf16>
    %c0_19 = arith.constant 0 : index
    %c0_20 = arith.constant 0 : index
    %c0_21 = arith.constant 0 : index
    %52 = vector.load %arg2[%c0_19, %c0_20, %c0_21] : memref<5x64x576xbf16, #tpu.memory_space<vmem>>, vector<1x64x576xbf16>
    %53 = vector.shape_cast %52 : vector<1x64x576xbf16> to vector<64x576xbf16>
    %cst = arith.constant dense<0.000000e+00> : vector<64x256xf32>
    %54 = tpu.matmul %53, %51, %cst {dimension_numbers = #tpu.dot_dimension_numbers<[1], [0], [0], [1], [0, 0, 1, 1], [], []>} : vector<64x576xbf16>, vector<576x256xbf16>, vector<64x256xf32> -> vector<64x256xf32>
    %c0_22 = arith.constant 0 : index
    %c0_23 = arith.constant 0 : index
    %c0_24 = arith.constant 0 : index
    %55 = vector.load %arg3[%c0_22, %c0_23, %c0_24] : memref<5x64x1xf32, #tpu.memory_space<vmem>>, vector<1x64x1xf32>
    %56 = vector.shape_cast %55 : vector<1x64x1xf32> to vector<64x1xf32>
    %57 = vector.broadcast %56 : vector<64x1xf32> to vector<64x256xf32>
    %58 = arith.mulf %54, %57 : vector<64x256xf32>
    %c0_25 = arith.constant 0 : index
    %c0_26 = arith.constant 0 : index
    %c0_27 = arith.constant 0 : index
    %59 = vector.load %arg4[%c0_25, %c0_26, %c0_27] : memref<5x64x1xf32, #tpu.memory_space<vmem>>, vector<1x64x1xf32>
    %60 = vector.shape_cast %59 : vector<1x64x1xf32> to vector<64x1xf32>
    %61 = vector.broadcast %60 : vector<64x1xf32> to vector<64x256xf32>
    %62 = arith.addf %58, %61 : vector<64x256xf32>
    %cst_28 = arith.constant 0.000000e+00 : f32
    %63 = vector.broadcast %cst_28 : f32 to vector<64x256xf32>
    %64 = arith.maximumf %62, %63 : vector<64x256xf32>
    %c17_i32_29 = arith.constant 17 : i32
    %65 = tpu.dynamic_rotate %64 by %c17_i32_29 dim 1 : vector<64x256xf32>, i32 -> vector<64x256xf32>
    %c0_30 = arith.constant 0 : index
    %c0_31 = arith.constant 0 : index
    %c0_32 = arith.constant 0 : index
    %66 = vector.load %arg5[%c0_30, %c0_31, %c0_32] : memref<9x1x256xf32, #tpu.memory_space<vmem>>, vector<1x1x256xf32>
    %67 = vector.shape_cast %66 : vector<1x1x256xf32> to vector<1x256xf32>
    %68 = vector.broadcast %67 : vector<1x256xf32> to vector<64x256xf32>
    %69 = arith.mulf %65, %68 : vector<64x256xf32>
    %70 = arith.truncf %69 : vector<64x256xf32> to vector<64x256xbf16>
    %c16_i32_33 = arith.constant 16 : i32
    %71 = tpu.dynamic_rotate %64 by %c16_i32_33 dim 1 : vector<64x256xf32>, i32 -> vector<64x256xf32>
    %c1_34 = arith.constant 1 : index
    %c0_35 = arith.constant 0 : index
    %c0_36 = arith.constant 0 : index
    %72 = vector.load %arg5[%c1_34, %c0_35, %c0_36] : memref<9x1x256xf32, #tpu.memory_space<vmem>>, vector<1x1x256xf32>
    %73 = vector.shape_cast %72 : vector<1x1x256xf32> to vector<1x256xf32>
    %74 = vector.broadcast %73 : vector<1x256xf32> to vector<64x256xf32>
    %75 = arith.mulf %71, %74 : vector<64x256xf32>
    %76 = arith.truncf %75 : vector<64x256xf32> to vector<64x256xbf16>
    %c15_i32_37 = arith.constant 15 : i32
    %77 = tpu.dynamic_rotate %64 by %c15_i32_37 dim 1 : vector<64x256xf32>, i32 -> vector<64x256xf32>
    %c2_38 = arith.constant 2 : index
    %c0_39 = arith.constant 0 : index
    %c0_40 = arith.constant 0 : index
    %78 = vector.load %arg5[%c2_38, %c0_39, %c0_40] : memref<9x1x256xf32, #tpu.memory_space<vmem>>, vector<1x1x256xf32>
    %79 = vector.shape_cast %78 : vector<1x1x256xf32> to vector<1x256xf32>
    %80 = vector.broadcast %79 : vector<1x256xf32> to vector<64x256xf32>
    %81 = arith.mulf %77, %80 : vector<64x256xf32>
    %82 = arith.truncf %81 : vector<64x256xf32> to vector<64x256xbf16>
    %c1_i32_41 = arith.constant 1 : i32
    %83 = tpu.dynamic_rotate %64 by %c1_i32_41 dim 1 : vector<64x256xf32>, i32 -> vector<64x256xf32>
    %c3_42 = arith.constant 3 : index
    %c0_43 = arith.constant 0 : index
    %c0_44 = arith.constant 0 : index
    %84 = vector.load %arg5[%c3_42, %c0_43, %c0_44] : memref<9x1x256xf32, #tpu.memory_space<vmem>>, vector<1x1x256xf32>
    %85 = vector.shape_cast %84 : vector<1x1x256xf32> to vector<1x256xf32>
    %86 = vector.broadcast %85 : vector<1x256xf32> to vector<64x256xf32>
    %87 = arith.mulf %83, %86 : vector<64x256xf32>
    %88 = arith.truncf %87 : vector<64x256xf32> to vector<64x256xbf16>
    %89 = arith.truncf %64 : vector<64x256xf32> to vector<64x256xbf16>
    %c255_i32_45 = arith.constant 255 : i32
    %90 = tpu.dynamic_rotate %64 by %c255_i32_45 dim 1 : vector<64x256xf32>, i32 -> vector<64x256xf32>
    %c5_46 = arith.constant 5 : index
    %c0_47 = arith.constant 0 : index
    %c0_48 = arith.constant 0 : index
    %91 = vector.load %arg5[%c5_46, %c0_47, %c0_48] : memref<9x1x256xf32, #tpu.memory_space<vmem>>, vector<1x1x256xf32>
    %92 = vector.shape_cast %91 : vector<1x1x256xf32> to vector<1x256xf32>
    %93 = vector.broadcast %92 : vector<1x256xf32> to vector<64x256xf32>
    %94 = arith.mulf %90, %93 : vector<64x256xf32>
    %95 = arith.truncf %94 : vector<64x256xf32> to vector<64x256xbf16>
    %c241_i32_49 = arith.constant 241 : i32
    %96 = tpu.dynamic_rotate %64 by %c241_i32_49 dim 1 : vector<64x256xf32>, i32 -> vector<64x256xf32>
    %c6_50 = arith.constant 6 : index
    %c0_51 = arith.constant 0 : index
    %c0_52 = arith.constant 0 : index
    %97 = vector.load %arg5[%c6_50, %c0_51, %c0_52] : memref<9x1x256xf32, #tpu.memory_space<vmem>>, vector<1x1x256xf32>
    %98 = vector.shape_cast %97 : vector<1x1x256xf32> to vector<1x256xf32>
    %99 = vector.broadcast %98 : vector<1x256xf32> to vector<64x256xf32>
    %100 = arith.mulf %96, %99 : vector<64x256xf32>
    %101 = arith.truncf %100 : vector<64x256xf32> to vector<64x256xbf16>
    %c240_i32_53 = arith.constant 240 : i32
    %102 = tpu.dynamic_rotate %64 by %c240_i32_53 dim 1 : vector<64x256xf32>, i32 -> vector<64x256xf32>
    %c7_54 = arith.constant 7 : index
    %c0_55 = arith.constant 0 : index
    %c0_56 = arith.constant 0 : index
    %103 = vector.load %arg5[%c7_54, %c0_55, %c0_56] : memref<9x1x256xf32, #tpu.memory_space<vmem>>, vector<1x1x256xf32>
    %104 = vector.shape_cast %103 : vector<1x1x256xf32> to vector<1x256xf32>
    %105 = vector.broadcast %104 : vector<1x256xf32> to vector<64x256xf32>
    %106 = arith.mulf %102, %105 : vector<64x256xf32>
    %107 = arith.truncf %106 : vector<64x256xf32> to vector<64x256xbf16>
    %c239_i32_57 = arith.constant 239 : i32
    %108 = tpu.dynamic_rotate %64 by %c239_i32_57 dim 1 : vector<64x256xf32>, i32 -> vector<64x256xf32>
    %c8_58 = arith.constant 8 : index
    %c0_59 = arith.constant 0 : index
    %c0_60 = arith.constant 0 : index
    %109 = vector.load %arg5[%c8_58, %c0_59, %c0_60] : memref<9x1x256xf32, #tpu.memory_space<vmem>>, vector<1x1x256xf32>
    %110 = vector.shape_cast %109 : vector<1x1x256xf32> to vector<1x256xf32>
    %111 = vector.broadcast %110 : vector<1x256xf32> to vector<64x256xf32>
    %112 = arith.mulf %108, %111 : vector<64x256xf32>
    %113 = arith.truncf %112 : vector<64x256xf32> to vector<64x256xbf16>
    %114 = tpu.concatenate %70, %76, %82, %88, %89, %95, %101, %107, %113 in 0 : vector<64x256xbf16>, vector<64x256xbf16>, vector<64x256xbf16>, vector<64x256xbf16>, vector<64x256xbf16>, vector<64x256xbf16>, vector<64x256xbf16>, vector<64x256xbf16>, vector<64x256xbf16> -> vector<576x256xbf16>
    %c1_61 = arith.constant 1 : index
    %c0_62 = arith.constant 0 : index
    %c0_63 = arith.constant 0 : index
    %115 = vector.load %arg2[%c1_61, %c0_62, %c0_63] : memref<5x64x576xbf16, #tpu.memory_space<vmem>>, vector<1x64x576xbf16>
    %116 = vector.shape_cast %115 : vector<1x64x576xbf16> to vector<64x576xbf16>
    %cst_64 = arith.constant dense<0.000000e+00> : vector<64x256xf32>
    %117 = tpu.matmul %116, %114, %cst_64 {dimension_numbers = #tpu.dot_dimension_numbers<[1], [0], [0], [1], [0, 0, 1, 1], [], []>} : vector<64x576xbf16>, vector<576x256xbf16>, vector<64x256xf32> -> vector<64x256xf32>
    %c1_65 = arith.constant 1 : index
    %c0_66 = arith.constant 0 : index
    %c0_67 = arith.constant 0 : index
    %118 = vector.load %arg3[%c1_65, %c0_66, %c0_67] : memref<5x64x1xf32, #tpu.memory_space<vmem>>, vector<1x64x1xf32>
    %119 = vector.shape_cast %118 : vector<1x64x1xf32> to vector<64x1xf32>
    %120 = vector.broadcast %119 : vector<64x1xf32> to vector<64x256xf32>
    %121 = arith.mulf %117, %120 : vector<64x256xf32>
    %c1_68 = arith.constant 1 : index
    %c0_69 = arith.constant 0 : index
    %c0_70 = arith.constant 0 : index
    %122 = vector.load %arg4[%c1_68, %c0_69, %c0_70] : memref<5x64x1xf32, #tpu.memory_space<vmem>>, vector<1x64x1xf32>
    %123 = vector.shape_cast %122 : vector<1x64x1xf32> to vector<64x1xf32>
    %124 = vector.broadcast %123 : vector<64x1xf32> to vector<64x256xf32>
    %125 = arith.addf %121, %124 : vector<64x256xf32>
    %cst_71 = arith.constant 0.000000e+00 : f32
    %126 = vector.broadcast %cst_71 : f32 to vector<64x256xf32>
    %127 = arith.maximumf %125, %126 : vector<64x256xf32>
    %c17_i32_72 = arith.constant 17 : i32
    %128 = tpu.dynamic_rotate %127 by %c17_i32_72 dim 1 : vector<64x256xf32>, i32 -> vector<64x256xf32>
    %c0_73 = arith.constant 0 : index
    %c0_74 = arith.constant 0 : index
    %c0_75 = arith.constant 0 : index
    %129 = vector.load %arg5[%c0_73, %c0_74, %c0_75] : memref<9x1x256xf32, #tpu.memory_space<vmem>>, vector<1x1x256xf32>
    %130 = vector.shape_cast %129 : vector<1x1x256xf32> to vector<1x256xf32>
    %131 = vector.broadcast %130 : vector<1x256xf32> to vector<64x256xf32>
    %132 = arith.mulf %128, %131 : vector<64x256xf32>
    %133 = arith.truncf %132 : vector<64x256xf32> to vector<64x256xbf16>
    %c16_i32_76 = arith.constant 16 : i32
    %134 = tpu.dynamic_rotate %127 by %c16_i32_76 dim 1 : vector<64x256xf32>, i32 -> vector<64x256xf32>
    %c1_77 = arith.constant 1 : index
    %c0_78 = arith.constant 0 : index
    %c0_79 = arith.constant 0 : index
    %135 = vector.load %arg5[%c1_77, %c0_78, %c0_79] : memref<9x1x256xf32, #tpu.memory_space<vmem>>, vector<1x1x256xf32>
    %136 = vector.shape_cast %135 : vector<1x1x256xf32> to vector<1x256xf32>
    %137 = vector.broadcast %136 : vector<1x256xf32> to vector<64x256xf32>
    %138 = arith.mulf %134, %137 : vector<64x256xf32>
    %139 = arith.truncf %138 : vector<64x256xf32> to vector<64x256xbf16>
    %c15_i32_80 = arith.constant 15 : i32
    %140 = tpu.dynamic_rotate %127 by %c15_i32_80 dim 1 : vector<64x256xf32>, i32 -> vector<64x256xf32>
    %c2_81 = arith.constant 2 : index
    %c0_82 = arith.constant 0 : index
    %c0_83 = arith.constant 0 : index
    %141 = vector.load %arg5[%c2_81, %c0_82, %c0_83] : memref<9x1x256xf32, #tpu.memory_space<vmem>>, vector<1x1x256xf32>
    %142 = vector.shape_cast %141 : vector<1x1x256xf32> to vector<1x256xf32>
    %143 = vector.broadcast %142 : vector<1x256xf32> to vector<64x256xf32>
    %144 = arith.mulf %140, %143 : vector<64x256xf32>
    %145 = arith.truncf %144 : vector<64x256xf32> to vector<64x256xbf16>
    %c1_i32_84 = arith.constant 1 : i32
    %146 = tpu.dynamic_rotate %127 by %c1_i32_84 dim 1 : vector<64x256xf32>, i32 -> vector<64x256xf32>
    %c3_85 = arith.constant 3 : index
    %c0_86 = arith.constant 0 : index
    %c0_87 = arith.constant 0 : index
    %147 = vector.load %arg5[%c3_85, %c0_86, %c0_87] : memref<9x1x256xf32, #tpu.memory_space<vmem>>, vector<1x1x256xf32>
    %148 = vector.shape_cast %147 : vector<1x1x256xf32> to vector<1x256xf32>
    %149 = vector.broadcast %148 : vector<1x256xf32> to vector<64x256xf32>
    %150 = arith.mulf %146, %149 : vector<64x256xf32>
    %151 = arith.truncf %150 : vector<64x256xf32> to vector<64x256xbf16>
    %152 = arith.truncf %127 : vector<64x256xf32> to vector<64x256xbf16>
    %c255_i32_88 = arith.constant 255 : i32
    %153 = tpu.dynamic_rotate %127 by %c255_i32_88 dim 1 : vector<64x256xf32>, i32 -> vector<64x256xf32>
    %c5_89 = arith.constant 5 : index
    %c0_90 = arith.constant 0 : index
    %c0_91 = arith.constant 0 : index
    %154 = vector.load %arg5[%c5_89, %c0_90, %c0_91] : memref<9x1x256xf32, #tpu.memory_space<vmem>>, vector<1x1x256xf32>
    %155 = vector.shape_cast %154 : vector<1x1x256xf32> to vector<1x256xf32>
    %156 = vector.broadcast %155 : vector<1x256xf32> to vector<64x256xf32>
    %157 = arith.mulf %153, %156 : vector<64x256xf32>
    %158 = arith.truncf %157 : vector<64x256xf32> to vector<64x256xbf16>
    %c241_i32_92 = arith.constant 241 : i32
    %159 = tpu.dynamic_rotate %127 by %c241_i32_92 dim 1 : vector<64x256xf32>, i32 -> vector<64x256xf32>
    %c6_93 = arith.constant 6 : index
    %c0_94 = arith.constant 0 : index
    %c0_95 = arith.constant 0 : index
    %160 = vector.load %arg5[%c6_93, %c0_94, %c0_95] : memref<9x1x256xf32, #tpu.memory_space<vmem>>, vector<1x1x256xf32>
    %161 = vector.shape_cast %160 : vector<1x1x256xf32> to vector<1x256xf32>
    %162 = vector.broadcast %161 : vector<1x256xf32> to vector<64x256xf32>
    %163 = arith.mulf %159, %162 : vector<64x256xf32>
    %164 = arith.truncf %163 : vector<64x256xf32> to vector<64x256xbf16>
    %c240_i32_96 = arith.constant 240 : i32
    %165 = tpu.dynamic_rotate %127 by %c240_i32_96 dim 1 : vector<64x256xf32>, i32 -> vector<64x256xf32>
    %c7_97 = arith.constant 7 : index
    %c0_98 = arith.constant 0 : index
    %c0_99 = arith.constant 0 : index
    %166 = vector.load %arg5[%c7_97, %c0_98, %c0_99] : memref<9x1x256xf32, #tpu.memory_space<vmem>>, vector<1x1x256xf32>
    %167 = vector.shape_cast %166 : vector<1x1x256xf32> to vector<1x256xf32>
    %168 = vector.broadcast %167 : vector<1x256xf32> to vector<64x256xf32>
    %169 = arith.mulf %165, %168 : vector<64x256xf32>
    %170 = arith.truncf %169 : vector<64x256xf32> to vector<64x256xbf16>
    %c239_i32_100 = arith.constant 239 : i32
    %171 = tpu.dynamic_rotate %127 by %c239_i32_100 dim 1 : vector<64x256xf32>, i32 -> vector<64x256xf32>
    %c8_101 = arith.constant 8 : index
    %c0_102 = arith.constant 0 : index
    %c0_103 = arith.constant 0 : index
    %172 = vector.load %arg5[%c8_101, %c0_102, %c0_103] : memref<9x1x256xf32, #tpu.memory_space<vmem>>, vector<1x1x256xf32>
    %173 = vector.shape_cast %172 : vector<1x1x256xf32> to vector<1x256xf32>
    %174 = vector.broadcast %173 : vector<1x256xf32> to vector<64x256xf32>
    %175 = arith.mulf %171, %174 : vector<64x256xf32>
    %176 = arith.truncf %175 : vector<64x256xf32> to vector<64x256xbf16>
    %177 = tpu.concatenate %133, %139, %145, %151, %152, %158, %164, %170, %176 in 0 : vector<64x256xbf16>, vector<64x256xbf16>, vector<64x256xbf16>, vector<64x256xbf16>, vector<64x256xbf16>, vector<64x256xbf16>, vector<64x256xbf16>, vector<64x256xbf16>, vector<64x256xbf16> -> vector<576x256xbf16>
    %c2_104 = arith.constant 2 : index
    %c0_105 = arith.constant 0 : index
    %c0_106 = arith.constant 0 : index
    %178 = vector.load %arg2[%c2_104, %c0_105, %c0_106] : memref<5x64x576xbf16, #tpu.memory_space<vmem>>, vector<1x64x576xbf16>
    %179 = vector.shape_cast %178 : vector<1x64x576xbf16> to vector<64x576xbf16>
    %cst_107 = arith.constant dense<0.000000e+00> : vector<64x256xf32>
    %180 = tpu.matmul %179, %177, %cst_107 {dimension_numbers = #tpu.dot_dimension_numbers<[1], [0], [0], [1], [0, 0, 1, 1], [], []>} : vector<64x576xbf16>, vector<576x256xbf16>, vector<64x256xf32> -> vector<64x256xf32>
    %c2_108 = arith.constant 2 : index
    %c0_109 = arith.constant 0 : index
    %c0_110 = arith.constant 0 : index
    %181 = vector.load %arg3[%c2_108, %c0_109, %c0_110] : memref<5x64x1xf32, #tpu.memory_space<vmem>>, vector<1x64x1xf32>
    %182 = vector.shape_cast %181 : vector<1x64x1xf32> to vector<64x1xf32>
    %183 = vector.broadcast %182 : vector<64x1xf32> to vector<64x256xf32>
    %184 = arith.mulf %180, %183 : vector<64x256xf32>
    %c2_111 = arith.constant 2 : index
    %c0_112 = arith.constant 0 : index
    %c0_113 = arith.constant 0 : index
    %185 = vector.load %arg4[%c2_111, %c0_112, %c0_113] : memref<5x64x1xf32, #tpu.memory_space<vmem>>, vector<1x64x1xf32>
    %186 = vector.shape_cast %185 : vector<1x64x1xf32> to vector<64x1xf32>
    %187 = vector.broadcast %186 : vector<64x1xf32> to vector<64x256xf32>
    %188 = arith.addf %184, %187 : vector<64x256xf32>
    %189 = arith.addf %188, %64 : vector<64x256xf32>
    %cst_114 = arith.constant 0.000000e+00 : f32
    %190 = vector.broadcast %cst_114 : f32 to vector<64x256xf32>
    %191 = arith.maximumf %189, %190 : vector<64x256xf32>
    %c17_i32_115 = arith.constant 17 : i32
    %192 = tpu.dynamic_rotate %191 by %c17_i32_115 dim 1 : vector<64x256xf32>, i32 -> vector<64x256xf32>
    %c0_116 = arith.constant 0 : index
    %c0_117 = arith.constant 0 : index
    %c0_118 = arith.constant 0 : index
    %193 = vector.load %arg5[%c0_116, %c0_117, %c0_118] : memref<9x1x256xf32, #tpu.memory_space<vmem>>, vector<1x1x256xf32>
    %194 = vector.shape_cast %193 : vector<1x1x256xf32> to vector<1x256xf32>
    %195 = vector.broadcast %194 : vector<1x256xf32> to vector<64x256xf32>
    %196 = arith.mulf %192, %195 : vector<64x256xf32>
    %197 = arith.truncf %196 : vector<64x256xf32> to vector<64x256xbf16>
    %c16_i32_119 = arith.constant 16 : i32
    %198 = tpu.dynamic_rotate %191 by %c16_i32_119 dim 1 : vector<64x256xf32>, i32 -> vector<64x256xf32>
    %c1_120 = arith.constant 1 : index
    %c0_121 = arith.constant 0 : index
    %c0_122 = arith.constant 0 : index
    %199 = vector.load %arg5[%c1_120, %c0_121, %c0_122] : memref<9x1x256xf32, #tpu.memory_space<vmem>>, vector<1x1x256xf32>
    %200 = vector.shape_cast %199 : vector<1x1x256xf32> to vector<1x256xf32>
    %201 = vector.broadcast %200 : vector<1x256xf32> to vector<64x256xf32>
    %202 = arith.mulf %198, %201 : vector<64x256xf32>
    %203 = arith.truncf %202 : vector<64x256xf32> to vector<64x256xbf16>
    %c15_i32_123 = arith.constant 15 : i32
    %204 = tpu.dynamic_rotate %191 by %c15_i32_123 dim 1 : vector<64x256xf32>, i32 -> vector<64x256xf32>
    %c2_124 = arith.constant 2 : index
    %c0_125 = arith.constant 0 : index
    %c0_126 = arith.constant 0 : index
    %205 = vector.load %arg5[%c2_124, %c0_125, %c0_126] : memref<9x1x256xf32, #tpu.memory_space<vmem>>, vector<1x1x256xf32>
    %206 = vector.shape_cast %205 : vector<1x1x256xf32> to vector<1x256xf32>
    %207 = vector.broadcast %206 : vector<1x256xf32> to vector<64x256xf32>
    %208 = arith.mulf %204, %207 : vector<64x256xf32>
    %209 = arith.truncf %208 : vector<64x256xf32> to vector<64x256xbf16>
    %c1_i32_127 = arith.constant 1 : i32
    %210 = tpu.dynamic_rotate %191 by %c1_i32_127 dim 1 : vector<64x256xf32>, i32 -> vector<64x256xf32>
    %c3_128 = arith.constant 3 : index
    %c0_129 = arith.constant 0 : index
    %c0_130 = arith.constant 0 : index
    %211 = vector.load %arg5[%c3_128, %c0_129, %c0_130] : memref<9x1x256xf32, #tpu.memory_space<vmem>>, vector<1x1x256xf32>
    %212 = vector.shape_cast %211 : vector<1x1x256xf32> to vector<1x256xf32>
    %213 = vector.broadcast %212 : vector<1x256xf32> to vector<64x256xf32>
    %214 = arith.mulf %210, %213 : vector<64x256xf32>
    %215 = arith.truncf %214 : vector<64x256xf32> to vector<64x256xbf16>
    %216 = arith.truncf %191 : vector<64x256xf32> to vector<64x256xbf16>
    %c255_i32_131 = arith.constant 255 : i32
    %217 = tpu.dynamic_rotate %191 by %c255_i32_131 dim 1 : vector<64x256xf32>, i32 -> vector<64x256xf32>
    %c5_132 = arith.constant 5 : index
    %c0_133 = arith.constant 0 : index
    %c0_134 = arith.constant 0 : index
    %218 = vector.load %arg5[%c5_132, %c0_133, %c0_134] : memref<9x1x256xf32, #tpu.memory_space<vmem>>, vector<1x1x256xf32>
    %219 = vector.shape_cast %218 : vector<1x1x256xf32> to vector<1x256xf32>
    %220 = vector.broadcast %219 : vector<1x256xf32> to vector<64x256xf32>
    %221 = arith.mulf %217, %220 : vector<64x256xf32>
    %222 = arith.truncf %221 : vector<64x256xf32> to vector<64x256xbf16>
    %c241_i32_135 = arith.constant 241 : i32
    %223 = tpu.dynamic_rotate %191 by %c241_i32_135 dim 1 : vector<64x256xf32>, i32 -> vector<64x256xf32>
    %c6_136 = arith.constant 6 : index
    %c0_137 = arith.constant 0 : index
    %c0_138 = arith.constant 0 : index
    %224 = vector.load %arg5[%c6_136, %c0_137, %c0_138] : memref<9x1x256xf32, #tpu.memory_space<vmem>>, vector<1x1x256xf32>
    %225 = vector.shape_cast %224 : vector<1x1x256xf32> to vector<1x256xf32>
    %226 = vector.broadcast %225 : vector<1x256xf32> to vector<64x256xf32>
    %227 = arith.mulf %223, %226 : vector<64x256xf32>
    %228 = arith.truncf %227 : vector<64x256xf32> to vector<64x256xbf16>
    %c240_i32_139 = arith.constant 240 : i32
    %229 = tpu.dynamic_rotate %191 by %c240_i32_139 dim 1 : vector<64x256xf32>, i32 -> vector<64x256xf32>
    %c7_140 = arith.constant 7 : index
    %c0_141 = arith.constant 0 : index
    %c0_142 = arith.constant 0 : index
    %230 = vector.load %arg5[%c7_140, %c0_141, %c0_142] : memref<9x1x256xf32, #tpu.memory_space<vmem>>, vector<1x1x256xf32>
    %231 = vector.shape_cast %230 : vector<1x1x256xf32> to vector<1x256xf32>
    %232 = vector.broadcast %231 : vector<1x256xf32> to vector<64x256xf32>
    %233 = arith.mulf %229, %232 : vector<64x256xf32>
    %234 = arith.truncf %233 : vector<64x256xf32> to vector<64x256xbf16>
    %c239_i32_143 = arith.constant 239 : i32
    %235 = tpu.dynamic_rotate %191 by %c239_i32_143 dim 1 : vector<64x256xf32>, i32 -> vector<64x256xf32>
    %c8_144 = arith.constant 8 : index
    %c0_145 = arith.constant 0 : index
    %c0_146 = arith.constant 0 : index
    %236 = vector.load %arg5[%c8_144, %c0_145, %c0_146] : memref<9x1x256xf32, #tpu.memory_space<vmem>>, vector<1x1x256xf32>
    %237 = vector.shape_cast %236 : vector<1x1x256xf32> to vector<1x256xf32>
    %238 = vector.broadcast %237 : vector<1x256xf32> to vector<64x256xf32>
    %239 = arith.mulf %235, %238 : vector<64x256xf32>
    %240 = arith.truncf %239 : vector<64x256xf32> to vector<64x256xbf16>
    %241 = tpu.concatenate %197, %203, %209, %215, %216, %222, %228, %234, %240 in 0 : vector<64x256xbf16>, vector<64x256xbf16>, vector<64x256xbf16>, vector<64x256xbf16>, vector<64x256xbf16>, vector<64x256xbf16>, vector<64x256xbf16>, vector<64x256xbf16>, vector<64x256xbf16> -> vector<576x256xbf16>
    %c3_147 = arith.constant 3 : index
    %c0_148 = arith.constant 0 : index
    %c0_149 = arith.constant 0 : index
    %242 = vector.load %arg2[%c3_147, %c0_148, %c0_149] : memref<5x64x576xbf16, #tpu.memory_space<vmem>>, vector<1x64x576xbf16>
    %243 = vector.shape_cast %242 : vector<1x64x576xbf16> to vector<64x576xbf16>
    %cst_150 = arith.constant dense<0.000000e+00> : vector<64x256xf32>
    %244 = tpu.matmul %243, %241, %cst_150 {dimension_numbers = #tpu.dot_dimension_numbers<[1], [0], [0], [1], [0, 0, 1, 1], [], []>} : vector<64x576xbf16>, vector<576x256xbf16>, vector<64x256xf32> -> vector<64x256xf32>
    %c3_151 = arith.constant 3 : index
    %c0_152 = arith.constant 0 : index
    %c0_153 = arith.constant 0 : index
    %245 = vector.load %arg3[%c3_151, %c0_152, %c0_153] : memref<5x64x1xf32, #tpu.memory_space<vmem>>, vector<1x64x1xf32>
    %246 = vector.shape_cast %245 : vector<1x64x1xf32> to vector<64x1xf32>
    %247 = vector.broadcast %246 : vector<64x1xf32> to vector<64x256xf32>
    %248 = arith.mulf %244, %247 : vector<64x256xf32>
    %c3_154 = arith.constant 3 : index
    %c0_155 = arith.constant 0 : index
    %c0_156 = arith.constant 0 : index
    %249 = vector.load %arg4[%c3_154, %c0_155, %c0_156] : memref<5x64x1xf32, #tpu.memory_space<vmem>>, vector<1x64x1xf32>
    %250 = vector.shape_cast %249 : vector<1x64x1xf32> to vector<64x1xf32>
    %251 = vector.broadcast %250 : vector<64x1xf32> to vector<64x256xf32>
    %252 = arith.addf %248, %251 : vector<64x256xf32>
    %cst_157 = arith.constant 0.000000e+00 : f32
    %253 = vector.broadcast %cst_157 : f32 to vector<64x256xf32>
    %254 = arith.maximumf %252, %253 : vector<64x256xf32>
    %c17_i32_158 = arith.constant 17 : i32
    %255 = tpu.dynamic_rotate %254 by %c17_i32_158 dim 1 : vector<64x256xf32>, i32 -> vector<64x256xf32>
    %c0_159 = arith.constant 0 : index
    %c0_160 = arith.constant 0 : index
    %c0_161 = arith.constant 0 : index
    %256 = vector.load %arg5[%c0_159, %c0_160, %c0_161] : memref<9x1x256xf32, #tpu.memory_space<vmem>>, vector<1x1x256xf32>
    %257 = vector.shape_cast %256 : vector<1x1x256xf32> to vector<1x256xf32>
    %258 = vector.broadcast %257 : vector<1x256xf32> to vector<64x256xf32>
    %259 = arith.mulf %255, %258 : vector<64x256xf32>
    %260 = arith.truncf %259 : vector<64x256xf32> to vector<64x256xbf16>
    %c16_i32_162 = arith.constant 16 : i32
    %261 = tpu.dynamic_rotate %254 by %c16_i32_162 dim 1 : vector<64x256xf32>, i32 -> vector<64x256xf32>
    %c1_163 = arith.constant 1 : index
    %c0_164 = arith.constant 0 : index
    %c0_165 = arith.constant 0 : index
    %262 = vector.load %arg5[%c1_163, %c0_164, %c0_165] : memref<9x1x256xf32, #tpu.memory_space<vmem>>, vector<1x1x256xf32>
    %263 = vector.shape_cast %262 : vector<1x1x256xf32> to vector<1x256xf32>
    %264 = vector.broadcast %263 : vector<1x256xf32> to vector<64x256xf32>
    %265 = arith.mulf %261, %264 : vector<64x256xf32>
    %266 = arith.truncf %265 : vector<64x256xf32> to vector<64x256xbf16>
    %c15_i32_166 = arith.constant 15 : i32
    %267 = tpu.dynamic_rotate %254 by %c15_i32_166 dim 1 : vector<64x256xf32>, i32 -> vector<64x256xf32>
    %c2_167 = arith.constant 2 : index
    %c0_168 = arith.constant 0 : index
    %c0_169 = arith.constant 0 : index
    %268 = vector.load %arg5[%c2_167, %c0_168, %c0_169] : memref<9x1x256xf32, #tpu.memory_space<vmem>>, vector<1x1x256xf32>
    %269 = vector.shape_cast %268 : vector<1x1x256xf32> to vector<1x256xf32>
    %270 = vector.broadcast %269 : vector<1x256xf32> to vector<64x256xf32>
    %271 = arith.mulf %267, %270 : vector<64x256xf32>
    %272 = arith.truncf %271 : vector<64x256xf32> to vector<64x256xbf16>
    %c1_i32_170 = arith.constant 1 : i32
    %273 = tpu.dynamic_rotate %254 by %c1_i32_170 dim 1 : vector<64x256xf32>, i32 -> vector<64x256xf32>
    %c3_171 = arith.constant 3 : index
    %c0_172 = arith.constant 0 : index
    %c0_173 = arith.constant 0 : index
    %274 = vector.load %arg5[%c3_171, %c0_172, %c0_173] : memref<9x1x256xf32, #tpu.memory_space<vmem>>, vector<1x1x256xf32>
    %275 = vector.shape_cast %274 : vector<1x1x256xf32> to vector<1x256xf32>
    %276 = vector.broadcast %275 : vector<1x256xf32> to vector<64x256xf32>
    %277 = arith.mulf %273, %276 : vector<64x256xf32>
    %278 = arith.truncf %277 : vector<64x256xf32> to vector<64x256xbf16>
    %279 = arith.truncf %254 : vector<64x256xf32> to vector<64x256xbf16>
    %c255_i32_174 = arith.constant 255 : i32
    %280 = tpu.dynamic_rotate %254 by %c255_i32_174 dim 1 : vector<64x256xf32>, i32 -> vector<64x256xf32>
    %c5_175 = arith.constant 5 : index
    %c0_176 = arith.constant 0 : index
    %c0_177 = arith.constant 0 : index
    %281 = vector.load %arg5[%c5_175, %c0_176, %c0_177] : memref<9x1x256xf32, #tpu.memory_space<vmem>>, vector<1x1x256xf32>
    %282 = vector.shape_cast %281 : vector<1x1x256xf32> to vector<1x256xf32>
    %283 = vector.broadcast %282 : vector<1x256xf32> to vector<64x256xf32>
    %284 = arith.mulf %280, %283 : vector<64x256xf32>
    %285 = arith.truncf %284 : vector<64x256xf32> to vector<64x256xbf16>
    %c241_i32_178 = arith.constant 241 : i32
    %286 = tpu.dynamic_rotate %254 by %c241_i32_178 dim 1 : vector<64x256xf32>, i32 -> vector<64x256xf32>
    %c6_179 = arith.constant 6 : index
    %c0_180 = arith.constant 0 : index
    %c0_181 = arith.constant 0 : index
    %287 = vector.load %arg5[%c6_179, %c0_180, %c0_181] : memref<9x1x256xf32, #tpu.memory_space<vmem>>, vector<1x1x256xf32>
    %288 = vector.shape_cast %287 : vector<1x1x256xf32> to vector<1x256xf32>
    %289 = vector.broadcast %288 : vector<1x256xf32> to vector<64x256xf32>
    %290 = arith.mulf %286, %289 : vector<64x256xf32>
    %291 = arith.truncf %290 : vector<64x256xf32> to vector<64x256xbf16>
    %c240_i32_182 = arith.constant 240 : i32
    %292 = tpu.dynamic_rotate %254 by %c240_i32_182 dim 1 : vector<64x256xf32>, i32 -> vector<64x256xf32>
    %c7_183 = arith.constant 7 : index
    %c0_184 = arith.constant 0 : index
    %c0_185 = arith.constant 0 : index
    %293 = vector.load %arg5[%c7_183, %c0_184, %c0_185] : memref<9x1x256xf32, #tpu.memory_space<vmem>>, vector<1x1x256xf32>
    %294 = vector.shape_cast %293 : vector<1x1x256xf32> to vector<1x256xf32>
    %295 = vector.broadcast %294 : vector<1x256xf32> to vector<64x256xf32>
    %296 = arith.mulf %292, %295 : vector<64x256xf32>
    %297 = arith.truncf %296 : vector<64x256xf32> to vector<64x256xbf16>
    %c239_i32_186 = arith.constant 239 : i32
    %298 = tpu.dynamic_rotate %254 by %c239_i32_186 dim 1 : vector<64x256xf32>, i32 -> vector<64x256xf32>
    %c8_187 = arith.constant 8 : index
    %c0_188 = arith.constant 0 : index
    %c0_189 = arith.constant 0 : index
    %299 = vector.load %arg5[%c8_187, %c0_188, %c0_189] : memref<9x1x256xf32, #tpu.memory_space<vmem>>, vector<1x1x256xf32>
    %300 = vector.shape_cast %299 : vector<1x1x256xf32> to vector<1x256xf32>
    %301 = vector.broadcast %300 : vector<1x256xf32> to vector<64x256xf32>
    %302 = arith.mulf %298, %301 : vector<64x256xf32>
    %303 = arith.truncf %302 : vector<64x256xf32> to vector<64x256xbf16>
    %304 = tpu.concatenate %260, %266, %272, %278, %279, %285, %291, %297, %303 in 0 : vector<64x256xbf16>, vector<64x256xbf16>, vector<64x256xbf16>, vector<64x256xbf16>, vector<64x256xbf16>, vector<64x256xbf16>, vector<64x256xbf16>, vector<64x256xbf16>, vector<64x256xbf16> -> vector<576x256xbf16>
    %c4 = arith.constant 4 : index
    %c0_190 = arith.constant 0 : index
    %c0_191 = arith.constant 0 : index
    %305 = vector.load %arg2[%c4, %c0_190, %c0_191] : memref<5x64x576xbf16, #tpu.memory_space<vmem>>, vector<1x64x576xbf16>
    %306 = vector.shape_cast %305 : vector<1x64x576xbf16> to vector<64x576xbf16>
    %cst_192 = arith.constant dense<0.000000e+00> : vector<64x256xf32>
    %307 = tpu.matmul %306, %304, %cst_192 {dimension_numbers = #tpu.dot_dimension_numbers<[1], [0], [0], [1], [0, 0, 1, 1], [], []>} : vector<64x576xbf16>, vector<576x256xbf16>, vector<64x256xf32> -> vector<64x256xf32>
    %c4_193 = arith.constant 4 : index
    %c0_194 = arith.constant 0 : index
    %c0_195 = arith.constant 0 : index
    %308 = vector.load %arg3[%c4_193, %c0_194, %c0_195] : memref<5x64x1xf32, #tpu.memory_space<vmem>>, vector<1x64x1xf32>
    %309 = vector.shape_cast %308 : vector<1x64x1xf32> to vector<64x1xf32>
    %310 = vector.broadcast %309 : vector<64x1xf32> to vector<64x256xf32>
    %311 = arith.mulf %307, %310 : vector<64x256xf32>
    %c4_196 = arith.constant 4 : index
    %c0_197 = arith.constant 0 : index
    %c0_198 = arith.constant 0 : index
    %312 = vector.load %arg4[%c4_196, %c0_197, %c0_198] : memref<5x64x1xf32, #tpu.memory_space<vmem>>, vector<1x64x1xf32>
    %313 = vector.shape_cast %312 : vector<1x64x1xf32> to vector<64x1xf32>
    %314 = vector.broadcast %313 : vector<64x1xf32> to vector<64x256xf32>
    %315 = arith.addf %311, %314 : vector<64x256xf32>
    %316 = arith.addf %315, %191 : vector<64x256xf32>
    %cst_199 = arith.constant 0.000000e+00 : f32
    %317 = vector.broadcast %cst_199 : f32 to vector<64x256xf32>
    %318 = arith.maximumf %316, %317 : vector<64x256xf32>
    %c0_200 = arith.constant 0 : index
    %c0_201 = arith.constant 0 : index
    %319 = vector.load %arg6[%c0_200, %c0_201] : memref<64x1xf32, #tpu.memory_space<vmem>>, vector<64x1xf32>
    %320 = vector.broadcast %319 : vector<64x1xf32> to vector<64x256xf32>
    %321 = arith.mulf %318, %320 : vector<64x256xf32>
    %cst_202 = arith.constant dense<0.000000e+00> : vector<256xf32>
    %322 = vector.multi_reduction <add>, %321, %cst_202 [0] : vector<64x256xf32> to vector<256xf32>
    %323 = vector.shape_cast %322 : vector<256xf32> to vector<1x256xf32>
    %c0_203 = arith.constant 0 : index
    %c0_204 = arith.constant 0 : index
    %c0_205 = arith.constant 0 : index
    %324 = vector.load %arg7[%c0_203, %c0_204, %c0_205] : memref<1x1x256xf32, #tpu.memory_space<vmem>>, vector<1x1x256xf32>
    %325 = vector.shape_cast %324 : vector<1x1x256xf32> to vector<1x256xf32>
    %326 = vector.shape_cast %323 : vector<1x256xf32> to vector<1x1x256xf32>
    tpu.vector_store %arg7[%c0_203, %c0_204, %c0_205], %326 {strides = array<i32>} : memref<1x1x256xf32, #tpu.memory_space<vmem>>, vector<1x1x256xf32>,
    return
  }
  func.func @transform_0(%arg0: i32) -> (i32, i32, i32) {
    %c0_i32 = arith.constant 0 : i32
    %c0_i32_0 = arith.constant 0 : i32
    %c0_i32_1 = arith.constant 0 : i32
    return %arg0, %c0_i32, %c0_i32_0 : i32, i32, i32
  }
  func.func @transform_1(%arg0: i32) -> (i32, i32, i32) {
    %c0_i32 = arith.constant 0 : i32
    %c0_i32_0 = arith.constant 0 : i32
    %c0_i32_1 = arith.constant 0 : i32
    %c0_i32_2 = arith.constant 0 : i32
    return %c0_i32, %c0_i32_0, %c0_i32_1 : i32, i32, i32
  }
  func.func @transform_2(%arg0: i32) -> (i32, i32, i32) {
    %c0_i32 = arith.constant 0 : i32
    %c0_i32_0 = arith.constant 0 : i32
    %c0_i32_1 = arith.constant 0 : i32
    %c0_i32_2 = arith.constant 0 : i32
    return %c0_i32, %c0_i32_0, %c0_i32_1 : i32, i32, i32
  }
  func.func @transform_3(%arg0: i32) -> (i32, i32, i32) {
    %c0_i32 = arith.constant 0 : i32
    %c0_i32_0 = arith.constant 0 : i32
    %c0_i32_1 = arith.constant 0 : i32
    %c0_i32_2 = arith.constant 0 : i32
    return %c0_i32, %c0_i32_0, %c0_i32_1 : i32, i32, i32
  }
  func.func @transform_4(%arg0: i32) -> (i32, i32, i32) {
    %c0_i32 = arith.constant 0 : i32
    %c0_i32_0 = arith.constant 0 : i32
    %c0_i32_1 = arith.constant 0 : i32
    %c0_i32_2 = arith.constant 0 : i32
    return %c0_i32, %c0_i32_0, %c0_i32_1 : i32, i32, i32
  }
  func.func @transform_5(%arg0: i32) -> (i32, i32) {
    %c0_i32 = arith.constant 0 : i32
    %c0_i32_0 = arith.constant 0 : i32
    %c0_i32_1 = arith.constant 0 : i32
    return %c0_i32, %c0_i32_0 : i32, i32
  }
  func.func @transform_6(%arg0: i32) -> (i32, i32, i32) {
    %c0_i32 = arith.constant 0 : i32
    %c0_i32_0 = arith.constant 0 : i32
    %c0_i32_1 = arith.constant 0 : i32
    return %arg0, %c0_i32, %c0_i32_0 : i32, i32, i32
  }
}

</mosaic_0001>

<bundles_post_ra>
// kernel: global_forward.1
= control target key start
LH: loop header
LB: loop body
LE: loop exit
PB: predicated region body
PF: predicated region fallthrough
CT: control target
= control target key end

     0   :  { %s6530_s21 = smov 0   ;;  %s13028_s0 = inlined_call_operand.vmem [shape: f32[2,64,256], index: 0, kind: input, shape index: {}]   ;;  %s13029_s1 = inlined_call_operand.vmem [shape: bf16[5,64,576], index: 1, kind: input, shape index: {}]   ;;  %s13030_s2 = inlined_call_operand.vmem [shape: f32[5,64,1], index: 2, kind: input, shape index: {}]   ;;  %s13031_s3 = inlined_call_operand.vmem [shape: f32[5,64,1], index: 3, kind: input, shape index: {}]   ;;  %s13032_s4 = inlined_call_operand.vmem [shape: f32[9,1,256], index: 4, kind: input, shape index: {}]   ;;  %s13033_s5 = inlined_call_operand.vmem [shape: f32[64,1], index: 5, kind: input, shape index: {}]   ;;  %s13034_s6 = inlined_call_operand.vmem [shape: f32[2,1,256], index: 6, kind: output, shape index: {}]  }
   0x1 LB: > { %s6006_s22 = sadd.s32 4294967295, %s6483_s21   ;;  %p6010_p0 = scmp.ge.s32.totalorder %s6483_s21, 1  ;;  %s6483_s21 = sphi %s6530_s21, %s16_s21  }
   0x2   : > { %p212_p1 = scmp.lt.s32.totalorder %s6483_s21, 3 }
   0x4   : > { %p213_p2 = pnand %p6010_p0, %p212_p1 }
   0x6   : > { %216 = sbr.rel (%p213_p2) target bundleno = 2973 (0xb9d), region = 44 }
   0xb   : > { %p241_p3 = scmp.lt.s32.totalorder %s6006_s22, 1  ;;  %s6485_s27 = smov 16   ;;  %v13035_v16 = vlaneseq  ;;  %v6014_v20 = vld [vmem:[%s13032_s4 + $0x2] sm:$0x3]  ;;  %vm1088_vm8 = vcmask 523264  }
   0xc   : > { %s6486_s28 = smov 17   ;;  %s6487_s29 = smov 127  }
   0xd   : > { %s13876_s22 = smov (!%p241_p3, %s6006_s22), 1  ;;  %s6488_s30 = smov 1   ;;  %v6703_v17 = vshrl.u32 %v13035_v16, 7  ;;  %v6710_v18 = vand.u32 127, %v13035_v16 }
   0xe   : > { %s6303_s23 = sshll.u32 %s13876_s22, 7  ;;  %s6489_s9 = smov 15  }
   0xf   : > { %s6544_s26 = scalar_lea.vmem %s13028_s0, %s6303_s23  ;;  %13335 = vst [vmem:[#allocation2_spill] sm:$0xff] %v6703_v17  ;;  %v6713_v19 = vsub.s32 1, %v6703_v17  ;;  %v6723_v21 = vsub.s32 0, %v6703_v17  ;;  %vm386_vm0 = vcmp.lt.s32.totalorder %v6710_v18, 16  ;;  %vm301_vm1 = vcmp.lt.s32.totalorder %v6710_v18, 17  ;;  %s6490_s12 = smov 112  }
  0x10   : > { %v6547_v0 = vld [vmem:[%s6544_s26 + $0x68] sm:$0xff]  ;;  %v6550_v1 = vld [vmem:[%s6544_s26 + $0x60] sm:$0xff]  ;;  %v6557_v2 = vld [vmem:[%s6544_s26 + $0x78] sm:$0xff]  ;;  %vm652_vm2 = vcmp.lt.s32.totalorder %v6710_v18, 127  ;;  %vm558_vm3 = vcmp.lt.s32.totalorder %v6710_v18, 1  ;;  %s6491_s17 = smov 113  }
  0x11   : > { %382 = vrot.lane.b32.xlu1 %v6547_v0, %s6485_s27  ;;  %366 = vrot.lane.b32.xlu0 %v6550_v1, %s6485_s27  ;;  %v6560_v3 = vld [vmem:[%s6544_s26 + $0x70] sm:$0xff]  ;;  %v6570_v5 = vld [vmem:[%s6544_s26 + $0x40] sm:$0xff]  ;;  %v6727_v24 = vrot.slane %v6014_v20, %v6713_v19  ;;  %v6736_v26 = vrot.slane %v6014_v20, %v6723_v21  ;;  %s6492_s20 = smov 111   ;;  %vm472_vm4 = vcmp.lt.s32.totalorder %v6710_v18, 15  ;;  %vm824_vm5 = vcmp.lt.s32.totalorder %v6710_v18, 112 }
  0x12   : > { %v6567_v4 = vld [vmem:[%s6544_s26 + $0x50] sm:$0xff]  ;;  %v6573_v6 = vld [vmem:[%s6544_s26 + $0x58] sm:$0xff]  ;;  %v6576_v7 = vld [vmem:[%s6544_s26 + $0x48] sm:$0xff]  ;;  %vm738_vm6 = vcmp.lt.s32.totalorder %v6710_v18, 113  ;;  %vm910_vm7 = vcmp.lt.s32.totalorder %v6710_v18, 111 }
  0x13   : > { %v6583_v8 = vld [vmem:[%s6544_s26 + $0x30] sm:$0xff]  ;;  %v6586_v9 = vld [vmem:[%s6544_s26 + $0x20] sm:$0xff]  ;;  %v6593_v10 = vld [vmem:[%s6544_s26 + $0x38] sm:$0xff]  ;;  %13336 = vst [vmem:[#allocation3_spill] sm:$0xff] %v6736_v26 }
  0x14   : > { %v6596_v11 = vld [vmem:[%s6544_s26 + $0x28] sm:$0xff]  ;;  %v6603_v12 = vld [vmem:[%s6544_s26 + $0x10] sm:$0xff]  ;;  %v6610_v13 = vld [vmem:[%s6544_s26] sm:$0xff] }
  0x15   : > { %384 = vrot.lane.b32.xlu1 %v6557_v2, %s6485_s27  ;;  %368 = vrot.lane.b32.xlu0 %v6560_v3, %s6485_s27  ;;  %v6613_v14 = vld [vmem:[%s6544_s26 + $0x18] sm:$0xff]  ;;  %v6616_v15 = vld [vmem:[%s6544_s26 + $0x8] sm:$0xff] }
  0x19   : > { %364 = vrot.lane.b32.xlu1 %v6567_v4, %s6485_s27  ;;  %362 = vrot.lane.b32.xlu0 %v6570_v5, %s6485_s27 }
  0x1d   : > { %380 = vrot.lane.b32.xlu1 %v6573_v6, %s6485_s27  ;;  %378 = vrot.lane.b32.xlu0 %v6576_v7, %s6485_s27 }
  0x21   : > { %360 = vrot.lane.b32.xlu1 %v6583_v8, %s6485_s27  ;;  %358 = vrot.lane.b32.xlu0 %v6586_v9, %s6485_s27 }
  0x25   : > { %376 = vrot.lane.b32.xlu1 %v6593_v10, %s6485_s27  ;;  %374 = vrot.lane.b32.xlu0 %v6596_v11, %s6485_s27 }
  0x29   : > { %356 = vrot.lane.b32.xlu1 %v6603_v12, %s6485_s27  ;;  %354 = vrot.lane.b32.xlu0 %v6610_v13, %s6485_s27 }
  0x2d   : > { %372 = vrot.lane.b32.xlu1 %v6613_v14, %s6485_s27  ;;  %370 = vrot.lane.b32.xlu0 %v6616_v15, %s6485_s27 }
  0x31   : > { %281 = vrot.lane.b32.xlu1 %v6560_v3, %s6486_s28  ;;  %279 = vrot.lane.b32.xlu0 %v6550_v1, %s6486_s28 }
  0x35   : > { %297 = vrot.lane.b32.xlu1 %v6557_v2, %s6486_s28  ;;  %295 = vrot.lane.b32.xlu0 %v6547_v0, %s6486_s28 }
  0x39   : > { %277 = vrot.lane.b32.xlu1 %v6567_v4, %s6486_s28  ;;  %275 = vrot.lane.b32.xlu0 %v6570_v5, %s6486_s28 }
  0x3d   : > { %293 = vrot.lane.b32.xlu1 %v6573_v6, %s6486_s28  ;;  %291 = vrot.lane.b32.xlu0 %v6576_v7, %s6486_s28 }
  0x41   : > { %273 = vrot.lane.b32.xlu1 %v6583_v8, %s6486_s28  ;;  %271 = vrot.lane.b32.xlu0 %v6586_v9, %s6486_s28 }
  0x45   : > { %289 = vrot.lane.b32.xlu1 %v6593_v10, %s6486_s28  ;;  %287 = vrot.lane.b32.xlu0 %v6596_v11, %s6486_s28 }
  0x49   : > { %269 = vrot.lane.b32.xlu1 %v6603_v12, %s6486_s28  ;;  %267 = vrot.lane.b32.xlu0 %v6610_v13, %s6486_s28 }
  0x4d   : > { %285 = vrot.lane.b32.xlu1 %v6613_v14, %s6486_s28  ;;  %283 = vrot.lane.b32.xlu0 %v6616_v15, %s6486_s28 }
  0x51   : > { %634 = vrot.lane.b32.xlu1 %v6560_v3, %s6487_s29  ;;  %632 = vrot.lane.b32.xlu0 %v6550_v1, %s6487_s29 }
  0x55   : > { %650 = vrot.lane.b32.xlu1 %v6557_v2, %s6487_s29  ;;  %648 = vrot.lane.b32.xlu0 %v6547_v0, %s6487_s29 }
  0x59   : > { %540 = vrot.lane.b32.xlu1 %v6560_v3, %s6488_s30  ;;  %538 = vrot.lane.b32.xlu0 %v6550_v1, %s6488_s30 }
  0x5d   : > { %556 = vrot.lane.b32.xlu1 %v6557_v2, %s6488_s30  ;;  %554 = vrot.lane.b32.xlu0 %v6547_v0, %s6488_s30 }
  0x61   : > { %630 = vrot.lane.b32.xlu1 %v6567_v4, %s6487_s29  ;;  %628 = vrot.lane.b32.xlu0 %v6570_v5, %s6487_s29 }
  0x65   : > { %646 = vrot.lane.b32.xlu1 %v6573_v6, %s6487_s29  ;;  %644 = vrot.lane.b32.xlu0 %v6576_v7, %s6487_s29 }
  0x69   : > { %536 = vrot.lane.b32.xlu1 %v6567_v4, %s6488_s30  ;;  %534 = vrot.lane.b32.xlu0 %v6570_v5, %s6488_s30 }
  0x6d   : > { %552 = vrot.lane.b32.xlu1 %v6573_v6, %s6488_s30  ;;  %550 = vrot.lane.b32.xlu0 %v6576_v7, %s6488_s30 }
  0x71   : > { %626 = vrot.lane.b32.xlu1 %v6583_v8, %s6487_s29  ;;  %624 = vrot.lane.b32.xlu0 %v6586_v9, %s6487_s29 }
  0x75   : > { %642 = vrot.lane.b32.xlu1 %v6593_v10, %s6487_s29  ;;  %640 = vrot.lane.b32.xlu0 %v6596_v11, %s6487_s29 }
  0x79   : > { %532 = vrot.lane.b32.xlu1 %v6583_v8, %s6488_s30  ;;  %530 = vrot.lane.b32.xlu0 %v6586_v9, %s6488_s30 }
  0x7d   : > { %548 = vrot.lane.b32.xlu1 %v6593_v10, %s6488_s30  ;;  %546 = vrot.lane.b32.xlu0 %v6596_v11, %s6488_s30 }
  0x81   : > { %622 = vrot.lane.b32.xlu1 %v6603_v12, %s6487_s29  ;;  %620 = vrot.lane.b32.xlu0 %v6610_v13, %s6487_s29 }
  0x83   : > { %v383_v22 = vpop.permute.xlu1 %382  ;;  %v367_v23 = vpop.permute.xlu0 %366 }
  0x84   : > { %v393_v25 = vsel %vm386_vm0, %v367_v23, %v383_v22  ;;  %v401_v27 = vsel %vm386_vm0, %v383_v22, %v367_v23 }
  0x85   : > { %638 = vrot.lane.b32.xlu1 %v6613_v14, %s6487_s29  ;;  %636 = vrot.lane.b32.xlu0 %v6616_v15, %s6487_s29  ;;  %v429_v32 = vmul.f32 %v6727_v24, %v393_v25  ;;  %v428_v34 = vmul.f32 %v6736_v26, %v401_v27 }
  0x87   : > { %v385_v28 = vpop.permute.xlu1 %384  ;;  %v369_v29 = vpop.permute.xlu0 %368 }
  0x88   : > { %v402_v30 = vsel %vm386_vm0, %v385_v28, %v369_v29  ;;  %v394_v31 = vsel %vm386_vm0, %v369_v29, %v385_v28 }
  0x89   : > { %528 = vrot.lane.b32.xlu1 %v6603_v12, %s6488_s30  ;;  %526 = vrot.lane.b32.xlu0 %v6610_v13, %s6488_s30  ;;  %v431_v33 = vmul.f32 %v6727_v24, %v394_v31  ;;  %v430_v35 = vmul.f32 %v6736_v26, %v402_v30 }
  0x8b   : > { %v365_v36 = vpop.permute.xlu1 %364  ;;  %v363_v37 = vpop.permute.xlu0 %362  ;;  %v439_v38 = vpack.c.bf16 %v431_v33, %v429_v32  ;;  %v438_v39 = vpack.c.bf16 %v430_v35, %v428_v34 }
  0x8d   : > { %1101 = vmatprep.subr.bf16.mxu0 %v439_v38  ;;  %544 = vrot.lane.b32.xlu1 %v6613_v14, %s6488_s30 }
  0x8e   : > { %542 = vrot.lane.b32.xlu0 %v6616_v15, %s6488_s30  ;;  %1102 = vmatpush1.bf16.msra.mxu0 %v438_v39 }
  0x8f   : > { %v381_v40 = vpop.permute.xlu1 %380  ;;  %v379_v41 = vpop.permute.xlu0 %378 }
  0x90   : > { %v392_v42 = vsel %vm386_vm0, %v365_v36, %v381_v40  ;;  %v400_v43 = vsel %vm386_vm0, %v381_v40, %v365_v36  ;;  %v391_v44 = vsel %vm386_vm0, %v363_v37, %v379_v41  ;;  %v399_v45 = vsel %vm386_vm0, %v379_v41, %v363_v37  ;;  %v318_v37 = vld [vmem:[%s13032_s4] sm:$0x3] }
  0x91   : > { %v426_v46 = vmul.f32 %v6736_v26, %v400_v43  ;;  %v427_v47 = vmul.f32 %v6727_v24, %v392_v42  ;;  %v424_v48 = vmul.f32 %v6736_v26, %v399_v45  ;;  %v425_v49 = vmul.f32 %v6727_v24, %v391_v44  ;;  %454 = vrot.lane.b32.xlu1 %v6560_v3, %s6489_s9 }
  0x92   : > { %452 = vrot.lane.b32.xlu0 %v6550_v1, %s6489_s9  ;;  %v6819_v42 = vrot.slane %v318_v37, %v6723_v21  ;;  %v6822_v43 = vrot.slane %v318_v37, %v6713_v19 }
  0x93   : > { %v361_v50 = vpop.permute.xlu1 %360  ;;  %v359_v51 = vpop.permute.xlu0 %358  ;;  %v437_v52 = vpack.c.bf16 %v427_v47, %v425_v49  ;;  %v436_v53 = vpack.c.bf16 %v426_v46, %v424_v48 }
  0x95   : > { %1103 = vmatprep.subr.bf16.mxu0 %v437_v52  ;;  %470 = vrot.lane.b32.xlu1 %v6557_v2, %s6489_s9 }
  0x96   : > { %468 = vrot.lane.b32.xlu0 %v6547_v0, %s6489_s9  ;;  %1104 = vmatpush1.bf16.msra.mxu0 %v436_v53 }
  0x97   : > { %v377_v54 = vpop.permute.xlu1 %376  ;;  %v375_v55 = vpop.permute.xlu0 %374 }
  0x98   : > { %v390_v56 = vsel %vm386_vm0, %v361_v50, %v377_v54  ;;  %v398_v57 = vsel %vm386_vm0, %v377_v54, %v361_v50  ;;  %v389_v58 = vsel %vm386_vm0, %v359_v51, %v375_v55  ;;  %v397_v59 = vsel %vm386_vm0, %v375_v55, %v359_v51 }
  0x99   : > { %v422_v60 = vmul.f32 %v6736_v26, %v398_v57  ;;  %v423_v61 = vmul.f32 %v6727_v24, %v390_v56  ;;  %v420_v62 = vmul.f32 %v6736_v26, %v397_v59  ;;  %v421_v63 = vmul.f32 %v6727_v24, %v389_v58  ;;  %450 = vrot.lane.b32.xlu1 %v6567_v4, %s6489_s9 }
  0x9a   : > { %448 = vrot.lane.b32.xlu0 %v6570_v5, %s6489_s9 }
  0x9b   : > { %v357_v20 = vpop.permute.xlu1 %356  ;;  %v355_v22 = vpop.permute.xlu0 %354  ;;  %v435_v23 = vpack.c.bf16 %v423_v61, %v421_v63  ;;  %v434_v25 = vpack.c.bf16 %v422_v60, %v420_v62 }
  0x9d   : > { %1105 = vmatprep.subr.bf16.mxu0 %v435_v23  ;;  %466 = vrot.lane.b32.xlu1 %v6573_v6, %s6489_s9 }
  0x9e   : > { %464 = vrot.lane.b32.xlu0 %v6576_v7, %s6489_s9  ;;  %1106 = vmatpush1.bf16.msra.mxu0 %v434_v25 }
  0x9f   : > { %v373_v27 = vpop.permute.xlu1 %372  ;;  %v371_v28 = vpop.permute.xlu0 %370 }
  0xa0   : > { %v388_v29 = vsel %vm386_vm0, %v357_v20, %v373_v27  ;;  %v396_v30 = vsel %vm386_vm0, %v373_v27, %v357_v20  ;;  %v387_v31 = vsel %vm386_vm0, %v355_v22, %v371_v28  ;;  %v395_v32 = vsel %vm386_vm0, %v371_v28, %v355_v22 }
  0xa1   : > { %v418_v33 = vmul.f32 %v6736_v26, %v396_v30  ;;  %v419_v34 = vmul.f32 %v6727_v24, %v388_v29  ;;  %v416_v35 = vmul.f32 %v6736_v26, %v395_v32  ;;  %v417_v36 = vmul.f32 %v6727_v24, %v387_v31  ;;  %446 = vrot.lane.b32.xlu1 %v6583_v8, %s6489_s9 }
  0xa2   : > { %444 = vrot.lane.b32.xlu0 %v6586_v9, %s6489_s9 }
  0xa3   : > { %v282_v38 = vpop.permute.xlu1 %281  ;;  %v280_v39 = vpop.permute.xlu0 %279  ;;  %v433_v40 = vpack.c.bf16 %v419_v34, %v417_v36  ;;  %v432_v41 = vpack.c.bf16 %v418_v33, %v416_v35 }
  0xa5   : > { %462 = vrot.lane.b32.xlu1 %v6593_v10, %s6489_s9  ;;  %1107 = vmatprep.subr.bf16.mxu0 %v433_v40 }
  0xa6   : > { %460 = vrot.lane.b32.xlu0 %v6596_v11, %s6489_s9  ;;  %1108 = vmatpush1.bf16.msra.mxu0 %v432_v41 }
  0xa7   : > { %v298_v44 = vpop.permute.xlu1 %297  ;;  %v296_v45 = vpop.permute.xlu0 %295 }
  0xa8   : > { %v309_v46 = vsel %vm301_vm1, %v282_v38, %v298_v44  ;;  %v317_v47 = vsel %vm301_vm1, %v298_v44, %v282_v38  ;;  %v308_v48 = vsel %vm301_vm1, %v280_v39, %v296_v45  ;;  %v316_v49 = vsel %vm301_vm1, %v296_v45, %v280_v39 }
  0xa9   : > { %v344_v50 = vmul.f32 %v6819_v42, %v317_v47  ;;  %v345_v51 = vmul.f32 %v6822_v43, %v309_v46  ;;  %v342_v52 = vmul.f32 %v6819_v42, %v316_v49  ;;  %v343_v53 = vmul.f32 %v6822_v43, %v308_v48  ;;  %442 = vrot.lane.b32.xlu1 %v6603_v12, %s6489_s9 }
  0xaa   : > { %440 = vrot.lane.b32.xlu0 %v6610_v13, %s6489_s9 }
  0xab   : > { %v278_v54 = vpop.permute.xlu1 %277  ;;  %v276_v55 = vpop.permute.xlu0 %275  ;;  %v353_v56 = vpack.c.bf16 %v345_v51, %v343_v53  ;;  %v352_v57 = vpack.c.bf16 %v344_v50, %v342_v52 }
  0xad   : > { %458 = vrot.lane.b32.xlu1 %v6613_v14, %s6489_s9  ;;  %1109 = vmatprep.subr.bf16.mxu0 %v353_v56 }
  0xae   : > { %456 = vrot.lane.b32.xlu0 %v6616_v15, %s6489_s9  ;;  %1110 = vmatpush1.bf16.msra.mxu0 %v352_v57  ;;  %v6017_v57 = vld [vmem:[%s13032_s4 + $0xa] sm:$0x3] }
  0xaf   : > { %v294_v58 = vpop.permute.xlu1 %293  ;;  %v292_v59 = vpop.permute.xlu0 %291 }
  0xb0   : > { %v307_v60 = vsel %vm301_vm1, %v278_v54, %v294_v58  ;;  %v315_v61 = vsel %vm301_vm1, %v294_v58, %v278_v54  ;;  %v306_v62 = vsel %vm301_vm1, %v276_v55, %v292_v59  ;;  %v314_v63 = vsel %vm301_vm1, %v292_v59, %v276_v55 }
  0xb1   : > { %v340_v20 = vmul.f32 %v6819_v42, %v315_v61  ;;  %v341_v22 = vmul.f32 %v6822_v43, %v307_v60  ;;  %v338_v23 = vmul.f32 %v6819_v42, %v314_v63  ;;  %v339_v25 = vmul.f32 %v6822_v43, %v306_v62  ;;  %806 = vrot.lane.b32.xlu1 %v6560_v3, %s6490_s12 }
  0xb2   : > { %804 = vrot.lane.b32.xlu0 %v6550_v1, %s6490_s12  ;;  %v6909_v62 = vrot.slane %v6017_v57, %v6713_v19  ;;  %v6912_v63 = vrot.slane %v6017_v57, %v6723_v21 }
  0xb3   : > { %v274_v27 = vpop.permute.xlu1 %273  ;;  %v272_v28 = vpop.permute.xlu0 %271  ;;  %v351_v29 = vpack.c.bf16 %v341_v22, %v339_v25  ;;  %v350_v30 = vpack.c.bf16 %v340_v20, %v338_v23 }
  0xb5   : > { %822 = vrot.lane.b32.xlu1 %v6557_v2, %s6490_s12  ;;  %1111 = vmatprep.subr.bf16.mxu0 %v351_v29 }
  0xb6   : > { %820 = vrot.lane.b32.xlu0 %v6547_v0, %s6490_s12  ;;  %1112 = vmatpush1.bf16.msra.mxu0 %v350_v30 }
  0xb7   : > { %v290_v31 = vpop.permute.xlu1 %289  ;;  %v288_v32 = vpop.permute.xlu0 %287 }
  0xb8   : > { %v305_v33 = vsel %vm301_vm1, %v274_v27, %v290_v31  ;;  %v313_v34 = vsel %vm301_vm1, %v290_v31, %v274_v27  ;;  %v304_v35 = vsel %vm301_vm1, %v272_v28, %v288_v32  ;;  %v312_v36 = vsel %vm301_vm1, %v288_v32, %v272_v28 }
  0xb9   : > { %v336_v37 = vmul.f32 %v6819_v42, %v313_v34  ;;  %v337_v38 = vmul.f32 %v6822_v43, %v305_v33  ;;  %v334_v39 = vmul.f32 %v6819_v42, %v312_v36  ;;  %v335_v40 = vmul.f32 %v6822_v43, %v304_v35  ;;  %802 = vrot.lane.b32.xlu1 %v6567_v4, %s6490_s12  ;;  %v6016_v33 = vld [vmem:[%s13032_s4 + $0x6] sm:$0x3] }
  0xba   : > { %800 = vrot.lane.b32.xlu0 %v6570_v5, %s6490_s12 }
  0xbb   : > { %v270_v41 = vpop.permute.xlu1 %269  ;;  %v268_v44 = vpop.permute.xlu0 %267  ;;  %v349_v45 = vpack.c.bf16 %v337_v38, %v335_v40  ;;  %v348_v46 = vpack.c.bf16 %v336_v37, %v334_v39  ;;  %v6939_v38 = vrot.slane %v6016_v33, %v6723_v21  ;;  %v6942_v39 = vrot.slane %v6016_v33, %v6713_v19 }
  0xbd   : > { %818 = vrot.lane.b32.xlu1 %v6573_v6, %s6490_s12  ;;  %1113 = vmatprep.subr.bf16.mxu0 %v349_v45  ;;  %13337 = vst [vmem:[#allocation4_spill] sm:$0xff] %v6939_v38  ;;  %13338 = vst [vmem:[#allocation5_spill] sm:$0xff] %v6942_v39 }
  0xbe   : > { %816 = vrot.lane.b32.xlu0 %v6576_v7, %s6490_s12  ;;  %1114 = vmatpush1.bf16.msra.mxu0 %v348_v46 }
  0xbf   : > { %v286_v47 = vpop.permute.xlu1 %285  ;;  %v284_v48 = vpop.permute.xlu0 %283 }
  0xc0   : > { %v303_v49 = vsel %vm301_vm1, %v270_v41, %v286_v47  ;;  %v311_v50 = vsel %vm301_vm1, %v286_v47, %v270_v41  ;;  %v302_v51 = vsel %vm301_vm1, %v268_v44, %v284_v48  ;;  %v310_v52 = vsel %vm301_vm1, %v284_v48, %v268_v44 }
  0xc1   : > { %v332_v53 = vmul.f32 %v6819_v42, %v311_v50  ;;  %v333_v54 = vmul.f32 %v6822_v43, %v303_v49  ;;  %v330_v55 = vmul.f32 %v6819_v42, %v310_v52  ;;  %v331_v56 = vmul.f32 %v6822_v43, %v302_v51  ;;  %798 = vrot.lane.b32.xlu1 %v6583_v8, %s6490_s12 }
  0xc2   : > { %796 = vrot.lane.b32.xlu0 %v6586_v9, %s6490_s12 }
  0xc3   : > { %v635_v58 = vpop.permute.xlu1 %634  ;;  %v633_v59 = vpop.permute.xlu0 %632  ;;  %v347_v60 = vpack.c.bf16 %v333_v54, %v331_v56  ;;  %v346_v61 = vpack.c.bf16 %v332_v53, %v330_v55  ;;  %v6334_v56 = vld [vmem:[%s13029_s1 + $0x4] ss:$20 sps:$4 sm:$0xff]  }
  0xc4   : > { %1133 = vmatprep.mubr.bf16.mxu0 %v6334_v56 }
  0xc5   : > { %814 = vrot.lane.b32.xlu1 %v6593_v10, %s6490_s12  ;;  %1115 = vmatprep.subr.bf16.mxu0 %v347_v60 }
  0xc6   : > { %812 = vrot.lane.b32.xlu0 %v6596_v11, %s6490_s12  ;;  %1116 = vmatpush1.bf16.msra.mxu0 %v346_v61 }
  0xc7   : > { %v651_v20 = vpop.permute.xlu1 %650  ;;  %v649_v22 = vpop.permute.xlu0 %648 }
  0xc8   : > { %v660_v23 = vsel %vm652_vm2, %v635_v58, %v651_v20  ;;  %v659_v25 = vsel %vm652_vm2, %v633_v59, %v649_v22  ;;  %v667_v27 = vsel %vm652_vm2, %v649_v22, %v633_v59  ;;  %v668_v28 = vsel %vm652_vm2, %v651_v20, %v635_v58 }
  0xc9   : > { %794 = vrot.lane.b32.xlu1 %v6603_v12, %s6490_s12  ;;  %v695_v29 = vmul.f32 %v6909_v62, %v667_v27  ;;  %v697_v30 = vmul.f32 %v6909_v62, %v668_v28  ;;  %v694_v31 = vmul.f32 %v6912_v63, %v659_v25  ;;  %v696_v32 = vmul.f32 %v6912_v63, %v660_v23 }
  0xca   : > { %792 = vrot.lane.b32.xlu0 %v6610_v13, %s6490_s12 }
  0xcb   : > { %v541_v34 = vpop.permute.xlu1 %540  ;;  %v539_v35 = vpop.permute.xlu0 %538  ;;  %v705_v36 = vpack.c.bf16 %v697_v30, %v695_v29  ;;  %v704_v37 = vpack.c.bf16 %v696_v32, %v694_v31 }
  0xcd   : > { %810 = vrot.lane.b32.xlu1 %v6613_v14, %s6490_s12  ;;  %1174 = vmatprep.subr.bf16.mxu1 %v705_v36 }
  0xce   : > { %808 = vrot.lane.b32.xlu0 %v6616_v15, %s6490_s12  ;;  %1175 = vmatpush1.bf16.msra.mxu1 %v704_v37 }
  0xcf   : > { %v557_v40 = vpop.permute.xlu1 %556  ;;  %v555_v41 = vpop.permute.xlu0 %554 }
  0xd0   : > { %v566_v44 = vsel %vm558_vm3, %v541_v34, %v557_v40  ;;  %v574_v45 = vsel %vm558_vm3, %v557_v40, %v541_v34  ;;  %v565_v46 = vsel %vm558_vm3, %v539_v35, %v555_v41  ;;  %v573_v47 = vsel %vm558_vm3, %v555_v41, %v539_v35 }
  0xd1   : > { %v602_v48 = vmul.f32 %v6939_v38, %v574_v45  ;;  %v603_v49 = vmul.f32 %v6942_v39, %v566_v44  ;;  %v600_v50 = vmul.f32 %v6939_v38, %v573_v47  ;;  %v601_v51 = vmul.f32 %v6942_v39, %v565_v46  ;;  %720 = vrot.lane.b32.xlu1 %v6560_v3, %s6491_s17 }
  0xd2   : > { %718 = vrot.lane.b32.xlu0 %v6550_v1, %s6491_s17 }
  0xd3   : > { %v631_v52 = vpop.permute.xlu1 %630  ;;  %v629_v53 = vpop.permute.xlu0 %628  ;;  %v611_v54 = vpack.c.bf16 %v603_v49, %v601_v51  ;;  %v610_v55 = vpack.c.bf16 %v602_v48, %v600_v50 }
  0xd5   : > { %736 = vrot.lane.b32.xlu1 %v6557_v2, %s6491_s17  ;;  %1117 = vmatprep.subr.bf16.mxu0 %v611_v54 }
  0xd6   : > { %734 = vrot.lane.b32.xlu0 %v6547_v0, %s6491_s17  ;;  %1118 = vmatpush2.bf16.msra.mxu0 %v610_v55 }
  0xd7   : > { %v647_v57 = vpop.permute.xlu1 %646  ;;  %v645_v58 = vpop.permute.xlu0 %644 }
  0xd8   : > { %v658_v59 = vsel %vm652_vm2, %v631_v52, %v647_v57  ;;  %v666_v60 = vsel %vm652_vm2, %v647_v57, %v631_v52  ;;  %v657_v61 = vsel %vm652_vm2, %v629_v53, %v645_v58  ;;  %v665_v20 = vsel %vm652_vm2, %v645_v58, %v629_v53 }
  0xd9   : > { %v692_v22 = vmul.f32 %v6912_v63, %v658_v59  ;;  %v693_v23 = vmul.f32 %v6909_v62, %v666_v60  ;;  %v690_v25 = vmul.f32 %v6912_v63, %v657_v61  ;;  %v691_v27 = vmul.f32 %v6909_v62, %v665_v20  ;;  %892 = vrot.lane.b32.xlu1 %v6560_v3, %s6492_s20 }
  0xda   : > { %890 = vrot.lane.b32.xlu0 %v6550_v1, %s6492_s20 }
  0xdb   : > { %v537_v28 = vpop.permute.xlu1 %536  ;;  %v535_v29 = vpop.permute.xlu0 %534  ;;  %v703_v30 = vpack.c.bf16 %v693_v23, %v691_v27  ;;  %v702_v31 = vpack.c.bf16 %v692_v22, %v690_v25 }
  0xdd   : > { %908 = vrot.lane.b32.xlu1 %v6557_v2, %s6492_s20  ;;  %1176 = vmatprep.subr.bf16.mxu1 %v703_v30 }
  0xde   : > { %906 = vrot.lane.b32.xlu0 %v6547_v0, %s6492_s20  ;;  %1177 = vmatpush1.bf16.msra.mxu1 %v702_v31 }
  0xdf   : > { %v553_v32 = vpop.permute.xlu1 %552  ;;  %v551_v33 = vpop.permute.xlu0 %550 }
  0xe0   : > { %v564_v34 = vsel %vm558_vm3, %v537_v28, %v553_v32  ;;  %v572_v1 = vsel %vm558_vm3, %v553_v32, %v537_v28  ;;  %v563_v35 = vsel %vm558_vm3, %v535_v29, %v551_v33  ;;  %v571_v36 = vsel %vm558_vm3, %v551_v33, %v535_v29 }
  0xe1   : > { %v598_v37 = vmul.f32 %v6939_v38, %v572_v1  ;;  %v599_v40 = vmul.f32 %v6942_v39, %v564_v34  ;;  %v596_v41 = vmul.f32 %v6939_v38, %v571_v36  ;;  %v597_v44 = vmul.f32 %v6942_v39, %v563_v35  ;;  %716 = vrot.lane.b32.xlu1 %v6567_v4, %s6491_s17 }
  0xe2   : > { %714 = vrot.lane.b32.xlu0 %v6570_v5, %s6491_s17 }
  0xe3   : > { %v627_v45 = vpop.permute.xlu1 %626  ;;  %v625_v46 = vpop.permute.xlu0 %624  ;;  %v609_v47 = vpack.c.bf16 %v599_v40, %v597_v44  ;;  %v608_v48 = vpack.c.bf16 %v598_v37, %v596_v41 }
  0xe5   : > { %732 = vrot.lane.b32.xlu1 %v6573_v6, %s6491_s17  ;;  %1119 = vmatprep.subr.bf16.mxu0 %v609_v47 }
  0xe6   : > { %730 = vrot.lane.b32.xlu0 %v6576_v7, %s6491_s17  ;;  %1120 = vmatpush2.bf16.msra.mxu0 %v608_v48 }
  0xe7   : > { %v643_v49 = vpop.permute.xlu1 %642  ;;  %v641_v50 = vpop.permute.xlu0 %640 }
  0xe8   : > { %v656_v51 = vsel %vm652_vm2, %v627_v45, %v643_v49  ;;  %v664_v52 = vsel %vm652_vm2, %v643_v49, %v627_v45  ;;  %v655_v53 = vsel %vm652_vm2, %v625_v46, %v641_v50  ;;  %v663_v54 = vsel %vm652_vm2, %v641_v50, %v625_v46 }
  0xe9   : > { %v688_v55 = vmul.f32 %v6912_v63, %v656_v51  ;;  %v689_v56 = vmul.f32 %v6909_v62, %v664_v52  ;;  %v686_v57 = vmul.f32 %v6912_v63, %v655_v53  ;;  %v687_v58 = vmul.f32 %v6909_v62, %v663_v54  ;;  %888 = vrot.lane.b32.xlu1 %v6567_v4, %s6492_s20  ;;  %v6472_v54 = vld [vmem:[%s6544_s26 + $0x60] sm:$0xff] }
  0xea   : > { %886 = vrot.lane.b32.xlu0 %v6570_v5, %s6492_s20  ;;  %v619_v53 = vpack.c.bf16 %v6557_v2, %v6547_v0  ;;  %v6346_v0 = vld [vmem:[%s13029_s1 + $0xc] ss:$20 sps:$4 sm:$0xff]  }
  0xeb   : > { %v533_v59 = vpop.permute.xlu1 %532  ;;  %v531_v60 = vpop.permute.xlu0 %530  ;;  %v701_v61 = vpack.c.bf16 %v689_v56, %v687_v58  ;;  %v700_v20 = vpack.c.bf16 %v688_v55, %v686_v57  ;;  %1206 = vmatprep.mubr.bf16.mxu1 %v6346_v0 }
  0xed   : > { %904 = vrot.lane.b32.xlu1 %v6573_v6, %s6492_s20  ;;  %1178 = vmatprep.subr.bf16.mxu1 %v701_v61  ;;  %v6015_v61 = vld [vmem:[%s13032_s4 + $0x4] sm:$0x3] }
  0xee   : > { %902 = vrot.lane.b32.xlu0 %v6576_v7, %s6492_s20  ;;  %1179 = vmatpush1.bf16.msra.mxu1 %v700_v20 }
  0xef   : > { %v549_v22 = vpop.permute.xlu1 %548  ;;  %v547_v23 = vpop.permute.xlu0 %546 }
  0xf0   : > { %v562_v4 = vsel %vm558_vm3, %v533_v59, %v549_v22  ;;  %v570_v5 = vsel %vm558_vm3, %v549_v22, %v533_v59  ;;  %v561_v25 = vsel %vm558_vm3, %v531_v60, %v547_v23  ;;  %v569_v27 = vsel %vm558_vm3, %v547_v23, %v531_v60  ;;  %v6473_v22 = vld [vmem:[%s6544_s26 + $0x50] sm:$0xff]  ;;  %v6474_v23 = vld [vmem:[%s6544_s26 + $0x40] sm:$0xff] }
  0xf1   : > { %v594_v28 = vmul.f32 %v6939_v38, %v570_v5  ;;  %v595_v29 = vmul.f32 %v6942_v39, %v562_v4  ;;  %v592_v30 = vmul.f32 %v6939_v38, %v569_v27  ;;  %v593_v31 = vmul.f32 %v6942_v39, %v561_v25  ;;  %712 = vrot.lane.b32.xlu1 %v6583_v8, %s6491_s17 }
  0xf2   : > { %710 = vrot.lane.b32.xlu0 %v6586_v9, %s6491_s17  ;;  %v616_v4 = vpack.c.bf16 %v6473_v22, %v6474_v23 }
  0xf3   : > { %v623_v32 = vpop.permute.xlu1 %622  ;;  %v621_v33 = vpop.permute.xlu0 %620  ;;  %v607_v34 = vpack.c.bf16 %v595_v29, %v593_v31  ;;  %v606_v1 = vpack.c.bf16 %v594_v28, %v592_v30  ;;  %v615_v28 = vpack.c.bf16 %v6593_v10, %v6596_v11  ;;  %v7105_v29 = vrot.slane %v6015_v61, %v6723_v21 }
  0xf4   : > { %v7108_v30 = vrot.slane %v6015_v61, %v6713_v19 }
  0xf5   : > { %728 = vrot.lane.b32.xlu1 %v6593_v10, %s6491_s17  ;;  %1121 = vmatprep.subr.bf16.mxu0 %v607_v34  ;;  %13339 = vst [vmem:[#allocation6_spill] sm:$0xff] %v7105_v29 }
  0xf6   : > { %726 = vrot.lane.b32.xlu0 %v6596_v11, %s6491_s17  ;;  %1122 = vmatpush2.bf16.msra.mxu0 %v606_v1  ;;  %13340 = vst [vmem:[#allocation7_spill] sm:$0xff] %v7108_v30 }
  0xf7   : > { %v639_v35 = vpop.permute.xlu1 %638  ;;  %v637_v36 = vpop.permute.xlu0 %636 }
  0xf8   : > { %v654_v37 = vsel %vm652_vm2, %v623_v32, %v639_v35  ;;  %v662_v40 = vsel %vm652_vm2, %v639_v35, %v623_v32  ;;  %v653_v41 = vsel %vm652_vm2, %v621_v33, %v637_v36  ;;  %v661_v44 = vsel %vm652_vm2, %v637_v36, %v621_v33  ;;  %v6475_v32 = vld [vmem:[%s6544_s26 + $0x30] sm:$0xff] }
  0xf9   : > { %v684_v45 = vmul.f32 %v6912_v63, %v654_v37  ;;  %v685_v46 = vmul.f32 %v6909_v62, %v662_v40  ;;  %v682_v47 = vmul.f32 %v6912_v63, %v653_v41  ;;  %v683_v48 = vmul.f32 %v6909_v62, %v661_v44  ;;  %884 = vrot.lane.b32.xlu1 %v6583_v8, %s6492_s20 }
  0xfa   : > { %882 = vrot.lane.b32.xlu0 %v6586_v9, %s6492_s20  ;;  %v618_v8 = vpack.c.bf16 %v6560_v3, %v6472_v54  ;;  %v617_v9 = vpack.c.bf16 %v6573_v6, %v6576_v7  ;;  %v613_v35 = vpack.c.bf16 %v6613_v14, %v6616_v15  ;;  %v13036_v36 = vmov 0  }
  0xfb   : > { %v529_v49 = vpop.permute.xlu1 %528  ;;  %v527_v50 = vpop.permute.xlu0 %526  ;;  %v699_v51 = vpack.c.bf16 %v685_v46, %v683_v48  ;;  %v698_v52 = vpack.c.bf16 %v684_v45, %v682_v47  ;;  %6331 = vset.pattern.permute.xlu1 %v13036_v36  ;;  %v612_v48 = vpack.c.bf16 %v6603_v12, %v6610_v13  ;;  %6330 = vset.pattern.permute.xlu0 %v13036_v36 }
  0xfd   : > { %900 = vrot.lane.b32.xlu1 %v6593_v10, %s6492_s20  ;;  %1180 = vmatprep.subr.bf16.mxu1 %v699_v51  ;;  %v6476_v10 = vld [vmem:[%s6544_s26 + $0x20] sm:$0xff] }
  0xfe   : > { %898 = vrot.lane.b32.xlu0 %v6596_v11, %s6492_s20  ;;  %1181 = vmatpush1.bf16.msra.mxu1 %v698_v52  ;;  %v614_v11 = vpack.c.bf16 %v6475_v32, %v6476_v10 }
  0xff   : > { %v545_v55 = vpop.permute.xlu1 %544  ;;  %1182 = vmatprep.subr.bf16.mxu1 %v619_v53 }
 0x100   : > { %v560_v2 = vsel %vm558_vm3, %v529_v49, %v545_v55  ;;  %v568_v56 = vsel %vm558_vm3, %v545_v55, %v529_v49  ;;  %v543_v57 = vpop.permute.xlu0 %542 }
 0x101   : > { %v590_v3 = vmul.f32 %v6939_v38, %v568_v56  ;;  %v591_v58 = vmul.f32 %v6942_v39, %v560_v2  ;;  %v559_v6 = vsel %vm558_vm3, %v527_v50, %v543_v57  ;;  %v567_v7 = vsel %vm558_vm3, %v543_v57, %v527_v50  ;;  %708 = vrot.lane.b32.xlu1 %v6603_v12, %s6491_s17 }
 0x102   : > { %v588_v59 = vmul.f32 %v6939_v38, %v567_v7  ;;  %v589_v60 = vmul.f32 %v6942_v39, %v559_v6  ;;  %706 = vrot.lane.b32.xlu0 %v6610_v13, %s6491_s17  ;;  %1183 = vmatpush1.bf16.msra.mxu1 %v618_v8 }
 0x103   : > { %v455_v20 = vpop.permute.xlu1 %454  ;;  %1184 = vmatprep.subr.bf16.mxu1 %v617_v9 }
 0x104   : > { %v453_v5 = vpop.permute.xlu0 %452  ;;  %v605_v25 = vpack.c.bf16 %v591_v58, %v589_v60  ;;  %v604_v27 = vpack.c.bf16 %v590_v3, %v588_v59 }
 0x105   : > { %724 = vrot.lane.b32.xlu1 %v6613_v14, %s6491_s17 }
 0x106   : > { %722 = vrot.lane.b32.xlu0 %v6616_v15, %s6491_s17  ;;  %1123 = vmatprep.subr.bf16.mxu0 %v605_v25 }
 0x107   : > { %1124 = vmatpush2.bf16.msra.mxu0 %v604_v27  ;;  %v471_v31 = vpop.permute.xlu1 %470  ;;  %1185 = vmatpush1.bf16.msra.mxu1 %v616_v4  ;;  %v1327_v4 = vld [vmem:[%s13030_s2 + $0x38] sm:$0xff] }
 0x108   : > { %v480_v33 = vsel %vm472_vm4, %v455_v20, %v471_v31  ;;  %v488_v34 = vsel %vm472_vm4, %v471_v31, %v455_v20  ;;  %v469_v1 = vpop.permute.xlu0 %468  ;;  %1186 = vmatprep.subr.bf16.mxu1 %v615_v28 }
 0x109   : > { %v516_v37 = vmul.f32 %v7105_v29, %v488_v34  ;;  %v517_v40 = vmul.f32 %v7108_v30, %v480_v33  ;;  %v479_v41 = vsel %vm472_vm4, %v453_v5, %v469_v1  ;;  %v487_v44 = vsel %vm472_vm4, %v469_v1, %v453_v5  ;;  %880 = vrot.lane.b32.xlu1 %v6603_v12, %s6492_s20  ;;  %v1326_v5 = vld [vmem:[%s13030_s2 + $0x30] sm:$0xff] }
 0x10a   : > { %v514_v45 = vmul.f32 %v7105_v29, %v487_v44  ;;  %v515_v46 = vmul.f32 %v7108_v30, %v479_v41  ;;  %878 = vrot.lane.b32.xlu0 %v6610_v13, %s6492_s20  ;;  %v6019_v44 = vld [vmem:[%s13032_s4 + $0xe] sm:$0x3] }
 0x10b   : > { %v451_v47 = vpop.permute.xlu1 %450  ;;  %1187 = vmatpush1.bf16.msra.mxu1 %v614_v11 }
 0x10c   : > { %v449_v49 = vpop.permute.xlu0 %448  ;;  %v525_v50 = vpack.c.bf16 %v517_v40, %v515_v46  ;;  %v524_v51 = vpack.c.bf16 %v516_v37, %v514_v45  ;;  %1188 = vmatprep.subr.bf16.mxu1 %v613_v35  ;;  %v1390_v45 = vld [vmem:[%s13031_s3 + $0x30] sm:$0xff]  ;;  %v1391_v46 = vld [vmem:[%s13031_s3 + $0x38] sm:$0xff] }
 0x10d   : > { %896 = vrot.lane.b32.xlu1 %v6613_v14, %s6492_s20 }
 0x10e   : > { %894 = vrot.lane.b32.xlu0 %v6616_v15, %s6492_s20  ;;  %1125 = vmatprep.subr.bf16.mxu0 %v525_v50 }
 0x10f   : > { %1126 = vmatpush2.bf16.msra.mxu0 %v524_v51  ;;  %v467_v52 = vpop.permute.xlu1 %466  ;;  %1189 = vmatpush1.bf16.msra.mxu1 %v612_v48  ;;  %v1324_v51 = vld [vmem:[%s13030_s2 + $0x20] sm:$0xff] }
 0x110   : > { %v478_v53 = vsel %vm472_vm4, %v451_v47, %v467_v52  ;;  %v486_v12 = vsel %vm472_vm4, %v467_v52, %v451_v47  ;;  %v465_v13 = vpop.permute.xlu0 %464  ;;  %v7196_v52 = vrot.slane %v6019_v44, %v6723_v21 }
 0x111   : > { %v512_v54 = vmul.f32 %v7105_v29, %v486_v12  ;;  %v513_v8 = vmul.f32 %v7108_v30, %v478_v53  ;;  %v477_v14 = vsel %vm472_vm4, %v449_v49, %v465_v13  ;;  %v485_v15 = vsel %vm472_vm4, %v465_v13, %v449_v49  ;;  %1365 = vperm.xlu1 %6331, %v1327_v4   ;;  %v1325_v12 = vld [vmem:[%s13030_s2 + $0x28] sm:$0xff]  ;;  %v6332_v13 = vld [vmem:[%s13029_s1] ss:$20 sps:$4 sm:$0xff]  }
 0x112   : > { %v510_v55 = vmul.f32 %v7105_v29, %v485_v15  ;;  %v511_v9 = vmul.f32 %v7108_v30, %v477_v14  ;;  %1360 = vperm.xlu0 %6330, %v1326_v5   ;;  %13341 = vst [vmem:[#allocation8_spill] sm:$0xff] %v7196_v52  ;;  %v7199_v53 = vrot.slane %v6019_v44, %v6713_v19  ;;  %v6338_v5 = vld [vmem:[%s13029_s1 + $0x54] ss:$20 sps:$4 sm:$0xff]  }
 0x113   : > { %v447_v0 = vpop.permute.xlu1 %446 }
 0x114   : > { %v445_v2 = vpop.permute.xlu0 %444  ;;  %v523_v56 = vpack.c.bf16 %v513_v8, %v511_v9  ;;  %v522_v57 = vpack.c.bf16 %v512_v54, %v510_v55  ;;  %13342 = vst [vmem:[#allocation9_spill] sm:$0xff] %v7199_v53  ;;  %v6335_v8 = vld [vmem:[%s13029_s1 + $0x2c] ss:$20 sps:$4 sm:$0xff]  }
 0x115   : > { %1424 = vperm.xlu1 %6331, %v1390_v45   ;;  %v1388_v9 = vld [vmem:[%s13031_s3 + $0x20] sm:$0xff] }
 0x116   : > { %1127 = vmatprep.subr.bf16.mxu0 %v523_v56  ;;  %1429 = vperm.xlu0 %6330, %v1391_v46   ;;  %v1320_v45 = vld [vmem:[%s13030_s2] sm:$0xff]  ;;  %v1321_v46 = vld [vmem:[%s13030_s2 + $0x8] sm:$0xff] }
 0x117   : > { %1128 = vmatpush2.bf16.msra.mxu0 %v522_v57  ;;  %v463_v3 = vpop.permute.xlu1 %462 }
 0x118   : > { %v476_v58 = vsel %vm472_vm4, %v447_v0, %v463_v3  ;;  %v484_v6 = vsel %vm472_vm4, %v463_v3, %v447_v0  ;;  %v461_v7 = vpop.permute.xlu0 %460  ;;  %v1389_v3 = vld [vmem:[%s13031_s3 + $0x28] sm:$0xff] }
 0x119   : > { %v508_v59 = vmul.f32 %v7105_v29, %v484_v6  ;;  %v509_v60 = vmul.f32 %v7108_v30, %v476_v58  ;;  %v475_v61 = vsel %vm472_vm4, %v445_v2, %v461_v7  ;;  %v483_v20 = vsel %vm472_vm4, %v461_v7, %v445_v2  ;;  %1350 = vperm.xlu1 %6331, %v1324_v51  }
 0x11a   : > { %v506_v22 = vmul.f32 %v7105_v29, %v483_v20  ;;  %v507_v23 = vmul.f32 %v7108_v30, %v475_v61  ;;  %1355 = vperm.xlu0 %6330, %v1325_v12   ;;  %v1322_v20 = vld [vmem:[%s13030_s2 + $0x10] sm:$0xff] }
 0x11b   : > { %v443_v25 = vpop.permute.xlu1 %442 }
 0x11c   : > { %v441_v27 = vpop.permute.xlu0 %440  ;;  %v521_v28 = vpack.c.bf16 %v509_v60, %v507_v23  ;;  %v520_v31 = vpack.c.bf16 %v508_v59, %v506_v22  ;;  %v1323_v22 = vld [vmem:[%s13030_s2 + $0x18] sm:$0xff] }
 0x11d   : > { %1414 = vperm.xlu1 %6331, %v1388_v9   ;;  %v6337_v23 = vld [vmem:[%s13029_s1 + $0x28] ss:$20 sps:$4 sm:$0xff]  }
 0x11e   : > { %1129 = vmatprep.subr.bf16.mxu0 %v521_v28  ;;  %1419 = vperm.xlu0 %6330, %v1389_v3  }
 0x11f   : > { %1130 = vmatpush2.bf16.msra.mxu0 %v520_v31  ;;  %v459_v32 = vpop.permute.xlu1 %458  ;;  %v1386_v31 = vld [vmem:[%s13031_s3 + $0x10] sm:$0xff] }
 0x120   : > { %v474_v10 = vsel %vm472_vm4, %v443_v25, %v459_v32  ;;  %v482_v11 = vsel %vm472_vm4, %v459_v32, %v443_v25  ;;  %v457_v33 = vpop.permute.xlu0 %456 }
 0x121   : > { %v504_v34 = vmul.f32 %v7105_v29, %v482_v11  ;;  %v505_v1 = vmul.f32 %v7108_v30, %v474_v10  ;;  %v473_v35 = vsel %vm472_vm4, %v441_v27, %v457_v33  ;;  %v481_v37 = vsel %vm472_vm4, %v457_v33, %v441_v27  ;;  %1340 = vperm.xlu1 %6331, %v1322_v20  }
 0x122   : > { %v502_v40 = vmul.f32 %v7105_v29, %v481_v37  ;;  %v503_v41 = vmul.f32 %v7108_v30, %v473_v35  ;;  %1345 = vperm.xlu0 %6330, %v1323_v22  }
 0x123   : > { %v807_v47 = vpop.permute.xlu1 %806 }
 0x124   : > { %v805_v48 = vpop.permute.xlu0 %804  ;;  %v519_v49 = vpack.c.bf16 %v505_v1, %v503_v41  ;;  %v518_v50 = vpack.c.bf16 %v504_v34, %v502_v40  ;;  %v1387_v34 = vld [vmem:[%s13031_s3 + $0x18] sm:$0xff] }
 0x125   : > { %1404 = vperm.xlu1 %6331, %v1386_v31  }
 0x126   : > { %1131 = vmatprep.subr.bf16.mxu0 %v519_v49  ;;  %1409 = vperm.xlu0 %6330, %v1387_v34   ;;  %v6341_v49 = vld [vmem:[%s13029_s1 + $0x7c] ss:$20 sps:$4 sm:$0xff]  }
 0x127   : > { %1132 = vmatpush2.bf16.msra.mxu0 %v518_v50  ;;  %v823_v54 = vpop.permute.xlu1 %822 }
 0x128   : > { %v832_v14 = vsel %vm824_vm5, %v807_v47, %v823_v54  ;;  %v840_v15 = vsel %vm824_vm5, %v823_v54, %v807_v47  ;;  %v821_v55 = vpop.permute.xlu0 %820  ;;  %v6340_v47 = vld [vmem:[%s13029_s1 + $0x50] ss:$20 sps:$4 sm:$0xff]  }
 0x129   : > { %v868_v0 = vmul.f32 %v7196_v52, %v832_v14  ;;  %v869_v2 = vmul.f32 %v7199_v53, %v840_v15  ;;  %v831_v56 = vsel %vm824_vm5, %v805_v48, %v821_v55  ;;  %v839_v57 = vsel %vm824_vm5, %v821_v55, %v805_v48  ;;  %1330 = vperm.xlu1 %6331, %v1320_v45   ;;  %v1385_v55 = vld [vmem:[%s13031_s3 + $0x8] sm:$0xff] }
 0x12a   : > { %v866_v58 = vmul.f32 %v7196_v52, %v831_v56  ;;  %v867_v6 = vmul.f32 %v7199_v53, %v839_v57  ;;  %1134 = vmatmul.mubr.bf16.vlgmr.msra.gmra.mxu0 %v6332_v13  ;;  %1335 = vperm.xlu0 %6330, %v1321_v46   ;;  %v1384_v13 = vld [vmem:[%s13031_s3] sm:$0xff] }
 0x12b   : > { %v803_v7 = vpop.permute.xlu1 %802  ;;  %1143 = vmatprep.mubr.bf16.mxu0 %v6335_v8 }
 0x12c   : > { %v801_v59 = vpop.permute.xlu0 %800  ;;  %v877_v60 = vpack.c.bf16 %v869_v2, %v867_v6  ;;  %v876_v61 = vpack.c.bf16 %v868_v0, %v866_v58  ;;  %v6343_v58 = vld [vmem:[%s13029_s1 + $0x78] ss:$20 sps:$4 sm:$0xff]  }
 0x12d   : > { %1394 = vperm.xlu1 %6331, %v1384_v13  }
 0x12e   : > { %1190 = vmatprep.subr.bf16.mxu1 %v877_v60  ;;  %1399 = vperm.xlu0 %6330, %v1385_v55  }
 0x12f   : > { %1191 = vmatpush2.bf16.msra.mxu1 %v876_v61  ;;  %v819_v4 = vpop.permute.xlu1 %818 }
 0x130   : > { %v830_v25 = vsel %vm824_vm5, %v803_v7, %v819_v4  ;;  %v838_v27 = vsel %vm824_vm5, %v819_v4, %v803_v7  ;;  %v817_v28 = vpop.permute.xlu0 %816 }
 0x131   : > { %v864_v32 = vmul.f32 %v7196_v52, %v830_v25  ;;  %v865_v10 = vmul.f32 %v7199_v53, %v838_v27  ;;  %v829_v11 = vsel %vm824_vm5, %v801_v59, %v817_v28  ;;  %v837_v33 = vsel %vm824_vm5, %v817_v28, %v801_v59  ;;  %v6018_v25 = vld [vmem:[%s13032_s4 + $0xc] sm:$0x3] }
 0x132   : > { %v862_v1 = vmul.f32 %v7196_v52, %v829_v11  ;;  %v863_v35 = vmul.f32 %v7199_v53, %v837_v33  ;;  %1144 = vmatmul.mubr.bf16.gmra.mxu0 %v6337_v23  ;;  %v7312_v11 = vrot.slane %v6018_v25, %v6713_v19 }
 0x133   : > { %v799_v37 = vpop.permute.xlu1 %798  ;;  %1153 = vmatprep.mubr.bf16.mxu0 %v6338_v5 }
 0x134   : > { %v797_v40 = vpop.permute.xlu0 %796  ;;  %v875_v41 = vpack.c.bf16 %v865_v10, %v863_v35  ;;  %v874_v44 = vpack.c.bf16 %v864_v32, %v862_v1  ;;  %v7309_v10 = vrot.slane %v6018_v25, %v6723_v21  ;;  %13344 = vst [vmem:[#allocation11_spill] sm:$0xff] %v7312_v11 }
 0x136   : > { %1192 = vmatprep.subr.bf16.mxu1 %v875_v41  ;;  %13343 = vst [vmem:[#allocation10_spill] sm:$0xff] %v7309_v10 }
 0x137   : > { %1193 = vmatpush2.bf16.msra.mxu1 %v874_v44  ;;  %v815_v48 = vpop.permute.xlu1 %814 }
 0x138   : > { %v828_v50 = vsel %vm824_vm5, %v799_v37, %v815_v48  ;;  %v836_v51 = vsel %vm824_vm5, %v815_v48, %v799_v37  ;;  %v813_v12 = vpop.permute.xlu0 %812 }
 0x139   : > { %v860_v54 = vmul.f32 %v7196_v52, %v828_v50  ;;  %v861_v8 = vmul.f32 %v7199_v53, %v836_v51  ;;  %v827_v14 = vsel %vm824_vm5, %v797_v40, %v813_v12  ;;  %v835_v15 = vsel %vm824_vm5, %v813_v12, %v797_v40 }
 0x13a   : > { %v858_v9 = vmul.f32 %v7196_v52, %v827_v14  ;;  %v859_v0 = vmul.f32 %v7199_v53, %v835_v15  ;;  %1154 = vmatmul.mubr.bf16.gmra.mxu0 %v6340_v47  ;;  %v6020_v47 = vld [vmem:[%s13032_s4 + $0x10] sm:$0x3] }
 0x13b   : > { %v795_v2 = vpop.permute.xlu1 %794  ;;  %1163 = vmatprep.mubr.bf16.mxu0 %v6341_v49  ;;  %v7331_v12 = vrot.slane %v6020_v47, %v6723_v21  ;;  %v7334_v13 = vrot.slane %v6020_v47, %v6713_v19 }
 0x13c   : > { %v793_v56 = vpop.permute.xlu0 %792  ;;  %v873_v57 = vpack.c.bf16 %v861_v8, %v859_v0  ;;  %v872_v3 = vpack.c.bf16 %v860_v54, %v858_v9 }
 0x13d   : > { %13345 = vst [vmem:[#allocation12_spill] sm:$0xff] %v7331_v12  ;;  %13346 = vst [vmem:[#allocation13_spill] sm:$0xff] %v7334_v13 }
 0x13e   : > { %1194 = vmatprep.subr.bf16.mxu1 %v873_v57 }
 0x13f   : > { %1195 = vmatpush2.bf16.msra.mxu1 %v872_v3  ;;  %v811_v6 = vpop.permute.xlu1 %810 }
 0x140   : > { %v826_v7 = vsel %vm824_vm5, %v795_v2, %v811_v6  ;;  %v834_v59 = vsel %vm824_vm5, %v811_v6, %v795_v2  ;;  %v809_v60 = vpop.permute.xlu0 %808 }
 0x141   : > { %v856_v61 = vmul.f32 %v7196_v52, %v826_v7  ;;  %v857_v20 = vmul.f32 %v7199_v53, %v834_v59  ;;  %v825_v22 = vsel %vm824_vm5, %v793_v56, %v809_v60  ;;  %v833_v23 = vsel %vm824_vm5, %v809_v60, %v793_v56 }
 0x142   : > { %v854_v4 = vmul.f32 %v7196_v52, %v825_v22  ;;  %v855_v5 = vmul.f32 %v7199_v53, %v833_v23  ;;  %1164 = vmatmul.mubr.bf16.gmra.mxu0 %v6343_v58 }
 0x143   : > { %v721_v27 = vpop.permute.xlu1 %720  ;;  %1279 = vmatprep.mubr.bf16.mxu0 %v13036_v36 }
 0x144   : > { %v719_v28 = vpop.permute.xlu0 %718  ;;  %v871_v31 = vpack.c.bf16 %v857_v20, %v855_v5  ;;  %v870_v32 = vpack.c.bf16 %v856_v61, %v854_v4 }
 0x146   : > { %1196 = vmatprep.subr.bf16.mxu1 %v871_v31 }
 0x147   : > { %1197 = vmatpush2.bf16.msra.mxu1 %v870_v32  ;;  %v737_v33 = vpop.permute.xlu1 %736 }
 0x148   : > { %v746_v34 = vsel %vm738_vm6, %v721_v27, %v737_v33  ;;  %v754_v1 = vsel %vm738_vm6, %v737_v33, %v721_v27  ;;  %v735_v35 = vpop.permute.xlu0 %734 }
 0x149   : > { %v782_v37 = vmul.f32 %v7309_v10, %v746_v34  ;;  %v783_v40 = vmul.f32 %v7312_v11, %v754_v1  ;;  %v745_v41 = vsel %vm738_vm6, %v719_v28, %v735_v35  ;;  %v753_v44 = vsel %vm738_vm6, %v735_v35, %v719_v28 }
 0x14a   : > { %v780_v45 = vmul.f32 %v7309_v10, %v745_v41  ;;  %v781_v46 = vmul.f32 %v7312_v11, %v753_v44 }
 0x14b   : > { %v893_v48 = vpop.permute.xlu1 %892 }
 0x14c   : > { %v891_v49 = vpop.permute.xlu0 %890  ;;  %v791_v50 = vpack.c.bf16 %v783_v40, %v781_v46  ;;  %v790_v51 = vpack.c.bf16 %v782_v37, %v780_v45 }
 0x14e   : > { %1198 = vmatprep.subr.bf16.mxu1 %v791_v50 }
 0x14f   : > { %1199 = vmatpush2.bf16.msra.mxu1 %v790_v51  ;;  %v909_v54 = vpop.permute.xlu1 %908 }
 0x150   : > { %v918_v8 = vsel %vm910_vm7, %v893_v48, %v909_v54  ;;  %v926_v14 = vsel %vm910_vm7, %v909_v54, %v893_v48  ;;  %v907_v15 = vpop.permute.xlu0 %906 }
 0x151   : > { %v954_v55 = vmul.f32 %v7331_v12, %v918_v8  ;;  %v955_v9 = vmul.f32 %v7334_v13, %v926_v14  ;;  %v917_v21 = vsel %vm910_vm7, %v891_v49, %v907_v15  ;;  %v925_v19 = vsel %vm910_vm7, %v907_v15, %v891_v49 }
 0x152   : > { %v952_v0 = vmul.f32 %v7331_v12, %v917_v21  ;;  %v953_v2 = vmul.f32 %v7334_v13, %v925_v19 }
 0x153   : > { %v717_v56 = vpop.permute.xlu1 %716 }
 0x154   : > { %v962_v57 = vpack.c.bf16 %v954_v55, %v952_v0  ;;  %v715_v3 = vpop.permute.xlu0 %714  ;;  %v963_v58 = vpack.c.bf16 %v955_v9, %v953_v2 }
 0x156   : > { %1255 = vmatprep.subr.bf16.mxu0 %v963_v58 }
 0x157   : > { %1256 = vmatpush1.bf16.msra.mxu0 %v962_v57  ;;  %v733_v6 = vpop.permute.xlu1 %732 }
 0x158   : > { %v744_v7 = vsel %vm738_vm6, %v717_v56, %v733_v6  ;;  %v752_v59 = vsel %vm738_vm6, %v733_v6, %v717_v56  ;;  %v731_v60 = vpop.permute.xlu0 %730 }
 0x159   : > { %v778_v61 = vmul.f32 %v7309_v10, %v744_v7  ;;  %v779_v20 = vmul.f32 %v7312_v11, %v752_v59  ;;  %v743_v22 = vsel %vm738_vm6, %v715_v3, %v731_v60  ;;  %v751_v23 = vsel %vm738_vm6, %v731_v60, %v715_v3 }
 0x15a   : > { %v776_v4 = vmul.f32 %v7309_v10, %v743_v22  ;;  %v777_v5 = vmul.f32 %v7312_v11, %v751_v23 }
 0x15b   : > { %v889_v25 = vpop.permute.xlu1 %888 }
 0x15c   : > { %v887_v27 = vpop.permute.xlu0 %886  ;;  %v789_v28 = vpack.c.bf16 %v779_v20, %v777_v5  ;;  %v788_v31 = vpack.c.bf16 %v778_v61, %v776_v4 }
 0x15e   : > { %1200 = vmatprep.subr.bf16.mxu1 %v789_v28 }
 0x15f   : > { %1201 = vmatpush2.bf16.msra.mxu1 %v788_v31  ;;  %v905_v32 = vpop.permute.xlu1 %904 }
 0x160   : > { %v916_v33 = vsel %vm910_vm7, %v889_v25, %v905_v32  ;;  %v924_v34 = vsel %vm910_vm7, %v905_v32, %v889_v25  ;;  %v903_v1 = vpop.permute.xlu0 %902 }
 0x161   : > { %v950_v35 = vmul.f32 %v7331_v12, %v916_v33  ;;  %v951_v37 = vmul.f32 %v7334_v13, %v924_v34  ;;  %v915_v40 = vsel %vm910_vm7, %v887_v27, %v903_v1  ;;  %v923_v41 = vsel %vm910_vm7, %v903_v1, %v887_v27 }
 0x162   : > { %v948_v44 = vmul.f32 %v7331_v12, %v915_v40  ;;  %v949_v45 = vmul.f32 %v7334_v13, %v923_v41 }
 0x163   : > { %v713_v46 = vpop.permute.xlu1 %712 }
 0x164   : > { %v960_v47 = vpack.c.bf16 %v950_v35, %v948_v44  ;;  %v711_v48 = vpop.permute.xlu0 %710  ;;  %v961_v49 = vpack.c.bf16 %v951_v37, %v949_v45 }
 0x166   : > { %1257 = vmatprep.subr.bf16.mxu0 %v961_v49 }
 0x167   : > { %1258 = vmatpush1.bf16.msra.mxu0 %v960_v47  ;;  %v729_v50 = vpop.permute.xlu1 %728 }
 0x168   : > { %v742_v51 = vsel %vm738_vm6, %v713_v46, %v729_v50  ;;  %v750_v54 = vsel %vm738_vm6, %v729_v50, %v713_v46  ;;  %v727_v8 = vpop.permute.xlu0 %726  ;;  %v6347_v50 = vld [vmem:[%s13029_s1 + $0x34] ss:$20 sps:$4 sm:$0xff]  }
 0x169   : > { %v774_v14 = vmul.f32 %v7309_v10, %v742_v51  ;;  %v775_v15 = vmul.f32 %v7312_v11, %v750_v54  ;;  %v741_v55 = vsel %vm738_vm6, %v711_v48, %v727_v8  ;;  %v749_v9 = vsel %vm738_vm6, %v727_v8, %v711_v48  ;;  %v6344_v48 = vld [vmem:[%s13029_s1 + $0x8] ss:$20 sps:$4 sm:$0xff]  }
 0x16a   : > { %v772_v21 = vmul.f32 %v7309_v10, %v741_v55  ;;  %v773_v19 = vmul.f32 %v7312_v11, %v749_v9 }
 0x16b   : > { %v885_v0 = vpop.permute.xlu1 %884 }
 0x16c   : > { %v883_v2 = vpop.permute.xlu0 %882  ;;  %v787_v56 = vpack.c.bf16 %v775_v15, %v773_v19  ;;  %v786_v57 = vpack.c.bf16 %v774_v14, %v772_v21 }
 0x16e   : > { %1202 = vmatprep.subr.bf16.mxu1 %v787_v56  ;;  %v6349_v56 = vld [vmem:[%s13029_s1 + $0x30] ss:$20 sps:$4 sm:$0xff]  }
 0x16f   : > { %1203 = vmatpush2.bf16.msra.mxu1 %v786_v57  ;;  %v901_v3 = vpop.permute.xlu1 %900  ;;  %v6350_v57 = vld [vmem:[%s13029_s1 + $0x10] ss:$20 sps:$4 sm:$0xff]  }
 0x170   : > { %v914_v58 = vsel %vm910_vm7, %v885_v0, %v901_v3  ;;  %v922_v6 = vsel %vm910_vm7, %v901_v3, %v885_v0  ;;  %v899_v7 = vpop.permute.xlu0 %898  ;;  %v6351_v3 = vld [vmem:[%s13029_s1 + $0x5c] ss:$20 sps:$4 sm:$0xff]  }
 0x171   : > { %v946_v59 = vmul.f32 %v7331_v12, %v914_v58  ;;  %v947_v60 = vmul.f32 %v7334_v13, %v922_v6  ;;  %v913_v61 = vsel %vm910_vm7, %v883_v2, %v899_v7  ;;  %v921_v20 = vsel %vm910_vm7, %v899_v7, %v883_v2  ;;  %v6353_v58 = vld [vmem:[%s13029_s1 + $0x58] ss:$20 sps:$4 sm:$0xff]  }
 0x172   : > { %v944_v22 = vmul.f32 %v7331_v12, %v913_v61  ;;  %v945_v23 = vmul.f32 %v7334_v13, %v921_v20  ;;  %v6354_v6 = vld [vmem:[%s13029_s1 + $0x38] ss:$20 sps:$4 sm:$0xff]   ;;  %v6359_v61 = vld [vmem:[%s13029_s1 + $0x88] ss:$20 sps:$4 sm:$0xff]  }
 0x173   : > { %v709_v4 = vpop.permute.xlu1 %708  ;;  %v6355_v7 = vld [vmem:[%s13029_s1 + $0x84] ss:$20 sps:$4 sm:$0xff]  }
 0x174   : > { %v958_v5 = vpack.c.bf16 %v946_v59, %v944_v22  ;;  %v707_v25 = vpop.permute.xlu0 %706  ;;  %v959_v27 = vpack.c.bf16 %v947_v60, %v945_v23  ;;  %v6357_v59 = vld [vmem:[%s13029_s1 + $0x80] ss:$20 sps:$4 sm:$0xff]  }
 0x175   : > { %v6358_v60 = vld [vmem:[%s13029_s1 + $0x60] ss:$20 sps:$4 sm:$0xff]  }
 0x176   : > { %1259 = vmatprep.subr.bf16.mxu0 %v959_v27 }
 0x177   : > { %1260 = vmatpush1.bf16.msra.mxu0 %v958_v5  ;;  %v725_v28 = vpop.permute.xlu1 %724 }
 0x178   : > { %v740_v31 = vsel %vm738_vm6, %v709_v4, %v725_v28  ;;  %v748_v32 = vsel %vm738_vm6, %v725_v28, %v709_v4  ;;  %v723_v33 = vpop.permute.xlu0 %722 }
 0x179   : > { %v770_v34 = vmul.f32 %v7309_v10, %v740_v31  ;;  %v771_v1 = vmul.f32 %v7312_v11, %v748_v32  ;;  %v739_v35 = vsel %vm738_vm6, %v707_v25, %v723_v33  ;;  %v747_v37 = vsel %vm738_vm6, %v723_v33, %v707_v25 }
 0x17a   : > { %v768_v40 = vmul.f32 %v7309_v10, %v739_v35  ;;  %v769_v41 = vmul.f32 %v7312_v11, %v747_v37 }
 0x17b   : > { %v881_v44 = vpop.permute.xlu1 %880 }
 0x17c   : > { %v879_v45 = vpop.permute.xlu0 %878  ;;  %v785_v46 = vpack.c.bf16 %v771_v1, %v769_v41  ;;  %v784_v47 = vpack.c.bf16 %v770_v34, %v768_v40 }
 0x17e   : > { %1204 = vmatprep.subr.bf16.mxu1 %v785_v46 }
 0x17f   : > { %1205 = vmatpush2.bf16.msra.mxu1 %v784_v47  ;;  %v897_v49 = vpop.permute.xlu1 %896 }
 0x180   : > { %v912_v51 = vsel %vm910_vm7, %v881_v44, %v897_v49  ;;  %v920_v54 = vsel %vm910_vm7, %v897_v49, %v881_v44  ;;  %v895_v8 = vpop.permute.xlu0 %894 }
 0x181   : > { %v942_v14 = vmul.f32 %v7331_v12, %v912_v51  ;;  %v943_v15 = vmul.f32 %v7334_v13, %v920_v54  ;;  %v911_v55 = vsel %vm910_vm7, %v879_v45, %v895_v8  ;;  %v919_v9 = vsel %vm910_vm7, %v895_v8, %v879_v45 }
 0x182   : > { %v940_v21 = vmul.f32 %v7331_v12, %v911_v55  ;;  %v941_v19 = vmul.f32 %v7334_v13, %v919_v9  ;;  %1207 = vmatmul.mubr.bf16.vlgmr.msra.gmra.mxu1 %v6344_v48 }
 0x183   : > { %1216 = vmatprep.mubr.bf16.mxu1 %v6347_v50 }
 0x184   : > { %v956_v0 = vpack.c.bf16 %v942_v14, %v940_v21  ;;  %v957_v2 = vpack.c.bf16 %v943_v15, %v941_v19 }
 0x186   : > { %1261 = vmatprep.subr.bf16.mxu0 %v957_v2 }
 0x187   : > { %1262 = vmatpush1.bf16.msra.mxu0 %v956_v0 }
 0x18a   : > { %1217 = vmatmul.mubr.bf16.gmra.mxu1 %v6349_v56  ;;  %6041 = vmatmul.mubr.msk.bf16.vlgmr.msra.gmra.mxu0 %vm1088_vm8, %v6350_v57 }
 0x18b   : > { %1226 = vmatprep.mubr.bf16.mxu1 %v6351_v3  ;;  %1289 = vmatprep.mubr.bf16.mxu0 %v13036_v36 }
 0x18c   : > { %v7464_v27 = vpop.permute.xlu1 %1365 }
 0x18d   : > { %v7468_v31 = vpop.permute.xlu0 %1360 }
 0x190   : > { %v7472_v33 = vpop.permute.xlu1 %1424 }
 0x191   : > { %v7476_v1 = vpop.permute.xlu0 %1429 }
 0x192   : > { %1227 = vmatmul.mubr.bf16.gmra.mxu1 %v6353_v58  ;;  %6042 = vmatmul.mubr.msk.bf16.gmra.mxu0 %vm1088_vm8, %v6354_v6 }
 0x193   : > { %1236 = vmatprep.mubr.bf16.mxu1 %v6355_v7  ;;  %1299 = vmatprep.mubr.bf16.mxu0 %v13036_v36 }
 0x194   : > { %v7478_v35 = vpop.permute.xlu1 %1350 }
 0x195   : > { %v7482_v40 = vpop.permute.xlu0 %1355 }
 0x198   : > { %v7486_v44 = vpop.permute.xlu1 %1414 }
 0x199   : > { %v7490_v46 = vpop.permute.xlu0 %1419 }
 0x19a   : > { %1237 = vmatmul.mubr.bf16.gmra.mxu1 %v6357_v59  ;;  %6043 = vmatmul.mubr.msk.bf16.gmra.mxu0 %vm1088_vm8, %v6358_v60 }
 0x19b   : > { %1309 = vmatprep.mubr.bf16.mxu0 %v13036_v36 }
 0x19c   : > { %v7492_v47 = vpop.permute.xlu1 %1340 }
 0x19d   : > { %v7496_v49 = vpop.permute.xlu0 %1345 }
 0x1a0   : > { %v7500_v51 = vpop.permute.xlu1 %1404 }
 0x1a1   : > { %v7504_v14 = vpop.permute.xlu0 %1409 }
 0x1a2   : > { %6044 = vmatmul.mubr.msk.bf16.gmra.mxu0 %vm1088_vm8, %v6359_v61 }
 0x1a4   : > { %v1331_v55 = vpop.permute.xlu1 %1330 }
 0x1a5   : > { %v1336_v56 = vpop.permute.xlu0 %1335 }
 0x1a8   : > { %v1395_v6 = vpop.permute.xlu1 %1394 }
 0x1a9   : > { %v1400_v36 = vpop.permute.xlu0 %1399 }
 0x1ea   : > { %v1135_v20 = vpop.f32.mrf.mxu0 }
 0x1ec   : > { %v1137_v22 = vpop.f32.mrf.mxu0 }
 0x1ee   : > { %v1139_v23 = vpop.f32.mrf.mxu0 }
 0x1f0   : > { %v1141_v4 = vpop.f32.mrf.mxu0 }
 0x1f2   : > { %v7460_v5 = vpop.f32.mrf.mxu0 }
 0x1f4   : > { %v7462_v25 = vpop.f32.mrf.mxu0 }
 0x1f6   : > { %v7466_v28 = vpop.f32.mrf.mxu0 }
 0x1f8   : > { %v7470_v32 = vpop.f32.mrf.mxu0 }
 0x1fa   : > { %v7474_v34 = vpop.f32.mrf.mxu0 }
 0x1fc   : > { %v7480_v37 = vpop.f32.mrf.mxu0 }
 0x1fe   : > { %v7484_v41 = vpop.f32.mrf.mxu0 }
 0x200   : > { %v7488_v45 = vpop.f32.mrf.mxu0 }
 0x202   : > { %v7494_v48 = vpop.f32.mrf.mxu0 }
 0x204   : > { %v7498_v50 = vpop.f32.mrf.mxu0 }
 0x206   : > { %v7502_v8 = vpop.f32.mrf.mxu0 }
 0x208   : > { %v7506_v9 = vpop.f32.mrf.mxu0 }
 0x242   : > { %v1208_v54 = vpop.f32.mrf.mxu1 }
 0x243   : > { %v1209_v21 = vadd.f32 %v1208_v54, %v1135_v20 }
 0x244   : > { %v1210_v15 = vpop.f32.mrf.mxu1 }
 0x245   : > { %v1211_v54 = vadd.f32 %v1210_v15, %v1137_v22 }
 0x246   : > { %v1212_v19 = vpop.f32.mrf.mxu1 }
 0x247   : > { %v1213_v3 = vadd.f32 %v1212_v19, %v1139_v23 }
 0x248   : > { %v1214_v23 = vpop.f32.mrf.mxu1 }
 0x24a   : > { %v1281_v0 = vpop.f32.mrf.mxu0 }
 0x24b   : > { %v1282_v2 = vadd.f32 %v1281_v0, %v1209_v21  ;;  %v1215_v0 = vadd.f32 %v1214_v23, %v1141_v4  ;;  %v1218_v4 = vpop.f32.mrf.mxu1 }
 0x24c   : > { %v1283_v57 = vpop.f32.mrf.mxu0 }
 0x24d   : > { %v1368_v58 = vmul.f32 %v1331_v55, %v1282_v2  ;;  %v1284_v21 = vadd.f32 %v1283_v57, %v1211_v54 }
 0x24e   : > { %v1285_v7 = vpop.f32.mrf.mxu0 }
 0x24f   : > { %v1432_v59 = vadd.f32 %v1395_v6, %v1368_v58  ;;  %v1286_v60 = vadd.f32 %v1285_v7, %v1213_v3 }
 0x250   : > { %v1287_v19 = vpop.f32.mrf.mxu0 }
 0x251   : > { %v7508_v61 = vmax.f32 %v1432_v59, 0.0  ;;  %v1370_v16 = vmul.f32 %v1336_v56, %v1286_v60 }
 0x252   : > { %v1291_v3 = vpop.f32.mrf.mxu0 }
 0x253   : > { %13347 = vst [vmem:[#allocation14_spill] sm:$0xff] %v7508_v61  ;;  %v1434_v17 = vadd.f32 %v1400_v36, %v1370_v16  ;;  %1536 = vrot.lane.b32.xlu1 %v7508_v61, %s6485_s27  ;;  %v1288_v16 = vadd.f32 %v1287_v19, %v1215_v0 }
 0x254   : > { %v1293_v58 = vpop.f32.mrf.mxu0 }
 0x255   : > { %v7512_v20 = vmax.f32 %v1434_v17, 0.0  ;;  %v1369_v17 = vmul.f32 %v1331_v55, %v1284_v21  ;;  %v1371_v22 = vmul.f32 %v1336_v56, %v1288_v16  ;;  %v1220_v55 = vpop.f32.mrf.mxu1 }
 0x256   : > { %v1295_v59 = vpop.f32.mrf.mxu0  ;;  %v1221_v16 = vadd.f32 %v1220_v55, %v7462_v25 }
 0x257   : > { %13348 = vst [vmem:[#allocation15_spill] sm:$0xff] %v7512_v20  ;;  %1538 = vrot.lane.b32.xlu0 %v7512_v20, %s6485_s27  ;;  %1464 = vrot.lane.b32.xlu1 %v7508_v61, %s6486_s28  ;;  %v1433_v15 = vadd.f32 %v1395_v6, %v1369_v17  ;;  %v1435_v2 = vadd.f32 %v1400_v36, %v1371_v22  ;;  %v1222_v7 = vpop.f32.mrf.mxu1 }
 0x258   : > { %v1219_v6 = vadd.f32 %v1218_v4, %v7460_v5  ;;  %v1223_v60 = vadd.f32 %v1222_v7, %v7466_v28  ;;  %v1294_v22 = vadd.f32 %v1293_v58, %v1221_v16 }
 0x259   : > { %v7530_v57 = vmax.f32 %v1433_v15, 0.0  ;;  %v7536_v56 = vmax.f32 %v1435_v2, 0.0  ;;  %v1224_v17 = vpop.f32.mrf.mxu1  ;;  %v1297_v15 = vpop.f32.mrf.mxu0 }
 0x25a   : > { %v1292_v36 = vadd.f32 %v1291_v3, %v1219_v6  ;;  %v1296_v54 = vadd.f32 %v1295_v59, %v1223_v60  ;;  %v1225_v4 = vadd.f32 %v1224_v17, %v7470_v32  ;;  %v1373_v3 = vmul.f32 %v7492_v47, %v1294_v22 }
 0x25b   : > { %1466 = vrot.lane.b32.xlu0 %v7512_v20, %s6486_s28  ;;  %1760 = vrot.lane.b32.xlu1 %v7508_v61, %s6487_s29  ;;  %13349 = vst [vmem:[#allocation16_spill] sm:$0xff] %v7530_v57  ;;  %13350 = vst [vmem:[#allocation17_spill] sm:$0xff] %v7536_v56  ;;  %v1228_v32 = vpop.f32.mrf.mxu1  ;;  %v1301_v6 = vpop.f32.mrf.mxu0 }
 0x25c   : > { %v1372_v23 = vmul.f32 %v7492_v47, %v1292_v36  ;;  %v1374_v5 = vmul.f32 %v7496_v49, %v1296_v54  ;;  %v1298_v2 = vadd.f32 %v1297_v15, %v1225_v4  ;;  %v1437_v55 = vadd.f32 %v7500_v51, %v1373_v3 }
 0x25d   : > { %v1230_v7 = vpop.f32.mrf.mxu1  ;;  %v1229_v36 = vadd.f32 %v1228_v32, %v7474_v34 }
 0x25e   : > { %v1436_v21 = vadd.f32 %v7500_v51, %v1372_v23  ;;  %v1438_v28 = vadd.f32 %v7504_v14, %v1374_v5  ;;  %v1375_v25 = vmul.f32 %v7496_v49, %v1298_v2  ;;  %v7590_v47 = vmax.f32 %v1437_v55, 0.0  ;;  %v1303_v51 = vpop.f32.mrf.mxu0 }
 0x25f   : > { %1762 = vrot.lane.b32.xlu0 %v7512_v20, %s6487_s29  ;;  %1680 = vrot.lane.b32.xlu1 %v7508_v61, %s6488_s30  ;;  %v1232_v59 = vpop.f32.mrf.mxu1  ;;  %v1231_v17 = vadd.f32 %v1230_v7, %v7480_v37 }
 0x260   : > { %v7560_v19 = vmax.f32 %v1436_v21, 0.0  ;;  %v7566_v0 = vmax.f32 %v1438_v28, 0.0  ;;  %v1439_v58 = vadd.f32 %v7504_v14, %v1375_v25  ;;  %13353 = vst [vmem:[#allocation20_spill] sm:$0xff] %v7590_v47  ;;  %v1302_v14 = vadd.f32 %v1301_v6, %v1229_v36  ;;  %v1305_v60 = vpop.f32.mrf.mxu0 }
 0x261   : > { %v1233_v54 = vadd.f32 %v1232_v59, %v7484_v41  ;;  %v1234_v22 = vpop.f32.mrf.mxu1  ;;  %v1304_v15 = vadd.f32 %v1303_v51, %v1231_v17 }
 0x262   : > { %13351 = vst [vmem:[#allocation18_spill] sm:$0xff] %v7560_v19  ;;  %13352 = vst [vmem:[#allocation19_spill] sm:$0xff] %v7566_v0  ;;  %v7596_v49 = vmax.f32 %v1439_v58, 0.0  ;;  %v1376_v5 = vmul.f32 %v7478_v35, %v1302_v14  ;;  %v1307_v4 = vpop.f32.mrf.mxu0  ;;  %v1235_v2 = vadd.f32 %v1234_v22, %v7488_v45 }
 0x263   : > { %1682 = vrot.lane.b32.xlu0 %v7512_v20, %s6488_s30  ;;  %1608 = vrot.lane.b32.xlu1 %v7508_v61, %s6489_s9  ;;  %v1306_v23 = vadd.f32 %v1305_v60, %v1233_v54  ;;  %v1377_v25 = vmul.f32 %v7478_v35, %v1304_v15  ;;  %v1238_v45 = vpop.f32.mrf.mxu1 }
 0x264   : > { %13354 = vst [vmem:[#allocation21_spill] sm:$0xff] %v7596_v49  ;;  %v1440_v21 = vadd.f32 %v7486_v44, %v1376_v5  ;;  %v1308_v3 = vadd.f32 %v1307_v4, %v1235_v2  ;;  %v1311_v58 = vpop.f32.mrf.mxu0  ;;  %v1239_v7 = vadd.f32 %v1238_v45, %v7494_v48 }
 0x265   : > { %v1378_v34 = vmul.f32 %v7482_v40, %v1306_v23  ;;  %v1441_v55 = vadd.f32 %v7486_v44, %v1377_v25  ;;  %v1240_v6 = vpop.f32.mrf.mxu1 }
 0x266   : > { %v7620_v28 = vmax.f32 %v1440_v21, 0.0  ;;  %v1379_v37 = vmul.f32 %v7482_v40, %v1308_v3  ;;  %v1313_v44 = vpop.f32.mrf.mxu0  ;;  %v1241_v2 = vadd.f32 %v1240_v6, %v7498_v50 }
 0x267   : > { %1610 = vrot.lane.b32.xlu0 %v7512_v20, %s6489_s9  ;;  %1552 = vrot.lane.b32.xlu1 %v7530_v57, %s6485_s27  ;;  %v1442_v41 = vadd.f32 %v7490_v46, %v1378_v34  ;;  %v7650_v35 = vmax.f32 %v1441_v55, 0.0  ;;  %v1242_v51 = vpop.f32.mrf.mxu1 }
 0x268   : > { %13355 = vst [vmem:[#allocation22_spill] sm:$0xff] %v7620_v28  ;;  %v1443_v32 = vadd.f32 %v7490_v46, %v1379_v37  ;;  %v1312_v46 = vadd.f32 %v1311_v58, %v1239_v7  ;;  %v1315_v36 = vpop.f32.mrf.mxu0  ;;  %v1243_v59 = vadd.f32 %v1242_v51, %v7502_v8  ;;  %v1314_v37 = vadd.f32 %v1313_v44, %v1241_v2 }
 0x269   : > { %v7626_v16 = vmax.f32 %v1442_v41, 0.0  ;;  %13357 = vst [vmem:[#allocation24_spill] sm:$0xff] %v7650_v35  ;;  %v1244_v3 = vpop.f32.mrf.mxu1 }
 0x26a   : > { %v7656_v40 = vmax.f32 %v1443_v32, 0.0  ;;  %v1316_v14 = vadd.f32 %v1315_v36, %v1243_v59  ;;  %v1380_v60 = vmul.f32 %v7468_v31, %v1312_v46  ;;  %v1317_v55 = vpop.f32.mrf.mxu0  ;;  %v1245_v32 = vadd.f32 %v1244_v3, %v7506_v9 }
 0x26b   : > { %1554 = vrot.lane.b32.xlu0 %v7536_v56, %s6485_s27  ;;  %1480 = vrot.lane.b32.xlu1 %v7530_v57, %s6486_s28  ;;  %13356 = vst [vmem:[#allocation23_spill] sm:$0xff] %v7626_v16  ;;  %v1381_v6 = vmul.f32 %v7468_v31, %v1314_v37 }
 0x26c   : > { %13358 = vst [vmem:[#allocation25_spill] sm:$0xff] %v7656_v40  ;;  %v1382_v48 = vmul.f32 %v7464_v27, %v1316_v14  ;;  %v1444_v8 = vadd.f32 %v7472_v33, %v1380_v60  ;;  %v1318_v58 = vadd.f32 %v1317_v55, %v1245_v32 }
 0x26d   : > { %v1445_v51 = vadd.f32 %v7472_v33, %v1381_v6 }
 0x26e   : > { %v1446_v23 = vadd.f32 %v7476_v1, %v1382_v48  ;;  %v7684_v34 = vmax.f32 %v1444_v8, 0.0  ;;  %v1383_v9 = vmul.f32 %v7464_v27, %v1318_v58 }
 0x26f   : > { %1482 = vrot.lane.b32.xlu0 %v7536_v56, %s6486_s28  ;;  %1776 = vrot.lane.b32.xlu1 %v7530_v57, %s6487_s29  ;;  %v7742_v59 = vmax.f32 %v1445_v51, 0.0 }
 0x270   : > { %13359 = vst [vmem:[#allocation26_spill] sm:$0xff] %v7684_v34  ;;  %v7692_v41 = vmax.f32 %v1446_v23, 0.0  ;;  %v1447_v31 = vadd.f32 %v7476_v1, %v1383_v9 }
 0x271   : > { %13363 = vst [vmem:[#allocation30_spill] sm:$0xff] %v7742_v59 }
 0x272   : > { %13360 = vst [vmem:[#allocation27_spill] sm:$0xff] %v7692_v41  ;;  %v7750_v27 = vmax.f32 %v1447_v31, 0.0 }
 0x273   : > { %1778 = vrot.lane.b32.xlu0 %v7536_v56, %s6487_s29  ;;  %1696 = vrot.lane.b32.xlu1 %v7530_v57, %s6488_s30 }
 0x274   : > { %13364 = vst [vmem:[#allocation31_spill] sm:$0xff] %v7750_v27 }
 0x277   : > { %1698 = vrot.lane.b32.xlu0 %v7536_v56, %s6488_s30  ;;  %1624 = vrot.lane.b32.xlu1 %v7530_v57, %s6489_s9 }
 0x27b   : > { %1626 = vrot.lane.b32.xlu0 %v7536_v56, %s6489_s9  ;;  %1540 = vrot.lane.b32.xlu1 %v7560_v19, %s6485_s27 }
 0x27f   : > { %1542 = vrot.lane.b32.xlu0 %v7566_v0, %s6485_s27  ;;  %1468 = vrot.lane.b32.xlu1 %v7560_v19, %s6486_s28 }
 0x283   : > { %1470 = vrot.lane.b32.xlu0 %v7566_v0, %s6486_s28  ;;  %1764 = vrot.lane.b32.xlu1 %v7560_v19, %s6487_s29 }
 0x287   : > { %1766 = vrot.lane.b32.xlu0 %v7566_v0, %s6487_s29  ;;  %1684 = vrot.lane.b32.xlu1 %v7560_v19, %s6488_s30 }
 0x28b   : > { %1686 = vrot.lane.b32.xlu0 %v7566_v0, %s6488_s30  ;;  %1612 = vrot.lane.b32.xlu1 %v7560_v19, %s6489_s9 }
 0x28f   : > { %1614 = vrot.lane.b32.xlu0 %v7566_v0, %s6489_s9  ;;  %1556 = vrot.lane.b32.xlu1 %v7590_v47, %s6485_s27 }
 0x293   : > { %1558 = vrot.lane.b32.xlu0 %v7596_v49, %s6485_s27  ;;  %1484 = vrot.lane.b32.xlu1 %v7590_v47, %s6486_s28 }
 0x297   : > { %1486 = vrot.lane.b32.xlu0 %v7596_v49, %s6486_s28  ;;  %1780 = vrot.lane.b32.xlu1 %v7590_v47, %s6487_s29 }
 0x29b   : > { %1782 = vrot.lane.b32.xlu0 %v7596_v49, %s6487_s29  ;;  %1700 = vrot.lane.b32.xlu1 %v7590_v47, %s6488_s30 }
 0x29f   : > { %1702 = vrot.lane.b32.xlu0 %v7596_v49, %s6488_s30  ;;  %1628 = vrot.lane.b32.xlu1 %v7590_v47, %s6489_s9 }
 0x2a3   : > { %1630 = vrot.lane.b32.xlu0 %v7596_v49, %s6489_s9  ;;  %1544 = vrot.lane.b32.xlu1 %v7620_v28, %s6485_s27 }
 0x2a7   : > { %1546 = vrot.lane.b32.xlu0 %v7626_v16, %s6485_s27  ;;  %1472 = vrot.lane.b32.xlu1 %v7620_v28, %s6486_s28 }
 0x2ab   : > { %1474 = vrot.lane.b32.xlu0 %v7626_v16, %s6486_s28  ;;  %1768 = vrot.lane.b32.xlu1 %v7620_v28, %s6487_s29 }
 0x2af   : > { %1770 = vrot.lane.b32.xlu0 %v7626_v16, %s6487_s29  ;;  %1688 = vrot.lane.b32.xlu1 %v7620_v28, %s6488_s30 }
 0x2b3   : > { %1690 = vrot.lane.b32.xlu0 %v7626_v16, %s6488_s30  ;;  %1616 = vrot.lane.b32.xlu1 %v7620_v28, %s6489_s9 }
 0x2b7   : > { %1618 = vrot.lane.b32.xlu0 %v7626_v16, %s6489_s9  ;;  %1560 = vrot.lane.b32.xlu1 %v7650_v35, %s6485_s27 }
 0x2bb   : > { %1562 = vrot.lane.b32.xlu0 %v7656_v40, %s6485_s27  ;;  %1488 = vrot.lane.b32.xlu1 %v7650_v35, %s6486_s28 }
 0x2bf   : > { %1490 = vrot.lane.b32.xlu0 %v7656_v40, %s6486_s28  ;;  %1784 = vrot.lane.b32.xlu1 %v7650_v35, %s6487_s29 }
 0x2c3   : > { %1786 = vrot.lane.b32.xlu0 %v7656_v40, %s6487_s29  ;;  %1704 = vrot.lane.b32.xlu1 %v7650_v35, %s6488_s30 }
 0x2c5   : > { %v7674_v54 = vpop.permute.xlu1 %1536 }
 0x2c7   : > { %1706 = vrot.lane.b32.xlu0 %v7656_v40, %s6488_s30  ;;  %1632 = vrot.lane.b32.xlu1 %v7650_v35, %s6489_s9 }
 0x2c9   : > { %v7682_v5 = vpop.permute.xlu0 %1538  ;;  %v7686_v21 = vpop.permute.xlu1 %1464 }
 0x2cb   : > { %1634 = vrot.lane.b32.xlu0 %v7656_v40, %s6489_s9  ;;  %1548 = vrot.lane.b32.xlu1 %v7684_v34, %s6485_s27 }
 0x2cd   : > { %v7694_v17 = vpop.permute.xlu0 %1466  ;;  %v7696_v22 = vpop.permute.xlu1 %1760 }
 0x2cf   : > { %1550 = vrot.lane.b32.xlu0 %v7692_v41, %s6485_s27  ;;  %1476 = vrot.lane.b32.xlu1 %v7684_v34, %s6486_s28 }
 0x2d1   : > { %v7702_v15 = vpop.permute.xlu0 %1762  ;;  %v7704_v4 = vpop.permute.xlu1 %1680 }
 0x2d3   : > { %1478 = vrot.lane.b32.xlu0 %v7692_v41, %s6486_s28  ;;  %1772 = vrot.lane.b32.xlu1 %v7684_v34, %s6487_s29 }
 0x2d5   : > { %v7711_v25 = vpop.permute.xlu0 %1682  ;;  %v7713_v45 = vpop.permute.xlu1 %1608 }
 0x2d6   : > { %13361 = vst [vmem:[#allocation28_spill] sm:$0xff] %v7713_v45 }
 0x2d7   : > { %1774 = vrot.lane.b32.xlu0 %v7692_v41, %s6487_s29  ;;  %1692 = vrot.lane.b32.xlu1 %v7684_v34, %s6488_s30 }
 0x2d9   : > { %v7720_v50 = vpop.permute.xlu0 %1610  ;;  %v7723_v7 = vpop.permute.xlu1 %1552 }
 0x2da   : > { %13362 = vst [vmem:[#allocation29_spill] sm:$0xff] %v7720_v50 }
 0x2db   : > { %1694 = vrot.lane.b32.xlu0 %v7692_v41, %s6488_s30  ;;  %1620 = vrot.lane.b32.xlu1 %v7684_v34, %s6489_s9 }
 0x2dd   : > { %v7730_v44 = vpop.permute.xlu0 %1554  ;;  %v7733_v46 = vpop.permute.xlu1 %1480 }
 0x2df   : > { %1622 = vrot.lane.b32.xlu0 %v7692_v41, %s6489_s9  ;;  %1916 = vrot.lane.b32.xlu1 %v7684_v34, %s6490_s12 }
 0x2e1   : > { %v7740_v36 = vpop.permute.xlu0 %1482  ;;  %v7744_v14 = vpop.permute.xlu1 %1776 }
 0x2e3   : > { %1918 = vrot.lane.b32.xlu0 %v7692_v41, %s6490_s12  ;;  %1564 = vrot.lane.b32.xlu1 %v7742_v59, %s6485_s27 }
 0x2e5   : > { %v7752_v33 = vpop.permute.xlu0 %1778  ;;  %v7754_v60 = vpop.permute.xlu1 %1696 }
 0x2e7   : > { %1566 = vrot.lane.b32.xlu0 %v7750_v27, %s6485_s27  ;;  %1492 = vrot.lane.b32.xlu1 %v7742_v59, %s6486_s28 }
 0x2e9   : > { %v7760_v1 = vpop.permute.xlu0 %1698  ;;  %v7762_v48 = vpop.permute.xlu1 %1624 }
 0x2ea   : > { %13365 = vst [vmem:[#allocation32_spill] sm:$0xff] %v7760_v1  ;;  %13366 = vst [vmem:[#allocation33_spill] sm:$0xff] %v7762_v48 }
 0x2eb   : > { %1494 = vrot.lane.b32.xlu0 %v7750_v27, %s6486_s28  ;;  %1788 = vrot.lane.b32.xlu1 %v7742_v59, %s6487_s29 }
 0x2ed   : > { %v7768_v8 = vpop.permute.xlu0 %1626  ;;  %v7770_v23 = vpop.permute.xlu1 %1540 }
 0x2ee   : > { %13367 = vst [vmem:[#allocation34_spill] sm:$0xff] %v7768_v8 }
 0x2ef   : > { %1790 = vrot.lane.b32.xlu0 %v7750_v27, %s6487_s29  ;;  %1708 = vrot.lane.b32.xlu1 %v7742_v59, %s6488_s30 }
 0x2f1   : > { %v7776_v2 = vpop.permute.xlu0 %1542  ;;  %v7778_v3 = vpop.permute.xlu1 %1468 }
 0x2f2   : > { %13368 = vst [vmem:[#allocation35_spill] sm:$0xff] %v7778_v3 }
 0x2f3   : > { %1710 = vrot.lane.b32.xlu0 %v7750_v27, %s6488_s30  ;;  %1636 = vrot.lane.b32.xlu1 %v7742_v59, %s6489_s9 }
 0x2f5   : > { %v7784_v37 = vpop.permute.xlu0 %1470  ;;  %v7786_v55 = vpop.permute.xlu1 %1764 }
 0x2f6   : > { %13369 = vst [vmem:[#allocation36_spill] sm:$0xff] %v7784_v37  ;;  %13370 = vst [vmem:[#allocation37_spill] sm:$0xff] %v7786_v55  ;;  %v6100_v55 = vld [vmem:[%s13030_s2 + $0x78] sm:$0xff] }
 0x2f7   : > { %1638 = vrot.lane.b32.xlu0 %v7750_v27, %s6489_s9  ;;  %1932 = vrot.lane.b32.xlu1 %v7742_v59, %s6490_s12 }
 0x2f9   : > { %v7792_v32 = vpop.permute.xlu0 %1766  ;;  %v7794_v58 = vpop.permute.xlu1 %1684 }
 0x2fa   : > { %13371 = vst [vmem:[#allocation38_spill] sm:$0xff] %v7794_v58  ;;  %v6362_v58 = vld [vmem:[%s13029_s1 + $0xa4] ss:$20 sps:$4 sm:$0xff]  }
 0x2fb   : > { %1934 = vrot.lane.b32.xlu0 %v7750_v27, %s6490_s12  ;;  %1912 = vrot.lane.b32.xlu1 %v7620_v28, %s6490_s12 }
 0x2fc   : > { %2217 = vmatprep.mubr.bf16.mxu1 %v6362_v58 }
 0x2fd   : > { %v7800_v6 = vpop.permute.xlu0 %1686  ;;  %v7802_v9 = vpop.permute.xlu1 %1612 }
 0x2fe   : > { %13372 = vst [vmem:[#allocation39_spill] sm:$0xff] %v7800_v6  ;;  %13373 = vst [vmem:[#allocation40_spill] sm:$0xff] %v7802_v9 }
 0x2ff   : > { %1914 = vrot.lane.b32.xlu0 %v7626_v16, %s6490_s12  ;;  %1928 = vrot.lane.b32.xlu1 %v7650_v35, %s6490_s12 }
 0x301   : > { %v7808_v51 = vpop.permute.xlu0 %1614  ;;  %v7810_v31 = vpop.permute.xlu1 %1556 }
 0x302   : > { %13374 = vst [vmem:[#allocation41_spill] sm:$0xff] %v7808_v51 }
 0x303   : > { %1930 = vrot.lane.b32.xlu0 %v7656_v40, %s6490_s12  ;;  %1908 = vrot.lane.b32.xlu1 %v7560_v19, %s6490_s12 }
 0x305   : > { %v7816_v12 = vpop.permute.xlu0 %1558  ;;  %v7818_v13 = vpop.permute.xlu1 %1484 }
 0x306   : > { %13375 = vst [vmem:[#allocation42_spill] sm:$0xff] %v7818_v13 }
 0x307   : > { %1910 = vrot.lane.b32.xlu0 %v7566_v0, %s6490_s12  ;;  %1924 = vrot.lane.b32.xlu1 %v7590_v47, %s6490_s12 }
 0x309   : > { %v7824_v10 = vpop.permute.xlu0 %1486  ;;  %v7826_v11 = vpop.permute.xlu1 %1780 }
 0x30a   : > { %13376 = vst [vmem:[#allocation43_spill] sm:$0xff] %v7824_v10  ;;  %13377 = vst [vmem:[#allocation44_spill] sm:$0xff] %v7826_v11  ;;  %v6099_v11 = vld [vmem:[%s13030_s2 + $0x70] sm:$0xff] }
 0x30b   : > { %1926 = vrot.lane.b32.xlu0 %v7596_v49, %s6490_s12  ;;  %1904 = vrot.lane.b32.xlu1 %v7508_v61, %s6490_s12 }
 0x30d   : > { %v7832_v29 = vpop.permute.xlu0 %1782  ;;  %v7834_v52 = vpop.permute.xlu1 %1700 }
 0x30e   : > { %13378 = vst [vmem:[#allocation45_spill] sm:$0xff] %v7834_v52 }
 0x30f   : > { %1906 = vrot.lane.b32.xlu0 %v7512_v20, %s6490_s12  ;;  %1920 = vrot.lane.b32.xlu1 %v7530_v57, %s6490_s12 }
 0x311   : > { %v7840_v53 = vpop.permute.xlu0 %1702  ;;  %v7842_v30 = vpop.permute.xlu1 %1628 }
 0x312   : > { %13379 = vst [vmem:[#allocation46_spill] sm:$0xff] %v7840_v53  ;;  %13380 = vst [vmem:[#allocation47_spill] sm:$0xff] %v7842_v30 }
 0x313   : > { %1922 = vrot.lane.b32.xlu0 %v7536_v56, %s6490_s12  ;;  %1844 = vrot.lane.b32.xlu1 %v7684_v34, %s6491_s17 }
 0x315   : > { %v7848_v51 = vpop.permute.xlu0 %1630  ;;  %v7850_v9 = vpop.permute.xlu1 %1544 }
 0x316   : > { %13381 = vst [vmem:[#allocation48_spill] sm:$0xff] %v7848_v51 }
 0x317   : > { %1846 = vrot.lane.b32.xlu0 %v7692_v41, %s6491_s17  ;;  %1860 = vrot.lane.b32.xlu1 %v7742_v59, %s6491_s17 }
 0x319   : > { %v7856_v50 = vpop.permute.xlu0 %1546  ;;  %v7858_v8 = vpop.permute.xlu1 %1472 }
 0x31a   : > { %13382 = vst [vmem:[#allocation49_spill] sm:$0xff] %v7858_v8 }
 0x31b   : > { %1862 = vrot.lane.b32.xlu0 %v7750_v27, %s6491_s17  ;;  %1988 = vrot.lane.b32.xlu1 %v7684_v34, %s6492_s20 }
 0x31d   : > { %v7864_v30 = vpop.permute.xlu0 %1474  ;;  %v7866_v51 = vpop.permute.xlu1 %1768 }
 0x31e   : > { %13383 = vst [vmem:[#allocation50_spill] sm:$0xff] %v7864_v30 }
 0x31f   : > { %1990 = vrot.lane.b32.xlu0 %v7692_v41, %s6492_s20  ;;  %2004 = vrot.lane.b32.xlu1 %v7742_v59, %s6492_s20 }
 0x321   : > { %v7875_v52 = vpop.permute.xlu0 %1770  ;;  %v7877_v53 = vpop.permute.xlu1 %1688 }
 0x322   : > { %13384 = vst [vmem:[#allocation51_spill] sm:$0xff] %v7877_v53 }
 0x323   : > { %2006 = vrot.lane.b32.xlu0 %v7750_v27, %s6492_s20  ;;  %1840 = vrot.lane.b32.xlu1 %v7620_v28, %s6491_s17 }
 0x325   : > { %v7883_v6 = vpop.permute.xlu0 %1690  ;;  %v7885_v45 = vpop.permute.xlu1 %1616 }
 0x326   : > { %13385 = vst [vmem:[#allocation52_spill] sm:$0xff] %v7883_v6  ;;  %13386 = vst [vmem:[#allocation53_spill] sm:$0xff] %v7885_v45 }
 0x327   : > { %1842 = vrot.lane.b32.xlu0 %v7626_v16, %s6491_s17  ;;  %1856 = vrot.lane.b32.xlu1 %v7650_v35, %s6491_s17 }
 0x329   : > { %v7891_v58 = vpop.permute.xlu0 %1618  ;;  %v7893_v48 = vpop.permute.xlu1 %1560 }
 0x32a   : > { %13387 = vst [vmem:[#allocation54_spill] sm:$0xff] %v7891_v58 }
 0x32b   : > { %1858 = vrot.lane.b32.xlu0 %v7656_v40, %s6491_s17  ;;  %1984 = vrot.lane.b32.xlu1 %v7620_v28, %s6492_s20 }
 0x32d   : > { %v7899_v53 = vpop.permute.xlu0 %1562  ;;  %v7901_v6 = vpop.permute.xlu1 %1488 }
 0x32e   : > { %13388 = vst [vmem:[#allocation55_spill] sm:$0xff] %v7901_v6 }
 0x32f   : > { %1986 = vrot.lane.b32.xlu0 %v7626_v16, %s6492_s20  ;;  %2000 = vrot.lane.b32.xlu1 %v7650_v35, %s6492_s20 }
 0x331   : > { %v7907_v45 = vpop.permute.xlu0 %1490  ;;  %v7909_v58 = vpop.permute.xlu1 %1784 }
 0x332   : > { %13389 = vst [vmem:[#allocation56_spill] sm:$0xff] %v7907_v45 }
 0x333   : > { %2002 = vrot.lane.b32.xlu0 %v7656_v40, %s6492_s20  ;;  %1836 = vrot.lane.b32.xlu1 %v7560_v19, %s6491_s17 }
 0x335   : > { %v7915_v39 = vpop.permute.xlu0 %1786  ;;  %v7917_v38 = vpop.permute.xlu1 %1704 }
 0x336   : > { %13390 = vst [vmem:[#allocation57_spill] sm:$0xff] %v7917_v38 }
 0x337   : > { %1838 = vrot.lane.b32.xlu0 %v7566_v0, %s6491_s17  ;;  %1852 = vrot.lane.b32.xlu1 %v7590_v47, %s6491_s17 }
 0x339   : > { %v7923_v3 = vpop.permute.xlu0 %1706  ;;  %v7925_v13 = vpop.permute.xlu1 %1632 }
 0x33a   : > { %13391 = vst [vmem:[#allocation58_spill] sm:$0xff] %v7923_v3  ;;  %13392 = vst [vmem:[#allocation59_spill] sm:$0xff] %v7925_v13 }
 0x33b   : > { %1854 = vrot.lane.b32.xlu0 %v7596_v49, %s6491_s17  ;;  %1980 = vrot.lane.b32.xlu1 %v7560_v19, %s6492_s20 }
 0x33d   : > { %v7931_v37 = vpop.permute.xlu0 %1634  ;;  %v7933_v10 = vpop.permute.xlu1 %1548 }
 0x33e   : > { %13393 = vst [vmem:[#allocation60_spill] sm:$0xff] %v7931_v37  ;;  %v6374_v37 = vld [vmem:[%s13029_s1 + $0xac] ss:$20 sps:$4 sm:$0xff]  }
 0x33f   : > { %1982 = vrot.lane.b32.xlu0 %v7566_v0, %s6492_s20  ;;  %1996 = vrot.lane.b32.xlu1 %v7590_v47, %s6492_s20 }
 0x340   : > { %2290 = vmatprep.mubr.bf16.mxu0 %v6374_v37  ;;  %v1569_v37 = vsel %vm386_vm0, %v7682_v5, %v7730_v44 }
 0x341   : > { %v7939_v38 = vpop.permute.xlu0 %1550  ;;  %v7941_v3 = vpop.permute.xlu1 %1476 }
 0x342   : > { %13394 = vst [vmem:[#allocation61_spill] sm:$0xff] %v7941_v3 }
 0x343   : > { %1998 = vrot.lane.b32.xlu0 %v7596_v49, %s6492_s20  ;;  %1832 = vrot.lane.b32.xlu1 %v7508_v61, %s6491_s17 }
 0x345   : > { %v7947_v13 = vpop.permute.xlu0 %1478  ;;  %v7952_v8 = vpop.permute.xlu1 %1772 }
 0x346   : > { %13395 = vst [vmem:[#allocation62_spill] sm:$0xff] %v7947_v13 }
 0x347   : > { %1834 = vrot.lane.b32.xlu0 %v7512_v20, %s6491_s17  ;;  %1848 = vrot.lane.b32.xlu1 %v7530_v57, %s6491_s17 }
 0x349   : > { %v7958_v6 = vpop.permute.xlu0 %1774  ;;  %v7960_v30 = vpop.permute.xlu1 %1692 }
 0x34a   : > { %13396 = vst [vmem:[#allocation63_spill] sm:$0xff] %v7960_v30  ;;  %v1577_v30 = vsel %vm386_vm0, %v7730_v44, %v7682_v5  ;;  %v1568_v44 = vsel %vm386_vm0, %v7674_v54, %v7723_v7 }
 0x34b   : > { %1850 = vrot.lane.b32.xlu0 %v7536_v56, %s6491_s17  ;;  %1976 = vrot.lane.b32.xlu1 %v7508_v61, %s6492_s20  ;;  %v8010_v5 = vmul.f32 %v1577_v30, %v6736_v26  ;;  %v8013_v61 = vmul.f32 %v1569_v37, %v6727_v24  ;;  %v1496_v30 = vsel %vm301_vm1, %v7686_v21, %v7733_v46 }
 0x34c   : > { %v1497_v37 = vsel %vm301_vm1, %v7694_v17, %v7740_v36 }
 0x34d   : > { %v7966_v45 = vpop.permute.xlu0 %1694  ;;  %v7968_v3 = vpop.permute.xlu1 %1620 }
 0x34e   : > { %13397 = vst [vmem:[#allocation64_spill] sm:$0xff] %v7966_v45  ;;  %13398 = vst [vmem:[#allocation65_spill] sm:$0xff] %v7968_v3  ;;  %v1576_v3 = vsel %vm386_vm0, %v7723_v7, %v7674_v54  ;;  %v1504_v54 = vsel %vm301_vm1, %v7733_v46, %v7686_v21  ;;  %v1792_v21 = vsel %vm652_vm2, %v7696_v22, %v7744_v14  ;;  %v6107_v46 = vld [vmem:[%s13031_s3 + $0x70] sm:$0xff] }
 0x34f   : > { %1978 = vrot.lane.b32.xlu0 %v7512_v20, %s6492_s20  ;;  %1992 = vrot.lane.b32.xlu1 %v7530_v57, %s6492_s20  ;;  %v8024_v1 = vmul.f32 %v1576_v3, %v6736_v26  ;;  %v8040_v3 = vmul.f32 %v1568_v44, %v6727_v24  ;;  %v8072_v57 = vmul.f32 %v1496_v30, %v6822_v43 }
 0x350   : > { %v8080_v19 = vmul.f32 %v1792_v21, %v6912_v63  ;;  %v1793_v21 = vsel %vm652_vm2, %v7702_v15, %v7752_v33 }
 0x351   : > { %v7986_v45 = vpop.permute.xlu0 %1622  ;;  %v8003_v13 = vpop.permute.xlu1 %1916 }
 0x352   : > { %13399 = vst [vmem:[#allocation66_spill] sm:$0xff] %v7986_v45  ;;  %v1505_v45 = vsel %vm301_vm1, %v7740_v36, %v7694_v17  ;;  %13400 = vst [vmem:[#allocation67_spill] sm:$0xff] %v8003_v13  ;;  %v8059_v36 = vmul.f32 %v1504_v54, %v6819_v42  ;;  %v8075_v54 = vmul.f32 %v1497_v37, %v6822_v43 }
 0x353   : > { %1994 = vrot.lane.b32.xlu0 %v7536_v56, %s6492_s20  ;;  %2445 = vperm.xlu1 %6331, %v6099_v11   ;;  %v8043_v20 = vmul.f32 %v1505_v45, %v6819_v42  ;;  %v1800_v11 = vsel %vm652_vm2, %v7744_v14, %v7696_v22  ;;  %v1801_v45 = vsel %vm652_vm2, %v7752_v33, %v7702_v15 }
 0x354   : > { %v8083_v7 = vmul.f32 %v1800_v11, %v6909_v62  ;;  %v8101_v11 = vmul.f32 %v1801_v45, %v6909_v62  ;;  %v1572_v37 = vsel %vm386_vm0, %v7850_v9, %v7893_v48  ;;  %v1581_v15 = vsel %vm386_vm0, %v7899_v53, %v7856_v50 }
 0x355   : > { %v8053_v17 = vpop.permute.xlu0 %1918  ;;  %v1565_v44 = vpop.permute.xlu1 %1564 }
 0x356   : > { %v1574_v22 = vsel %vm386_vm0, %v7933_v10, %v1565_v44  ;;  %v1582_v30 = vsel %vm386_vm0, %v1565_v44, %v7933_v10  ;;  %v1573_v10 = vsel %vm386_vm0, %v7856_v50, %v7899_v53  ;;  %v6097_v44 = vld [vmem:[%s13030_s2 + $0x60] sm:$0xff]  ;;  %v8131_v53 = vmul.f32 %v1793_v21, %v6912_v63 }
 0x357   : > { %2450 = vperm.xlu0 %6330, %v6100_v55   ;;  %2510 = vperm.xlu1 %6331, %v6107_v46   ;;  %v6108_v55 = vld [vmem:[%s13031_s3 + $0x78] sm:$0xff]  ;;  %v1596_v56 = vmul.f32 %v1582_v30, %v6736_v26  ;;  %v1597_v0 = vmul.f32 %v1574_v22, %v6727_v24  ;;  %v1571_v50 = vsel %vm386_vm0, %v7776_v2, %v7816_v12  ;;  %v6098_v30 = vld [vmem:[%s13030_s2 + $0x68] sm:$0xff] }
 0x358   : > { %v1595_v22 = vmul.f32 %v1573_v10, %v6727_v24  ;;  %v1570_v21 = vsel %vm386_vm0, %v7770_v23, %v7810_v31 }
 0x359   : > { %v1567_v46 = vpop.permute.xlu0 %1566  ;;  %v8124_v14 = vpop.permute.xlu1 %1492 }
 0x35a   : > { %v1575_v33 = vsel %vm386_vm0, %v7939_v38, %v1567_v46  ;;  %v1583_v45 = vsel %vm386_vm0, %v1567_v46, %v7939_v38  ;;  %v1580_v38 = vsel %vm386_vm0, %v7893_v48, %v7850_v9  ;;  %v6105_v9 = vld [vmem:[%s13031_s3 + $0x60] sm:$0xff] }
 0x35b   : > { %v1598_v13 = vmul.f32 %v1583_v45, %v6736_v26  ;;  %v1599_v47 = vmul.f32 %v1575_v33, %v6727_v24  ;;  %2515 = vperm.xlu0 %6330, %v6108_v55   ;;  %2435 = vperm.xlu1 %6331, %v6097_v44   ;;  %v8149_v55 = vsel %vm558_vm3, %v7704_v4, %v7754_v60 }
 0x35c   : > { %v1578_v44 = vsel %vm386_vm0, %v7810_v31, %v7770_v23  ;;  %v1579_v33 = vsel %vm386_vm0, %v7816_v12, %v7776_v2  ;;  %v1593_v45 = vmul.f32 %v1572_v37, %v6727_v24  ;;  %v1592_v23 = vmul.f32 %v1580_v38, %v6736_v26 }
 0x35d   : > { %v1606_v46 = vpack.c.bf16 %v1598_v13, %v1596_v56  ;;  %v1495_v48 = vpop.permute.xlu0 %1494  ;;  %v1607_v10 = vpack.c.bf16 %v1599_v47, %v1597_v0  ;;  %v1594_v13 = vmul.f32 %v1581_v15, %v6736_v26  ;;  %v1789_v56 = vpop.permute.xlu1 %1788  ;;  %v8172_v0 = vsel %vm558_vm3, %v7754_v60, %v7704_v4  ;;  %v6106_v60 = vld [vmem:[%s13031_s3 + $0x68] sm:$0xff] }
 0x35e   : > { %v1591_v47 = vmul.f32 %v1571_v50, %v6727_v24  ;;  %v1798_v12 = vsel %vm652_vm2, %v7952_v8, %v1789_v56  ;;  %v1806_v2 = vsel %vm652_vm2, %v1789_v56, %v7952_v8  ;;  %v1605_v4 = vpack.c.bf16 %v1595_v22, %v1593_v45  ;;  %v6095_v22 = vld [vmem:[%s13030_s2 + $0x50] sm:$0xff] }
 0x35f   : > { %2440 = vperm.xlu0 %6330, %v6098_v30   ;;  %2500 = vperm.xlu1 %6331, %v6105_v9   ;;  %v1588_v37 = vmul.f32 %v1578_v44, %v6736_v26  ;;  %v1589_v15 = vmul.f32 %v1570_v21, %v6727_v24  ;;  %v1590_v50 = vmul.f32 %v1579_v33, %v6736_v26 }
 0x360   : > { %2185 = vmatprep.subr.bf16.mxu1 %v1607_v10  ;;  %v1805_v38 = vsel %vm652_vm2, %v7915_v39, %v7875_v52  ;;  %v1604_v30 = vpack.c.bf16 %v1594_v13, %v1592_v23  ;;  %v1804_v9 = vsel %vm652_vm2, %v7909_v58, %v7866_v51  ;;  %v1820_v44 = vmul.f32 %v1798_v12, %v6912_v63 }
 0x361   : > { %2186 = vmatpush1.bf16.msra.mxu1 %v1606_v46  ;;  %v1791_v8 = vpop.permute.xlu0 %1790  ;;  %v8207_v46 = vpop.permute.xlu1 %1708  ;;  %v1821_v33 = vmul.f32 %v1806_v2, %v6909_v62  ;;  %v1803_v56 = vsel %vm652_vm2, %v7832_v29, %v7792_v32  ;;  %v1819_v23 = vmul.f32 %v1805_v38, %v6909_v62  ;;  %v1603_v12 = vpack.c.bf16 %v1591_v47, %v1589_v15  ;;  %v6096_v2 = vld [vmem:[%s13030_s2 + $0x58] sm:$0xff] }
 0x362   : > { %v1799_v21 = vsel %vm652_vm2, %v7958_v6, %v1791_v8  ;;  %v1807_v10 = vsel %vm652_vm2, %v1791_v8, %v7958_v6  ;;  %2187 = vmatprep.subr.bf16.mxu1 %v1605_v4  ;;  %v1797_v6 = vsel %vm652_vm2, %v7875_v52, %v7915_v39  ;;  %v13401_v4 = vld [vmem:[#allocation32_spill] sm:$0xff]  ;;  %v13402_v8 = vld [vmem:[#allocation62_spill] sm:$0xff]  ;;  %v1602_v15 = vpack.c.bf16 %v1590_v50, %v1588_v37  ;;  %v13403_v38 = vld [vmem:[#allocation37_spill] sm:$0xff] }
 0x363   : > { %v1822_v45 = vmul.f32 %v1799_v21, %v6912_v63  ;;  %v1823_v13 = vmul.f32 %v1807_v10, %v6909_v62  ;;  %2505 = vperm.xlu0 %6330, %v6106_v60   ;;  %2425 = vperm.xlu1 %6331, %v6095_v22   ;;  %v8229_v60 = vsel %vm558_vm3, %v13401_v4, %v7711_v25  ;;  %v6103_v52 = vld [vmem:[%s13031_s3 + $0x50] sm:$0xff] }
 0x364   : > { %v1503_v21 = vsel %vm301_vm1, %v13402_v8, %v1495_v48  ;;  %v13404_v22 = vld [vmem:[#allocation44_spill] sm:$0xff]  ;;  %v1796_v26 = vsel %vm652_vm2, %v7866_v51, %v7909_v58  ;;  %v1795_v37 = vsel %vm652_vm2, %v7792_v32, %v7832_v29  ;;  %v1815_v50 = vmul.f32 %v1803_v56, %v6909_v62  ;;  %v6104_v29 = vld [vmem:[%s13031_s3 + $0x58] sm:$0xff] }
 0x365   : > { %v1830_v10 = vpack.c.bf16 %v1822_v45, %v1820_v44  ;;  %2188 = vmatpush1.bf16.msra.mxu1 %v1604_v30  ;;  %v8234_v39 = vpop.permute.xlu0 %1710  ;;  %v1831_v47 = vpack.c.bf16 %v1823_v13, %v1821_v33  ;;  %v1802_v31 = vsel %vm652_vm2, %v13404_v22, %v13403_v38  ;;  %v1817_v30 = vmul.f32 %v1804_v9, %v6909_v62  ;;  %v8248_v44 = vpop.permute.xlu1 %1636  ;;  %v13405_v45 = vld [vmem:[#allocation61_spill] sm:$0xff]  ;;  %v13406_v56 = vld [vmem:[#allocation56_spill] sm:$0xff] }
 0x366   : > { %2189 = vmatprep.subr.bf16.mxu1 %v1603_v12  ;;  %v1818_v33 = vmul.f32 %v1797_v6, %v6912_v63  ;;  %v1502_v13 = vsel %vm301_vm1, %v13405_v45, %v8124_v14  ;;  %v1511_v51 = vsel %vm301_vm1, %v1495_v48, %v13402_v8  ;;  %v1527_v58 = vmul.f32 %v1503_v21, %v6822_v43  ;;  %v13407_v6 = vld [vmem:[#allocation50_spill] sm:$0xff] }
 0x367   : > { %2430 = vperm.xlu0 %6330, %v6096_v2   ;;  %2490 = vperm.xlu1 %6331, %v6103_v52   ;;  %v1829_v9 = vpack.c.bf16 %v1819_v23, %v1817_v30  ;;  %v1794_v32 = vsel %vm652_vm2, %v13403_v38, %v13404_v22  ;;  %v1501_v12 = vsel %vm301_vm1, %v13407_v6, %v13406_v56  ;;  %v6093_v23 = vld [vmem:[%s13030_s2 + $0x40] sm:$0xff]  ;;  %v13410_v38 = vld [vmem:[#allocation49_spill] sm:$0xff] }
 0x368   : > { %2258 = vmatprep.subr.bf16.mxu0 %v1831_v47  ;;  %v1816_v48 = vmul.f32 %v1796_v26, %v6912_v63  ;;  %v1813_v8 = vmul.f32 %v1802_v31, %v6909_v62  ;;  %v1510_v21 = vsel %vm301_vm1, %v8124_v14, %v13405_v45  ;;  %v1525_v52 = vmul.f32 %v1502_v13, %v6822_v43  ;;  %v13411_v13 = vld [vmem:[#allocation43_spill] sm:$0xff] }
 0x369   : > { %2190 = vmatpush1.bf16.msra.mxu1 %v1602_v15  ;;  %2259 = vmatpush1.bf16.msra.mxu0 %v1830_v10  ;;  %v8276_v2 = vpop.permute.xlu0 %1638  ;;  %v13408_v26 = vpack.c.bf16 %v8013_v61, %v8040_v3  ;;  %v8290_v10 = vpop.permute.xlu1 %1932  ;;  %v1814_v47 = vmul.f32 %v1795_v37, %v6912_v63  ;;  %v13409_v15 = vld [vmem:[#allocation55_spill] sm:$0xff]  ;;  %v1526_v30 = vmul.f32 %v1511_v51, %v6819_v42 }
 0x36a   : > { %2260 = vmatprep.subr.bf16.mxu0 %v1829_v9  ;;  %v1500_v31 = vsel %vm301_vm1, %v13410_v38, %v13409_v15  ;;  %v1828_v22 = vpack.c.bf16 %v1818_v33, %v1816_v48  ;;  %v1509_v61 = vsel %vm301_vm1, %v13406_v56, %v13407_v6  ;;  %v1523_v3 = vmul.f32 %v1501_v12, %v6822_v43  ;;  %v6094_v37 = vld [vmem:[%s13030_s2 + $0x48] sm:$0xff]  ;;  %v13412_v9 = vld [vmem:[#allocation36_spill] sm:$0xff]  ;;  %v13414_v12 = vld [vmem:[#allocation42_spill] sm:$0xff] }
 0x36b   : > { %2191 = vmatprep.subr.bf16.mxu1 %v13408_v26  ;;  %2495 = vperm.xlu0 %6330, %v6104_v29   ;;  %v1535_v14 = vpack.c.bf16 %v1527_v58, %v1525_v52  ;;  %v1827_v45 = vpack.c.bf16 %v1815_v50, %v1813_v8  ;;  %v1499_v33 = vsel %vm301_vm1, %v13412_v9, %v13411_v13  ;;  %v6101_v50 = vld [vmem:[%s13031_s3 + $0x40] sm:$0xff]  ;;  %v13415_v48 = vld [vmem:[#allocation35_spill] sm:$0xff] }
 0x36c   : > { %2415 = vperm.xlu1 %6331, %v6093_v23   ;;  %v1812_v51 = vmul.f32 %v1794_v32, %v6912_v63  ;;  %v1524_v29 = vmul.f32 %v1510_v21, %v6819_v42  ;;  %v13413_v56 = vpack.c.bf16 %v8010_v5, %v8024_v1  ;;  %v1713_v6 = vsel %vm558_vm3, %v7711_v25, %v13401_v4  ;;  %v13416_v4 = vld [vmem:[#allocation4_spill] sm:$0xff] }
 0x36d   : > { %2261 = vmatpush1.bf16.msra.mxu0 %v1828_v22  ;;  %v8315_v58 = vpop.permute.xlu0 %1934  ;;  %v1508_v32 = vsel %vm301_vm1, %v13409_v15, %v13410_v38  ;;  %v1521_v1 = vmul.f32 %v1500_v31, %v6822_v43  ;;  %v8329_v5 = vpop.permute.xlu1 %1912  ;;  %v1498_v23 = vsel %vm301_vm1, %v13415_v48, %v13414_v12  ;;  %v1522_v21 = vmul.f32 %v1509_v61, %v6819_v42  ;;  %v13417_v61 = vld [vmem:[#allocation5_spill] sm:$0xff] }
 0x36e   : > { %2192 = vmatpush1.bf16.msra.mxu1 %v13413_v56  ;;  %2262 = vmatprep.subr.bf16.mxu0 %v1827_v45  ;;  %v1826_v8 = vpack.c.bf16 %v1814_v47, %v1812_v51  ;;  %v1534_v25 = vpack.c.bf16 %v1526_v30, %v1524_v29  ;;  %v8338_v52 = vmul.f32 %v8229_v60, %v13416_v4  ;;  %v6102_v47 = vld [vmem:[%s13031_s3 + $0x48] sm:$0xff]  ;;  %v13419_v51 = vld [vmem:[#allocation33_spill] sm:$0xff]  ;;  %v13420_v29 = vld [vmem:[#allocation28_spill] sm:$0xff] }
 0x36f   : > { %2193 = vmatprep.subr.bf16.mxu1 %v1535_v14  ;;  %2420 = vperm.xlu0 %6330, %v6094_v37   ;;  %v1507_v26 = vsel %vm301_vm1, %v13411_v13, %v13412_v9  ;;  %v1519_v15 = vmul.f32 %v1499_v33, %v6822_v43  ;;  %v1533_v38 = vpack.c.bf16 %v1523_v3, %v1521_v1  ;;  %v13422_v56 = vld [vmem:[#allocation46_spill] sm:$0xff] }
 0x370   : > { %2480 = vperm.xlu1 %6331, %v6101_v50   ;;  %v8350_v31 = vmul.f32 %v8172_v0, %v13416_v4  ;;  %v1520_v60 = vmul.f32 %v1508_v32, %v6819_v42  ;;  %v1529_v30 = vpack.c.bf16 %v8075_v54, %v8072_v57  ;;  %v8358_v14 = vmul.f32 %v1713_v6, %v13417_v61  ;;  %v13423_v6 = vld [vmem:[#allocation64_spill] sm:$0xff] }
 0x371   : > { %2263 = vmatpush1.bf16.msra.mxu0 %v1826_v8  ;;  %v8353_v22 = vpop.permute.xlu0 %1914  ;;  %v1506_v3 = vsel %vm301_vm1, %v13414_v12, %v13415_v48  ;;  %v1517_v0 = vmul.f32 %v1498_v23, %v6822_v43  ;;  %v13418_v45 = vpack.c.bf16 %v8101_v11, %v8083_v7  ;;  %v8368_v37 = vpop.permute.xlu1 %1928  ;;  %v1824_v57 = vpack.c.bf16 %v8131_v53, %v8080_v19  ;;  %v13421_v11 = vld [vmem:[#allocation39_spill] sm:$0xff]  ;;  %v13424_v12 = vld [vmem:[#allocation45_spill] sm:$0xff]  ;;  %v13425_v48 = vld [vmem:[#allocation38_spill] sm:$0xff] }
 0x372   : > { %2194 = vmatpush1.bf16.msra.mxu1 %v1534_v25  ;;  %v8374_v54 = vmul.f32 %v8149_v55, %v13417_v61  ;;  %v1518_v13 = vmul.f32 %v1507_v26, %v6819_v42  ;;  %v1532_v9 = vpack.c.bf16 %v1522_v21, %v1520_v60  ;;  %v8383_v7 = vsel %vm472_vm4, %v13420_v29, %v13419_v51  ;;  %v13438_v26 = vld [vmem:[#allocation57_spill] sm:$0xff] }
 0x373   : > { %2195 = vmatprep.subr.bf16.mxu1 %v1533_v38  ;;  %2264 = vmatprep.subr.bf16.mxu0 %v13418_v45  ;;  %v1723_v19 = vsel %vm558_vm3, %v13422_v56, %v13421_v11  ;;  %v1531_v53 = vpack.c.bf16 %v1519_v15, %v1517_v0  ;;  %v1516_v55 = vmul.f32 %v1506_v3, %v6819_v42  ;;  %v13427_v15 = vld [vmem:[#allocation34_spill] sm:$0xff]  ;;  %v13428_v38 = vld [vmem:[#allocation29_spill] sm:$0xff]  ;;  %v13429_v0 = vld [vmem:[#allocation63_spill] sm:$0xff] }
 0x374   : > { %2485 = vperm.xlu0 %6330, %v6102_v47   ;;  %v1715_v50 = vsel %vm558_vm3, %v13421_v11, %v13422_v56  ;;  %v1719_v32 = vsel %vm558_vm3, %v13423_v6, %v8234_v39  ;;  %v1714_v23 = vsel %vm558_vm3, %v13425_v48, %v13424_v12  ;;  %v1722_v8 = vsel %vm558_vm3, %v13424_v12, %v13425_v48 }
 0x375   : > { %2265 = vmatpush1.bf16.msra.mxu0 %v1824_v57  ;;  %v8398_v1 = vpop.permute.xlu0 %1930  ;;  %v13426_v21 = vpack.c.bf16 %v7750_v27, %v7742_v59  ;;  %v8411_v25 = vpop.permute.xlu1 %1908  ;;  %v8419_v47 = vsel %vm472_vm4, %v13428_v38, %v13427_v15  ;;  %v1530_v60 = vpack.c.bf16 %v1518_v13, %v1516_v55  ;;  %v8422_v3 = vmul.f32 %v1723_v19, %v13416_v4  ;;  %v13431_v55 = vld [vmem:[#allocation52_spill] sm:$0xff]  ;;  %v13439_v27 = vld [vmem:[#allocation51_spill] sm:$0xff] }
 0x376   : > { %2196 = vmatpush1.bf16.msra.mxu1 %v1532_v9  ;;  %v1718_v45 = vsel %vm558_vm3, %v13429_v0, %v8207_v46  ;;  %v8432_v57 = vsel %vm472_vm4, %v13427_v15, %v13428_v38  ;;  %v8435_v9 = vmul.f32 %v1715_v50, %v13417_v61  ;;  %v1727_v13 = vsel %vm558_vm3, %v8234_v39, %v13423_v6  ;;  %v13433_v39 = vld [vmem:[#allocation47_spill] sm:$0xff]  ;;  %v13434_v6 = vld [vmem:[#allocation40_spill] sm:$0xff] }
 0x377   : > { %2197 = vmatprep.subr.bf16.mxu1 %v1531_v53  ;;  %2266 = vmatprep.subr.bf16.mxu0 %v13426_v21  ;;  %v1743_v11 = vmul.f32 %v1719_v32, %v13417_v61  ;;  %v8443_v56 = vmul.f32 %v1722_v8, %v13416_v4  ;;  %v8446_v19 = vmul.f32 %v1714_v23, %v13417_v61  ;;  %v13430_v53 = vld [vmem:[#allocation58_spill] sm:$0xff] }
 0x378   : > { %v1717_v12 = vsel %vm558_vm3, %v13431_v55, %v13430_v53  ;;  %v13432_v50 = vpack.c.bf16 %v7692_v41, %v7684_v34  ;;  %v8461_v32 = vsel %vm472_vm4, %v13434_v6, %v13433_v39  ;;  %v1726_v23 = vsel %vm558_vm3, %v8207_v46, %v13429_v0 }
 0x379   : > { %v8455_v48 = vpop.permute.xlu0 %1910  ;;  %v1741_v8 = vmul.f32 %v1718_v45, %v13417_v61  ;;  %v13435_v21 = vpack.c.bf16 %v7656_v40, %v7650_v35  ;;  %v8471_v15 = vpop.permute.xlu1 %1924  ;;  %v1716_v46 = vsel %vm558_vm3, %v13439_v27, %v13438_v26  ;;  %v1725_v0 = vsel %vm558_vm3, %v13430_v53, %v13431_v55  ;;  %v13450_v40 = vld [vmem:[#allocation54_spill] sm:$0xff] }
 0x37a   : > { %2198 = vmatpush1.bf16.msra.mxu1 %v1530_v60  ;;  %2267 = vmatpush1.bf16.msra.mxu0 %v13432_v50  ;;  %v13436_v60 = vld [vmem:[#allocation48_spill] sm:$0xff]  ;;  %v13437_v50 = vld [vmem:[#allocation41_spill] sm:$0xff]  ;;  %v1739_v45 = vmul.f32 %v1717_v12, %v13417_v61  ;;  %v1747_v38 = vpack.c.bf16 %v8435_v9, %v8446_v19  ;;  %v1724_v59 = vsel %vm558_vm3, %v13438_v26, %v13439_v27  ;;  %v13442_v26 = vld [vmem:[#allocation7_spill] sm:$0xff] }
 0x37b   : > { %2199 = vmatprep.subr.bf16.mxu1 %v1529_v30  ;;  %2268 = vmatprep.subr.bf16.mxu0 %v13435_v21  ;;  %v1643_v33 = vsel %vm472_vm4, %v13437_v50, %v13436_v60  ;;  %v1742_v30 = vmul.f32 %v1727_v13, %v13416_v4  ;;  %v1751_v21 = vpack.c.bf16 %v1743_v11, %v1741_v8  ;;  %v13445_v8 = vld [vmem:[#allocation59_spill] sm:$0xff] }
 0x37c   : > { %v1740_v41 = vmul.f32 %v1726_v23, %v13416_v4  ;;  %v1951_v13 = vsel %vm824_vm5, %v8315_v58, %v8053_v17  ;;  %v13440_v53 = vpack.c.bf16 %v8043_v20, %v8059_v36  ;;  %v13441_v11 = vpack.c.bf16 %v7626_v16, %v7620_v28  ;;  %v13443_v20 = vld [vmem:[#allocation20_spill] sm:$0xff]  ;;  %v13454_v16 = vld [vmem:[#allocation17_spill] sm:$0xff] }
 0x37d   : > { %v1927_v9 = vpop.permute.xlu0 %1926  ;;  %v8510_v27 = vsel %vm472_vm4, %v13436_v60, %v13437_v50  ;;  %v8513_v19 = vmul.f32 %v1643_v33, %v13442_v26  ;;  %v1737_v55 = vmul.f32 %v1716_v46, %v13417_v61  ;;  %v13444_v36 = vpack.c.bf16 %v7596_v49, %v13443_v20  ;;  %v8519_v12 = vpop.permute.xlu1 %1904  ;;  %v13455_v28 = vld [vmem:[#allocation16_spill] sm:$0xff] }
 0x37e   : > { %2200 = vmatpush1.bf16.msra.mxu1 %v13440_v53  ;;  %2269 = vmatpush1.bf16.msra.mxu0 %v13441_v11  ;;  %v1738_v23 = vmul.f32 %v1725_v0, %v13416_v4  ;;  %v13446_v53 = vld [vmem:[#allocation53_spill] sm:$0xff]  ;;  %v1750_v50 = vpack.c.bf16 %v1742_v30, %v1740_v41  ;;  %v13447_v11 = vld [vmem:[#allocation67_spill] sm:$0xff]  ;;  %v1736_v46 = vmul.f32 %v1724_v59, %v13416_v4  ;;  %v13449_v30 = vld [vmem:[#allocation60_spill] sm:$0xff] }
 0x37f   : > { %2201 = vmatprep.subr.bf16.mxu1 %v1751_v21  ;;  %2270 = vmatprep.subr.bf16.mxu0 %v13444_v36  ;;  %v1644_v60 = vsel %vm472_vm4, %v13446_v53, %v13445_v8  ;;  %v1950_v33 = vsel %vm824_vm5, %v8290_v10, %v13447_v11  ;;  %v1943_v21 = vsel %vm824_vm5, %v8053_v17, %v8315_v58  ;;  %v13448_v36 = vld [vmem:[#allocation9_spill] sm:$0xff]  ;;  %v13451_v17 = vld [vmem:[#allocation19_spill] sm:$0xff]  ;;  %v13452_v58 = vld [vmem:[#allocation18_spill] sm:$0xff] }
 0x380   : > { %v1967_v0 = vmul.f32 %v1951_v13, %v13448_v36  ;;  %v1749_v34 = vpack.c.bf16 %v1739_v45, %v1737_v55  ;;  %v8540_v41 = vsel %vm472_vm4, %v13445_v8, %v13446_v53  ;;  %v1645_v35 = vsel %vm472_vm4, %v13450_v40, %v13449_v30 }
 0x381   : > { %v1949_v59 = vsel %vm824_vm5, %v8398_v1, %v8353_v22  ;;  %v13453_v45 = vpack.c.bf16 %v13451_v17, %v13452_v58  ;;  %v1907_v13 = vpop.permute.xlu0 %1906  ;;  %v8554_v55 = vmul.f32 %v1644_v60, %v13442_v26  ;;  %v1942_v8 = vsel %vm824_vm5, %v13447_v11, %v8290_v10 }
 0x382   : > { %2202 = vmatpush2.bf16.msra.mxu1 %v1750_v50  ;;  %v1965_v53 = vmul.f32 %v1950_v33, %v13448_v36  ;;  %v13456_v49 = vpack.c.bf16 %v13454_v16, %v13455_v28  ;;  %v1921_v50 = vpop.permute.xlu1 %1920  ;;  %v1748_v20 = vpack.c.bf16 %v1738_v23, %v1736_v46  ;;  %v1653_v60 = vsel %vm472_vm4, %v13449_v30, %v13450_v40  ;;  %v13458_v40 = vld [vmem:[#allocation66_spill] sm:$0xff] }
 0x383   : > { %2271 = vmatpush1.bf16.msra.mxu0 %v13453_v45  ;;  %2203 = vmatprep.subr.bf16.mxu1 %v1749_v34  ;;  %v13457_v45 = vld [vmem:[#allocation8_spill] sm:$0xff]  ;;  %v1948_v10 = vsel %vm824_vm5, %v8368_v37, %v8329_v5  ;;  %v8574_v34 = vmul.f32 %v1645_v35, %v13442_v26  ;;  %v1963_v23 = vmul.f32 %v1949_v59, %v13448_v36  ;;  %v13460_v30 = vld [vmem:[#allocation14_spill] sm:$0xff] }
 0x384   : > { %2272 = vmatprep.subr.bf16.mxu0 %v13456_v49  ;;  %v1966_v17 = vmul.f32 %v1943_v21, %v13457_v45  ;;  %v1941_v49 = vsel %vm824_vm5, %v8353_v22, %v8398_v1  ;;  %v1975_v11 = vpack.c.bf16 %v1967_v0, %v1965_v53  ;;  %v1647_v33 = vsel %vm472_vm4, %v13458_v40, %v8276_v2  ;;  %v13459_v21 = vld [vmem:[#allocation15_spill] sm:$0xff]  ;;  %v13462_v1 = vld [vmem:[#allocation65_spill] sm:$0xff] }
 0x385   : > { %v1964_v46 = vmul.f32 %v1942_v8, %v13457_v45  ;;  %v1947_v35 = vsel %vm824_vm5, %v1927_v9, %v8455_v48  ;;  %v13461_v58 = vpack.c.bf16 %v13459_v21, %v13460_v30  ;;  %v1923_v22 = vpop.permute.xlu0 %1922  ;;  %v1646_v0 = vsel %vm472_vm4, %v13462_v1, %v8248_v44 }
 0x386   : > { %2204 = vmatpush2.bf16.msra.mxu1 %v1748_v20  ;;  %v1940_v59 = vsel %vm824_vm5, %v8329_v5, %v8368_v37  ;;  %v1961_v8 = vmul.f32 %v1948_v10, %v13448_v36  ;;  %v1845_v53 = vpop.permute.xlu1 %1844  ;;  %v1655_v20 = vsel %vm472_vm4, %v8276_v2, %v13458_v40  ;;  %v1962_v16 = vmul.f32 %v1941_v49, %v13457_v45 }
 0x387   : > { %2273 = vmatpush1.bf16.msra.mxu0 %v13461_v58  ;;  %2205 = vmatprep.subr.bf16.mxu1 %v1747_v38  ;;  %v1974_v58 = vpack.c.bf16 %v1966_v17, %v1964_v46  ;;  %v1946_v28 = vsel %vm824_vm5, %v8471_v15, %v8411_v25  ;;  %v1671_v5 = vmul.f32 %v1647_v33, %v13442_v26  ;;  %v13465_v46 = vld [vmem:[#allocation6_spill] sm:$0xff] }
 0x388   : > { %2274 = vmatprep.subr.bf16.mxu0 %v1975_v11  ;;  %v1939_v37 = vsel %vm824_vm5, %v8455_v48, %v1927_v9  ;;  %v1959_v38 = vmul.f32 %v1947_v35, %v13448_v36  ;;  %v1973_v10 = vpack.c.bf16 %v1963_v23, %v1961_v8  ;;  %v1654_v2 = vsel %vm472_vm4, %v8248_v44, %v13462_v1 }
 0x389   : > { %v1960_v17 = vmul.f32 %v1940_v59, %v13457_v45  ;;  %v1945_v49 = vsel %vm824_vm5, %v1923_v22, %v1907_v13  ;;  %v13463_v11 = vpack.c.bf16 %v8422_v3, %v8443_v56  ;;  %v1847_v40 = vpop.permute.xlu0 %1846  ;;  %v1669_v48 = vmul.f32 %v1646_v0, %v13442_v26 }
 0x38a   : > { %v1938_v9 = vsel %vm824_vm5, %v8411_v25, %v8471_v15  ;;  %v1957_v44 = vmul.f32 %v1946_v28, %v13448_v36  ;;  %v13464_v23 = vpack.c.bf16 %v8358_v14, %v8374_v54  ;;  %v1861_v33 = vpop.permute.xlu1 %1860  ;;  %v1670_v3 = vmul.f32 %v1655_v20, %v13465_v46 }
 0x38b   : > { %2206 = vmatpush2.bf16.msra.mxu1 %v13463_v11  ;;  %2275 = vmatpush2.bf16.msra.mxu0 %v1974_v58  ;;  %v1972_v56 = vpack.c.bf16 %v1962_v16, %v1960_v17  ;;  %v1958_v35 = vmul.f32 %v1939_v37, %v13457_v45  ;;  %v1944_v1 = vsel %vm824_vm5, %v1921_v50, %v8519_v12 }
 0x38c   : > { %2207 = vmatprep.subr.bf16.mxu1 %v13464_v23  ;;  %2276 = vmatprep.subr.bf16.mxu0 %v1973_v10  ;;  %v1937_v25 = vsel %vm824_vm5, %v1907_v13, %v1923_v22  ;;  %v1955_v28 = vmul.f32 %v1945_v49, %v13448_v36  ;;  %v1679_v15 = vpack.c.bf16 %v1671_v5, %v1669_v48 }
 0x38d   : > { %v1971_v0 = vpack.c.bf16 %v1959_v38, %v1957_v44  ;;  %v1666_v14 = vmul.f32 %v1653_v60, %v13465_v46  ;;  %v1668_v54 = vmul.f32 %v1654_v2, %v13465_v46  ;;  %v1956_v59 = vmul.f32 %v1938_v9, %v13457_v45  ;;  %v1863_v8 = vpop.permute.xlu0 %1862  ;;  %v13467_v38 = vld [vmem:[#allocation11_spill] sm:$0xff]  ;;  %v13468_v9 = vld [vmem:[#allocation10_spill] sm:$0xff] }
 0x38e   : > { %v13466_v16 = vpack.c.bf16 %v8338_v52, %v8350_v31  ;;  %v1936_v13 = vsel %vm824_vm5, %v8519_v12, %v1921_v50  ;;  %v1953_v22 = vmul.f32 %v1944_v1, %v13448_v36  ;;  %v1879_v20 = vsel %vm738_vm6, %v1863_v8, %v1847_v40  ;;  %v1989_v60 = vpop.permute.xlu1 %1988 }
 0x38f   : > { %2277 = vmatpush2.bf16.msra.mxu0 %v1972_v56  ;;  %v1678_v58 = vpack.c.bf16 %v1670_v3, %v1668_v54  ;;  %v1970_v5 = vpack.c.bf16 %v1958_v35, %v1956_v59  ;;  %v1954_v37 = vmul.f32 %v1937_v25, %v13457_v45  ;;  %v1878_v52 = vsel %vm738_vm6, %v1861_v33, %v1845_v53 }
 0x390   : > { %2208 = vmatpush2.bf16.msra.mxu1 %v13466_v16  ;;  %2278 = vmatprep.subr.bf16.mxu0 %v1971_v0  ;;  %v1871_v31 = vsel %vm738_vm6, %v1847_v40, %v1863_v8  ;;  %v1895_v12 = vmul.f32 %v1879_v20, %v13467_v38  ;;  %v1677_v50 = vpack.c.bf16 %v8574_v34, %v8554_v55  ;;  %v13470_v16 = vld [vmem:[#allocation12_spill] sm:$0xff] }
 0x391   : > { %2209 = vmatprep.subr.bf16.mxu1 %v1679_v15  ;;  %v1969_v10 = vpack.c.bf16 %v1955_v28, %v1953_v22  ;;  %v1650_v2 = vsel %vm472_vm4, %v13433_v39, %v13434_v6  ;;  %v1664_v17 = vmul.f32 %v8540_v41, %v13465_v46  ;;  %v1952_v49 = vmul.f32 %v1936_v13, %v13457_v45  ;;  %v1991_v11 = vpop.permute.xlu0 %1990  ;;  %v13469_v15 = vld [vmem:[#allocation13_spill] sm:$0xff] }
 0x392   : > { %v1661_v40 = vmul.f32 %v8461_v32, %v13442_v26  ;;  %v1870_v55 = vsel %vm738_vm6, %v1845_v53, %v1861_v33  ;;  %v1893_v34 = vmul.f32 %v1878_v52, %v13467_v38  ;;  %v2005_v48 = vpop.permute.xlu1 %2004  ;;  %v1662_v39 = vmul.f32 %v8510_v27, %v13465_v46 }
 0x393   : > { %2279 = vmatpush2.bf16.msra.mxu0 %v1970_v5  ;;  %v1676_v6 = vpack.c.bf16 %v1666_v14, %v1664_v17  ;;  %v1968_v41 = vpack.c.bf16 %v1954_v37, %v1952_v49  ;;  %v1894_v44 = vmul.f32 %v1871_v31, %v13468_v9  ;;  %v1659_v23 = vmul.f32 %v8419_v47, %v13442_v26  ;;  %v6363_v31 = vld [vmem:[%s13029_s1 + $0xcc] ss:$20 sps:$4 sm:$0xff]  }
 0x394   : > { %2210 = vmatpush2.bf16.msra.mxu1 %v1678_v58  ;;  %2280 = vmatprep.subr.bf16.mxu0 %v1969_v10  ;;  %v1675_v32 = vpack.c.bf16 %v8513_v19, %v1661_v40  ;;  %v1903_v3 = vpack.c.bf16 %v1895_v12, %v1893_v34  ;;  %v1648_v53 = vsel %vm472_vm4, %v13419_v51, %v13420_v29 }
 0x395   : > { %2211 = vmatprep.subr.bf16.mxu1 %v1677_v50  ;;  %v1660_v33 = vmul.f32 %v1650_v2, %v13465_v46  ;;  %v1892_v56 = vmul.f32 %v1870_v55, %v13468_v9  ;;  %v2007_v27 = vpop.permute.xlu0 %2006  ;;  %v1657_v35 = vmul.f32 %v8383_v7, %v13442_v26  ;;  %v1658_v47 = vmul.f32 %v8432_v57, %v13465_v46  ;;  %v6390_v26 = vld [vmem:[%s13029_s1 + $0x144] ss:$20 sps:$4 sm:$0xff]  }
 0x396   : > { %v2023_v19 = vsel %vm910_vm7, %v2007_v27, %v1991_v11  ;;  %v1841_v1 = vpop.permute.xlu1 %1840  ;;  %v2022_v25 = vsel %vm910_vm7, %v2005_v48, %v1989_v60  ;;  %v2015_v28 = vsel %vm910_vm7, %v1991_v11, %v2007_v27  ;;  %v1656_v14 = vmul.f32 %v1648_v53, %v13465_v46 }
 0x397   : > { %2281 = vmatpush2.bf16.msra.mxu0 %v1968_v41  ;;  %v1674_v51 = vpack.c.bf16 %v1662_v39, %v1660_v33  ;;  %v1902_v29 = vpack.c.bf16 %v1894_v44, %v1892_v56  ;;  %v2039_v0 = vmul.f32 %v2023_v19, %v13469_v15  ;;  %v1673_v7 = vpack.c.bf16 %v1659_v23, %v1657_v35  ;;  %v6365_v44 = vld [vmem:[%s13029_s1 + $0xc8] ss:$20 sps:$4 sm:$0xff]  }
 0x398   : > { %2212 = vmatpush2.bf16.msra.mxu1 %v1676_v6  ;;  %2282 = vmatprep.subr.bf16.mxu0 %v1903_v3  ;;  %v2014_v57 = vsel %vm910_vm7, %v1989_v60, %v2005_v48  ;;  %v2037_v59 = vmul.f32 %v2022_v25, %v13469_v15  ;;  %v2038_v8 = vmul.f32 %v2015_v28, %v13470_v16  ;;  %v6360_v60 = vld [vmem:[%s13029_s1 + $0xa0] ss:$20 sps:$4 sm:$0xff]  }
 0x399   : > { %2213 = vmatprep.subr.bf16.mxu1 %v1675_v32  ;;  %v1843_v54 = vpop.permute.xlu0 %1842  ;;  %v1672_v22 = vpack.c.bf16 %v1658_v47, %v1656_v14  ;;  %v2036_v20 = vmul.f32 %v2014_v57, %v13470_v16  ;;  %v6366_v32 = vld [vmem:[%s13029_s1 + $0xf4] ss:$20 sps:$4 sm:$0xff]   ;;  %v6369_v14 = vld [vmem:[%s13029_s1 + $0x11c] ss:$20 sps:$4 sm:$0xff]  }
 0x39a   : > { %v1857_v13 = vpop.permute.xlu1 %1856  ;;  %v2047_v37 = vpack.c.bf16 %v2039_v0, %v2037_v59  ;;  %v6368_v0 = vld [vmem:[%s13029_s1 + $0xf0] ss:$20 sps:$4 sm:$0xff]  }
 0x39b   : > { %2283 = vmatpush2.bf16.msra.mxu0 %v1902_v29  ;;  %v1868_v58 = vsel %vm738_vm6, %v1841_v1, %v1857_v13  ;;  %v1876_v5 = vsel %vm738_vm6, %v1857_v13, %v1841_v1  ;;  %v2046_v12 = vpack.c.bf16 %v2038_v8, %v2036_v20 }
 0x39c   : > { %2214 = vmatpush2.bf16.msra.mxu1 %v1674_v51  ;;  %v1888_v17 = vmul.f32 %v1868_v58, %v13468_v9  ;;  %v1889_v49 = vmul.f32 %v1876_v5, %v13467_v38 }
 0x39d   : > { %2215 = vmatprep.subr.bf16.mxu1 %v1673_v7  ;;  %v1859_v52 = vpop.permute.xlu0 %1858 }
 0x39e   : > { %v1869_v50 = vsel %vm738_vm6, %v1843_v54, %v1859_v52  ;;  %v1877_v10 = vsel %vm738_vm6, %v1859_v52, %v1843_v54  ;;  %v1985_v2 = vpop.permute.xlu1 %1984 }
 0x39f   : > { %v1890_v11 = vmul.f32 %v1869_v50, %v13468_v9  ;;  %v1891_v40 = vmul.f32 %v1877_v10, %v13467_v38 }
 0x3a0   : > { %2216 = vmatpush2.bf16.msra.mxu1 %v1672_v22 }
 0x3a1   : > { %2339 = vmatprep.subr.bf16.mxu1 %v2047_v37  ;;  %v1900_v55 = vpack.c.bf16 %v1890_v11, %v1888_v17  ;;  %v1987_v34 = vpop.permute.xlu0 %1986  ;;  %v1901_v48 = vpack.c.bf16 %v1891_v40, %v1889_v49 }
 0x3a2   : > { %v2001_v39 = vpop.permute.xlu1 %2000 }
 0x3a3   : > { %2218 = vmatmul.mubr.bf16.vlgmr.msra.gmra.mxu1 %v6360_v60  ;;  %2284 = vmatprep.subr.bf16.mxu0 %v1901_v48  ;;  %v2012_v6 = vsel %vm910_vm7, %v1985_v2, %v2001_v39  ;;  %v2020_v41 = vsel %vm910_vm7, %v2001_v39, %v1985_v2 }
 0x3a4   : > { %2340 = vmatpush1.bf16.msra.mxu1 %v2046_v12  ;;  %2227 = vmatprep.mubr.bf16.mxu1 %v6363_v31  ;;  %v2032_v56 = vmul.f32 %v2012_v6, %v13470_v16  ;;  %v2033_v27 = vmul.f32 %v2020_v41, %v13469_v15  ;;  %v6371_v12 = vld [vmem:[%s13029_s1 + $0x118] ss:$20 sps:$4 sm:$0xff]   ;;  %v13471_v6 = vmov 0  }
 0x3a5   : > { %2285 = vmatpush2.bf16.msra.mxu0 %v1900_v55  ;;  %v2003_v23 = vpop.permute.xlu0 %2002 }
 0x3a6   : > { %v2013_v3 = vsel %vm910_vm7, %v1987_v34, %v2003_v23  ;;  %v2021_v53 = vsel %vm910_vm7, %v2003_v23, %v1987_v34  ;;  %v1837_v33 = vpop.permute.xlu1 %1836 }
 0x3a7   : > { %v2034_v35 = vmul.f32 %v2013_v3, %v13470_v16  ;;  %v2035_v47 = vmul.f32 %v2021_v53, %v13469_v15 }
 0x3a9   : > { %v2044_v19 = vpack.c.bf16 %v2034_v35, %v2032_v56  ;;  %v1839_v1 = vpop.permute.xlu0 %1838  ;;  %v2045_v51 = vpack.c.bf16 %v2035_v47, %v2033_v27 }
 0x3aa   : > { %v1853_v29 = vpop.permute.xlu1 %1852 }
 0x3ab   : > { %2228 = vmatmul.mubr.bf16.gmra.mxu1 %v6365_v44  ;;  %2341 = vmatprep.subr.bf16.mxu1 %v2045_v51  ;;  %v1866_v25 = vsel %vm738_vm6, %v1837_v33, %v1853_v29  ;;  %v1874_v28 = vsel %vm738_vm6, %v1853_v29, %v1837_v33 }
 0x3ac   : > { %2237 = vmatprep.mubr.bf16.mxu1 %v6366_v32  ;;  %2342 = vmatpush1.bf16.msra.mxu1 %v2044_v19  ;;  %v1884_v8 = vmul.f32 %v1866_v25, %v13468_v9  ;;  %v1885_v13 = vmul.f32 %v1874_v28, %v13467_v38  ;;  %v6372_v25 = vld [vmem:[%s13029_s1 + $0xa8] ss:$20 sps:$4 sm:$0xff]  }
 0x3ad   : > { %v1855_v7 = vpop.permute.xlu0 %1854 }
 0x3ae   : > { %v1867_v57 = vsel %vm738_vm6, %v1839_v1, %v1855_v7  ;;  %v1875_v54 = vsel %vm738_vm6, %v1855_v7, %v1839_v1  ;;  %v1981_v59 = vpop.permute.xlu1 %1980  ;;  %v6375_v7 = vld [vmem:[%s13029_s1 + $0xd4] ss:$20 sps:$4 sm:$0xff]  }
 0x3af   : > { %v1886_v22 = vmul.f32 %v1867_v57, %v13468_v9  ;;  %v1887_v20 = vmul.f32 %v1875_v54, %v13467_v38 }
 0x3b1   : > { %v1898_v58 = vpack.c.bf16 %v1886_v22, %v1884_v8  ;;  %v1983_v5 = vpop.permute.xlu0 %1982  ;;  %v1899_v37 = vpack.c.bf16 %v1887_v20, %v1885_v13 }
 0x3b2   : > { %v1997_v60 = vpop.permute.xlu1 %1996 }
 0x3b3   : > { %2238 = vmatmul.mubr.bf16.gmra.mxu1 %v6368_v0  ;;  %2286 = vmatprep.subr.bf16.mxu0 %v1899_v37  ;;  %v2010_v52 = vsel %vm910_vm7, %v1981_v59, %v1997_v60  ;;  %v2018_v31 = vsel %vm910_vm7, %v1997_v60, %v1981_v59  ;;  %v6378_v37 = vld [vmem:[%s13029_s1 + $0xb0] ss:$20 sps:$4 sm:$0xff]  }
 0x3b4   : > { %2247 = vmatprep.mubr.bf16.mxu1 %v6369_v14  ;;  %2287 = vmatpush2.bf16.msra.mxu0 %v1898_v58  ;;  %v2028_v49 = vmul.f32 %v2010_v52, %v13470_v16  ;;  %v2029_v11 = vmul.f32 %v2018_v31, %v13469_v15  ;;  %v6379_v60 = vld [vmem:[%s13029_s1 + $0xfc] ss:$20 sps:$4 sm:$0xff]   ;;  %v6381_v52 = vld [vmem:[%s13029_s1 + $0xf8] ss:$20 sps:$4 sm:$0xff]  }
 0x3b5   : > { %v1999_v50 = vpop.permute.xlu0 %1998  ;;  %v6382_v31 = vld [vmem:[%s13029_s1 + $0xd8] ss:$20 sps:$4 sm:$0xff]  }
 0x3b6   : > { %v2011_v10 = vsel %vm910_vm7, %v1983_v5, %v1999_v50  ;;  %v2019_v2 = vsel %vm910_vm7, %v1999_v50, %v1983_v5  ;;  %v1833_v17 = vpop.permute.xlu1 %1832  ;;  %v6377_v5 = vld [vmem:[%s13029_s1 + $0xd0] ss:$20 sps:$4 sm:$0xff]   ;;  %v6385_v50 = vld [vmem:[%s13029_s1 + $0x120] ss:$20 sps:$4 sm:$0xff]  }
 0x3b7   : > { %v2030_v40 = vmul.f32 %v2011_v10, %v13470_v16  ;;  %v2031_v55 = vmul.f32 %v2019_v2, %v13469_v15  ;;  %v6386_v10 = vld [vmem:[%s13029_s1 + $0x100] ss:$20 sps:$4 sm:$0xff]   ;;  %v6387_v2 = vld [vmem:[%s13029_s1 + $0x128] ss:$20 sps:$4 sm:$0xff]  }
 0x3b9   : > { %v2042_v34 = vpack.c.bf16 %v2030_v40, %v2028_v49  ;;  %v1835_v48 = vpop.permute.xlu0 %1834  ;;  %v2043_v39 = vpack.c.bf16 %v2031_v55, %v2029_v11 }
 0x3ba   : > { %v1849_v41 = vpop.permute.xlu1 %1848 }
 0x3bb   : > { %2248 = vmatmul.mubr.bf16.gmra.mxu1 %v6371_v12  ;;  %2343 = vmatprep.subr.bf16.mxu1 %v2043_v39  ;;  %v1864_v44 = vsel %vm738_vm6, %v1833_v17, %v1849_v41  ;;  %v1872_v23 = vsel %vm738_vm6, %v1849_v41, %v1833_v17  ;;  %v6383_v12 = vld [vmem:[%s13029_s1 + $0x124] ss:$20 sps:$4 sm:$0xff]  }
 0x3bc   : > { %2363 = vmatprep.mubr.bf16.mxu1 %v13471_v6  ;;  %2344 = vmatpush1.bf16.msra.mxu1 %v2042_v34  ;;  %v1880_v56 = vmul.f32 %v1864_v44, %v13468_v9  ;;  %v1881_v27 = vmul.f32 %v1872_v23, %v13467_v38 }
 0x3bd   : > { %v1851_v32 = vpop.permute.xlu0 %1850 }
 0x3be   : > { %v1865_v3 = vsel %vm738_vm6, %v1835_v48, %v1851_v32  ;;  %v1873_v53 = vsel %vm738_vm6, %v1851_v32, %v1835_v48  ;;  %v1977_v33 = vpop.permute.xlu1 %1976 }
 0x3bf   : > { %v1882_v35 = vmul.f32 %v1865_v3, %v13468_v9  ;;  %v1883_v47 = vmul.f32 %v1873_v53, %v13467_v38 }
 0x3c1   : > { %v1896_v19 = vpack.c.bf16 %v1882_v35, %v1880_v56  ;;  %v1979_v1 = vpop.permute.xlu0 %1978  ;;  %v1897_v51 = vpack.c.bf16 %v1883_v47, %v1881_v27 }
 0x3c2   : > { %v1993_v29 = vpop.permute.xlu1 %1992 }
 0x3c3   : > { %2288 = vmatprep.subr.bf16.mxu0 %v1897_v51  ;;  %v2008_v28 = vsel %vm910_vm7, %v1977_v33, %v1993_v29  ;;  %v2016_v0 = vsel %vm910_vm7, %v1993_v29, %v1977_v33 }
 0x3c4   : > { %2289 = vmatpush2.bf16.msra.mxu0 %v1896_v19  ;;  %v2024_v59 = vmul.f32 %v2008_v28, %v13470_v16  ;;  %v2025_v8 = vmul.f32 %v2016_v0, %v13469_v15 }
 0x3c5   : > { %v1995_v14 = vpop.permute.xlu0 %1994 }
 0x3c6   : > { %v2009_v57 = vsel %vm910_vm7, %v1979_v1, %v1995_v14  ;;  %v2017_v54 = vsel %vm910_vm7, %v1995_v14, %v1979_v1 }
 0x3c7   : > { %v2026_v13 = vmul.f32 %v2009_v57, %v13470_v16  ;;  %v2027_v22 = vmul.f32 %v2017_v54, %v13469_v15  ;;  %2291 = vmatmul.mubr.bf16.vlgmr.msra.gmra.mxu0 %v6372_v25 }
 0x3c8   : > { %2300 = vmatprep.mubr.bf16.mxu0 %v6375_v7 }
 0x3c9   : > { %v2040_v20 = vpack.c.bf16 %v2026_v13, %v2024_v59  ;;  %v2041_v58 = vpack.c.bf16 %v2027_v22, %v2025_v8 }
 0x3cb   : > { %2345 = vmatprep.subr.bf16.mxu1 %v2041_v58 }
 0x3cc   : > { %2346 = vmatpush1.bf16.msra.mxu1 %v2040_v20 }
 0x3ce   : > { %v8839_v34 = vpop.permute.xlu1 %2445 }
 0x3cf   : > { %2301 = vmatmul.mubr.bf16.gmra.mxu0 %v6377_v5  ;;  %6089 = vmatmul.mubr.msk.bf16.vlgmr.msra.gmra.mxu1 %vm1088_vm8, %v6378_v37 }
 0x3d0   : > { %2373 = vmatprep.mubr.bf16.mxu1 %v13471_v6  ;;  %2310 = vmatprep.mubr.bf16.mxu0 %v6379_v60 }
 0x3d2   : > { %v8845_v41 = vpop.permute.xlu0 %2450  ;;  %v8849_v23 = vpop.permute.xlu1 %2510 }
 0x3d6   : > { %v8853_v3 = vpop.permute.xlu0 %2515  ;;  %v8855_v53 = vpop.permute.xlu1 %2435 }
 0x3d7   : > { %2311 = vmatmul.mubr.bf16.gmra.mxu0 %v6381_v52  ;;  %6090 = vmatmul.mubr.msk.bf16.gmra.mxu1 %vm1088_vm8, %v6382_v31 }
 0x3d8   : > { %2383 = vmatprep.mubr.bf16.mxu1 %v13471_v6  ;;  %2320 = vmatprep.mubr.bf16.mxu0 %v6383_v12 }
 0x3da   : > { %v8859_v56 = vpop.permute.xlu0 %2440  ;;  %v8863_v35 = vpop.permute.xlu1 %2500 }
 0x3de   : > { %v8867_v19 = vpop.permute.xlu0 %2505  ;;  %v8869_v1 = vpop.permute.xlu1 %2425 }
 0x3df   : > { %2321 = vmatmul.mubr.bf16.gmra.mxu0 %v6385_v50  ;;  %6091 = vmatmul.mubr.msk.bf16.gmra.mxu1 %vm1088_vm8, %v6386_v10 }
 0x3e0   : > { %2393 = vmatprep.mubr.bf16.mxu1 %v13471_v6  ;;  %3303 = vmatprep.mubr.bf16.mxu0 %v6390_v26 }
 0x3e2   : > { %v8873_v29 = vpop.permute.xlu0 %2430  ;;  %v8877_v28 = vpop.permute.xlu1 %2490 }
 0x3e6   : > { %v8881_v14 = vpop.permute.xlu0 %2495 }
 0x3e7   : > { %6092 = vmatmul.mubr.msk.bf16.gmra.mxu1 %vm1088_vm8, %v6387_v2  ;;  %v2416_v54 = vpop.permute.xlu1 %2415 }
 0x3ea   : > { %v2421_v58 = vpop.permute.xlu0 %2420 }
 0x3eb   : > { %v2481_v52 = vpop.permute.xlu1 %2480 }
 0x3ef   : > { %v2486_v21 = vpop.permute.xlu0 %2485 }
 0x463   : > { %v2219_v17 = vpop.f32.mrf.mxu1 }
 0x465   : > { %v2221_v49 = vpop.f32.mrf.mxu1 }
 0x467   : > { %v2223_v11 = vpop.f32.mrf.mxu1 }
 0x469   : > { %v2225_v40 = vpop.f32.mrf.mxu1 }
 0x46b   : > { %v8837_v55 = vpop.f32.mrf.mxu1 }
 0x46d   : > { %v8841_v48 = vpop.f32.mrf.mxu1 }
 0x46f   : > { %v8843_v39 = vpop.f32.mrf.mxu1 }
 0x471   : > { %v8847_v44 = vpop.f32.mrf.mxu1 }
 0x473   : > { %v8851_v32 = vpop.f32.mrf.mxu1 }
 0x475   : > { %v8857_v33 = vpop.f32.mrf.mxu1 }
 0x477   : > { %v8861_v27 = vpop.f32.mrf.mxu1 }
 0x479   : > { %v8865_v47 = vpop.f32.mrf.mxu1 }
 0x47b   : > { %v8871_v51 = vpop.f32.mrf.mxu1 }
 0x47d   : > { %v8875_v25 = vpop.f32.mrf.mxu1 }
 0x47f   : > { %v8879_v7 = vpop.f32.mrf.mxu1 }
 0x481   : > { %v8883_v59 = vpop.f32.mrf.mxu1 }
 0x487   : > { %v2292_v0 = vpop.f32.mrf.mxu0 }
 0x488   : > { %v2293_v8 = vadd.f32 %v2292_v0, %v2219_v17 }
 0x489   : > { %v2294_v57 = vpop.f32.mrf.mxu0 }
 0x48a   : > { %v2295_v0 = vadd.f32 %v2294_v57, %v2221_v49 }
 0x48b   : > { %v2296_v13 = vpop.f32.mrf.mxu0 }
 0x48c   : > { %v2297_v37 = vadd.f32 %v2296_v13, %v2223_v11 }
 0x48d   : > { %v2298_v11 = vpop.f32.mrf.mxu0 }
 0x48f   : > { %v2365_v22 = vpop.f32.mrf.mxu1 }
 0x490   : > { %v2366_v20 = vadd.f32 %v2365_v22, %v2293_v8  ;;  %v2299_v22 = vadd.f32 %v2298_v11, %v2225_v40  ;;  %v2302_v40 = vpop.f32.mrf.mxu0 }
 0x491   : > { %v2367_v5 = vpop.f32.mrf.mxu1 }
 0x492   : > { %v2453_v60 = vmul.f32 %v2416_v54, %v2366_v20  ;;  %v2368_v8 = vadd.f32 %v2367_v5, %v2295_v0 }
 0x493   : > { %v2369_v31 = vpop.f32.mrf.mxu1 }
 0x494   : > { %v2518_v12 = vadd.f32 %v2481_v52, %v2453_v60  ;;  %v2370_v50 = vadd.f32 %v2369_v31, %v2297_v37  ;;  %v2303_v31 = vadd.f32 %v2302_v40, %v8837_v55 }
 0x495   : > { %v2371_v13 = vpop.f32.mrf.mxu1 }
 0x496   : > { %v8885_v10 = vmax.f32 %v2518_v12, 0.0  ;;  %v2455_v2 = vmul.f32 %v2421_v58, %v2370_v50  ;;  %v2372_v20 = vadd.f32 %v2371_v13, %v2299_v22 }
 0x497   : > { %v2375_v60 = vpop.f32.mrf.mxu1 }
 0x498   : > { %13472 = vst [vmem:[#allocation32_spill] sm:$0xff] %v8885_v10  ;;  %v2520_v30 = vadd.f32 %v2486_v21, %v2455_v2  ;;  %2622 = vrot.lane.b32.xlu1 %v8885_v10, %s6485_s27  ;;  %v2456_v49 = vmul.f32 %v2421_v58, %v2372_v20 }
 0x49a   : > { %v8889_v17 = vmax.f32 %v2520_v30, 0.0  ;;  %v2454_v30 = vmul.f32 %v2416_v54, %v2368_v8  ;;  %v2521_v5 = vadd.f32 %v2486_v21, %v2456_v49  ;;  %v2304_v54 = vpop.f32.mrf.mxu0  ;;  %v2376_v21 = vadd.f32 %v2375_v60, %v2303_v31 }
 0x49b   : > { %v2305_v20 = vadd.f32 %v2304_v54, %v8841_v48 }
 0x49c   : > { %13473 = vst [vmem:[#allocation62_spill] sm:$0xff] %v8889_v17  ;;  %2624 = vrot.lane.b32.xlu0 %v8889_v17, %s6485_s27  ;;  %2550 = vrot.lane.b32.xlu1 %v8885_v10, %s6486_s28  ;;  %v2519_v57 = vadd.f32 %v2481_v52, %v2454_v30  ;;  %v8913_v58 = vmax.f32 %v2521_v5, 0.0  ;;  %v2377_v52 = vpop.f32.mrf.mxu1  ;;  %v2306_v12 = vpop.f32.mrf.mxu0  ;;  %v2457_v11 = vmul.f32 %v8869_v1, %v2376_v21 }
 0x49d   : > { %v2307_v2 = vadd.f32 %v2306_v12, %v8843_v39  ;;  %v2378_v49 = vadd.f32 %v2377_v52, %v2305_v20 }
 0x49e   : > { %v8907_v37 = vmax.f32 %v2519_v57, 0.0  ;;  %13475 = vst [vmem:[#allocation44_spill] sm:$0xff] %v8913_v58  ;;  %v2379_v50 = vpop.f32.mrf.mxu1  ;;  %v2522_v8 = vadd.f32 %v8877_v28, %v2457_v11  ;;  %v2308_v30 = vpop.f32.mrf.mxu0 }
 0x49f   : > { %v2380_v0 = vadd.f32 %v2379_v50, %v2307_v2  ;;  %v2309_v40 = vadd.f32 %v2308_v30, %v8847_v44  ;;  %v2458_v60 = vmul.f32 %v8869_v1, %v2378_v49 }
 0x4a0   : > { %2552 = vrot.lane.b32.xlu0 %v8889_v17, %s6486_s28  ;;  %2846 = vrot.lane.b32.xlu1 %v8885_v10, %s6487_s29  ;;  %13474 = vst [vmem:[#allocation37_spill] sm:$0xff] %v8907_v37  ;;  %v8937_v13 = vmax.f32 %v2522_v8, 0.0  ;;  %v2381_v57 = vpop.f32.mrf.mxu1  ;;  %v2312_v1 = vpop.f32.mrf.mxu0 }
 0x4a1   : > { %v2459_v55 = vmul.f32 %v8873_v29, %v2380_v0  ;;  %v2382_v5 = vadd.f32 %v2381_v57, %v2309_v40  ;;  %v2523_v54 = vadd.f32 %v8877_v28, %v2458_v60  ;;  %v2313_v12 = vadd.f32 %v2312_v1, %v8851_v32 }
 0x4a2   : > { %13476 = vst [vmem:[#allocation61_spill] sm:$0xff] %v8937_v13  ;;  %v2385_v28 = vpop.f32.mrf.mxu1  ;;  %v2314_v31 = vpop.f32.mrf.mxu0 }
 0x4a3   : > { %v2524_v39 = vadd.f32 %v8881_v14, %v2459_v55  ;;  %v2460_v48 = vmul.f32 %v8873_v29, %v2382_v5  ;;  %v8971_v52 = vmax.f32 %v2523_v54, 0.0  ;;  %v2386_v50 = vadd.f32 %v2385_v28, %v2313_v12 }
 0x4a4   : > { %2848 = vrot.lane.b32.xlu0 %v8889_v17, %s6487_s29  ;;  %2766 = vrot.lane.b32.xlu1 %v8885_v10, %s6488_s30  ;;  %v2316_v21 = vpop.f32.mrf.mxu0  ;;  %v2315_v30 = vadd.f32 %v2314_v31, %v8857_v33 }
 0x4a5   : > { %v8943_v22 = vmax.f32 %v2524_v39, 0.0  ;;  %v2525_v44 = vadd.f32 %v8881_v14, %v2460_v48  ;;  %13478 = vst [vmem:[#allocation50_spill] sm:$0xff] %v8971_v52  ;;  %v2387_v14 = vpop.f32.mrf.mxu1  ;;  %v2317_v0 = vadd.f32 %v2316_v21, %v8861_v27  ;;  %v2461_v55 = vmul.f32 %v8855_v53, %v2386_v50 }
 0x4a6   : > { %v2318_v49 = vpop.f32.mrf.mxu0  ;;  %v2388_v57 = vadd.f32 %v2387_v14, %v2315_v30 }
 0x4a7   : > { %13477 = vst [vmem:[#allocation56_spill] sm:$0xff] %v8943_v22  ;;  %v8977_v29 = vmax.f32 %v2525_v44, 0.0  ;;  %v2389_v2 = vpop.f32.mrf.mxu1  ;;  %v2526_v8 = vadd.f32 %v8863_v35, %v2461_v55  ;;  %v2319_v5 = vadd.f32 %v2318_v49, %v8865_v47 }
 0x4a8   : > { %2768 = vrot.lane.b32.xlu0 %v8889_v17, %s6488_s30  ;;  %2694 = vrot.lane.b32.xlu1 %v8885_v10, %s6489_s9  ;;  %v2390_v11 = vadd.f32 %v2389_v2, %v2317_v0  ;;  %v2462_v48 = vmul.f32 %v8855_v53, %v2388_v57  ;;  %v2322_v53 = vpop.f32.mrf.mxu0 }
 0x4a9   : > { %13479 = vst [vmem:[#allocation55_spill] sm:$0xff] %v8977_v29  ;;  %v9005_v39 = vmax.f32 %v2526_v8, 0.0  ;;  %v2391_v40 = vpop.f32.mrf.mxu1  ;;  %v2323_v12 = vadd.f32 %v2322_v53, %v8871_v51 }
 0x4aa   : > { %v2463_v32 = vmul.f32 %v8859_v56, %v2390_v11  ;;  %v2392_v60 = vadd.f32 %v2391_v40, %v2319_v5  ;;  %v2527_v54 = vadd.f32 %v8863_v35, %v2462_v48  ;;  %v2324_v28 = vpop.f32.mrf.mxu0 }
 0x4ab   : > { %13480 = vst [vmem:[#allocation49_spill] sm:$0xff] %v9005_v39  ;;  %v2395_v1 = vpop.f32.mrf.mxu1 }
 0x4ac   : > { %2696 = vrot.lane.b32.xlu0 %v8889_v17, %s6489_s9  ;;  %2638 = vrot.lane.b32.xlu1 %v8907_v37, %s6485_s27  ;;  %v2528_v27 = vadd.f32 %v8867_v19, %v2463_v32  ;;  %v2464_v33 = vmul.f32 %v8859_v56, %v2392_v60  ;;  %v9039_v44 = vmax.f32 %v2527_v54, 0.0  ;;  %v2326_v21 = vpop.f32.mrf.mxu0  ;;  %v2396_v2 = vadd.f32 %v2395_v1, %v2323_v12 }
 0x4ad   : > { %v2397_v31 = vpop.f32.mrf.mxu1  ;;  %v2327_v55 = vadd.f32 %v2326_v21, %v8879_v7  ;;  %v2325_v12 = vadd.f32 %v2324_v28, %v8875_v25 }
 0x4ae   : > { %v9011_v20 = vmax.f32 %v2528_v27, 0.0  ;;  %v2529_v47 = vadd.f32 %v8867_v19, %v2464_v33  ;;  %13482 = vst [vmem:[#allocation36_spill] sm:$0xff] %v9039_v44  ;;  %v2465_v8 = vmul.f32 %v8839_v34, %v2396_v2  ;;  %v2328_v21 = vpop.f32.mrf.mxu0 }
 0x4af   : > { %v2399_v0 = vpop.f32.mrf.mxu1 }
 0x4b0   : > { %2640 = vrot.lane.b32.xlu0 %v8913_v58, %s6485_s27  ;;  %2566 = vrot.lane.b32.xlu1 %v8907_v37, %s6486_s28  ;;  %13481 = vst [vmem:[#allocation43_spill] sm:$0xff] %v9011_v20  ;;  %v9045_v56 = vmax.f32 %v2529_v47, 0.0  ;;  %v2400_v32 = vadd.f32 %v2399_v0, %v2327_v55  ;;  %v2530_v49 = vadd.f32 %v8849_v23, %v2465_v8 }
 0x4b1   : > { %v2398_v0 = vadd.f32 %v2397_v31, %v2325_v12  ;;  %v2401_v55 = vpop.f32.mrf.mxu1  ;;  %v2329_v8 = vadd.f32 %v2328_v21, %v8883_v59 }
 0x4b2   : > { %13483 = vst [vmem:[#allocation42_spill] sm:$0xff] %v9045_v56  ;;  %v2467_v7 = vmul.f32 %v8845_v41, %v2400_v32  ;;  %v9093_v60 = vmax.f32 %v2530_v49, 0.0 }
 0x4b3   : > { %v2466_v28 = vmul.f32 %v8839_v34, %v2398_v0 }
 0x4b4   : > { %2568 = vrot.lane.b32.xlu0 %v8913_v58, %s6486_s28  ;;  %2862 = vrot.lane.b32.xlu1 %v8907_v37, %s6487_s29  ;;  %v2532_v40 = vadd.f32 %v8853_v3, %v2467_v7  ;;  %13488 = vst [vmem:[#allocation46_spill] sm:$0xff] %v9093_v60  ;;  %v2402_v7 = vadd.f32 %v2401_v55, %v2329_v8 }
 0x4b6   : > { %v9101_v33 = vmax.f32 %v2532_v40, 0.0  ;;  %v2468_v59 = vmul.f32 %v8845_v41, %v2402_v7  ;;  %v2531_v40 = vadd.f32 %v8849_v23, %v2466_v28 }
 0x4b8   : > { %2864 = vrot.lane.b32.xlu0 %v8913_v58, %s6487_s29  ;;  %2782 = vrot.lane.b32.xlu1 %v8907_v37, %s6488_s30  ;;  %13489 = vst [vmem:[#allocation64_spill] sm:$0xff] %v9101_v33  ;;  %v2533_v34 = vadd.f32 %v8853_v3, %v2468_v59  ;;  %v9151_v0 = vmax.f32 %v2531_v40, 0.0 }
 0x4ba   : > { %13494 = vst [vmem:[#allocation63_spill] sm:$0xff] %v9151_v0  ;;  %v9159_v41 = vmax.f32 %v2533_v34, 0.0 }
 0x4bc   : > { %2784 = vrot.lane.b32.xlu0 %v8913_v58, %s6488_s30  ;;  %2710 = vrot.lane.b32.xlu1 %v8907_v37, %s6489_s9  ;;  %13495 = vst [vmem:[#allocation58_spill] sm:$0xff] %v9159_v41 }
 0x4c0   : > { %2712 = vrot.lane.b32.xlu0 %v8913_v58, %s6489_s9  ;;  %2626 = vrot.lane.b32.xlu1 %v8937_v13, %s6485_s27 }
 0x4c4   : > { %2628 = vrot.lane.b32.xlu0 %v8943_v22, %s6485_s27  ;;  %2554 = vrot.lane.b32.xlu1 %v8937_v13, %s6486_s28 }
 0x4c8   : > { %2556 = vrot.lane.b32.xlu0 %v8943_v22, %s6486_s28  ;;  %2850 = vrot.lane.b32.xlu1 %v8937_v13, %s6487_s29 }
 0x4cc   : > { %2852 = vrot.lane.b32.xlu0 %v8943_v22, %s6487_s29  ;;  %2770 = vrot.lane.b32.xlu1 %v8937_v13, %s6488_s30 }
 0x4d0   : > { %2772 = vrot.lane.b32.xlu0 %v8943_v22, %s6488_s30  ;;  %2698 = vrot.lane.b32.xlu1 %v8937_v13, %s6489_s9 }
 0x4d4   : > { %2700 = vrot.lane.b32.xlu0 %v8943_v22, %s6489_s9  ;;  %2994 = vrot.lane.b32.xlu1 %v8937_v13, %s6490_s12 }
 0x4d8   : > { %2996 = vrot.lane.b32.xlu0 %v8943_v22, %s6490_s12  ;;  %2642 = vrot.lane.b32.xlu1 %v8971_v52, %s6485_s27 }
 0x4dc   : > { %2644 = vrot.lane.b32.xlu0 %v8977_v29, %s6485_s27  ;;  %2570 = vrot.lane.b32.xlu1 %v8971_v52, %s6486_s28 }
 0x4e0   : > { %2572 = vrot.lane.b32.xlu0 %v8977_v29, %s6486_s28  ;;  %2866 = vrot.lane.b32.xlu1 %v8971_v52, %s6487_s29 }
 0x4e4   : > { %2868 = vrot.lane.b32.xlu0 %v8977_v29, %s6487_s29  ;;  %2786 = vrot.lane.b32.xlu1 %v8971_v52, %s6488_s30 }
 0x4e8   : > { %2788 = vrot.lane.b32.xlu0 %v8977_v29, %s6488_s30  ;;  %2714 = vrot.lane.b32.xlu1 %v8971_v52, %s6489_s9 }
 0x4ec   : > { %2716 = vrot.lane.b32.xlu0 %v8977_v29, %s6489_s9  ;;  %3010 = vrot.lane.b32.xlu1 %v8971_v52, %s6490_s12 }
 0x4f0   : > { %3012 = vrot.lane.b32.xlu0 %v8977_v29, %s6490_s12  ;;  %2630 = vrot.lane.b32.xlu1 %v9005_v39, %s6485_s27 }
 0x4f4   : > { %2632 = vrot.lane.b32.xlu0 %v9011_v20, %s6485_s27  ;;  %2558 = vrot.lane.b32.xlu1 %v9005_v39, %s6486_s28 }
 0x4f8   : > { %2560 = vrot.lane.b32.xlu0 %v9011_v20, %s6486_s28  ;;  %2854 = vrot.lane.b32.xlu1 %v9005_v39, %s6487_s29 }
 0x4fc   : > { %2856 = vrot.lane.b32.xlu0 %v9011_v20, %s6487_s29  ;;  %2774 = vrot.lane.b32.xlu1 %v9005_v39, %s6488_s30 }
 0x500   : > { %2776 = vrot.lane.b32.xlu0 %v9011_v20, %s6488_s30  ;;  %2702 = vrot.lane.b32.xlu1 %v9005_v39, %s6489_s9 }
 0x504   : > { %2704 = vrot.lane.b32.xlu0 %v9011_v20, %s6489_s9  ;;  %2998 = vrot.lane.b32.xlu1 %v9005_v39, %s6490_s12 }
 0x508   : > { %3000 = vrot.lane.b32.xlu0 %v9011_v20, %s6490_s12  ;;  %2646 = vrot.lane.b32.xlu1 %v9039_v44, %s6485_s27 }
 0x50a   : > { %v9047_v35 = vpop.permute.xlu1 %2622 }
 0x50c   : > { %2648 = vrot.lane.b32.xlu0 %v9045_v56, %s6485_s27  ;;  %2574 = vrot.lane.b32.xlu1 %v9039_v44, %s6486_s28 }
 0x50e   : > { %v9053_v19 = vpop.permute.xlu0 %2624  ;;  %v9055_v14 = vpop.permute.xlu1 %2550 }
 0x510   : > { %2576 = vrot.lane.b32.xlu0 %v9045_v56, %s6486_s28  ;;  %2870 = vrot.lane.b32.xlu1 %v9039_v44, %s6487_s29 }
 0x512   : > { %v9062_v50 = vpop.permute.xlu0 %2552  ;;  %v9064_v11 = vpop.permute.xlu1 %2846 }
 0x514   : > { %2872 = vrot.lane.b32.xlu0 %v9045_v56, %s6487_s29  ;;  %2790 = vrot.lane.b32.xlu1 %v9039_v44, %s6488_s30 }
 0x516   : > { %v9071_v51 = vpop.permute.xlu0 %2848  ;;  %v9074_v27 = vpop.permute.xlu1 %2766 }
 0x517   : > { %13484 = vst [vmem:[#allocation35_spill] sm:$0xff] %v9074_v27 }
 0x518   : > { %2792 = vrot.lane.b32.xlu0 %v9045_v56, %s6488_s30  ;;  %2718 = vrot.lane.b32.xlu1 %v9039_v44, %s6489_s9 }
 0x51a   : > { %v9081_v30 = vpop.permute.xlu0 %2768  ;;  %v9084_v57 = vpop.permute.xlu1 %2694 }
 0x51b   : > { %13485 = vst [vmem:[#allocation33_spill] sm:$0xff] %v9081_v30  ;;  %13486 = vst [vmem:[#allocation28_spill] sm:$0xff] %v9084_v57 }
 0x51c   : > { %2720 = vrot.lane.b32.xlu0 %v9045_v56, %s6489_s9  ;;  %3014 = vrot.lane.b32.xlu1 %v9039_v44, %s6490_s12 }
 0x51e   : > { %v9091_v5 = vpop.permute.xlu0 %2696  ;;  %v9095_v48 = vpop.permute.xlu1 %2638 }
 0x51f   : > { %13487 = vst [vmem:[#allocation39_spill] sm:$0xff] %v9091_v5 }
 0x520   : > { %3016 = vrot.lane.b32.xlu0 %v9045_v56, %s6490_s12  ;;  %2634 = vrot.lane.b32.xlu1 %v9093_v60, %s6485_s27 }
 0x522   : > { %v9103_v54 = vpop.permute.xlu0 %2640  ;;  %v9105_v47 = vpop.permute.xlu1 %2566 }
 0x524   : > { %2636 = vrot.lane.b32.xlu0 %v9101_v33, %s6485_s27  ;;  %2562 = vrot.lane.b32.xlu1 %v9093_v60, %s6486_s28 }
 0x526   : > { %v9111_v53 = vpop.permute.xlu0 %2568  ;;  %v9113_v1 = vpop.permute.xlu1 %2862 }
 0x528   : > { %2564 = vrot.lane.b32.xlu0 %v9101_v33, %s6486_s28  ;;  %2858 = vrot.lane.b32.xlu1 %v9093_v60, %s6487_s29 }
 0x52a   : > { %v9120_v2 = vpop.permute.xlu0 %2864  ;;  %v9122_v32 = vpop.permute.xlu1 %2782 }
 0x52b   : > { %13490 = vst [vmem:[#allocation45_spill] sm:$0xff] %v9122_v32 }
 0x52c   : > { %2860 = vrot.lane.b32.xlu0 %v9101_v33, %s6487_s29  ;;  %2778 = vrot.lane.b32.xlu1 %v9093_v60, %s6488_s30 }
 0x52e   : > { %v9129_v25 = vpop.permute.xlu0 %2784  ;;  %v9132_v49 = vpop.permute.xlu1 %2710 }
 0x52f   : > { %13491 = vst [vmem:[#allocation38_spill] sm:$0xff] %v9129_v25  ;;  %13492 = vst [vmem:[#allocation34_spill] sm:$0xff] %v9132_v49  ;;  %v6162_v25 = vld [vmem:[%s13030_s2 + $0xa8] sm:$0xff] }
 0x530   : > { %2780 = vrot.lane.b32.xlu0 %v9101_v33, %s6488_s30  ;;  %2706 = vrot.lane.b32.xlu1 %v9093_v60, %s6489_s9 }
 0x532   : > { %v9139_v31 = vpop.permute.xlu0 %2712  ;;  %v9142_v12 = vpop.permute.xlu1 %2626 }
 0x533   : > { %13493 = vst [vmem:[#allocation29_spill] sm:$0xff] %v9139_v31 }
 0x534   : > { %2708 = vrot.lane.b32.xlu0 %v9101_v33, %s6489_s9  ;;  %3002 = vrot.lane.b32.xlu1 %v9093_v60, %s6490_s12 }
 0x536   : > { %v9149_v21 = vpop.permute.xlu0 %2628  ;;  %v9153_v55 = vpop.permute.xlu1 %2554 }
 0x538   : > { %3004 = vrot.lane.b32.xlu0 %v9101_v33, %s6490_s12  ;;  %2650 = vrot.lane.b32.xlu1 %v9151_v0, %s6485_s27 }
 0x53a   : > { %v9161_v23 = vpop.permute.xlu0 %2556  ;;  %v9163_v8 = vpop.permute.xlu1 %2850 }
 0x53c   : > { %2652 = vrot.lane.b32.xlu0 %v9159_v41, %s6485_s27  ;;  %2990 = vrot.lane.b32.xlu1 %v8885_v10, %s6490_s12 }
 0x53e   : > { %v9169_v3 = vpop.permute.xlu0 %2852  ;;  %v9171_v7 = vpop.permute.xlu1 %2770 }
 0x53f   : > { %13496 = vst [vmem:[#allocation52_spill] sm:$0xff] %v9171_v7 }
 0x540   : > { %2992 = vrot.lane.b32.xlu0 %v8889_v17, %s6490_s12  ;;  %2578 = vrot.lane.b32.xlu1 %v9151_v0, %s6486_s28 }
 0x542   : > { %v9177_v28 = vpop.permute.xlu0 %2772  ;;  %v9179_v59 = vpop.permute.xlu1 %2698 }
 0x543   : > { %13497 = vst [vmem:[#allocation47_spill] sm:$0xff] %v9177_v28  ;;  %13498 = vst [vmem:[#allocation40_spill] sm:$0xff] %v9179_v59 }
 0x544   : > { %3008 = vrot.lane.b32.xlu0 %v8913_v58, %s6490_s12  ;;  %2874 = vrot.lane.b32.xlu1 %v9151_v0, %s6487_s29 }
 0x546   : > { %v9185_v40 = vpop.permute.xlu0 %2700  ;;  %v9187_v34 = vpop.permute.xlu1 %2994 }
 0x547   : > { %13499 = vst [vmem:[#allocation48_spill] sm:$0xff] %v9185_v40  ;;  %13500 = vst [vmem:[#allocation41_spill] sm:$0xff] %v9187_v34 }
 0x548   : > { %2932 = vrot.lane.b32.xlu0 %v9101_v33, %s6491_s17  ;;  %2794 = vrot.lane.b32.xlu1 %v9151_v0, %s6488_s30 }
 0x54a   : > { %v9193_v6 = vpop.permute.xlu0 %2996  ;;  %v9195_v15 = vpop.permute.xlu1 %2642 }
 0x54b   : > { %13501 = vst [vmem:[#allocation57_spill] sm:$0xff] %v9193_v6 }
 0x54c   : > { %2580 = vrot.lane.b32.xlu0 %v9159_v41, %s6486_s28  ;;  %2722 = vrot.lane.b32.xlu1 %v9151_v0, %s6489_s9 }
 0x54e   : > { %v9201_v16 = vpop.permute.xlu0 %2644  ;;  %v9203_v38 = vpop.permute.xlu1 %2570 }
 0x550   : > { %3076 = vrot.lane.b32.xlu0 %v9101_v33, %s6492_s20  ;;  %3018 = vrot.lane.b32.xlu1 %v9151_v0, %s6490_s12 }
 0x552   : > { %v9209_v9 = vpop.permute.xlu0 %2572  ;;  %v9211_v34 = vpop.permute.xlu1 %2866 }
 0x554   : > { %2928 = vrot.lane.b32.xlu0 %v9011_v20, %s6491_s17  ;;  %3006 = vrot.lane.b32.xlu1 %v8907_v37, %s6490_s12 }
 0x556   : > { %v9217_v6 = vpop.permute.xlu0 %2868  ;;  %v9219_v45 = vpop.permute.xlu1 %2786 }
 0x557   : > { %13502 = vst [vmem:[#allocation51_spill] sm:$0xff] %v9219_v45  ;;  %v6170_v45 = vld [vmem:[%s13031_s3 + $0xa8] sm:$0xff] }
 0x558   : > { %2876 = vrot.lane.b32.xlu0 %v9159_v41, %s6487_s29  ;;  %2930 = vrot.lane.b32.xlu1 %v9093_v60, %s6491_s17 }
 0x55a   : > { %v9225_v36 = vpop.permute.xlu0 %2788  ;;  %v9227_v57 = vpop.permute.xlu1 %2714 }
 0x55b   : > { %13503 = vst [vmem:[#allocation59_spill] sm:$0xff] %v9225_v36  ;;  %13504 = vst [vmem:[#allocation53_spill] sm:$0xff] %v9227_v57 }
 0x55c   : > { %2796 = vrot.lane.b32.xlu0 %v9159_v41, %s6488_s30  ;;  %2946 = vrot.lane.b32.xlu1 %v9151_v0, %s6491_s17 }
 0x55e   : > { %v9233_v49 = vpop.permute.xlu0 %2716  ;;  %v9235_v59 = vpop.permute.xlu1 %3010 }
 0x55f   : > { %13505 = vst [vmem:[#allocation67_spill] sm:$0xff] %v9233_v49  ;;  %13506 = vst [vmem:[#allocation60_spill] sm:$0xff] %v9235_v59 }
 0x560   : > { %2944 = vrot.lane.b32.xlu0 %v9045_v56, %s6491_s17  ;;  %3074 = vrot.lane.b32.xlu1 %v9093_v60, %s6492_s20 }
 0x562   : > { %v9241_v5 = vpop.permute.xlu0 %3012  ;;  %v9243_v31 = vpop.permute.xlu1 %2630 }
 0x563   : > { %13507 = vst [vmem:[#allocation54_spill] sm:$0xff] %v9241_v5 }
 0x564   : > { %3072 = vrot.lane.b32.xlu0 %v9011_v20, %s6492_s20  ;;  %3090 = vrot.lane.b32.xlu1 %v9151_v0, %s6492_s20 }
 0x566   : > { %v9249_v57 = vpop.permute.xlu0 %2632  ;;  %v9251_v40 = vpop.permute.xlu1 %2558 }
 0x568   : > { %3088 = vrot.lane.b32.xlu0 %v9045_v56, %s6492_s20  ;;  %2926 = vrot.lane.b32.xlu1 %v9005_v39, %s6491_s17 }
 0x56a   : > { %v9257_v59 = vpop.permute.xlu0 %2560  ;;  %v9259_v5 = vpop.permute.xlu1 %2854 }
 0x56c   : > { %2724 = vrot.lane.b32.xlu0 %v9159_v41, %s6489_s9  ;;  %2942 = vrot.lane.b32.xlu1 %v9039_v44, %s6491_s17 }
 0x56e   : > { %v9265_v20 = vpop.permute.xlu0 %2856  ;;  %v9267_v49 = vpop.permute.xlu1 %2774 }
 0x56f   : > { %13508 = vst [vmem:[#allocation66_spill] sm:$0xff] %v9267_v49  ;;  %v13526_v49 = vld [vmem:[#allocation3_spill] sm:$0xff] }
 0x570   : > { %2924 = vrot.lane.b32.xlu0 %v8943_v22, %s6491_s17  ;;  %3070 = vrot.lane.b32.xlu1 %v9005_v39, %s6492_s20 }
 0x572   : > { %v9273_v46 = vpop.permute.xlu0 %2776  ;;  %v9278_v33 = vpop.permute.xlu1 %2702 }
 0x573   : > { %13509 = vst [vmem:[#allocation65_spill] sm:$0xff] %v9273_v46  ;;  %13510 = vst [vmem:[#allocation68_spill] sm:$0xff] %v9278_v33 }
 0x574   : > { %2940 = vrot.lane.b32.xlu0 %v8977_v29, %s6491_s17  ;;  %3086 = vrot.lane.b32.xlu1 %v9039_v44, %s6492_s20 }
 0x576   : > { %v9284_v60 = vpop.permute.xlu0 %2704  ;;  %v9286_v56 = vpop.permute.xlu1 %2998 }
 0x577   : > { %13511 = vst [vmem:[#allocation69_spill] sm:$0xff] %v9284_v60  ;;  %13512 = vst [vmem:[#allocation70_spill] sm:$0xff] %v9286_v56  ;;  %v6402_v60 = vld [vmem:[%s13029_s1 + $0x14c] ss:$20 sps:$4 sm:$0xff]  }
 0x578   : > { %3020 = vrot.lane.b32.xlu0 %v9159_v41, %s6490_s12  ;;  %2922 = vrot.lane.b32.xlu1 %v8937_v13, %s6491_s17 }
 0x579   : > { %3376 = vmatprep.mubr.bf16.mxu1 %v6402_v60  ;;  %v6164_v60 = vld [vmem:[%s13030_s2 + $0xb8] sm:$0xff] }
 0x57a   : > { %v9292_v39 = vpop.permute.xlu0 %3000  ;;  %v9294_v33 = vpop.permute.xlu1 %2646 }
 0x57b   : > { %13513 = vst [vmem:[#allocation71_spill] sm:$0xff] %v9292_v39 }
 0x57c   : > { %3068 = vrot.lane.b32.xlu0 %v8943_v22, %s6492_s20  ;;  %2938 = vrot.lane.b32.xlu1 %v8971_v52, %s6491_s17 }
 0x57e   : > { %v9300_v26 = vpop.permute.xlu0 %2648  ;;  %v9302_v44 = vpop.permute.xlu1 %2574 }
 0x580   : > { %3084 = vrot.lane.b32.xlu0 %v8977_v29, %s6492_s20  ;;  %3066 = vrot.lane.b32.xlu1 %v8937_v13, %s6492_s20 }
 0x582   : > { %v9308_v56 = vpop.permute.xlu0 %2576  ;;  %v9310_v39 = vpop.permute.xlu1 %2870 }
 0x584   : > { %2920 = vrot.lane.b32.xlu0 %v8889_v17, %s6491_s17  ;;  %3082 = vrot.lane.b32.xlu1 %v8971_v52, %s6492_s20 }
 0x586   : > { %v9316_v22 = vpop.permute.xlu0 %2872  ;;  %v9318_v0 = vpop.permute.xlu1 %2790 }
 0x587   : > { %13514 = vst [vmem:[#allocation72_spill] sm:$0xff] %v9318_v0 }
 0x588   : > { %2948 = vrot.lane.b32.xlu0 %v9159_v41, %s6491_s17  ;;  %2918 = vrot.lane.b32.xlu1 %v8885_v10, %s6491_s17 }
 0x58a   : > { %v9324_v13 = vpop.permute.xlu0 %2792  ;;  %v9326_v29 = vpop.permute.xlu1 %2718 }
 0x58b   : > { %13515 = vst [vmem:[#allocation73_spill] sm:$0xff] %v9326_v29 }
 0x58c   : > { %3092 = vrot.lane.b32.xlu0 %v9159_v41, %s6492_s20  ;;  %2934 = vrot.lane.b32.xlu1 %v8907_v37, %s6491_s17 }
 0x58e   : > { %v9332_v52 = vpop.permute.xlu0 %2720  ;;  %v9337_v27 = vpop.permute.xlu1 %3014 }
 0x58f   : > { %13516 = vst [vmem:[#allocation74_spill] sm:$0xff] %v9332_v52  ;;  %13517 = vst [vmem:[#allocation75_spill] sm:$0xff] %v9337_v27  ;;  %v6163_v27 = vld [vmem:[%s13030_s2 + $0xb0] sm:$0xff] }
 0x590   : > { %2936 = vrot.lane.b32.xlu0 %v8913_v58, %s6491_s17  ;;  %3062 = vrot.lane.b32.xlu1 %v8885_v10, %s6492_s20  ;;  %v6172_v10 = vld [vmem:[%s13031_s3 + $0xb8] sm:$0xff] }
 0x592   : > { %v9343_v29 = vpop.permute.xlu0 %3016  ;;  %v2635_v41 = vpop.permute.xlu1 %2634 }
 0x593   : > { %13518 = vst [vmem:[#allocation76_spill] sm:$0xff] %v9343_v29 }
 0x594   : > { %3064 = vrot.lane.b32.xlu0 %v8889_v17, %s6492_s20  ;;  %3078 = vrot.lane.b32.xlu1 %v8907_v37, %s6492_s20  ;;  %v6171_v37 = vld [vmem:[%s13031_s3 + $0xb0] sm:$0xff] }
 0x596   : > { %v2637_v52 = vpop.permute.xlu0 %2636  ;;  %v9352_v32 = vpop.permute.xlu1 %2562 }
 0x598   : > { %3080 = vrot.lane.b32.xlu0 %v8913_v58, %s6492_s20  ;;  %3531 = vperm.xlu1 %6331, %v6163_v27   ;;  %v6161_v27 = vld [vmem:[%s13030_s2 + $0xa0] sm:$0xff] }
 0x59a   : > { %v9359_v29 = vpop.permute.xlu0 %2564  ;;  %v9364_v17 = vpop.permute.xlu1 %2858 }
 0x59c   : > { %3536 = vperm.xlu0 %6330, %v6164_v60   ;;  %3596 = vperm.xlu1 %6331, %v6171_v37   ;;  %v6169_v37 = vld [vmem:[%s13031_s3 + $0xa0] sm:$0xff] }
 0x59e   : > { %v9369_v58 = vpop.permute.xlu0 %2860  ;;  %v9374_v30 = vpop.permute.xlu1 %2778 }
 0x59f   : > { %13519 = vst [vmem:[#allocation77_spill] sm:$0xff] %v9369_v58  ;;  %13520 = vst [vmem:[#allocation78_spill] sm:$0xff] %v9374_v30 }
 0x5a0   : > { %3601 = vperm.xlu0 %6330, %v6172_v10   ;;  %3521 = vperm.xlu1 %6331, %v6161_v27   ;;  %v6159_v27 = vld [vmem:[%s13030_s2 + $0x90] sm:$0xff] }
 0x5a2   : > { %v9379_v60 = vpop.permute.xlu0 %2780  ;;  %v9384_v7 = vpop.permute.xlu1 %2706 }
 0x5a3   : > { %13521 = vst [vmem:[#allocation79_spill] sm:$0xff] %v9379_v60  ;;  %13522 = vst [vmem:[#allocation80_spill] sm:$0xff] %v9384_v7  ;;  %v6160_v7 = vld [vmem:[%s13030_s2 + $0x98] sm:$0xff] }
 0x5a4   : > { %3526 = vperm.xlu0 %6330, %v6162_v25   ;;  %3586 = vperm.xlu1 %6331, %v6169_v37   ;;  %v6167_v37 = vld [vmem:[%s13031_s3 + $0x90] sm:$0xff] }
 0x5a6   : > { %v9389_v10 = vpop.permute.xlu0 %2708  ;;  %v9394_v28 = vpop.permute.xlu1 %3002 }
 0x5a7   : > { %13523 = vst [vmem:[#allocation81_spill] sm:$0xff] %v9389_v10  ;;  %13524 = vst [vmem:[#allocation82_spill] sm:$0xff] %v9394_v28  ;;  %v2659_v10 = vsel %vm386_vm0, %v9249_v57, %v9300_v26  ;;  %v2658_v28 = vsel %vm386_vm0, %v9243_v31, %v9294_v33 }
 0x5a8   : > { %3591 = vperm.xlu0 %6330, %v6170_v45   ;;  %3511 = vperm.xlu1 %6331, %v6159_v27  }
 0x5aa   : > { %v9399_v25 = vpop.permute.xlu0 %3004  ;;  %v2651_v36 = vpop.permute.xlu1 %2650 }
 0x5ab   : > { %13525 = vst [vmem:[#allocation83_spill] sm:$0xff] %v9399_v25  ;;  %v2660_v45 = vsel %vm386_vm0, %v2635_v41, %v2651_v36  ;;  %v2668_v27 = vsel %vm386_vm0, %v2651_v36, %v2635_v41  ;;  %v6168_v25 = vld [vmem:[%s13031_s3 + $0x98] sm:$0xff]  ;;  %v2667_v36 = vsel %vm386_vm0, %v9300_v26, %v9249_v57  ;;  %v2681_v41 = vmul.f32 %v2659_v10, %v6727_v24 }
 0x5ac   : > { %3516 = vperm.xlu0 %6330, %v6160_v7   ;;  %3576 = vperm.xlu1 %6331, %v6167_v37   ;;  %v6157_v7 = vld [vmem:[%s13030_s2 + $0x80] sm:$0xff]  ;;  %v2682_v0 = vmul.f32 %v2668_v27, %v13526_v49  ;;  %v2683_v30 = vmul.f32 %v2660_v45, %v6727_v24  ;;  %v2657_v57 = vsel %vm386_vm0, %v9149_v21, %v9201_v16 }
 0x5ad   : > { %v2679_v26 = vmul.f32 %v2658_v28, %v6727_v24  ;;  %v2656_v27 = vsel %vm386_vm0, %v9142_v12, %v9195_v15 }
 0x5ae   : > { %v2653_v4 = vpop.permute.xlu0 %2652  ;;  %v9431_v61 = vpop.permute.xlu1 %2990 }
 0x5af   : > { %v2661_v37 = vsel %vm386_vm0, %v2637_v52, %v2653_v4  ;;  %v2669_v60 = vsel %vm386_vm0, %v2653_v4, %v2637_v52  ;;  %v6158_v4 = vld [vmem:[%s13030_s2 + $0x88] sm:$0xff]  ;;  %v2666_v52 = vsel %vm386_vm0, %v9294_v33, %v9243_v31  ;;  %v2677_v33 = vmul.f32 %v2657_v57, %v6727_v24 }
 0x5b0   : > { %v2684_v58 = vmul.f32 %v2669_v60, %v13526_v49  ;;  %v2685_v46 = vmul.f32 %v2661_v37, %v6727_v24  ;;  %3581 = vperm.xlu0 %6330, %v6168_v25   ;;  %3501 = vperm.xlu1 %6331, %v6157_v7   ;;  %v6165_v25 = vld [vmem:[%s13031_s3 + $0x80] sm:$0xff]  ;;  %v2680_v7 = vmul.f32 %v2667_v36, %v13526_v49 }
 0x5b1   : > { %v2691_v31 = vpack.c.bf16 %v2681_v41, %v2679_v26  ;;  %v2654_v36 = vsel %vm386_vm0, %v9047_v35, %v9095_v48  ;;  %v2663_v41 = vsel %vm386_vm0, %v9103_v54, %v9053_v19  ;;  %v2662_v26 = vsel %vm386_vm0, %v9095_v48, %v9047_v35 }
 0x5b2   : > { %v2692_v60 = vpack.c.bf16 %v2684_v58, %v2682_v0  ;;  %v9449_v10 = vpop.permute.xlu0 %2992  ;;  %v2693_v45 = vpack.c.bf16 %v2685_v46, %v2683_v30  ;;  %v2579_v37 = vpop.permute.xlu1 %2578  ;;  %v2665_v58 = vsel %vm386_vm0, %v9201_v16, %v9149_v21  ;;  %v2655_v46 = vsel %vm386_vm0, %v9053_v19, %v9103_v54  ;;  %v6166_v0 = vld [vmem:[%s13031_s3 + $0x88] sm:$0xff] }
 0x5b3   : > { %v2678_v30 = vmul.f32 %v2666_v52, %v13526_v49  ;;  %v2664_v16 = vsel %vm386_vm0, %v9195_v15, %v9142_v12  ;;  %v2675_v21 = vmul.f32 %v2656_v27, %v6727_v24  ;;  %v2676_v57 = vmul.f32 %v2665_v58, %v13526_v49 }
 0x5b4   : > { %3506 = vperm.xlu0 %6330, %v6158_v4   ;;  %3271 = vmatprep.subr.bf16.mxu0 %v2693_v45  ;;  %v2673_v15 = vmul.f32 %v2655_v46, %v6727_v24  ;;  %v2672_v19 = vmul.f32 %v2663_v41, %v13526_v49  ;;  %v2590_v54 = vsel %vm301_vm1, %v9105_v47, %v9055_v14 }
 0x5b5   : > { %3566 = vperm.xlu1 %6331, %v6165_v25   ;;  %3272 = vmatpush1.bf16.msra.mxu0 %v2692_v60  ;;  %v2690_v4 = vpack.c.bf16 %v2680_v7, %v2678_v30  ;;  %v2689_v12 = vpack.c.bf16 %v2677_v33, %v2675_v21  ;;  %v2674_v60 = vmul.f32 %v2664_v16, %v13526_v49 }
 0x5b6   : > { %v9477_v28 = vpop.permute.xlu0 %3008  ;;  %3273 = vmatprep.subr.bf16.mxu0 %v2691_v31  ;;  %v9488_v52 = vpop.permute.xlu1 %2874  ;;  %v2671_v25 = vmul.f32 %v2654_v36, %v6727_v24  ;;  %v2591_v35 = vsel %vm301_vm1, %v9111_v53, %v9062_v50  ;;  %v2670_v7 = vmul.f32 %v2662_v26, %v13526_v49  ;;  %v2587_v58 = vsel %vm301_vm1, %v9257_v59, %v9308_v56 }
 0x5b7   : > { %v2688_v48 = vpack.c.bf16 %v2676_v57, %v2674_v60  ;;  %v2582_v31 = vsel %vm301_vm1, %v9055_v14, %v9105_v47  ;;  %v9520_v46 = vmul.f32 %v2590_v54, %v6819_v42  ;;  %v2588_v30 = vsel %vm301_vm1, %v9352_v32, %v2579_v37 }
 0x5b8   : > { %3571 = vperm.xlu0 %6330, %v6166_v0   ;;  %v2687_v33 = vpack.c.bf16 %v2673_v15, %v2671_v25  ;;  %v2596_v0 = vsel %vm301_vm1, %v2579_v37, %v9352_v32  ;;  %v2686_v16 = vpack.c.bf16 %v2672_v19, %v2670_v7  ;;  %v2583_v21 = vsel %vm301_vm1, %v9062_v50, %v9111_v53 }
 0x5b9   : > { %3274 = vmatpush1.bf16.msra.mxu0 %v2690_v4  ;;  %v9533_v14 = vmul.f32 %v2591_v35, %v6819_v42  ;;  %v2586_v47 = vsel %vm301_vm1, %v9251_v40, %v9302_v44  ;;  %v2595_v32 = vsel %vm301_vm1, %v9308_v56, %v9257_v59  ;;  %v2609_v37 = vmul.f32 %v2587_v58, %v6822_v43 }
 0x5ba   : > { %v9502_v45 = vpop.permute.xlu0 %2932  ;;  %3275 = vmatprep.subr.bf16.mxu0 %v2689_v12  ;;  %v9508_v27 = vpop.permute.xlu1 %2794  ;;  %v2610_v57 = vmul.f32 %v2596_v0, %v6819_v42  ;;  %v2611_v4 = vmul.f32 %v2588_v30, %v6822_v43  ;;  %v9557_v59 = vmul.f32 %v2583_v21, %v6822_v43  ;;  %v2886_v12 = vsel %vm652_vm2, %v9113_v1, %v9064_v11 }
 0x5bb   : > { %v2593_v26 = vsel %vm301_vm1, %v9209_v9, %v9161_v23  ;;  %v2594_v60 = vsel %vm301_vm1, %v9302_v44, %v9251_v40  ;;  %v2607_v25 = vmul.f32 %v2586_v47, %v6822_v43  ;;  %v2879_v7 = vsel %vm652_vm2, %v9071_v51, %v9120_v2 }
 0x5bc   : > { %v2608_v44 = vmul.f32 %v2595_v32, %v6819_v42  ;;  %v9594_v40 = vsel %vm652_vm2, %v9064_v11, %v9113_v1  ;;  %v2592_v58 = vsel %vm301_vm1, %v9203_v38, %v9153_v55  ;;  %v9602_v30 = vmul.f32 %v2886_v12, %v6909_v62 }
 0x5bd   : > { %3276 = vmatpush1.bf16.msra.mxu0 %v2688_v48  ;;  %v2599_v48 = vmul.f32 %v2582_v31, %v6822_v43  ;;  %v2619_v31 = vpack.c.bf16 %v2609_v37, %v2607_v25  ;;  %v2887_v0 = vsel %vm652_vm2, %v9120_v2, %v9071_v51  ;;  %v2604_v11 = vmul.f32 %v2593_v26, %v6819_v42 }
 0x5be   : > { %v2581_v36 = vpop.permute.xlu0 %2580  ;;  %3277 = vmatprep.subr.bf16.mxu0 %v2687_v33  ;;  %v9550_v41 = vpop.permute.xlu1 %2722  ;;  %v2606_v1 = vmul.f32 %v2594_v60, %v6819_v42  ;;  %v2602_v51 = vmul.f32 %v2592_v58, %v6819_v42  ;;  %v2889_v2 = vsel %vm652_vm2, %v9217_v6, %v9169_v3  ;;  %v9631_v32 = vmul.f32 %v2887_v0, %v6909_v62 }
 0x5bf   : > { %v2589_v50 = vsel %vm301_vm1, %v9359_v29, %v2581_v36  ;;  %v2597_v53 = vsel %vm301_vm1, %v2581_v36, %v9359_v29  ;;  %v2585_v29 = vsel %vm301_vm1, %v9161_v23, %v9209_v9  ;;  %v2584_v9 = vsel %vm301_vm1, %v9153_v55, %v9203_v38 }
 0x5c0   : > { %v2612_v15 = vmul.f32 %v2597_v53, %v6819_v42  ;;  %v2613_v56 = vmul.f32 %v2589_v50, %v6822_v43  ;;  %v2605_v33 = vmul.f32 %v2585_v29, %v6822_v43  ;;  %v2614_v38 = vpack.c.bf16 %v9533_v14, %v9520_v46 }
 0x5c1   : > { %3278 = vmatpush1.bf16.msra.mxu0 %v2686_v16  ;;  %v9613_v55 = vmul.f32 %v2879_v7, %v6912_v63  ;;  %v2603_v16 = vmul.f32 %v2584_v9, %v6822_v43  ;;  %v2615_v47 = vpack.c.bf16 %v9557_v59, %v2599_v48  ;;  %v2618_v36 = vpack.c.bf16 %v2608_v44, %v2606_v1  ;;  %v13529_v9 = vld [vmem:[#allocation78_spill] sm:$0xff] }
 0x5c2   : > { %v2620_v19 = vpack.c.bf16 %v2612_v15, %v2610_v57  ;;  %v9576_v54 = vpop.permute.xlu0 %3076  ;;  %v2621_v35 = vpack.c.bf16 %v2613_v56, %v2611_v4  ;;  %v9588_v23 = vpop.permute.xlu1 %3018  ;;  %v2891_v46 = vsel %vm652_vm2, %v9316_v22, %v9265_v20  ;;  %v9637_v37 = vsel %vm652_vm2, %v9163_v8, %v9211_v34 }
 0x5c3   : > { %v2890_v50 = vsel %vm652_vm2, %v9310_v39, %v9259_v5  ;;  %v2617_v53 = vpack.c.bf16 %v2605_v33, %v2603_v16  ;;  %v2616_v57 = vpack.c.bf16 %v2604_v11, %v2602_v51  ;;  %v2888_v4 = vsel %vm652_vm2, %v9211_v34, %v9163_v8  ;;  %v13530_v33 = vld [vmem:[#allocation72_spill] sm:$0xff]  ;;  %v13532_v51 = vld [vmem:[#allocation5_spill] sm:$0xff] }
 0x5c4   : > { %3279 = vmatprep.subr.bf16.mxu0 %v2621_v35  ;;  %v2884_v15 = vsel %vm652_vm2, %v9364_v17, %v9488_v52  ;;  %v2892_v56 = vsel %vm652_vm2, %v9488_v52, %v9364_v17  ;;  %v2881_v59 = vsel %vm652_vm2, %v9169_v3, %v9217_v6  ;;  %v9660_v12 = vmul.f32 %v2889_v2, %v6909_v62  ;;  %v13527_v52 = vld [vmem:[#allocation65_spill] sm:$0xff] }
 0x5c5   : > { %3280 = vmatpush1.bf16.msra.mxu0 %v2620_v19  ;;  %v2883_v8 = vsel %vm652_vm2, %v9265_v20, %v9316_v22  ;;  %v2905_v34 = vmul.f32 %v2891_v46, %v6909_v62  ;;  %v2903_v17 = vmul.f32 %v2890_v50, %v6909_v62  ;;  %v2803_v26 = vsel %vm558_vm3, %v13527_v52, %v9324_v13  ;;  %v13528_v6 = vld [vmem:[#allocation77_spill] sm:$0xff] }
 0x5c6   : > { %v9616_v21 = vpop.permute.xlu0 %2928  ;;  %3281 = vmatprep.subr.bf16.mxu0 %v2619_v31  ;;  %v9628_v14 = vpop.permute.xlu1 %3006  ;;  %v2906_v20 = vmul.f32 %v2884_v15, %v6912_v63  ;;  %v2907_v25 = vmul.f32 %v2892_v56, %v6909_v62  ;;  %v2882_v48 = vsel %vm652_vm2, %v9259_v5, %v9310_v39  ;;  %v2904_v7 = vmul.f32 %v2883_v8, %v6912_v63  ;;  %v13531_v31 = vld [vmem:[#allocation66_spill] sm:$0xff]  ;;  %v13535_v8 = vld [vmem:[#allocation59_spill] sm:$0xff] }
 0x5c7   : > { %v2804_v44 = vsel %vm558_vm3, %v13529_v9, %v9508_v27  ;;  %v2812_v58 = vsel %vm558_vm3, %v9508_v27, %v13529_v9  ;;  %v2802_v0 = vsel %vm558_vm3, %v13531_v31, %v13530_v33  ;;  %v2915_v1 = vpack.c.bf16 %v2905_v34, %v2903_v17  ;;  %v13536_v34 = vld [vmem:[#allocation47_spill] sm:$0xff] }
 0x5c8   : > { %v2811_v16 = vsel %vm558_vm3, %v9324_v13, %v13527_v52  ;;  %v2825_v2 = vmul.f32 %v2803_v26, %v13532_v51  ;;  %v2899_v56 = vmul.f32 %v2888_v4, %v6909_v62  ;;  %v2902_v17 = vmul.f32 %v2882_v48, %v6912_v63 }
 0x5c9   : > { %3282 = vmatpush1.bf16.msra.mxu0 %v2618_v36  ;;  %v13533_v36 = vld [vmem:[#allocation79_spill] sm:$0xff]  ;;  %v2810_v52 = vsel %vm558_vm3, %v13530_v33, %v13531_v31  ;;  %v2823_v26 = vmul.f32 %v2802_v0, %v13532_v51  ;;  %v2809_v9 = vsel %vm558_vm3, %v13535_v8, %v13536_v34  ;;  %v13539_v33 = vld [vmem:[#allocation38_spill] sm:$0xff]  ;;  %v13540_v31 = vld [vmem:[#allocation33_spill] sm:$0xff]  ;;  %v2898_v0 = vmul.f32 %v9637_v37, %v6912_v63 }
 0x5ca   : > { %v2877_v29 = vpop.permute.xlu0 %2876  ;;  %3283 = vmatprep.subr.bf16.mxu0 %v2617_v53  ;;  %v9678_v22 = vpop.permute.xlu1 %2930  ;;  %v2807_v37 = vsel %vm558_vm3, %v13539_v33, %v13540_v31 }
 0x5cb   : > { %v2885_v3 = vsel %vm652_vm2, %v13528_v6, %v2877_v29  ;;  %v2893_v60 = vsel %vm652_vm2, %v2877_v29, %v13528_v6  ;;  %v2801_v29 = vsel %vm558_vm3, %v13536_v34, %v13535_v8 }
 0x5cc   : > { %v2908_v19 = vmul.f32 %v2885_v3, %v6912_v63  ;;  %v2909_v35 = vmul.f32 %v2893_v60, %v6909_v62  ;;  %v2900_v60 = vmul.f32 %v2881_v59, %v6912_v63  ;;  %v2913_v59 = vpack.c.bf16 %v9660_v12, %v2899_v56 }
 0x5cd   : > { %3284 = vmatpush1.bf16.msra.mxu0 %v2616_v57  ;;  %v2827_v57 = vmul.f32 %v2804_v44, %v13532_v51  ;;  %v2821_v44 = vmul.f32 %v2801_v29, %v13532_v51  ;;  %v2894_v56 = vmul.f32 %v9594_v40, %v6912_v63 }
 0x5ce   : > { %v2916_v11 = vpack.c.bf16 %v2908_v19, %v2906_v20  ;;  %v2797_v39 = vpop.permute.xlu0 %2796  ;;  %3285 = vmatprep.subr.bf16.mxu0 %v2615_v47  ;;  %v2917_v5 = vpack.c.bf16 %v2909_v35, %v2907_v25  ;;  %v9712_v50 = vpop.permute.xlu1 %2946  ;;  %v13534_v47 = vld [vmem:[#allocation4_spill] sm:$0xff]  ;;  %v13537_v20 = vld [vmem:[#allocation51_spill] sm:$0xff]  ;;  %v2914_v19 = vpack.c.bf16 %v2904_v7, %v2902_v17  ;;  %v2799_v7 = vsel %vm558_vm3, %v13540_v31, %v13539_v33  ;;  %v13550_v31 = vld [vmem:[#allocation73_spill] sm:$0xff] }
 0x5cf   : > { %v2805_v27 = vsel %vm558_vm3, %v13533_v36, %v2797_v39  ;;  %v2813_v46 = vsel %vm558_vm3, %v2797_v39, %v13533_v36  ;;  %v2826_v53 = vmul.f32 %v2812_v58, %v13534_v47  ;;  %v13538_v25 = vld [vmem:[#allocation52_spill] sm:$0xff]  ;;  %v2824_v35 = vmul.f32 %v2811_v16, %v13534_v47  ;;  %v13541_v39 = vld [vmem:[#allocation45_spill] sm:$0xff] }
 0x5d0   : > { %v2828_v15 = vmul.f32 %v2813_v46, %v13534_v47  ;;  %v2829_v13 = vmul.f32 %v2805_v27, %v13532_v51  ;;  %3344 = vmatprep.subr.bf16.mxu1 %v2917_v5  ;;  %v2835_v58 = vpack.c.bf16 %v2825_v2, %v2823_v26  ;;  %v13542_v5 = vld [vmem:[#allocation35_spill] sm:$0xff]  ;;  %v2808_v12 = vsel %vm558_vm3, %v13537_v20, %v13538_v25 }
 0x5d1   : > { %3286 = vmatpush1.bf16.msra.mxu0 %v2614_v38  ;;  %3345 = vmatpush1.bf16.msra.mxu1 %v2916_v11  ;;  %v2800_v38 = vsel %vm558_vm3, %v13538_v25, %v13537_v20  ;;  %v2822_v11 = vmul.f32 %v2810_v52, %v13534_v47  ;;  %v2912_v36 = vpack.c.bf16 %v2900_v60, %v2898_v0  ;;  %v13545_v25 = vld [vmem:[#allocation63_spill] sm:$0xff] }
 0x5d2   : > { %v2836_v6 = vpack.c.bf16 %v2828_v15, %v2826_v53  ;;  %v9729_v3 = vpop.permute.xlu0 %2944  ;;  %3346 = vmatprep.subr.bf16.mxu1 %v2915_v1  ;;  %v2837_v4 = vpack.c.bf16 %v2829_v13, %v2827_v57  ;;  %v9737_v48 = vpop.permute.xlu1 %3074  ;;  %v2798_v1 = vsel %vm558_vm3, %v13542_v5, %v13541_v39  ;;  %v2819_v16 = vmul.f32 %v2800_v38, %v13532_v51  ;;  %v13546_v38 = vld [vmem:[#allocation58_spill] sm:$0xff] }
 0x5d3   : > { %v2820_v27 = vmul.f32 %v2809_v9, %v13534_v47  ;;  %v2834_v46 = vpack.c.bf16 %v2824_v35, %v2822_v11  ;;  %v2817_v57 = vmul.f32 %v2799_v7, %v13532_v51  ;;  %v2911_v13 = vpack.c.bf16 %v9631_v32, %v9602_v30  ;;  %v13547_v35 = vld [vmem:[#allocation80_spill] sm:$0xff] }
 0x5d4   : > { %3287 = vmatprep.subr.bf16.mxu0 %v2837_v4  ;;  %v2833_v15 = vpack.c.bf16 %v2821_v44, %v2819_v16  ;;  %v2806_v8 = vsel %vm558_vm3, %v13541_v39, %v13542_v5  ;;  %v2818_v34 = vmul.f32 %v2808_v12, %v13534_v47  ;;  %v2815_v29 = vmul.f32 %v2798_v1, %v13532_v51  ;;  %v13544_v4 = vld [vmem:[#allocation69_spill] sm:$0xff]  ;;  %v13548_v44 = vld [vmem:[#allocation36_spill] sm:$0xff]  ;;  %v13552_v39 = vld [vmem:[#allocation46_spill] sm:$0xff] }
 0x5d5   : > { %3288 = vmatpush2.bf16.msra.mxu0 %v2836_v6  ;;  %3347 = vmatpush1.bf16.msra.mxu1 %v2914_v19  ;;  %v2816_v17 = vmul.f32 %v2807_v37, %v13534_v47  ;;  %v2910_v30 = vpack.c.bf16 %v9613_v55, %v2894_v56  ;;  %v2814_v26 = vmul.f32 %v2806_v8, %v13534_v47  ;;  %v13543_v6 = vld [vmem:[#allocation74_spill] sm:$0xff]  ;;  %v13551_v7 = vld [vmem:[#allocation68_spill] sm:$0xff]  ;;  %v13554_v12 = vld [vmem:[#allocation7_spill] sm:$0xff] }
 0x5d6   : > { %v9761_v2 = vpop.permute.xlu0 %3072  ;;  %3289 = vmatprep.subr.bf16.mxu0 %v2835_v58  ;;  %3348 = vmatprep.subr.bf16.mxu1 %v2913_v59  ;;  %v9768_v53 = vpop.permute.xlu1 %3090  ;;  %v2832_v40 = vpack.c.bf16 %v2820_v27, %v2818_v34  ;;  %v2731_v60 = vsel %vm472_vm4, %v13544_v4, %v13543_v6  ;;  %v2831_v20 = vpack.c.bf16 %v2817_v57, %v2815_v29  ;;  %v13549_v58 = vld [vmem:[#allocation42_spill] sm:$0xff]  ;;  %v13553_v5 = vld [vmem:[#allocation64_spill] sm:$0xff]  ;;  %v13555_v37 = vld [vmem:[#allocation81_spill] sm:$0xff] }
 0x5d7   : > { %v2845_v19 = vpack.c.bf16 %v13546_v38, %v13545_v25  ;;  %v2732_v9 = vsel %vm472_vm4, %v13547_v35, %v9550_v41  ;;  %v2740_v55 = vsel %vm472_vm4, %v9550_v41, %v13547_v35  ;;  %v2843_v59 = vpack.c.bf16 %v13549_v58, %v13548_v44  ;;  %v13556_v57 = vld [vmem:[#allocation6_spill] sm:$0xff]  ;;  %v13557_v34 = vld [vmem:[#allocation67_spill] sm:$0xff]  ;;  %v13558_v29 = vld [vmem:[#allocation48_spill] sm:$0xff] }
 0x5d8   : > { %v2830_v33 = vpack.c.bf16 %v2816_v17, %v2814_v26  ;;  %v2730_v0 = vsel %vm472_vm4, %v13551_v7, %v13550_v31  ;;  %v2844_v1 = vpack.c.bf16 %v13553_v5, %v13552_v39  ;;  %v2739_v41 = vsel %vm472_vm4, %v13543_v6, %v13544_v4  ;;  %v13561_v6 = vld [vmem:[#allocation32_spill] sm:$0xff]  ;;  %v13562_v4 = vld [vmem:[#allocation62_spill] sm:$0xff]  ;;  %v13565_v58 = vld [vmem:[#allocation53_spill] sm:$0xff] }
 0x5d9   : > { %3290 = vmatpush2.bf16.msra.mxu0 %v2834_v46  ;;  %3349 = vmatpush1.bf16.msra.mxu1 %v2912_v36  ;;  %v2753_v16 = vmul.f32 %v2731_v60, %v13554_v12  ;;  %v2729_v17 = vsel %vm472_vm4, %v13558_v29, %v13557_v34  ;;  %v2838_v60 = vpack.c.bf16 %v13562_v4, %v13561_v6  ;;  %v13568_v39 = vld [vmem:[#allocation28_spill] sm:$0xff]  ;;  %v13571_v6 = vld [vmem:[#allocation61_spill] sm:$0xff] }
 0x5da   : > { %v9782_v52 = vpop.permute.xlu0 %3088  ;;  %3291 = vmatprep.subr.bf16.mxu0 %v2833_v15  ;;  %3350 = vmatprep.subr.bf16.mxu1 %v2911_v13  ;;  %v9785_v32 = vpop.permute.xlu1 %2926  ;;  %v2754_v15 = vmul.f32 %v2740_v55, %v13556_v57  ;;  %v2755_v13 = vmul.f32 %v2732_v9, %v13554_v12  ;;  %v2751_v25 = vmul.f32 %v2730_v0, %v13554_v12  ;;  %v13563_v9 = vld [vmem:[#allocation29_spill] sm:$0xff]  ;;  %v13564_v55 = vld [vmem:[#allocation39_spill] sm:$0xff] }
 0x5db   : > { %v2727_v44 = vsel %vm472_vm4, %v13564_v55, %v13563_v9 }
 0x5dd   : > { %3292 = vmatpush2.bf16.msra.mxu0 %v2832_v40  ;;  %3351 = vmatpush1.bf16.msra.mxu1 %v2910_v30  ;;  %v13559_v30 = vld [vmem:[#allocation49_spill] sm:$0xff]  ;;  %v13560_v40 = vld [vmem:[#allocation43_spill] sm:$0xff] }
 0x5de   : > { %v2725_v11 = vpop.permute.xlu0 %2724  ;;  %3293 = vmatprep.subr.bf16.mxu0 %v2831_v20  ;;  %3352 = vmatprep.subr.bf16.mxu1 %v2845_v19  ;;  %v9821_v46 = vpop.permute.xlu1 %2942  ;;  %v2842_v26 = vpack.c.bf16 %v13560_v40, %v13559_v30  ;;  %v2738_v20 = vsel %vm472_vm4, %v13550_v31, %v13551_v7  ;;  %v2737_v31 = vsel %vm472_vm4, %v13557_v34, %v13558_v29 }
 0x5df   : > { %v2733_v36 = vsel %vm472_vm4, %v13555_v37, %v2725_v11  ;;  %v2741_v27 = vsel %vm472_vm4, %v2725_v11, %v13555_v37  ;;  %v2752_v7 = vmul.f32 %v2739_v41, %v13556_v57  ;;  %v2763_v37 = vpack.c.bf16 %v2753_v16, %v2751_v25  ;;  %v13574_v25 = vld [vmem:[#allocation44_spill] sm:$0xff] }
 0x5e0   : > { %v2756_v56 = vmul.f32 %v2741_v27, %v13556_v57  ;;  %v2757_v8 = vmul.f32 %v2733_v36, %v13554_v12  ;;  %v13569_v36 = vld [vmem:[#allocation50_spill] sm:$0xff]  ;;  %v13570_v27 = vld [vmem:[#allocation55_spill] sm:$0xff]  ;;  %v2748_v34 = vmul.f32 %v2737_v31, %v13556_v57 }
 0x5e1   : > { %3294 = vmatpush2.bf16.msra.mxu0 %v2830_v33  ;;  %3353 = vmatpush1.bf16.msra.mxu1 %v2844_v1  ;;  %v13566_v33 = vld [vmem:[#allocation40_spill] sm:$0xff]  ;;  %v2749_v1 = vmul.f32 %v2729_v17, %v13554_v12  ;;  %v13577_v31 = vld [vmem:[#allocation82_spill] sm:$0xff] }
 0x5e2   : > { %v2764_v38 = vpack.c.bf16 %v2756_v56, %v2754_v15  ;;  %v9840_v19 = vpop.permute.xlu0 %2924  ;;  %3354 = vmatprep.subr.bf16.mxu1 %v2843_v59  ;;  %v2765_v35 = vpack.c.bf16 %v2757_v8, %v2755_v13  ;;  %v2728_v11 = vsel %vm472_vm4, %v13566_v33, %v13565_v58  ;;  %v9855_v0 = vpop.permute.xlu1 %3070  ;;  %v13567_v59 = vld [vmem:[#allocation34_spill] sm:$0xff]  ;;  %v2841_v15 = vpack.c.bf16 %v13570_v27, %v13569_v36 }
 0x5e3   : > { %v2726_v5 = vsel %vm472_vm4, %v13568_v39, %v13567_v59  ;;  %v2735_v13 = vsel %vm472_vm4, %v13563_v9, %v13564_v55  ;;  %v2736_v41 = vsel %vm472_vm4, %v13565_v58, %v13566_v33  ;;  %v2750_v56 = vmul.f32 %v2738_v20, %v13556_v57  ;;  %v13573_v20 = vld [vmem:[#allocation37_spill] sm:$0xff]  ;;  %v13575_v55 = vld [vmem:[#allocation71_spill] sm:$0xff] }
 0x5e4   : > { %3295 = vmatprep.subr.bf16.mxu0 %v2765_v35  ;;  %v2745_v8 = vmul.f32 %v2727_v44, %v13554_v12  ;;  %v2747_v16 = vmul.f32 %v2728_v11, %v13554_v12  ;;  %v2734_v17 = vsel %vm472_vm4, %v13567_v59, %v13568_v39  ;;  %v2743_v35 = vmul.f32 %v2726_v5, %v13554_v12  ;;  %v13576_v44 = vld [vmem:[#allocation76_spill] sm:$0xff]  ;;  %v13578_v5 = vld [vmem:[#allocation70_spill] sm:$0xff] }
 0x5e5   : > { %3296 = vmatpush2.bf16.msra.mxu0 %v2764_v38  ;;  %3355 = vmatpush1.bf16.msra.mxu1 %v2842_v26  ;;  %v2762_v30 = vpack.c.bf16 %v2752_v7, %v2750_v56  ;;  %v13572_v26 = vld [vmem:[#allocation56_spill] sm:$0xff]  ;;  %v2839_v38 = vpack.c.bf16 %v13574_v25, %v13573_v20  ;;  %v2746_v9 = vmul.f32 %v2736_v41, %v13556_v57  ;;  %v13583_v25 = vld [vmem:[#allocation57_spill] sm:$0xff] }
 0x5e6   : > { %v9876_v29 = vpop.permute.xlu0 %2940  ;;  %3297 = vmatprep.subr.bf16.mxu0 %v2763_v37  ;;  %3356 = vmatprep.subr.bf16.mxu1 %v2841_v15  ;;  %v9882_v40 = vpop.permute.xlu1 %3086  ;;  %v2840_v4 = vpack.c.bf16 %v13572_v26, %v13571_v6  ;;  %v3035_v58 = vsel %vm824_vm5, %v13576_v44, %v13575_v55  ;;  %v2761_v33 = vpack.c.bf16 %v2749_v1, %v2747_v16  ;;  %v13579_v37 = vld [vmem:[#allocation75_spill] sm:$0xff] }
 0x5e7   : > { %v2744_v11 = vmul.f32 %v2735_v13, %v13556_v57  ;;  %v3028_v7 = vsel %vm824_vm5, %v13577_v31, %v9588_v23  ;;  %v3036_v59 = vsel %vm824_vm5, %v9588_v23, %v13577_v31  ;;  %v2760_v39 = vpack.c.bf16 %v2748_v34, %v2746_v9  ;;  %v13580_v13 = vld [vmem:[#allocation9_spill] sm:$0xff]  ;;  %v13581_v23 = vld [vmem:[#allocation83_spill] sm:$0xff] }
 0x5e8   : > { %v3034_v1 = vsel %vm824_vm5, %v13579_v37, %v13578_v5  ;;  %v2759_v27 = vpack.c.bf16 %v2745_v8, %v2743_v35  ;;  %v3027_v15 = vsel %vm824_vm5, %v13575_v55, %v13576_v44  ;;  %v3049_v41 = vmul.f32 %v3035_v58, %v13580_v13  ;;  %v13585_v31 = vld [vmem:[#allocation41_spill] sm:$0xff] }
 0x5e9   : > { %3298 = vmatpush2.bf16.msra.mxu0 %v2762_v30  ;;  %3357 = vmatpush1.bf16.msra.mxu1 %v2840_v4  ;;  %v13582_v30 = vld [vmem:[#allocation8_spill] sm:$0xff]  ;;  %v3051_v8 = vmul.f32 %v3036_v59, %v13580_v13  ;;  %v2742_v20 = vmul.f32 %v2734_v17, %v13556_v57  ;;  %v3026_v9 = vsel %vm824_vm5, %v13578_v5, %v13579_v37 }
 0x5ea   : > { %v3021_v36 = vpop.permute.xlu0 %3020  ;;  %3299 = vmatprep.subr.bf16.mxu0 %v2761_v33  ;;  %3358 = vmatprep.subr.bf16.mxu1 %v2839_v38  ;;  %v9918_v34 = vpop.permute.xlu1 %2922  ;;  %v3050_v6 = vmul.f32 %v3028_v7, %v13582_v30  ;;  %v13584_v38 = vld [vmem:[#allocation54_spill] sm:$0xff]  ;;  %v3047_v55 = vmul.f32 %v3034_v1, %v13580_v13  ;;  %v13586_v7 = vld [vmem:[#allocation60_spill] sm:$0xff] }
 0x5eb   : > { %v3029_v56 = vsel %vm824_vm5, %v13581_v23, %v3021_v36  ;;  %v3037_v16 = vsel %vm824_vm5, %v3021_v36, %v13581_v23  ;;  %v3033_v35 = vsel %vm824_vm5, %v13584_v38, %v13583_v25  ;;  %v2758_v17 = vpack.c.bf16 %v2744_v11, %v2742_v20  ;;  %v6388_v11 = vld [vmem:[%s13029_s1 + $0x140] ss:$20 sps:$4 sm:$0xff]  }
 0x5ec   : > { %v3052_v26 = vmul.f32 %v3029_v56, %v13582_v30  ;;  %v3053_v4 = vmul.f32 %v3037_v16, %v13580_v13  ;;  %v3032_v59 = vsel %vm824_vm5, %v13586_v7, %v13585_v31  ;;  %v3025_v5 = vsel %vm824_vm5, %v13583_v25, %v13584_v38 }
 0x5ed   : > { %3300 = vmatpush2.bf16.msra.mxu0 %v2760_v39  ;;  %3359 = vmatpush1.bf16.msra.mxu1 %v2838_v60  ;;  %v3048_v60 = vmul.f32 %v3027_v15, %v13582_v30  ;;  %v3045_v37 = vmul.f32 %v3033_v35, %v13580_v13  ;;  %v3059_v1 = vpack.c.bf16 %v3049_v41, %v3047_v55  ;;  %v6391_v41 = vld [vmem:[%s13029_s1 + $0x16c] ss:$20 sps:$4 sm:$0xff]  }
 0x5ee   : > { %v3060_v44 = vpack.c.bf16 %v3052_v26, %v3050_v6  ;;  %v9934_v58 = vpop.permute.xlu0 %3068  ;;  %3301 = vmatprep.subr.bf16.mxu0 %v2759_v27  ;;  %v3061_v33 = vpack.c.bf16 %v3053_v4, %v3051_v8  ;;  %v9941_v39 = vpop.permute.xlu1 %2938  ;;  %v3046_v36 = vmul.f32 %v3026_v9, %v13582_v30  ;;  %v3022_v27 = vsel %vm824_vm5, %v9431_v61, %v9628_v14 }
 0x5ef   : > { %v3030_v15 = vsel %vm824_vm5, %v9628_v14, %v9431_v61  ;;  %v3024_v23 = vsel %vm824_vm5, %v13585_v31, %v13586_v7  ;;  %v3043_v56 = vmul.f32 %v3032_v59, %v13580_v13  ;;  %v3023_v16 = vsel %vm824_vm5, %v9449_v10, %v9477_v28  ;;  %v13587_v59 = vld [vmem:[#allocation10_spill] sm:$0xff] }
 0x5f0   : > { %3360 = vmatprep.subr.bf16.mxu1 %v3061_v33  ;;  %v3044_v61 = vmul.f32 %v3025_v5, %v13582_v30  ;;  %v3058_v14 = vpack.c.bf16 %v3048_v60, %v3046_v36  ;;  %v3031_v8 = vsel %vm824_vm5, %v9477_v28, %v9449_v10  ;;  %v3038_v4 = vmul.f32 %v3022_v27, %v13582_v30 }
 0x5f1   : > { %3302 = vmatpush2.bf16.msra.mxu0 %v2758_v17  ;;  %3361 = vmatpush2.bf16.msra.mxu1 %v3060_v44  ;;  %v3039_v20 = vmul.f32 %v3030_v15, %v13580_v13  ;;  %v3057_v25 = vpack.c.bf16 %v3045_v37, %v3043_v56  ;;  %v3042_v38 = vmul.f32 %v3024_v23, %v13582_v30  ;;  %v13589_v15 = vld [vmem:[#allocation12_spill] sm:$0xff]  ;;  %v13590_v56 = vld [vmem:[#allocation13_spill] sm:$0xff] }
 0x5f2   : > { %v9972_v6 = vpop.permute.xlu0 %3084  ;;  %3362 = vmatprep.subr.bf16.mxu1 %v3059_v1  ;;  %v9979_v26 = vpop.permute.xlu1 %3066  ;;  %v3040_v35 = vmul.f32 %v3023_v16, %v13582_v30  ;;  %v2956_v9 = vsel %vm738_vm6, %v9678_v22, %v9712_v50  ;;  %v3041_v10 = vmul.f32 %v3031_v8, %v13580_v13  ;;  %v2964_v28 = vsel %vm738_vm6, %v9712_v50, %v9678_v22  ;;  %v6393_v1 = vld [vmem:[%s13029_s1 + $0x168] ss:$20 sps:$4 sm:$0xff]  }
 0x5f3   : > { %v2955_v55 = vsel %vm738_vm6, %v9616_v21, %v9729_v3  ;;  %v2954_v44 = vsel %vm738_vm6, %v9785_v32, %v9821_v46  ;;  %v3056_v17 = vpack.c.bf16 %v3044_v61, %v3042_v38  ;;  %v2963_v31 = vsel %vm738_vm6, %v9729_v3, %v9616_v21  ;;  %v13588_v21 = vld [vmem:[#allocation11_spill] sm:$0xff] }
 0x5f4   : > { %3304 = vmatmul.mubr.bf16.vlgmr.msra.gmra.mxu0 %v6388_v11  ;;  %v3100_v22 = vsel %vm910_vm7, %v9737_v48, %v9768_v53  ;;  %v3054_v7 = vpack.c.bf16 %v3040_v35, %v3038_v4  ;;  %v2978_v60 = vmul.f32 %v2956_v9, %v13587_v59  ;;  %v3108_v5 = vsel %vm910_vm7, %v9768_v53, %v9737_v48  ;;  %v6394_v48 = vld [vmem:[%s13029_s1 + $0x194] ss:$20 sps:$4 sm:$0xff]  }
 0x5f5   : > { %3363 = vmatpush2.bf16.msra.mxu1 %v3058_v14  ;;  %3313 = vmatprep.mubr.bf16.mxu0 %v6391_v41  ;;  %v3055_v37 = vpack.c.bf16 %v3041_v10, %v3039_v20  ;;  %v2979_v3 = vmul.f32 %v2964_v28, %v13588_v21  ;;  %v10022_v11 = vmul.f32 %v2955_v55, %v13587_v59 }
 0x5f6   : > { %v10002_v33 = vpop.permute.xlu0 %2920  ;;  %3364 = vmatprep.subr.bf16.mxu1 %v3057_v25  ;;  %v3083_v50 = vpop.permute.xlu1 %3082  ;;  %v2962_v36 = vsel %vm738_vm6, %v9821_v46, %v9785_v32  ;;  %v10029_v27 = vmul.f32 %v2954_v44, %v13587_v59  ;;  %v2977_v53 = vmul.f32 %v2963_v31, %v13588_v21  ;;  %v3122_v41 = vmul.f32 %v3100_v22, %v13589_v15 }
 0x5f7   : > { %v3107_v23 = vsel %vm910_vm7, %v9782_v52, %v9761_v2  ;;  %v3106_v32 = vsel %vm910_vm7, %v9882_v40, %v9855_v0  ;;  %v3123_v16 = vmul.f32 %v3108_v5, %v13590_v56  ;;  %v3099_v61 = vsel %vm910_vm7, %v9761_v2, %v9782_v52 }
 0x5f8   : > { %v2975_v20 = vmul.f32 %v2962_v36, %v13588_v21  ;;  %v2960_v25 = vsel %vm738_vm6, %v9941_v39, %v9918_v34  ;;  %v3121_v52 = vmul.f32 %v3107_v23, %v13590_v56  ;;  %v2986_v35 = vpack.c.bf16 %v10022_v11, %v10029_v27 }
 0x5f9   : > { %3365 = vmatpush2.bf16.msra.mxu1 %v3056_v17  ;;  %v2961_v9 = vsel %vm738_vm6, %v9876_v29, %v9840_v19  ;;  %v3098_v10 = vsel %vm910_vm7, %v9855_v0, %v9882_v40  ;;  %v2952_v17 = vsel %vm738_vm6, %v9918_v34, %v9941_v39  ;;  %v2971_v31 = vmul.f32 %v2960_v25, %v13588_v21 }
 0x5fa   : > { %v2949_v46 = vpop.permute.xlu0 %2948  ;;  %3366 = vmatprep.subr.bf16.mxu1 %v3055_v37  ;;  %v2919_v4 = vpop.permute.xlu1 %2918  ;;  %v2953_v0 = vsel %vm738_vm6, %v9840_v19, %v9876_v29  ;;  %v2987_v39 = vpack.c.bf16 %v2977_v53, %v2975_v20  ;;  %v2973_v37 = vmul.f32 %v2961_v9, %v13588_v21  ;;  %v2970_v29 = vmul.f32 %v2952_v17, %v13587_v59 }
 0x5fb   : > { %v2957_v14 = vsel %vm738_vm6, %v9502_v45, %v2949_v46  ;;  %v2965_v8 = vsel %vm738_vm6, %v2949_v46, %v9502_v45  ;;  %v3119_v45 = vmul.f32 %v3106_v32, %v13590_v56  ;;  %v3097_v20 = vsel %vm910_vm7, %v9934_v58, %v9972_v6 }
 0x5fc   : > { %v2980_v38 = vmul.f32 %v2957_v14, %v13587_v59  ;;  %v2981_v2 = vmul.f32 %v2965_v8, %v13588_v21  ;;  %3314 = vmatmul.mubr.bf16.gmra.mxu0 %v6393_v1  ;;  %v3104_v1 = vsel %vm910_vm7, %v3083_v50, %v9979_v26  ;;  %v2985_v46 = vpack.c.bf16 %v2973_v37, %v2971_v31  ;;  %v6404_v37 = vld [vmem:[%s13029_s1 + $0x174] ss:$20 sps:$4 sm:$0xff]  }
 0x5fd   : > { %3367 = vmatpush2.bf16.msra.mxu1 %v3054_v7  ;;  %3323 = vmatprep.mubr.bf16.mxu0 %v6394_v48  ;;  %v3131_v19 = vpack.c.bf16 %v3121_v52, %v3119_v45  ;;  %v3096_v48 = vsel %vm910_vm7, %v9979_v26, %v3083_v50  ;;  %v3115_v14 = vmul.f32 %v3104_v1, %v13590_v56 }
 0x5fe   : > { %v2988_v28 = vpack.c.bf16 %v2980_v38, %v2978_v60  ;;  %v3093_v55 = vpop.permute.xlu0 %3092  ;;  %v2989_v44 = vpack.c.bf16 %v2981_v2, %v2979_v3  ;;  %v2935_v5 = vpop.permute.xlu1 %2934  ;;  %v6396_v60 = vld [vmem:[%s13029_s1 + $0x190] ss:$20 sps:$4 sm:$0xff]   ;;  %v3105_v3 = vsel %vm910_vm7, %v9972_v6, %v9934_v58  ;;  %v3120_v50 = vmul.f32 %v3099_v61, %v13589_v15 }
 0x5ff   : > { %v3101_v22 = vsel %vm910_vm7, %v9576_v54, %v3093_v55  ;;  %v3109_v7 = vsel %vm910_vm7, %v3093_v55, %v9576_v54  ;;  %v3118_v54 = vmul.f32 %v3098_v10, %v13589_v15  ;;  %v2958_v53 = vsel %vm738_vm6, %v2935_v5, %v2919_v4 }
 0x600   : > { %v3124_v40 = vmul.f32 %v3101_v22, %v13589_v15  ;;  %v3125_v34 = vmul.f32 %v3109_v7, %v13590_v56  ;;  %3368 = vmatprep.subr.bf16.mxu1 %v2989_v44  ;;  %v2972_v8 = vmul.f32 %v2953_v0, %v13587_v59  ;;  %v3117_v25 = vmul.f32 %v3105_v3, %v13590_v56  ;;  %v6406_v3 = vld [vmem:[%s13029_s1 + $0x170] ss:$20 sps:$4 sm:$0xff]  }
 0x601   : > { %3369 = vmatpush2.bf16.msra.mxu1 %v2988_v28  ;;  %v2967_v38 = vmul.f32 %v2958_v53, %v13588_v21  ;;  %v3130_v61 = vpack.c.bf16 %v3120_v50, %v3118_v54  ;;  %v3114_v45 = vmul.f32 %v3096_v48, %v13589_v15  ;;  %v3116_v58 = vmul.f32 %v3097_v20, %v13589_v15  ;;  %v6412_v48 = vld [vmem:[%s13029_s1 + $0x1c4] ss:$20 sps:$4 sm:$0xff]   ;;  %v6411_v53 = vld [vmem:[%s13029_s1 + $0x1a0] ss:$20 sps:$4 sm:$0xff]  }
 0x602   : > { %v3132_v11 = vpack.c.bf16 %v3124_v40, %v3122_v41  ;;  %v2937_v36 = vpop.permute.xlu0 %2936  ;;  %3370 = vmatprep.subr.bf16.mxu1 %v2987_v39  ;;  %v3133_v27 = vpack.c.bf16 %v3125_v34, %v3123_v16  ;;  %v3063_v32 = vpop.permute.xlu1 %3062  ;;  %v6397_v41 = vld [vmem:[%s13029_s1 + $0x1bc] ss:$20 sps:$4 sm:$0xff]   ;;  %v2984_v52 = vpack.c.bf16 %v2972_v8, %v2970_v29 }
 0x603   : > { %v2959_v23 = vsel %vm738_vm6, %v2937_v36, %v10002_v33  ;;  %v2951_v16 = vsel %vm738_vm6, %v10002_v33, %v2937_v36  ;;  %v2950_v33 = vsel %vm738_vm6, %v2919_v4, %v2935_v5  ;;  %v6399_v4 = vld [vmem:[%s13029_s1 + $0x1b8] ss:$20 sps:$4 sm:$0xff]   ;;  %v3128_v31 = vpack.c.bf16 %v3116_v58, %v3114_v45  ;;  %v6403_v29 = vld [vmem:[%s13029_s1 + $0x150] ss:$20 sps:$4 sm:$0xff]  }
 0x604   : > { %v2969_v26 = vmul.f32 %v2959_v23, %v13588_v21  ;;  %3324 = vmatmul.mubr.bf16.gmra.mxu0 %v6396_v60  ;;  %3425 = vmatprep.subr.bf16.mxu0 %v3133_v27  ;;  %v2968_v9 = vmul.f32 %v2951_v16, %v13587_v59  ;;  %v2966_v28 = vmul.f32 %v2950_v33, %v13587_v59  ;;  %v6400_v60 = vld [vmem:[%s13029_s1 + $0x148] ss:$20 sps:$4 sm:$0xff]   ;;  %v6407_v36 = vld [vmem:[%s13029_s1 + $0x178] ss:$20 sps:$4 sm:$0xff]   ;;  %v6414_v23 = vld [vmem:[%s13029_s1 + $0x1c0] ss:$20 sps:$4 sm:$0xff]  }
 0x605   : > { %3371 = vmatpush2.bf16.msra.mxu1 %v2986_v35  ;;  %3426 = vmatpush1.bf16.msra.mxu0 %v3132_v11  ;;  %v3129_v35 = vpack.c.bf16 %v3117_v25, %v3115_v14  ;;  %v6408_v11 = vld [vmem:[%s13029_s1 + $0x19c] ss:$20 sps:$4 sm:$0xff]   ;;  %v6410_v27 = vld [vmem:[%s13029_s1 + $0x198] ss:$20 sps:$4 sm:$0xff]  }
 0x606   : > { %v3065_v2 = vpop.permute.xlu0 %3064  ;;  %3427 = vmatprep.subr.bf16.mxu0 %v3131_v19  ;;  %3372 = vmatprep.subr.bf16.mxu1 %v2985_v46  ;;  %v3079_v10 = vpop.permute.xlu1 %3078  ;;  %v2983_v6 = vpack.c.bf16 %v2969_v26, %v2967_v38  ;;  %v2982_v22 = vpack.c.bf16 %v2968_v9, %v2966_v28  ;;  %v13591_v19 = vmov 0   ;;  %v13594_v21 = vld [vmem:[#allocation15_spill] sm:$0xff] }
 0x607   : > { %3333 = vmatprep.mubr.bf16.mxu0 %v6397_v41  ;;  %v3094_v55 = vsel %vm910_vm7, %v3063_v32, %v3079_v10  ;;  %v3102_v44 = vsel %vm910_vm7, %v3079_v10, %v3063_v32  ;;  %v6415_v32 = vld [vmem:[%s13029_s1 + $0x1c8] ss:$20 sps:$4 sm:$0xff]  }
 0x608   : > { %v3110_v0 = vmul.f32 %v3094_v55, %v13589_v15  ;;  %v3111_v40 = vmul.f32 %v3102_v44, %v13590_v56 }
 0x609   : > { %3373 = vmatpush2.bf16.msra.mxu1 %v2984_v52  ;;  %3428 = vmatpush1.bf16.msra.mxu0 %v3130_v61 }
 0x60a   : > { %v3081_v17 = vpop.permute.xlu0 %3080  ;;  %3374 = vmatprep.subr.bf16.mxu1 %v2983_v6  ;;  %3429 = vmatprep.subr.bf16.mxu0 %v3129_v35 }
 0x60b   : > { %v3095_v7 = vsel %vm910_vm7, %v3065_v2, %v3081_v17  ;;  %v3103_v5 = vsel %vm910_vm7, %v3081_v17, %v3065_v2 }
 0x60c   : > { %v3112_v34 = vmul.f32 %v3095_v7, %v13589_v15  ;;  %v3113_v39 = vmul.f32 %v3103_v5, %v13590_v56  ;;  %3334 = vmatmul.mubr.bf16.gmra.mxu0 %v6399_v4 }
 0x60d   : > { %3375 = vmatpush2.bf16.msra.mxu1 %v2982_v22  ;;  %3430 = vmatpush1.bf16.msra.mxu0 %v3128_v31 }
 0x60e   : > { %v3126_v54 = vpack.c.bf16 %v3112_v34, %v3110_v0  ;;  %v3127_v1 = vpack.c.bf16 %v3113_v39, %v3111_v40  ;;  %3449 = vmatprep.mubr.bf16.mxu0 %v13591_v19 }
 0x610   : > { %3377 = vmatmul.mubr.bf16.vlgmr.msra.gmra.mxu1 %v6400_v60  ;;  %3431 = vmatprep.subr.bf16.mxu0 %v3127_v1 }
 0x611   : > { %3432 = vmatpush1.bf16.msra.mxu0 %v3126_v54  ;;  %3386 = vmatprep.mubr.bf16.mxu1 %v6404_v37 }
 0x613   : > { %v10190_v46 = vpop.permute.xlu1 %3531 }
 0x614   : > { %6153 = vmatmul.mubr.msk.bf16.vlgmr.msra.gmra.mxu0 %vm1088_vm8, %v6403_v29 }
 0x615   : > { %3459 = vmatprep.mubr.bf16.mxu0 %v13591_v19 }
 0x617   : > { %v10192_v41 = vpop.permute.xlu0 %3536  ;;  %v10194_v14 = vpop.permute.xlu1 %3596 }
 0x618   : > { %3387 = vmatmul.mubr.bf16.gmra.mxu1 %v6406_v3 }
 0x619   : > { %3396 = vmatprep.mubr.bf16.mxu1 %v6408_v11 }
 0x61b   : > { %v10196_v50 = vpop.permute.xlu0 %3601  ;;  %v10198_v20 = vpop.permute.xlu1 %3521 }
 0x61c   : > { %6154 = vmatmul.mubr.msk.bf16.gmra.mxu0 %vm1088_vm8, %v6407_v36 }
 0x61d   : > { %3469 = vmatprep.mubr.bf16.mxu0 %v13591_v19 }
 0x61f   : > { %v10202_v38 = vpop.permute.xlu0 %3526  ;;  %v10206_v61 = vpop.permute.xlu1 %3586 }
 0x620   : > { %3397 = vmatmul.mubr.bf16.gmra.mxu1 %v6410_v27 }
 0x621   : > { %3406 = vmatprep.mubr.bf16.mxu1 %v6412_v48 }
 0x623   : > { %v10212_v9 = vpop.permute.xlu0 %3591  ;;  %v10216_v58 = vpop.permute.xlu1 %3511 }
 0x624   : > { %6155 = vmatmul.mubr.msk.bf16.gmra.mxu0 %vm1088_vm8, %v6411_v53  ;;  %v13592_v53 = vld [vmem:[#allocation14_spill] sm:$0xff] }
 0x625   : > { %3479 = vmatprep.mubr.bf16.mxu0 %v13591_v19 }
 0x627   : > { %v10222_v4 = vpop.permute.xlu0 %3516  ;;  %v10226_v55 = vpop.permute.xlu1 %3576 }
 0x628   : > { %3407 = vmatmul.mubr.bf16.gmra.mxu1 %v6414_v23 }
 0x62b   : > { %v10232_v31 = vpop.permute.xlu0 %3581  ;;  %v3502_v5 = vpop.permute.xlu1 %3501 }
 0x62c   : > { %6156 = vmatmul.mubr.msk.bf16.gmra.mxu0 %vm1088_vm8, %v6415_v32 }
 0x62f   : > { %v3507_v54 = vpop.permute.xlu0 %3506 }
 0x630   : > { %v3567_v11 = vpop.permute.xlu1 %3566 }
 0x633   : > { %v3572_v19 = vpop.permute.xlu0 %3571 }
 0x6b4   : > { %v3305_v16 = vpop.f32.mrf.mxu0 }
 0x6b6   : > { %v3307_v26 = vpop.f32.mrf.mxu0 }
 0x6b8   : > { %v3309_v8 = vpop.f32.mrf.mxu0 }
 0x6ba   : > { %v3311_v25 = vpop.f32.mrf.mxu0 }
 0x6bc   : > { %v10200_v33 = vpop.f32.mrf.mxu0 }
 0x6be   : > { %v10204_v2 = vpop.f32.mrf.mxu0 }
 0x6c0   : > { %v10208_v52 = vpop.f32.mrf.mxu0 }
 0x6c2   : > { %v10210_v45 = vpop.f32.mrf.mxu0 }
 0x6c4   : > { %v10214_v10 = vpop.f32.mrf.mxu0 }
 0x6c6   : > { %v10218_v6 = vpop.f32.mrf.mxu0 }
 0x6c8   : > { %v10220_v35 = vpop.f32.mrf.mxu0 }
 0x6ca   : > { %v10224_v28 = vpop.f32.mrf.mxu0 }
 0x6cc   : > { %v10228_v44 = vpop.f32.mrf.mxu0 }
 0x6ce   : > { %v10230_v17 = vpop.f32.mrf.mxu0 }
 0x6d0   : > { %v10234_v22 = vpop.f32.mrf.mxu0  ;;  %v3378_v7 = vpop.f32.mrf.mxu1 }
 0x6d1   : > { %v3379_v34 = vadd.f32 %v3378_v7, %v3305_v16 }
 0x6d2   : > { %v10236_v0 = vpop.f32.mrf.mxu0  ;;  %v3380_v40 = vpop.f32.mrf.mxu1 }
 0x6d3   : > { %v3381_v7 = vadd.f32 %v3380_v40, %v3307_v26  ;;  %v13596_v40 = vld [vmem:[#allocation16_spill] sm:$0xff] }
 0x6d4   : > { %v3382_v39 = vpop.f32.mrf.mxu1  ;;  %v3451_v60 = vpop.f32.mrf.mxu0 }
 0x6d5   : > { %v3452_v37 = vadd.f32 %v3451_v60, %v3379_v34  ;;  %v3383_v29 = vadd.f32 %v3382_v39, %v3309_v8 }
 0x6d6   : > { %v3453_v1 = vpop.f32.mrf.mxu0  ;;  %v3384_v34 = vpop.f32.mrf.mxu1 }
 0x6d7   : > { %v3539_v3 = vmul.f32 %v3502_v5, %v3452_v37  ;;  %v3454_v39 = vadd.f32 %v3453_v1, %v3381_v7  ;;  %v3385_v37 = vadd.f32 %v3384_v34, %v3311_v25 }
 0x6d8   : > { %v3455_v36 = vpop.f32.mrf.mxu0  ;;  %v3388_v26 = vpop.f32.mrf.mxu1 }
 0x6d9   : > { %v3604_v27 = vadd.f32 %v3567_v11, %v3539_v3  ;;  %v3456_v48 = vadd.f32 %v3455_v36, %v3383_v29  ;;  %v3540_v3 = vmul.f32 %v3502_v5, %v3454_v39 }
 0x6da   : > { %v3457_v60 = vpop.f32.mrf.mxu0  ;;  %v3390_v5 = vpop.f32.mrf.mxu1 }
 0x6db   : > { %v3620_v23 = vadd.f32 %v3604_v27, %v13592_v53  ;;  %v3541_v32 = vmul.f32 %v3507_v54, %v3456_v48  ;;  %v3458_v29 = vadd.f32 %v3457_v60, %v3385_v37  ;;  %v13600_v37 = vld [vmem:[#allocation18_spill] sm:$0xff] }
 0x6dc   : > { %v3461_v36 = vpop.f32.mrf.mxu0  ;;  %v3392_v53 = vpop.f32.mrf.mxu1 }
 0x6dd   : > { %v10239_v56 = vmax.f32 %v3620_v23, 0.0  ;;  %v3606_v15 = vadd.f32 %v3572_v19, %v3541_v32  ;;  %v3393_v7 = vadd.f32 %v3392_v53, %v10208_v52 }
 0x6de   : > { %v3463_v48 = vpop.f32.mrf.mxu0 }
 0x6df   : > { %13593 = vst [vmem:[#allocation3_spill] sm:$0xff] %v10239_v56  ;;  %v3622_v16 = vadd.f32 %v3606_v15, %v13594_v21  ;;  %3724 = vrot.lane.b32.xlu1 %v10239_v56, %s6485_s27  ;;  %v3542_v21 = vmul.f32 %v3507_v54, %v3458_v29  ;;  %v3605_v15 = vadd.f32 %v3567_v11, %v3540_v3  ;;  %v13597_v54 = vld [vmem:[#allocation17_spill] sm:$0xff]  ;;  %v13601_v3 = vld [vmem:[#allocation19_spill] sm:$0xff] }
 0x6e1   : > { %v10244_v8 = vmax.f32 %v3622_v16, 0.0  ;;  %v3607_v25 = vadd.f32 %v3572_v19, %v3542_v21  ;;  %v3621_v1 = vadd.f32 %v3605_v15, %v13596_v40  ;;  %v3389_v19 = vadd.f32 %v3388_v26, %v10200_v33  ;;  %v3465_v16 = vpop.f32.mrf.mxu0  ;;  %v3394_v40 = vpop.f32.mrf.mxu1 }
 0x6e2   : > { %v3466_v34 = vadd.f32 %v3465_v16, %v3393_v7 }
 0x6e3   : > { %13595 = vst [vmem:[#allocation65_spill] sm:$0xff] %v10244_v8  ;;  %3726 = vrot.lane.b32.xlu0 %v10244_v8, %s6485_s27  ;;  %3652 = vrot.lane.b32.xlu1 %v10239_v56, %s6486_s28  ;;  %v3623_v11 = vadd.f32 %v3607_v25, %v13597_v54  ;;  %v10264_v27 = vmax.f32 %v3621_v1, 0.0  ;;  %v3462_v32 = vadd.f32 %v3461_v36, %v3389_v19  ;;  %v3467_v36 = vpop.f32.mrf.mxu0  ;;  %v3398_v53 = vpop.f32.mrf.mxu1 }
 0x6e4   : > { %v3545_v33 = vmul.f32 %v10222_v4, %v3466_v34  ;;  %v3391_v25 = vadd.f32 %v3390_v5, %v10204_v2  ;;  %v3395_v54 = vadd.f32 %v3394_v40, %v10210_v45 }
 0x6e5   : > { %13598 = vst [vmem:[#allocation77_spill] sm:$0xff] %v10264_v27  ;;  %v10271_v23 = vmax.f32 %v3623_v11, 0.0  ;;  %v3543_v39 = vmul.f32 %v10216_v58, %v3462_v32  ;;  %v3471_v16 = vpop.f32.mrf.mxu0  ;;  %v3400_v7 = vpop.f32.mrf.mxu1 }
 0x6e6   : > { %v3610_v52 = vadd.f32 %v10232_v31, %v3545_v33  ;;  %v3464_v1 = vadd.f32 %v3463_v48, %v3391_v25  ;;  %v3468_v11 = vadd.f32 %v3467_v36, %v3395_v54  ;;  %v13604_v48 = vld [vmem:[#allocation20_spill] sm:$0xff]  ;;  %v13608_v25 = vld [vmem:[#allocation22_spill] sm:$0xff] }
 0x6e7   : > { %3654 = vrot.lane.b32.xlu0 %v10244_v8, %s6486_s28  ;;  %3948 = vrot.lane.b32.xlu1 %v10239_v56, %s6487_s29  ;;  %13599 = vst [vmem:[#allocation78_spill] sm:$0xff] %v10271_v23  ;;  %v3608_v60 = vadd.f32 %v10226_v55, %v3543_v39  ;;  %v3473_v34 = vpop.f32.mrf.mxu0  ;;  %v3399_v39 = vadd.f32 %v3398_v53, %v10214_v10  ;;  %v3402_v33 = vpop.f32.mrf.mxu1 }
 0x6e8   : > { %v3626_v21 = vadd.f32 %v3610_v52, %v13601_v3  ;;  %v3544_v19 = vmul.f32 %v10216_v58, %v3464_v1  ;;  %v3546_v2 = vmul.f32 %v10222_v4, %v3468_v11  ;;  %v13605_v4 = vld [vmem:[#allocation21_spill] sm:$0xff]  ;;  %v13609_v1 = vld [vmem:[#allocation23_spill] sm:$0xff] }
 0x6e9   : > { %v3624_v29 = vadd.f32 %v3608_v60, %v13600_v37  ;;  %v3472_v60 = vadd.f32 %v3471_v16, %v3399_v39  ;;  %v3475_v52 = vpop.f32.mrf.mxu0  ;;  %v3403_v37 = vadd.f32 %v3402_v33, %v10220_v35 }
 0x6ea   : > { %v10302_v26 = vmax.f32 %v3626_v21, 0.0  ;;  %v3609_v5 = vadd.f32 %v10226_v55, %v3544_v19  ;;  %v3611_v45 = vadd.f32 %v10232_v31, %v3546_v2  ;;  %v3401_v19 = vadd.f32 %v3400_v7, %v10218_v6  ;;  %v3404_v2 = vpop.f32.mrf.mxu1 }
 0x6eb   : > { %3950 = vrot.lane.b32.xlu0 %v10244_v8, %s6487_s29  ;;  %3868 = vrot.lane.b32.xlu1 %v10239_v56, %s6488_s30  ;;  %v10296_v15 = vmax.f32 %v3624_v29, 0.0  ;;  %v3476_v29 = vadd.f32 %v3475_v52, %v3403_v37  ;;  %v3547_v3 = vmul.f32 %v10198_v20, %v3472_v60 }
 0x6ec   : > { %13603 = vst [vmem:[#allocation66_spill] sm:$0xff] %v10302_v26  ;;  %v3625_v58 = vadd.f32 %v3609_v5, %v13604_v48  ;;  %v3627_v32 = vadd.f32 %v3611_v45, %v13605_v4  ;;  %v3474_v5 = vadd.f32 %v3473_v34, %v3401_v19  ;;  %v3477_v45 = vpop.f32.mrf.mxu0  ;;  %v3405_v48 = vadd.f32 %v3404_v2, %v10224_v28  ;;  %v3408_v16 = vpop.f32.mrf.mxu1 }
 0x6ed   : > { %13602 = vst [vmem:[#allocation72_spill] sm:$0xff] %v10296_v15  ;;  %v3549_v10 = vmul.f32 %v10202_v38, %v3476_v29  ;;  %v3612_v21 = vadd.f32 %v10206_v61, %v3547_v3  ;;  %v3409_v52 = vadd.f32 %v3408_v16, %v10228_v44 }
 0x6ee   : > { %v10332_v55 = vmax.f32 %v3625_v58, 0.0  ;;  %v10338_v31 = vmax.f32 %v3627_v32, 0.0  ;;  %v3478_v58 = vadd.f32 %v3477_v45, %v3405_v48  ;;  %v3548_v53 = vmul.f32 %v10198_v20, %v3474_v5  ;;  %v13612_v32 = vld [vmem:[#allocation24_spill] sm:$0xff]  ;;  %v3481_v34 = vpop.f32.mrf.mxu0  ;;  %v3410_v39 = vpop.f32.mrf.mxu1  ;;  %v13618_v48 = vld [vmem:[#allocation26_spill] sm:$0xff] }
 0x6ef   : > { %3870 = vrot.lane.b32.xlu0 %v10244_v8, %s6488_s30  ;;  %3796 = vrot.lane.b32.xlu1 %v10239_v56, %s6489_s9  ;;  %v3614_v35 = vadd.f32 %v10212_v9, %v3549_v10  ;;  %v3628_v40 = vadd.f32 %v3612_v21, %v13608_v25  ;;  %v3482_v3 = vadd.f32 %v3481_v34, %v3409_v52 }
 0x6f0   : > { %13606 = vst [vmem:[#allocation79_spill] sm:$0xff] %v10332_v55  ;;  %13607 = vst [vmem:[#allocation59_spill] sm:$0xff] %v10338_v31  ;;  %v3550_v6 = vmul.f32 %v10202_v38, %v3478_v58  ;;  %v3613_v4 = vadd.f32 %v10206_v61, %v3548_v53  ;;  %v13613_v38 = vld [vmem:[#allocation25_spill] sm:$0xff]  ;;  %v3483_v60 = vpop.f32.mrf.mxu0  ;;  %v3412_v37 = vpop.f32.mrf.mxu1  ;;  %v3411_v34 = vadd.f32 %v3410_v39, %v10230_v17 }
 0x6f1   : > { %v3630_v36 = vadd.f32 %v3614_v35, %v13609_v1  ;;  %v10368_v54 = vmax.f32 %v3628_v40, 0.0  ;;  %v3413_v35 = vadd.f32 %v3412_v37, %v10234_v22  ;;  %v3551_v40 = vmul.f32 %v10190_v46, %v3482_v3 }
 0x6f2   : > { %v3615_v28 = vadd.f32 %v10212_v9, %v3550_v6  ;;  %v3629_v20 = vadd.f32 %v3613_v4, %v13612_v32  ;;  %v3485_v10 = vpop.f32.mrf.mxu0  ;;  %v13620_v6 = vld [vmem:[#allocation27_spill] sm:$0xff]  ;;  %v3414_v52 = vpop.f32.mrf.mxu1  ;;  %v3484_v3 = vadd.f32 %v3483_v60, %v3411_v34 }
 0x6f3   : > { %3798 = vrot.lane.b32.xlu0 %v10244_v8, %s6489_s9  ;;  %3740 = vrot.lane.b32.xlu1 %v10264_v27, %s6485_s27  ;;  %13610 = vst [vmem:[#allocation47_spill] sm:$0xff] %v10368_v54  ;;  %v10374_v11 = vmax.f32 %v3630_v36, 0.0  ;;  %v3486_v25 = vadd.f32 %v3485_v10, %v3413_v35  ;;  %v3616_v19 = vadd.f32 %v10194_v14, %v3551_v40 }
 0x6f4   : > { %v3631_v7 = vadd.f32 %v3615_v28, %v13613_v38  ;;  %v10404_v61 = vmax.f32 %v3629_v20, 0.0  ;;  %v3487_v10 = vpop.f32.mrf.mxu0  ;;  %v3552_v39 = vmul.f32 %v10190_v46, %v3484_v3 }
 0x6f5   : > { %13611 = vst [vmem:[#allocation51_spill] sm:$0xff] %v10374_v11  ;;  %v3553_v22 = vmul.f32 %v10192_v41, %v3486_v25  ;;  %v3632_v58 = vadd.f32 %v3616_v19, %v13618_v48  ;;  %v3415_v25 = vadd.f32 %v3414_v52, %v10236_v0 }
 0x6f6   : > { %13614 = vst [vmem:[#allocation52_spill] sm:$0xff] %v10404_v61  ;;  %v10410_v9 = vmax.f32 %v3631_v7, 0.0  ;;  %v3617_v19 = vadd.f32 %v10194_v14, %v3552_v39 }
 0x6f7   : > { %3742 = vrot.lane.b32.xlu0 %v10271_v23, %s6485_s27  ;;  %3668 = vrot.lane.b32.xlu1 %v10264_v27, %s6486_s28  ;;  %v3618_v5 = vadd.f32 %v10196_v50, %v3553_v22  ;;  %v10460_v32 = vmax.f32 %v3632_v58, 0.0  ;;  %v3488_v40 = vadd.f32 %v3487_v10, %v3415_v25  ;;  %v13628_v58 = vld [vmem:[#allocation30_spill] sm:$0xff] }
 0x6f8   : > { %13615 = vst [vmem:[#allocation38_spill] sm:$0xff] %v10410_v9 }
 0x6f9   : > { %v3634_v4 = vadd.f32 %v3618_v5, %v13620_v6  ;;  %13622 = vst [vmem:[#allocation69_spill] sm:$0xff] %v10460_v32  ;;  %v3554_v0 = vmul.f32 %v10192_v41, %v3488_v40  ;;  %v3633_v6 = vadd.f32 %v3617_v19, %v13628_v58  ;;  %v13629_v41 = vld [vmem:[#allocation31_spill] sm:$0xff] }
 0x6fb   : > { %3670 = vrot.lane.b32.xlu0 %v10271_v23, %s6486_s28  ;;  %3964 = vrot.lane.b32.xlu1 %v10264_v27, %s6487_s29  ;;  %v10468_v16 = vmax.f32 %v3634_v4, 0.0  ;;  %v3619_v46 = vadd.f32 %v10196_v50, %v3554_v0  ;;  %v10520_v52 = vmax.f32 %v3633_v6, 0.0 }
 0x6fd   : > { %13623 = vst [vmem:[#allocation63_spill] sm:$0xff] %v10468_v16  ;;  %v3635_v14 = vadd.f32 %v3619_v46, %v13629_v41  ;;  %13630 = vst [vmem:[#allocation73_spill] sm:$0xff] %v10520_v52 }
 0x6ff   : > { %3966 = vrot.lane.b32.xlu0 %v10271_v23, %s6487_s29  ;;  %3884 = vrot.lane.b32.xlu1 %v10264_v27, %s6488_s30  ;;  %v10528_v50 = vmax.f32 %v3635_v14, 0.0 }
 0x701   : > { %13631 = vst [vmem:[#allocation68_spill] sm:$0xff] %v10528_v50 }
 0x703   : > { %3886 = vrot.lane.b32.xlu0 %v10271_v23, %s6488_s30  ;;  %3812 = vrot.lane.b32.xlu1 %v10264_v27, %s6489_s9 }
 0x707   : > { %3814 = vrot.lane.b32.xlu0 %v10271_v23, %s6489_s9  ;;  %3728 = vrot.lane.b32.xlu1 %v10296_v15, %s6485_s27 }
 0x70b   : > { %3730 = vrot.lane.b32.xlu0 %v10302_v26, %s6485_s27  ;;  %3656 = vrot.lane.b32.xlu1 %v10296_v15, %s6486_s28 }
 0x70f   : > { %3658 = vrot.lane.b32.xlu0 %v10302_v26, %s6486_s28  ;;  %3952 = vrot.lane.b32.xlu1 %v10296_v15, %s6487_s29 }
 0x713   : > { %3954 = vrot.lane.b32.xlu0 %v10302_v26, %s6487_s29  ;;  %3872 = vrot.lane.b32.xlu1 %v10296_v15, %s6488_s30 }
 0x717   : > { %3874 = vrot.lane.b32.xlu0 %v10302_v26, %s6488_s30  ;;  %3800 = vrot.lane.b32.xlu1 %v10296_v15, %s6489_s9 }
 0x71b   : > { %3802 = vrot.lane.b32.xlu0 %v10302_v26, %s6489_s9  ;;  %4096 = vrot.lane.b32.xlu1 %v10296_v15, %s6490_s12 }
 0x71f   : > { %4098 = vrot.lane.b32.xlu0 %v10302_v26, %s6490_s12  ;;  %3744 = vrot.lane.b32.xlu1 %v10332_v55, %s6485_s27 }
 0x723   : > { %3746 = vrot.lane.b32.xlu0 %v10338_v31, %s6485_s27  ;;  %3672 = vrot.lane.b32.xlu1 %v10332_v55, %s6486_s28 }
 0x727   : > { %3674 = vrot.lane.b32.xlu0 %v10338_v31, %s6486_s28  ;;  %3968 = vrot.lane.b32.xlu1 %v10332_v55, %s6487_s29 }
 0x72b   : > { %3970 = vrot.lane.b32.xlu0 %v10338_v31, %s6487_s29  ;;  %3888 = vrot.lane.b32.xlu1 %v10332_v55, %s6488_s30 }
 0x72f   : > { %3890 = vrot.lane.b32.xlu0 %v10338_v31, %s6488_s30  ;;  %3816 = vrot.lane.b32.xlu1 %v10332_v55, %s6489_s9 }
 0x733   : > { %3818 = vrot.lane.b32.xlu0 %v10338_v31, %s6489_s9  ;;  %4112 = vrot.lane.b32.xlu1 %v10332_v55, %s6490_s12 }
 0x737   : > { %4114 = vrot.lane.b32.xlu0 %v10338_v31, %s6490_s12  ;;  %3732 = vrot.lane.b32.xlu1 %v10368_v54, %s6485_s27 }
 0x73b   : > { %3734 = vrot.lane.b32.xlu0 %v10374_v11, %s6485_s27  ;;  %3660 = vrot.lane.b32.xlu1 %v10368_v54, %s6486_s28 }
 0x73f   : > { %3662 = vrot.lane.b32.xlu0 %v10374_v11, %s6486_s28  ;;  %3956 = vrot.lane.b32.xlu1 %v10368_v54, %s6487_s29 }
 0x743   : > { %3958 = vrot.lane.b32.xlu0 %v10374_v11, %s6487_s29  ;;  %3876 = vrot.lane.b32.xlu1 %v10368_v54, %s6488_s30 }
 0x747   : > { %3878 = vrot.lane.b32.xlu0 %v10374_v11, %s6488_s30  ;;  %3804 = vrot.lane.b32.xlu1 %v10368_v54, %s6489_s9 }
 0x74b   : > { %3806 = vrot.lane.b32.xlu0 %v10374_v11, %s6489_s9  ;;  %4100 = vrot.lane.b32.xlu1 %v10368_v54, %s6490_s12 }
 0x74f   : > { %4102 = vrot.lane.b32.xlu0 %v10374_v11, %s6490_s12  ;;  %3748 = vrot.lane.b32.xlu1 %v10404_v61, %s6485_s27 }
 0x751   : > { %v10412_v33 = vpop.permute.xlu1 %3724 }
 0x753   : > { %3750 = vrot.lane.b32.xlu0 %v10410_v9, %s6485_s27  ;;  %3676 = vrot.lane.b32.xlu1 %v10404_v61, %s6486_s28 }
 0x755   : > { %v10419_v29 = vpop.permute.xlu0 %3726  ;;  %v10421_v21 = vpop.permute.xlu1 %3652 }
 0x757   : > { %3678 = vrot.lane.b32.xlu0 %v10410_v9, %s6486_s28  ;;  %3972 = vrot.lane.b32.xlu1 %v10404_v61, %s6487_s29 }
 0x759   : > { %v10428_v44 = vpop.permute.xlu0 %3654  ;;  %v10431_v1 = vpop.permute.xlu1 %3948 }
 0x75b   : > { %3974 = vrot.lane.b32.xlu0 %v10410_v9, %s6487_s29  ;;  %3892 = vrot.lane.b32.xlu1 %v10404_v61, %s6488_s30 }
 0x75d   : > { %v10438_v36 = vpop.permute.xlu0 %3950  ;;  %v10441_v2 = vpop.permute.xlu1 %3868 }
 0x75e   : > { %13616 = vst [vmem:[#allocation33_spill] sm:$0xff] %v10441_v2  ;;  %v6430_v2 = vld [vmem:[%s13029_s1 + $0x1ec] ss:$20 sps:$4 sm:$0xff]  }
 0x75f   : > { %3894 = vrot.lane.b32.xlu0 %v10410_v9, %s6488_s30  ;;  %3820 = vrot.lane.b32.xlu1 %v10404_v61, %s6489_s9 }
 0x760   : > { %4478 = vmatprep.mubr.bf16.mxu0 %v6430_v2  ;;  %v6228_v2 = vld [vmem:[%s13030_s2 + $0xf8] sm:$0xff] }
 0x761   : > { %v10448_v45 = vpop.permute.xlu0 %3870  ;;  %v10451_v53 = vpop.permute.xlu1 %3796 }
 0x762   : > { %13617 = vst [vmem:[#allocation45_spill] sm:$0xff] %v10448_v45  ;;  %13619 = vst [vmem:[#allocation35_spill] sm:$0xff] %v10451_v53 }
 0x763   : > { %3822 = vrot.lane.b32.xlu0 %v10410_v9, %s6489_s9  ;;  %4116 = vrot.lane.b32.xlu1 %v10404_v61, %s6490_s12 }
 0x765   : > { %v10458_v28 = vpop.permute.xlu0 %3798  ;;  %v10462_v20 = vpop.permute.xlu1 %3740 }
 0x766   : > { %13621 = vst [vmem:[#allocation74_spill] sm:$0xff] %v10458_v28 }
 0x767   : > { %4118 = vrot.lane.b32.xlu0 %v10410_v9, %s6490_s12  ;;  %3736 = vrot.lane.b32.xlu1 %v10460_v32, %s6485_s27 }
 0x769   : > { %v10470_v38 = vpop.permute.xlu0 %3742  ;;  %v10472_v7 = vpop.permute.xlu1 %3668 }
 0x76b   : > { %3738 = vrot.lane.b32.xlu0 %v10468_v16, %s6485_s27  ;;  %3664 = vrot.lane.b32.xlu1 %v10460_v32, %s6486_s28 }
 0x76d   : > { %v10479_v37 = vpop.permute.xlu0 %3670  ;;  %v10481_v35 = vpop.permute.xlu1 %3964 }
 0x76f   : > { %3666 = vrot.lane.b32.xlu0 %v10468_v16, %s6486_s28  ;;  %3960 = vrot.lane.b32.xlu1 %v10460_v32, %s6487_s29 }
 0x771   : > { %v10488_v17 = vpop.permute.xlu0 %3966  ;;  %v10491_v22 = vpop.permute.xlu1 %3884 }
 0x772   : > { %13624 = vst [vmem:[#allocation58_spill] sm:$0xff] %v10491_v22 }
 0x773   : > { %3962 = vrot.lane.b32.xlu0 %v10468_v16, %s6487_s29  ;;  %3880 = vrot.lane.b32.xlu1 %v10460_v32, %s6488_s30 }
 0x775   : > { %v10498_v60 = vpop.permute.xlu0 %3886  ;;  %v10501_v5 = vpop.permute.xlu1 %3812 }
 0x776   : > { %13625 = vst [vmem:[#allocation80_spill] sm:$0xff] %v10498_v60  ;;  %13626 = vst [vmem:[#allocation36_spill] sm:$0xff] %v10501_v5 }
 0x777   : > { %3882 = vrot.lane.b32.xlu0 %v10468_v16, %s6488_s30  ;;  %3808 = vrot.lane.b32.xlu1 %v10460_v32, %s6489_s9 }
 0x779   : > { %v10508_v48 = vpop.permute.xlu0 %3814  ;;  %v10511_v4 = vpop.permute.xlu1 %3728 }
 0x77a   : > { %13627 = vst [vmem:[#allocation42_spill] sm:$0xff] %v10508_v48 }
 0x77b   : > { %3810 = vrot.lane.b32.xlu0 %v10468_v16, %s6489_s9  ;;  %4104 = vrot.lane.b32.xlu1 %v10460_v32, %s6490_s12 }
 0x77d   : > { %v10518_v34 = vpop.permute.xlu0 %3730  ;;  %v10522_v3 = vpop.permute.xlu1 %3656 }
 0x77f   : > { %4106 = vrot.lane.b32.xlu0 %v10468_v16, %s6490_s12  ;;  %3752 = vrot.lane.b32.xlu1 %v10520_v52, %s6485_s27 }
 0x781   : > { %v10530_v10 = vpop.permute.xlu0 %3658  ;;  %v10532_v25 = vpop.permute.xlu1 %3952 }
 0x783   : > { %3754 = vrot.lane.b32.xlu0 %v10528_v50, %s6485_s27  ;;  %4092 = vrot.lane.b32.xlu1 %v10239_v56, %s6490_s12 }
 0x785   : > { %v10538_v40 = vpop.permute.xlu0 %3954  ;;  %v10540_v39 = vpop.permute.xlu1 %3872 }
 0x786   : > { %13632 = vst [vmem:[#allocation46_spill] sm:$0xff] %v10540_v39  ;;  %v6226_v39 = vld [vmem:[%s13030_s2 + $0xe8] sm:$0xff] }
 0x787   : > { %4094 = vrot.lane.b32.xlu0 %v10244_v8, %s6490_s12  ;;  %3680 = vrot.lane.b32.xlu1 %v10520_v52, %s6486_s28 }
 0x789   : > { %v10546_v0 = vpop.permute.xlu0 %3874  ;;  %v10548_v19 = vpop.permute.xlu1 %3800 }
 0x78a   : > { %13633 = vst [vmem:[#allocation64_spill] sm:$0xff] %v10546_v0  ;;  %13634 = vst [vmem:[#allocation81_spill] sm:$0xff] %v10548_v19  ;;  %v6234_v0 = vld [vmem:[%s13031_s3 + $0xe8] sm:$0xff] }
 0x78b   : > { %4110 = vrot.lane.b32.xlu0 %v10271_v23, %s6490_s12  ;;  %3976 = vrot.lane.b32.xlu1 %v10520_v52, %s6487_s29 }
 0x78d   : > { %v10554_v46 = vpop.permute.xlu0 %3802  ;;  %v10556_v58 = vpop.permute.xlu1 %4096 }
 0x78e   : > { %13635 = vst [vmem:[#allocation67_spill] sm:$0xff] %v10554_v46  ;;  %13636 = vst [vmem:[#allocation48_spill] sm:$0xff] %v10556_v58 }
 0x78f   : > { %4034 = vrot.lane.b32.xlu0 %v10468_v16, %s6491_s17  ;;  %3896 = vrot.lane.b32.xlu1 %v10520_v52, %s6488_s30 }
 0x791   : > { %v10562_v6 = vpop.permute.xlu0 %4098  ;;  %v10564_v41 = vpop.permute.xlu1 %3744 }
 0x792   : > { %13637 = vst [vmem:[#allocation49_spill] sm:$0xff] %v10562_v6 }
 0x793   : > { %3682 = vrot.lane.b32.xlu0 %v10528_v50, %s6486_s28  ;;  %3824 = vrot.lane.b32.xlu1 %v10520_v52, %s6489_s9 }
 0x795   : > { %v10570_v14 = vpop.permute.xlu0 %3746  ;;  %v10572_v59 = vpop.permute.xlu1 %3672 }
 0x797   : > { %4178 = vrot.lane.b32.xlu0 %v10468_v16, %s6492_s20  ;;  %4120 = vrot.lane.b32.xlu1 %v10520_v52, %s6490_s12  ;;  %v6418_v16 = vld [vmem:[%s13029_s1 + $0x1e4] ss:$20 sps:$4 sm:$0xff]  }
 0x798   : > { %4405 = vmatprep.mubr.bf16.mxu1 %v6418_v16 }
 0x799   : > { %v10578_v58 = vpop.permute.xlu0 %3674  ;;  %v10580_v6 = vpop.permute.xlu1 %3968 }
 0x79b   : > { %4030 = vrot.lane.b32.xlu0 %v10374_v11, %s6491_s17  ;;  %4108 = vrot.lane.b32.xlu1 %v10264_v27, %s6490_s12 }
 0x79d   : > { %v10586_v30 = vpop.permute.xlu0 %3970  ;;  %v10588_v13 = vpop.permute.xlu1 %3888 }
 0x79e   : > { %13638 = vst [vmem:[#allocation43_spill] sm:$0xff] %v10588_v13 }
 0x79f   : > { %3978 = vrot.lane.b32.xlu0 %v10528_v50, %s6487_s29  ;;  %4032 = vrot.lane.b32.xlu1 %v10460_v32, %s6491_s17 }
 0x7a1   : > { %v10594_v53 = vpop.permute.xlu0 %3890  ;;  %v10596_v5 = vpop.permute.xlu1 %3816 }
 0x7a2   : > { %13639 = vst [vmem:[#allocation32_spill] sm:$0xff] %v10594_v53  ;;  %13640 = vst [vmem:[#allocation62_spill] sm:$0xff] %v10596_v5 }
 0x7a3   : > { %3898 = vrot.lane.b32.xlu0 %v10528_v50, %s6488_s30  ;;  %4048 = vrot.lane.b32.xlu1 %v10520_v52, %s6491_s17 }
 0x7a5   : > { %v10602_v19 = vpop.permute.xlu0 %3818  ;;  %v10604_v28 = vpop.permute.xlu1 %4112 }
 0x7a6   : > { %13641 = vst [vmem:[#allocation29_spill] sm:$0xff] %v10602_v19  ;;  %13642 = vst [vmem:[#allocation39_spill] sm:$0xff] %v10604_v28 }
 0x7a7   : > { %4046 = vrot.lane.b32.xlu0 %v10410_v9, %s6491_s17  ;;  %4176 = vrot.lane.b32.xlu1 %v10460_v32, %s6492_s20 }
 0x7a9   : > { %v10610_v48 = vpop.permute.xlu0 %4114  ;;  %v10612_v46 = vpop.permute.xlu1 %3732 }
 0x7aa   : > { %13643 = vst [vmem:[#allocation53_spill] sm:$0xff] %v10610_v48 }
 0x7ab   : > { %4174 = vrot.lane.b32.xlu0 %v10374_v11, %s6492_s20  ;;  %4192 = vrot.lane.b32.xlu1 %v10520_v52, %s6492_s20 }
 0x7ad   : > { %v10618_v5 = vpop.permute.xlu0 %3734  ;;  %v10620_v19 = vpop.permute.xlu1 %3660 }
 0x7af   : > { %4190 = vrot.lane.b32.xlu0 %v10410_v9, %s6492_s20  ;;  %4028 = vrot.lane.b32.xlu1 %v10368_v54, %s6491_s17 }
 0x7b1   : > { %v10626_v28 = vpop.permute.xlu0 %3662  ;;  %v10628_v48 = vpop.permute.xlu1 %3956 }
 0x7b3   : > { %3826 = vrot.lane.b32.xlu0 %v10528_v50, %s6489_s9  ;;  %4044 = vrot.lane.b32.xlu1 %v10404_v61, %s6491_s17 }
 0x7b5   : > { %v10634_v11 = vpop.permute.xlu0 %3958  ;;  %v10636_v57 = vpop.permute.xlu1 %3876 }
 0x7b6   : > { %13644 = vst [vmem:[#allocation40_spill] sm:$0xff] %v10636_v57 }
 0x7b7   : > { %4026 = vrot.lane.b32.xlu0 %v10302_v26, %s6491_s17  ;;  %4172 = vrot.lane.b32.xlu1 %v10368_v54, %s6492_s20 }
 0x7b9   : > { %v10642_v12 = vpop.permute.xlu0 %3878  ;;  %v10647_v32 = vpop.permute.xlu1 %3804 }
 0x7ba   : > { %13645 = vst [vmem:[#allocation34_spill] sm:$0xff] %v10642_v12  ;;  %13646 = vst [vmem:[#allocation28_spill] sm:$0xff] %v10647_v32 }
 0x7bb   : > { %4042 = vrot.lane.b32.xlu0 %v10338_v31, %s6491_s17  ;;  %4188 = vrot.lane.b32.xlu1 %v10404_v61, %s6492_s20 }
 0x7bd   : > { %v10653_v9 = vpop.permute.xlu0 %3806  ;;  %v10655_v52 = vpop.permute.xlu1 %4100 }
 0x7be   : > { %13647 = vst [vmem:[#allocation50_spill] sm:$0xff] %v10653_v9  ;;  %13648 = vst [vmem:[#allocation55_spill] sm:$0xff] %v10655_v52 }
 0x7bf   : > { %4122 = vrot.lane.b32.xlu0 %v10528_v50, %s6490_s12  ;;  %4024 = vrot.lane.b32.xlu1 %v10296_v15, %s6491_s17 }
 0x7c1   : > { %v10661_v54 = vpop.permute.xlu0 %4102  ;;  %v10663_v32 = vpop.permute.xlu1 %3748 }
 0x7c2   : > { %13649 = vst [vmem:[#allocation61_spill] sm:$0xff] %v10661_v54 }
 0x7c3   : > { %4170 = vrot.lane.b32.xlu0 %v10302_v26, %s6492_s20  ;;  %4040 = vrot.lane.b32.xlu1 %v10332_v55, %s6491_s17 }
 0x7c5   : > { %v10669_v16 = vpop.permute.xlu0 %3750  ;;  %v10671_v61 = vpop.permute.xlu1 %3676 }
 0x7c7   : > { %4186 = vrot.lane.b32.xlu0 %v10338_v31, %s6492_s20  ;;  %4168 = vrot.lane.b32.xlu1 %v10296_v15, %s6492_s20 }
 0x7c9   : > { %v10677_v52 = vpop.permute.xlu0 %3678  ;;  %v10679_v54 = vpop.permute.xlu1 %3972 }
 0x7cb   : > { %4022 = vrot.lane.b32.xlu0 %v10244_v8, %s6491_s17  ;;  %4184 = vrot.lane.b32.xlu1 %v10332_v55, %s6492_s20 }
 0x7cd   : > { %v10685_v26 = vpop.permute.xlu0 %3974  ;;  %v10687_v9 = vpop.permute.xlu1 %3892 }
 0x7ce   : > { %13650 = vst [vmem:[#allocation56_spill] sm:$0xff] %v10687_v9 }
 0x7cf   : > { %4050 = vrot.lane.b32.xlu0 %v10528_v50, %s6491_s17  ;;  %4020 = vrot.lane.b32.xlu1 %v10239_v56, %s6491_s17 }
 0x7d1   : > { %v10693_v15 = vpop.permute.xlu0 %3894  ;;  %v10695_v31 = vpop.permute.xlu1 %3820 }
 0x7d2   : > { %13651 = vst [vmem:[#allocation37_spill] sm:$0xff] %v10695_v31 }
 0x7d3   : > { %4194 = vrot.lane.b32.xlu0 %v10528_v50, %s6492_s20  ;;  %4036 = vrot.lane.b32.xlu1 %v10264_v27, %s6491_s17 }
 0x7d5   : > { %v10701_v55 = vpop.permute.xlu0 %3822  ;;  %v10706_v22 = vpop.permute.xlu1 %4116 }
 0x7d6   : > { %13652 = vst [vmem:[#allocation44_spill] sm:$0xff] %v10701_v55  ;;  %13653 = vst [vmem:[#allocation71_spill] sm:$0xff] %v10706_v22  ;;  %v6227_v22 = vld [vmem:[%s13030_s2 + $0xf0] sm:$0xff] }
 0x7d7   : > { %4038 = vrot.lane.b32.xlu0 %v10271_v23, %s6491_s17  ;;  %4164 = vrot.lane.b32.xlu1 %v10239_v56, %s6492_s20  ;;  %v6236_v56 = vld [vmem:[%s13031_s3 + $0xf8] sm:$0xff] }
 0x7d9   : > { %v10712_v31 = vpop.permute.xlu0 %4118  ;;  %v3737_v50 = vpop.permute.xlu1 %3736 }
 0x7da   : > { %13654 = vst [vmem:[#allocation76_spill] sm:$0xff] %v10712_v31 }
 0x7db   : > { %4166 = vrot.lane.b32.xlu0 %v10244_v8, %s6492_s20  ;;  %4180 = vrot.lane.b32.xlu1 %v10264_v27, %s6492_s20  ;;  %v6235_v27 = vld [vmem:[%s13031_s3 + $0xf0] sm:$0xff] }
 0x7dd   : > { %v3739_v55 = vpop.permute.xlu0 %3738  ;;  %v10721_v45 = vpop.permute.xlu1 %3664 }
 0x7df   : > { %4182 = vrot.lane.b32.xlu0 %v10271_v23, %s6492_s20  ;;  %4633 = vperm.xlu1 %6331, %v6227_v22   ;;  %v6225_v22 = vld [vmem:[%s13030_s2 + $0xe0] sm:$0xff] }
 0x7e1   : > { %v10728_v31 = vpop.permute.xlu0 %3666  ;;  %v10733_v8 = vpop.permute.xlu1 %3960 }
 0x7e3   : > { %4638 = vperm.xlu0 %6330, %v6228_v2   ;;  %4698 = vperm.xlu1 %6331, %v6235_v27   ;;  %v6233_v27 = vld [vmem:[%s13031_s3 + $0xe0] sm:$0xff] }
 0x7e5   : > { %v10738_v23 = vpop.permute.xlu0 %3962  ;;  %v10743_v60 = vpop.permute.xlu1 %3880 }
 0x7e6   : > { %13655 = vst [vmem:[#allocation82_spill] sm:$0xff] %v10738_v23  ;;  %13656 = vst [vmem:[#allocation70_spill] sm:$0xff] %v10743_v60 }
 0x7e7   : > { %4703 = vperm.xlu0 %6330, %v6236_v56   ;;  %4623 = vperm.xlu1 %6331, %v6225_v22   ;;  %v6223_v22 = vld [vmem:[%s13030_s2 + $0xd0] sm:$0xff] }
 0x7e9   : > { %v10748_v2 = vpop.permute.xlu0 %3882  ;;  %v10753_v13 = vpop.permute.xlu1 %3808 }
 0x7ea   : > { %13657 = vst [vmem:[#allocation75_spill] sm:$0xff] %v10748_v2  ;;  %13658 = vst [vmem:[#allocation83_spill] sm:$0xff] %v10753_v13  ;;  %v6224_v13 = vld [vmem:[%s13030_s2 + $0xd8] sm:$0xff] }
 0x7eb   : > { %4628 = vperm.xlu0 %6330, %v6226_v39   ;;  %4688 = vperm.xlu1 %6331, %v6233_v27   ;;  %v6231_v27 = vld [vmem:[%s13031_s3 + $0xd0] sm:$0xff] }
 0x7ed   : > { %v10758_v56 = vpop.permute.xlu0 %3810  ;;  %v10763_v53 = vpop.permute.xlu1 %4104 }
 0x7ee   : > { %13659 = vst [vmem:[#allocation57_spill] sm:$0xff] %v10758_v56  ;;  %13660 = vst [vmem:[#allocation54_spill] sm:$0xff] %v10763_v53  ;;  %v3761_v56 = vsel %vm386_vm0, %v10618_v5, %v10669_v16  ;;  %v3760_v53 = vsel %vm386_vm0, %v10612_v46, %v10663_v32 }
 0x7ef   : > { %4693 = vperm.xlu0 %6330, %v6234_v0   ;;  %4613 = vperm.xlu1 %6331, %v6223_v22  }
 0x7f1   : > { %v10768_v39 = vpop.permute.xlu0 %4106  ;;  %v3753_v47 = vpop.permute.xlu1 %3752 }
 0x7f2   : > { %13661 = vst [vmem:[#allocation41_spill] sm:$0xff] %v10768_v39  ;;  %v3762_v0 = vsel %vm386_vm0, %v3737_v50, %v3753_v47  ;;  %v3770_v22 = vsel %vm386_vm0, %v3753_v47, %v3737_v50  ;;  %v6232_v39 = vld [vmem:[%s13031_s3 + $0xd8] sm:$0xff]  ;;  %v3769_v47 = vsel %vm386_vm0, %v10669_v16, %v10618_v5  ;;  %v3783_v50 = vmul.f32 %v3761_v56, %v6727_v24 }
 0x7f3   : > { %4618 = vperm.xlu0 %6330, %v6224_v13   ;;  %4678 = vperm.xlu1 %6331, %v6231_v27   ;;  %v6221_v13 = vld [vmem:[%s13030_s2 + $0xc0] sm:$0xff]  ;;  %v3784_v9 = vmul.f32 %v3770_v22, %v13526_v49  ;;  %v3785_v60 = vmul.f32 %v3762_v0, %v6727_v24  ;;  %v3759_v5 = vsel %vm386_vm0, %v10518_v34, %v10570_v14 }
 0x7f4   : > { %v3768_v16 = vsel %vm386_vm0, %v10663_v32, %v10612_v46  ;;  %v3758_v22 = vsel %vm386_vm0, %v10511_v4, %v10564_v41 }
 0x7f5   : > { %v3755_v2 = vpop.permute.xlu0 %3754  ;;  %v10800_v57 = vpop.permute.xlu1 %4092  ;;  %v3780_v32 = vmul.f32 %v3768_v16, %v13526_v49  ;;  %v3777_v46 = vmul.f32 %v3758_v22, %v6727_v24 }
 0x7f6   : > { %v3763_v27 = vsel %vm386_vm0, %v3739_v55, %v3755_v2  ;;  %v3771_v51 = vsel %vm386_vm0, %v3755_v2, %v3739_v55  ;;  %v6222_v55 = vld [vmem:[%s13030_s2 + $0xc8] sm:$0xff] }
 0x7f7   : > { %v3786_v23 = vmul.f32 %v3771_v51, %v13526_v49  ;;  %v3787_v12 = vmul.f32 %v3763_v27, %v6727_v24  ;;  %4683 = vperm.xlu0 %6330, %v6232_v39   ;;  %4603 = vperm.xlu1 %6331, %v6221_v13   ;;  %v3781_v51 = vmul.f32 %v3760_v53, %v6727_v24  ;;  %v6229_v39 = vld [vmem:[%s13031_s3 + $0xc0] sm:$0xff] }
 0x7f8   : > { %v3782_v13 = vmul.f32 %v3769_v47, %v13526_v49  ;;  %v3756_v47 = vsel %vm386_vm0, %v10412_v33, %v10462_v20 }
 0x7f9   : > { %v3794_v2 = vpack.c.bf16 %v3786_v23, %v3784_v9  ;;  %v10818_v56 = vpop.permute.xlu0 %4094  ;;  %v3795_v0 = vpack.c.bf16 %v3787_v12, %v3785_v60  ;;  %v3681_v27 = vpop.permute.xlu1 %3680  ;;  %v3767_v23 = vsel %vm386_vm0, %v10570_v14, %v10518_v34  ;;  %v3779_v9 = vmul.f32 %v3759_v5, %v6727_v24  ;;  %v6230_v60 = vld [vmem:[%s13031_s3 + $0xc8] sm:$0xff] }
 0x7fa   : > { %v3793_v53 = vpack.c.bf16 %v3783_v50, %v3781_v51  ;;  %v3757_v12 = vsel %vm386_vm0, %v10419_v29, %v10470_v38  ;;  %v3766_v34 = vsel %vm386_vm0, %v10564_v41, %v10511_v4  ;;  %v3765_v50 = vsel %vm386_vm0, %v10470_v38, %v10419_v29 }
 0x7fb   : > { %4608 = vperm.xlu0 %6330, %v6222_v55   ;;  %4373 = vmatprep.subr.bf16.mxu1 %v3795_v0  ;;  %v3778_v5 = vmul.f32 %v3767_v23, %v13526_v49  ;;  %v3792_v55 = vpack.c.bf16 %v3782_v13, %v3780_v32  ;;  %v3775_v4 = vmul.f32 %v3757_v12, %v6727_v24 }
 0x7fc   : > { %4668 = vperm.xlu1 %6331, %v6229_v39   ;;  %4374 = vmatpush1.bf16.msra.mxu1 %v3794_v2  ;;  %v3791_v41 = vpack.c.bf16 %v3779_v9, %v3777_v46  ;;  %v3764_v51 = vsel %vm386_vm0, %v10462_v20, %v10412_v33  ;;  %v3776_v2 = vmul.f32 %v3766_v34, %v13526_v49 }
 0x7fd   : > { %v10846_v14 = vpop.permute.xlu0 %4110  ;;  %4375 = vmatprep.subr.bf16.mxu1 %v3793_v53  ;;  %v10857_v16 = vpop.permute.xlu1 %3976  ;;  %v3773_v39 = vmul.f32 %v3756_v47, %v6727_v24  ;;  %v3774_v29 = vmul.f32 %v3765_v50, %v13526_v49  ;;  %v3692_v38 = vsel %vm301_vm1, %v10472_v7, %v10421_v21  ;;  %v3693_v33 = vsel %vm301_vm1, %v10479_v37, %v10428_v44 }
 0x7fe   : > { %v3790_v20 = vpack.c.bf16 %v3778_v5, %v3776_v2  ;;  %v3772_v13 = vmul.f32 %v3764_v51, %v13526_v49  ;;  %v3689_v23 = vsel %vm301_vm1, %v10626_v28, %v10677_v52  ;;  %v3684_v53 = vsel %vm301_vm1, %v10421_v21, %v10472_v7 }
 0x7ff   : > { %4673 = vperm.xlu0 %6330, %v6230_v60   ;;  %v3789_v9 = vpack.c.bf16 %v3775_v4, %v3773_v39  ;;  %v10889_v12 = vmul.f32 %v3692_v38, %v6819_v42  ;;  %v3690_v32 = vsel %vm301_vm1, %v10721_v45, %v3681_v27  ;;  %v3698_v60 = vsel %vm301_vm1, %v3681_v27, %v10721_v45 }
 0x800   : > { %4376 = vmatpush1.bf16.msra.mxu1 %v3792_v55  ;;  %v3788_v34 = vpack.c.bf16 %v3774_v29, %v3772_v13  ;;  %v3685_v46 = vsel %vm301_vm1, %v10428_v44, %v10479_v37  ;;  %v10902_v21 = vmul.f32 %v3693_v33, %v6819_v42  ;;  %v3688_v7 = vsel %vm301_vm1, %v10620_v19, %v10671_v61 }
 0x801   : > { %v10871_v0 = vpop.permute.xlu0 %4034  ;;  %4377 = vmatprep.subr.bf16.mxu1 %v3791_v41  ;;  %v10877_v22 = vpop.permute.xlu1 %3896  ;;  %v3697_v45 = vsel %vm301_vm1, %v10677_v52, %v10626_v28  ;;  %v3711_v27 = vmul.f32 %v3689_v23, %v6822_v43  ;;  %v3712_v5 = vmul.f32 %v3698_v60, %v6819_v42  ;;  %v3713_v55 = vmul.f32 %v3690_v32, %v6822_v43 }
 0x802   : > { %v10926_v52 = vmul.f32 %v3685_v46, %v6822_v43  ;;  %v3988_v41 = vsel %vm652_vm2, %v10481_v35, %v10431_v1  ;;  %v3695_v51 = vsel %vm301_vm1, %v10578_v58, %v10530_v10  ;;  %v3696_v2 = vsel %vm301_vm1, %v10671_v61, %v10620_v19 }
 0x803   : > { %v3709_v39 = vmul.f32 %v3688_v7, %v6822_v43  ;;  %v3981_v13 = vsel %vm652_vm2, %v10438_v36, %v10488_v17  ;;  %v3710_v61 = vmul.f32 %v3697_v45, %v6819_v42  ;;  %v3694_v23 = vsel %vm301_vm1, %v10572_v59, %v10522_v3 }
 0x804   : > { %4378 = vmatpush1.bf16.msra.mxu1 %v3790_v20  ;;  %v3701_v20 = vmul.f32 %v3684_v53, %v6822_v43  ;;  %v10971_v32 = vmul.f32 %v3988_v41, %v6909_v62  ;;  %v3989_v60 = vsel %vm652_vm2, %v10488_v17, %v10438_v36  ;;  %v3704_v36 = vmul.f32 %v3694_v23, %v6819_v42 }
 0x805   : > { %v3683_v47 = vpop.permute.xlu0 %3682  ;;  %4379 = vmatprep.subr.bf16.mxu1 %v3789_v9  ;;  %v10919_v50 = vpop.permute.xlu1 %3824  ;;  %v3721_v53 = vpack.c.bf16 %v3711_v27, %v3709_v39  ;;  %v3991_v17 = vsel %vm652_vm2, %v10586_v30, %v10538_v40  ;;  %v11000_v45 = vmul.f32 %v3989_v60, %v6909_v62  ;;  %v11006_v27 = vsel %vm652_vm2, %v10532_v25, %v10580_v6 }
 0x806   : > { %v3691_v44 = vsel %vm301_vm1, %v10728_v31, %v3683_v47  ;;  %v3699_v37 = vsel %vm301_vm1, %v3683_v47, %v10728_v31  ;;  %v3687_v31 = vsel %vm301_vm1, %v10530_v10, %v10578_v58  ;;  %v3686_v10 = vsel %vm301_vm1, %v10522_v3, %v10572_v59 }
 0x807   : > { %v3714_v4 = vmul.f32 %v3699_v37, %v6819_v42  ;;  %v3715_v28 = vmul.f32 %v3691_v44, %v6822_v43  ;;  %v10963_v58 = vsel %vm652_vm2, %v10431_v1, %v10481_v35  ;;  %v3707_v9 = vmul.f32 %v3687_v31, %v6822_v43 }
 0x808   : > { %4380 = vmatpush1.bf16.msra.mxu1 %v3788_v34  ;;  %v3706_v1 = vmul.f32 %v3695_v51, %v6819_v42  ;;  %v3708_v35 = vmul.f32 %v3696_v2, %v6819_v42  ;;  %v3716_v59 = vpack.c.bf16 %v10902_v21, %v10889_v12  ;;  %v10982_v3 = vmul.f32 %v3981_v13, %v6912_v63 }
 0x809   : > { %v3722_v29 = vpack.c.bf16 %v3714_v4, %v3712_v5  ;;  %v10945_v38 = vpop.permute.xlu0 %4178  ;;  %v3723_v33 = vpack.c.bf16 %v3715_v28, %v3713_v55  ;;  %v10957_v19 = vpop.permute.xlu1 %4120  ;;  %v3705_v34 = vmul.f32 %v3686_v10, %v6822_v43  ;;  %v3717_v7 = vpack.c.bf16 %v10926_v52, %v3701_v20  ;;  %v13664_v10 = vld [vmem:[#allocation70_spill] sm:$0xff] }
 0x80a   : > { %v3720_v47 = vpack.c.bf16 %v3710_v61, %v3708_v35  ;;  %v3993_v12 = vsel %vm652_vm2, %v10685_v26, %v10634_v11  ;;  %v3992_v44 = vsel %vm652_vm2, %v10679_v54, %v10628_v48  ;;  %v3718_v5 = vpack.c.bf16 %v3706_v1, %v3704_v36  ;;  %v13667_v36 = vld [vmem:[#allocation5_spill] sm:$0xff] }
 0x80b   : > { %4381 = vmatprep.subr.bf16.mxu1 %v3723_v33  ;;  %v3719_v37 = vpack.c.bf16 %v3707_v9, %v3705_v34  ;;  %v3990_v55 = vsel %vm652_vm2, %v10580_v6, %v10532_v25  ;;  %v3986_v4 = vsel %vm652_vm2, %v10733_v8, %v10857_v16  ;;  %v3994_v28 = vsel %vm652_vm2, %v10857_v16, %v10733_v8  ;;  %v13662_v16 = vld [vmem:[#allocation34_spill] sm:$0xff]  ;;  %v13665_v9 = vld [vmem:[#allocation56_spill] sm:$0xff] }
 0x80c   : > { %4382 = vmatpush1.bf16.msra.mxu1 %v3722_v29  ;;  %v3983_v52 = vsel %vm652_vm2, %v10538_v40, %v10586_v30  ;;  %v11029_v41 = vmul.f32 %v3991_v17, %v6909_v62  ;;  %v3985_v25 = vsel %vm652_vm2, %v10634_v11, %v10685_v26  ;;  %v4007_v6 = vmul.f32 %v3993_v12, %v6909_v62  ;;  %v13663_v30 = vld [vmem:[#allocation82_spill] sm:$0xff] }
 0x80d   : > { %v10985_v46 = vpop.permute.xlu0 %4030  ;;  %4383 = vmatprep.subr.bf16.mxu1 %v3721_v53  ;;  %v10997_v21 = vpop.permute.xlu1 %4108  ;;  %v4005_v8 = vmul.f32 %v3992_v44, %v6909_v62  ;;  %v3905_v51 = vsel %vm558_vm3, %v13662_v16, %v10693_v15  ;;  %v4008_v11 = vmul.f32 %v3986_v4, %v6912_v63  ;;  %v4009_v39 = vmul.f32 %v3994_v28, %v6909_v62  ;;  %v13666_v53 = vld [vmem:[#allocation40_spill] sm:$0xff] }
 0x80e   : > { %v3984_v20 = vsel %vm652_vm2, %v10628_v48, %v10679_v54  ;;  %v4006_v13 = vmul.f32 %v3985_v25, %v6912_v63  ;;  %v3906_v61 = vsel %vm558_vm3, %v13664_v10, %v10877_v22  ;;  %v3914_v23 = vsel %vm558_vm3, %v10877_v22, %v13664_v10  ;;  %v13670_v25 = vld [vmem:[#allocation32_spill] sm:$0xff] }
 0x80f   : > { %v3904_v60 = vsel %vm558_vm3, %v13666_v53, %v13665_v9  ;;  %v4017_v35 = vpack.c.bf16 %v4007_v6, %v4005_v8  ;;  %v3913_v34 = vsel %vm558_vm3, %v10693_v15, %v13662_v16  ;;  %v3927_v17 = vmul.f32 %v3905_v51, %v13667_v36  ;;  %v13671_v6 = vld [vmem:[#allocation64_spill] sm:$0xff] }
 0x810   : > { %4384 = vmatpush1.bf16.msra.mxu1 %v3720_v47  ;;  %v13668_v47 = vld [vmem:[#allocation75_spill] sm:$0xff]  ;;  %v4001_v28 = vmul.f32 %v3990_v55, %v6909_v62  ;;  %v4004_v8 = vmul.f32 %v3984_v20, %v6912_v63  ;;  %v3912_v16 = vsel %vm558_vm3, %v13665_v9, %v13666_v53  ;;  %v3925_v51 = vmul.f32 %v3904_v60, %v13667_v36  ;;  %v13674_v9 = vld [vmem:[#allocation80_spill] sm:$0xff]  ;;  %v13675_v53 = vld [vmem:[#allocation45_spill] sm:$0xff] }
 0x811   : > { %v3979_v31 = vpop.permute.xlu0 %3978  ;;  %4385 = vmatprep.subr.bf16.mxu1 %v3719_v37  ;;  %v11047_v26 = vpop.permute.xlu1 %4032  ;;  %v3911_v10 = vsel %vm558_vm3, %v13670_v25, %v13671_v6  ;;  %v4000_v60 = vmul.f32 %v11006_v27, %v6912_v63  ;;  %v3909_v27 = vsel %vm558_vm3, %v13674_v9, %v13675_v53 }
 0x812   : > { %v3987_v40 = vsel %vm652_vm2, %v13663_v30, %v3979_v31  ;;  %v3995_v2 = vsel %vm652_vm2, %v3979_v31, %v13663_v30  ;;  %v3903_v31 = vsel %vm558_vm3, %v13671_v6, %v13670_v25 }
 0x813   : > { %v4010_v29 = vmul.f32 %v3987_v40, %v6912_v63  ;;  %v4011_v33 = vmul.f32 %v3995_v2, %v6909_v62  ;;  %v4002_v2 = vmul.f32 %v3983_v52, %v6912_v63  ;;  %v4015_v52 = vpack.c.bf16 %v11029_v41, %v4001_v28 }
 0x814   : > { %4386 = vmatpush1.bf16.msra.mxu1 %v3718_v5  ;;  %v3929_v5 = vmul.f32 %v3906_v61, %v13667_v36  ;;  %v3923_v61 = vmul.f32 %v3903_v31, %v13667_v36  ;;  %v3996_v28 = vmul.f32 %v10963_v58, %v6912_v63 }
 0x815   : > { %v4018_v1 = vpack.c.bf16 %v4010_v29, %v4008_v11  ;;  %v3899_v54 = vpop.permute.xlu0 %3898  ;;  %4387 = vmatprep.subr.bf16.mxu1 %v3717_v7  ;;  %v4019_v48 = vpack.c.bf16 %v4011_v33, %v4009_v39  ;;  %v11081_v44 = vpop.permute.xlu1 %4048  ;;  %v13669_v7 = vld [vmem:[#allocation4_spill] sm:$0xff]  ;;  %v13672_v11 = vld [vmem:[#allocation43_spill] sm:$0xff]  ;;  %v13673_v39 = vld [vmem:[#allocation46_spill] sm:$0xff]  ;;  %v4016_v29 = vpack.c.bf16 %v4006_v13, %v4004_v8  ;;  %v3901_v13 = vsel %vm558_vm3, %v13675_v53, %v13674_v9 }
 0x816   : > { %v3907_v22 = vsel %vm558_vm3, %v13668_v47, %v3899_v54  ;;  %v3915_v12 = vsel %vm558_vm3, %v3899_v54, %v13668_v47  ;;  %v3928_v37 = vmul.f32 %v3914_v23, %v13669_v7  ;;  %v3926_v33 = vmul.f32 %v3913_v34, %v13669_v7  ;;  %v13676_v54 = vld [vmem:[#allocation58_spill] sm:$0xff]  ;;  %v13685_v53 = vld [vmem:[#allocation37_spill] sm:$0xff] }
 0x817   : > { %v3930_v4 = vmul.f32 %v3915_v12, %v13669_v7  ;;  %v3931_v15 = vmul.f32 %v3907_v22, %v13667_v36  ;;  %4446 = vmatprep.subr.bf16.mxu0 %v4019_v48  ;;  %v3937_v23 = vpack.c.bf16 %v3927_v17, %v3925_v51  ;;  %v13677_v48 = vld [vmem:[#allocation33_spill] sm:$0xff]  ;;  %v3910_v41 = vsel %vm558_vm3, %v13672_v11, %v13673_v39 }
 0x818   : > { %4388 = vmatpush1.bf16.msra.mxu1 %v3716_v59  ;;  %4447 = vmatpush1.bf16.msra.mxu0 %v4018_v1  ;;  %v3902_v59 = vsel %vm558_vm3, %v13673_v39, %v13672_v11  ;;  %v3924_v1 = vmul.f32 %v3912_v16, %v13669_v7  ;;  %v4014_v47 = vpack.c.bf16 %v4002_v2, %v4000_v60  ;;  %v13680_v39 = vld [vmem:[#allocation73_spill] sm:$0xff] }
 0x819   : > { %v3938_v30 = vpack.c.bf16 %v3930_v4, %v3928_v37  ;;  %v11098_v40 = vpop.permute.xlu0 %4046  ;;  %4448 = vmatprep.subr.bf16.mxu0 %v4017_v35  ;;  %v3939_v55 = vpack.c.bf16 %v3931_v15, %v3929_v5  ;;  %v11106_v20 = vpop.permute.xlu1 %4176  ;;  %v3900_v35 = vsel %vm558_vm3, %v13677_v48, %v13676_v54  ;;  %v3921_v34 = vmul.f32 %v3902_v59, %v13667_v36  ;;  %v13681_v59 = vld [vmem:[#allocation68_spill] sm:$0xff] }
 0x81a   : > { %v3922_v22 = vmul.f32 %v3911_v10, %v13669_v7  ;;  %v3936_v12 = vpack.c.bf16 %v3926_v33, %v3924_v1  ;;  %v3919_v5 = vmul.f32 %v3901_v13, %v13667_v36  ;;  %v4013_v15 = vpack.c.bf16 %v11000_v45, %v10971_v32  ;;  %v13682_v33 = vld [vmem:[#allocation83_spill] sm:$0xff]  ;;  %v13686_v13 = vld [vmem:[#allocation28_spill] sm:$0xff] }
 0x81b   : > { %4389 = vmatprep.subr.bf16.mxu1 %v3939_v55  ;;  %v3935_v4 = vpack.c.bf16 %v3923_v61, %v3921_v34  ;;  %v3908_v25 = vsel %vm558_vm3, %v13676_v54, %v13677_v48  ;;  %v3920_v6 = vmul.f32 %v3910_v41, %v13669_v7  ;;  %v3917_v31 = vmul.f32 %v3900_v35, %v13667_v36  ;;  %v13679_v55 = vld [vmem:[#allocation50_spill] sm:$0xff]  ;;  %v13683_v61 = vld [vmem:[#allocation52_spill] sm:$0xff]  ;;  %v13687_v54 = vld [vmem:[#allocation69_spill] sm:$0xff] }
 0x81c   : > { %4390 = vmatpush2.bf16.msra.mxu1 %v3938_v30  ;;  %4449 = vmatpush1.bf16.msra.mxu0 %v4016_v29  ;;  %v3918_v8 = vmul.f32 %v3909_v27, %v13669_v7  ;;  %v4012_v32 = vpack.c.bf16 %v10982_v3, %v3996_v28  ;;  %v3916_v51 = vmul.f32 %v3908_v25, %v13669_v7  ;;  %v13678_v30 = vld [vmem:[#allocation44_spill] sm:$0xff]  ;;  %v13688_v48 = vld [vmem:[#allocation63_spill] sm:$0xff]  ;;  %v13690_v27 = vld [vmem:[#allocation57_spill] sm:$0xff] }
 0x81d   : > { %v11130_v17 = vpop.permute.xlu0 %4174  ;;  %4391 = vmatprep.subr.bf16.mxu1 %v3937_v23  ;;  %4450 = vmatprep.subr.bf16.mxu0 %v4015_v52  ;;  %v11137_v37 = vpop.permute.xlu1 %4192  ;;  %v3934_v58 = vpack.c.bf16 %v3922_v22, %v3920_v6  ;;  %v3833_v2 = vsel %vm472_vm4, %v13679_v55, %v13678_v30  ;;  %v3933_v11 = vpack.c.bf16 %v3919_v5, %v3917_v31  ;;  %v13684_v23 = vld [vmem:[#allocation38_spill] sm:$0xff]  ;;  %v13689_v41 = vld [vmem:[#allocation7_spill] sm:$0xff]  ;;  %v13692_v6 = vld [vmem:[#allocation29_spill] sm:$0xff] }
 0x81e   : > { %v3947_v29 = vpack.c.bf16 %v13681_v59, %v13680_v39  ;;  %v3834_v10 = vsel %vm472_vm4, %v13682_v33, %v10919_v50  ;;  %v3842_v3 = vsel %vm472_vm4, %v10919_v50, %v13682_v33  ;;  %v3945_v52 = vpack.c.bf16 %v13684_v23, %v13683_v61  ;;  %v13691_v5 = vld [vmem:[#allocation6_spill] sm:$0xff]  ;;  %v13693_v31 = vld [vmem:[#allocation67_spill] sm:$0xff] }
 0x81f   : > { %v3932_v9 = vpack.c.bf16 %v3918_v8, %v3916_v51  ;;  %v3832_v60 = vsel %vm472_vm4, %v13686_v13, %v13685_v53  ;;  %v3946_v35 = vpack.c.bf16 %v13688_v48, %v13687_v54  ;;  %v3841_v50 = vsel %vm472_vm4, %v13678_v30, %v13679_v55  ;;  %v13696_v30 = vld [vmem:[#allocation3_spill] sm:$0xff]  ;;  %v13697_v55 = vld [vmem:[#allocation65_spill] sm:$0xff] }
 0x820   : > { %4392 = vmatpush2.bf16.msra.mxu1 %v3936_v12  ;;  %4451 = vmatpush1.bf16.msra.mxu0 %v4014_v47  ;;  %v3855_v34 = vmul.f32 %v3833_v2, %v13689_v41  ;;  %v3831_v8 = vsel %vm472_vm4, %v13693_v31, %v13692_v6  ;;  %v3940_v2 = vpack.c.bf16 %v13697_v55, %v13696_v30  ;;  %v13704_v59 = vld [vmem:[#allocation79_spill] sm:$0xff] }
 0x821   : > { %v11151_v16 = vpop.permute.xlu0 %4190  ;;  %4393 = vmatprep.subr.bf16.mxu1 %v3935_v4  ;;  %4452 = vmatprep.subr.bf16.mxu0 %v4013_v15  ;;  %v11154_v45 = vpop.permute.xlu1 %4028  ;;  %v3856_v4 = vmul.f32 %v3842_v3, %v13691_v5  ;;  %v3857_v15 = vmul.f32 %v3834_v10, %v13689_v41  ;;  %v13705_v48 = vld [vmem:[#allocation59_spill] sm:$0xff] }
 0x822   : > { %v3943_v39 = vpack.c.bf16 %v13705_v48, %v13704_v59 }
 0x824   : > { %4394 = vmatpush2.bf16.msra.mxu1 %v3934_v58  ;;  %4453 = vmatpush1.bf16.msra.mxu0 %v4012_v32  ;;  %v13694_v32 = vld [vmem:[#allocation47_spill] sm:$0xff] }
 0x825   : > { %v3827_v1 = vpop.permute.xlu0 %3826  ;;  %4395 = vmatprep.subr.bf16.mxu1 %v3933_v11  ;;  %4454 = vmatprep.subr.bf16.mxu0 %v3947_v29  ;;  %v11190_v12 = vpop.permute.xlu1 %4044  ;;  %v13695_v58 = vld [vmem:[#allocation51_spill] sm:$0xff]  ;;  %v3840_v11 = vsel %vm472_vm4, %v13685_v53, %v13686_v13  ;;  %v3853_v29 = vmul.f32 %v3832_v60, %v13689_v41  ;;  %v3839_v53 = vsel %vm472_vm4, %v13692_v6, %v13693_v31 }
 0x826   : > { %v3835_v47 = vsel %vm472_vm4, %v13690_v27, %v3827_v1  ;;  %v3843_v22 = vsel %vm472_vm4, %v3827_v1, %v13690_v27  ;;  %v3944_v51 = vpack.c.bf16 %v13695_v58, %v13694_v32  ;;  %v13699_v1 = vld [vmem:[#allocation74_spill] sm:$0xff]  ;;  %v3854_v13 = vmul.f32 %v3841_v50, %v13691_v5  ;;  %v13714_v58 = vld [vmem:[#allocation71_spill] sm:$0xff] }
 0x827   : > { %v3858_v28 = vmul.f32 %v3843_v22, %v13691_v5  ;;  %v3859_v25 = vmul.f32 %v3835_v47, %v13689_v41  ;;  %v13700_v27 = vld [vmem:[#allocation62_spill] sm:$0xff]  ;;  %v13701_v47 = vld [vmem:[#allocation81_spill] sm:$0xff]  ;;  %v3852_v31 = vmul.f32 %v3840_v11, %v13691_v5  ;;  %v13706_v11 = vld [vmem:[#allocation72_spill] sm:$0xff] }
 0x828   : > { %4396 = vmatpush2.bf16.msra.mxu1 %v3932_v9  ;;  %4455 = vmatpush1.bf16.msra.mxu0 %v3946_v35  ;;  %v13698_v9 = vld [vmem:[#allocation42_spill] sm:$0xff]  ;;  %v3830_v22 = vsel %vm472_vm4, %v13701_v47, %v13700_v27  ;;  %v3838_v50 = vsel %vm472_vm4, %v13700_v27, %v13701_v47  ;;  %v13721_v32 = vld [vmem:[#allocation39_spill] sm:$0xff] }
 0x829   : > { %v3866_v33 = vpack.c.bf16 %v3858_v28, %v3856_v4  ;;  %v11209_v10 = vpop.permute.xlu0 %4026  ;;  %4456 = vmatprep.subr.bf16.mxu0 %v3945_v52  ;;  %v3867_v3 = vpack.c.bf16 %v3859_v25, %v3857_v15  ;;  %v3829_v35 = vsel %vm472_vm4, %v13699_v1, %v13698_v9  ;;  %v11224_v60 = vpop.permute.xlu1 %4172  ;;  %v13702_v52 = vld [vmem:[#allocation36_spill] sm:$0xff]  ;;  %v13703_v4 = vld [vmem:[#allocation35_spill] sm:$0xff]  ;;  %v3851_v28 = vmul.f32 %v3831_v8, %v13689_v41  ;;  %v13709_v47 = vld [vmem:[#allocation78_spill] sm:$0xff] }
 0x82a   : > { %v3828_v15 = vsel %vm472_vm4, %v13703_v4, %v13702_v52  ;;  %v3865_v25 = vpack.c.bf16 %v3855_v34, %v3853_v29  ;;  %v3837_v6 = vsel %vm472_vm4, %v13698_v9, %v13699_v1  ;;  %v3847_v8 = vmul.f32 %v3829_v35, %v13689_v41  ;;  %v13708_v35 = vld [vmem:[#allocation77_spill] sm:$0xff] }
 0x82b   : > { %4397 = vmatprep.subr.bf16.mxu1 %v3867_v3  ;;  %v3849_v34 = vmul.f32 %v3830_v22, %v13689_v41  ;;  %v3850_v29 = vmul.f32 %v3839_v53, %v13691_v5  ;;  %v3836_v9 = vsel %vm472_vm4, %v13702_v52, %v13703_v4  ;;  %v3864_v1 = vpack.c.bf16 %v3854_v13, %v3852_v31  ;;  %v13712_v52 = vld [vmem:[#allocation54_spill] sm:$0xff]  ;;  %v13713_v31 = vld [vmem:[#allocation55_spill] sm:$0xff] }
 0x82c   : > { %4398 = vmatpush2.bf16.msra.mxu1 %v3866_v33  ;;  %4457 = vmatpush1.bf16.msra.mxu0 %v3944_v51  ;;  %v13707_v51 = vld [vmem:[#allocation66_spill] sm:$0xff]  ;;  %v3941_v22 = vpack.c.bf16 %v13709_v47, %v13708_v35  ;;  %v3845_v53 = vmul.f32 %v3828_v15, %v13689_v41  ;;  %v3848_v54 = vmul.f32 %v3838_v50, %v13691_v5 }
 0x82d   : > { %v11245_v3 = vpop.permute.xlu0 %4042  ;;  %4399 = vmatprep.subr.bf16.mxu1 %v3865_v25  ;;  %4458 = vmatprep.subr.bf16.mxu0 %v3943_v39  ;;  %v11251_v27 = vpop.permute.xlu1 %4188  ;;  %v3942_v33 = vpack.c.bf16 %v13707_v51, %v13706_v11  ;;  %v13710_v25 = vld [vmem:[#allocation61_spill] sm:$0xff]  ;;  %v13711_v39 = vld [vmem:[#allocation76_spill] sm:$0xff]  ;;  %v3863_v48 = vpack.c.bf16 %v3851_v28, %v3849_v34  ;;  %v3846_v13 = vmul.f32 %v3837_v6, %v13691_v5 }
 0x82e   : > { %v4137_v23 = vsel %vm824_vm5, %v13711_v39, %v13710_v25  ;;  %v4130_v4 = vsel %vm824_vm5, %v13712_v52, %v10957_v19  ;;  %v4138_v15 = vsel %vm824_vm5, %v10957_v19, %v13712_v52  ;;  %v3862_v50 = vpack.c.bf16 %v3850_v29, %v3848_v54  ;;  %v13715_v51 = vld [vmem:[#allocation9_spill] sm:$0xff] }
 0x82f   : > { %v4136_v28 = vsel %vm824_vm5, %v13714_v58, %v13713_v31  ;;  %v3861_v6 = vpack.c.bf16 %v3847_v8, %v3845_v53  ;;  %v4129_v61 = vsel %vm824_vm5, %v13710_v25, %v13711_v39  ;;  %v4151_v59 = vmul.f32 %v4137_v23, %v13715_v51  ;;  %v13716_v19 = vld [vmem:[#allocation41_spill] sm:$0xff] }
 0x830   : > { %4400 = vmatpush2.bf16.msra.mxu1 %v3864_v1  ;;  %4459 = vmatpush1.bf16.msra.mxu0 %v3942_v33  ;;  %v4153_v8 = vmul.f32 %v4138_v15, %v13715_v51  ;;  %v3844_v23 = vmul.f32 %v3836_v9, %v13691_v5  ;;  %v13718_v25 = vld [vmem:[#allocation49_spill] sm:$0xff]  ;;  %v4149_v15 = vmul.f32 %v4136_v28, %v13715_v51 }
 0x831   : > { %v4123_v34 = vpop.permute.xlu0 %4122  ;;  %4401 = vmatprep.subr.bf16.mxu1 %v3863_v48  ;;  %4460 = vmatprep.subr.bf16.mxu0 %v3941_v22  ;;  %v11287_v1 = vpop.permute.xlu1 %4024  ;;  %v13717_v48 = vld [vmem:[#allocation8_spill] sm:$0xff]  ;;  %v13719_v39 = vld [vmem:[#allocation53_spill] sm:$0xff] }
 0x832   : > { %v4131_v54 = vsel %vm824_vm5, %v13716_v19, %v4123_v34  ;;  %v4139_v29 = vsel %vm824_vm5, %v4123_v34, %v13716_v19  ;;  %v4152_v33 = vmul.f32 %v4130_v4, %v13717_v48  ;;  %v4135_v52 = vsel %vm824_vm5, %v13719_v39, %v13718_v25 }
 0x833   : > { %v4154_v22 = vmul.f32 %v4131_v54, %v13717_v48  ;;  %v4155_v53 = vmul.f32 %v4139_v29, %v13715_v51  ;;  %v4128_v4 = vsel %vm824_vm5, %v13713_v31, %v13714_v58  ;;  %v3860_v9 = vpack.c.bf16 %v3846_v13, %v3844_v23  ;;  %v13720_v29 = vld [vmem:[#allocation48_spill] sm:$0xff] }
 0x834   : > { %4402 = vmatpush2.bf16.msra.mxu1 %v3862_v50  ;;  %4461 = vmatpush1.bf16.msra.mxu0 %v3940_v2  ;;  %v4134_v11 = vsel %vm824_vm5, %v13721_v32, %v13720_v29  ;;  %v4150_v2 = vmul.f32 %v4129_v61, %v13717_v48  ;;  %v4127_v58 = vsel %vm824_vm5, %v13718_v25, %v13719_v39  ;;  %v6416_v13 = vld [vmem:[%s13029_s1 + $0x1e0] ss:$20 sps:$4 sm:$0xff]  }
 0x835   : > { %v4162_v34 = vpack.c.bf16 %v4154_v22, %v4152_v33  ;;  %v11303_v19 = vpop.permute.xlu0 %4170  ;;  %4403 = vmatprep.subr.bf16.mxu1 %v3861_v6  ;;  %v4163_v54 = vpack.c.bf16 %v4155_v53, %v4153_v8  ;;  %v11310_v50 = vpop.permute.xlu1 %4040  ;;  %v4147_v31 = vmul.f32 %v4135_v52, %v13715_v51  ;;  %v4161_v28 = vpack.c.bf16 %v4151_v59, %v4149_v15  ;;  %v6419_v59 = vld [vmem:[%s13029_s1 + $0x20c] ss:$20 sps:$4 sm:$0xff]  }
 0x836   : > { %v4148_v6 = vmul.f32 %v4128_v4, %v13717_v48  ;;  %v4124_v61 = vsel %vm824_vm5, %v10800_v57, %v10997_v21  ;;  %v4132_v33 = vsel %vm824_vm5, %v10997_v21, %v10800_v57  ;;  %v4126_v8 = vsel %vm824_vm5, %v13720_v29, %v13721_v32 }
 0x837   : > { %4462 = vmatprep.subr.bf16.mxu0 %v4163_v54  ;;  %v4145_v22 = vmul.f32 %v4134_v11, %v13715_v51  ;;  %v4125_v53 = vsel %vm824_vm5, %v10818_v56, %v10846_v14  ;;  %v4146_v57 = vmul.f32 %v4127_v58, %v13717_v48  ;;  %v4133_v25 = vsel %vm824_vm5, %v10846_v14, %v10818_v56 }
 0x838   : > { %4404 = vmatpush2.bf16.msra.mxu1 %v3860_v9  ;;  %4463 = vmatpush2.bf16.msra.mxu0 %v4162_v34  ;;  %v4160_v21 = vpack.c.bf16 %v4150_v2, %v4148_v6  ;;  %v4140_v32 = vmul.f32 %v4124_v61, %v13717_v48  ;;  %v4141_v11 = vmul.f32 %v4132_v33, %v13715_v51  ;;  %v6421_v33 = vld [vmem:[%s13029_s1 + $0x208] ss:$20 sps:$4 sm:$0xff]  }
 0x839   : > { %v11341_v23 = vpop.permute.xlu0 %4186  ;;  %4464 = vmatprep.subr.bf16.mxu0 %v4161_v28  ;;  %v11348_v39 = vpop.permute.xlu1 %4168  ;;  %v4159_v52 = vpack.c.bf16 %v4147_v31, %v4145_v22  ;;  %v4144_v4 = vmul.f32 %v4126_v8, %v13717_v48  ;;  %v4142_v15 = vmul.f32 %v4125_v53, %v13717_v48  ;;  %v4058_v34 = vsel %vm738_vm6, %v11047_v26, %v11081_v44  ;;  %v13722_v28 = vld [vmem:[#allocation10_spill] sm:$0xff]  ;;  %v13724_v53 = vld [vmem:[#allocation12_spill] sm:$0xff] }
 0x83a   : > { %v4143_v56 = vmul.f32 %v4133_v25, %v13715_v51  ;;  %v4066_v14 = vsel %vm738_vm6, %v11081_v44, %v11047_v26  ;;  %v4057_v54 = vsel %vm738_vm6, %v10985_v46, %v11098_v40  ;;  %v4056_v9 = vsel %vm738_vm6, %v11154_v45, %v11190_v12  ;;  %v13725_v25 = vld [vmem:[#allocation13_spill] sm:$0xff] }
 0x83b   : > { %4406 = vmatmul.mubr.bf16.vlgmr.msra.gmra.mxu1 %v6416_v13  ;;  %v4158_v2 = vpack.c.bf16 %v4146_v57, %v4144_v4  ;;  %v4065_v58 = vsel %vm738_vm6, %v11098_v40, %v10985_v46  ;;  %v4202_v26 = vsel %vm910_vm7, %v11106_v20, %v11137_v37  ;;  %v4156_v31 = vpack.c.bf16 %v4142_v15, %v4140_v32  ;;  %v13723_v46 = vld [vmem:[#allocation11_spill] sm:$0xff] }
 0x83c   : > { %4465 = vmatpush2.bf16.msra.mxu0 %v4160_v21  ;;  %4415 = vmatprep.mubr.bf16.mxu1 %v6419_v59  ;;  %v4080_v13 = vmul.f32 %v4058_v34, %v13722_v28  ;;  %v4210_v6 = vsel %vm910_vm7, %v11137_v37, %v11106_v20  ;;  %v4157_v61 = vpack.c.bf16 %v4143_v56, %v4141_v11  ;;  %v6422_v20 = vld [vmem:[%s13029_s1 + $0x234] ss:$20 sps:$4 sm:$0xff]  }
 0x83d   : > { %v11371_v29 = vpop.permute.xlu0 %4022  ;;  %4466 = vmatprep.subr.bf16.mxu0 %v4159_v52  ;;  %v4185_v44 = vpop.permute.xlu1 %4184  ;;  %v4081_v40 = vmul.f32 %v4066_v14, %v13723_v46  ;;  %v11391_v59 = vmul.f32 %v4057_v54, %v13722_v28  ;;  %v4064_v8 = vsel %vm738_vm6, %v11190_v12, %v11154_v45  ;;  %v11398_v22 = vmul.f32 %v4056_v9, %v13722_v28 }
 0x83e   : > { %v4079_v37 = vmul.f32 %v4065_v58, %v13723_v46  ;;  %v4224_v57 = vmul.f32 %v4202_v26, %v13724_v53  ;;  %v4209_v21 = vsel %vm910_vm7, %v11151_v16, %v11130_v17  ;;  %v4208_v45 = vsel %vm910_vm7, %v11251_v27, %v11224_v60 }
 0x83f   : > { %v4225_v32 = vmul.f32 %v4210_v6, %v13725_v25  ;;  %v4201_v11 = vsel %vm910_vm7, %v11130_v17, %v11151_v16  ;;  %v4077_v34 = vmul.f32 %v4064_v8, %v13723_v46  ;;  %v4062_v56 = vsel %vm738_vm6, %v11310_v50, %v11287_v1 }
 0x840   : > { %4467 = vmatpush2.bf16.msra.mxu0 %v4158_v2  ;;  %v4223_v16 = vmul.f32 %v4209_v21, %v13725_v25  ;;  %v4088_v54 = vpack.c.bf16 %v11391_v59, %v11398_v22  ;;  %v4063_v9 = vsel %vm738_vm6, %v11245_v3, %v11209_v10  ;;  %v4200_v2 = vsel %vm910_vm7, %v11224_v60, %v11251_v27 }
 0x841   : > { %v4051_v12 = vpop.permute.xlu0 %4050  ;;  %4468 = vmatprep.subr.bf16.mxu0 %v4157_v61  ;;  %v4021_v15 = vpop.permute.xlu1 %4020  ;;  %v4054_v61 = vsel %vm738_vm6, %v11287_v1, %v11310_v50  ;;  %v4055_v60 = vsel %vm738_vm6, %v11209_v10, %v11245_v3  ;;  %v4089_v50 = vpack.c.bf16 %v4079_v37, %v4077_v34  ;;  %v4206_v22 = vsel %vm910_vm7, %v4185_v44, %v11348_v39 }
 0x842   : > { %v4059_v52 = vsel %vm738_vm6, %v10871_v0, %v4051_v12  ;;  %v4067_v4 = vsel %vm738_vm6, %v4051_v12, %v10871_v0  ;;  %v4221_v0 = vmul.f32 %v4208_v45, %v13725_v25  ;;  %v4072_v3 = vmul.f32 %v4054_v61, %v13722_v28 }
 0x843   : > { %v4082_v14 = vmul.f32 %v4059_v52, %v13722_v28  ;;  %v4083_v17 = vmul.f32 %v4067_v4, %v13723_v46  ;;  %4416 = vmatmul.mubr.bf16.gmra.mxu1 %v6421_v33  ;;  %v4198_v12 = vsel %vm910_vm7, %v11348_v39, %v4185_v44  ;;  %v4222_v44 = vmul.f32 %v4201_v11, %v13724_v53 }
 0x844   : > { %4469 = vmatpush2.bf16.msra.mxu0 %v4156_v31  ;;  %4425 = vmatprep.mubr.bf16.mxu1 %v6422_v20  ;;  %v4073_v31 = vmul.f32 %v4062_v56, %v13723_v46  ;;  %v4233_v10 = vpack.c.bf16 %v4223_v16, %v4221_v0  ;;  %v4207_v20 = vsel %vm910_vm7, %v11341_v23, %v11303_v19 }
 0x845   : > { %v4090_v58 = vpack.c.bf16 %v4082_v14, %v4080_v13  ;;  %v4195_v26 = vpop.permute.xlu0 %4194  ;;  %v4091_v6 = vpack.c.bf16 %v4083_v17, %v4081_v40  ;;  %v4037_v8 = vpop.permute.xlu1 %4036  ;;  %v6424_v13 = vld [vmem:[%s13029_s1 + $0x230] ss:$20 sps:$4 sm:$0xff]   ;;  %v4075_v40 = vmul.f32 %v4063_v9, %v13723_v46  ;;  %v4217_v14 = vmul.f32 %v4206_v22, %v13725_v25 }
 0x846   : > { %v4203_v33 = vsel %vm910_vm7, %v10945_v38, %v4195_v26  ;;  %v4211_v59 = vsel %vm910_vm7, %v4195_v26, %v10945_v38  ;;  %v4220_v38 = vmul.f32 %v4200_v2, %v13724_v53  ;;  %v4060_v52 = vsel %vm738_vm6, %v4037_v8, %v4021_v15 }
 0x847   : > { %v4226_v27 = vmul.f32 %v4203_v33, %v13724_v53  ;;  %v4227_v1 = vmul.f32 %v4211_v59, %v13725_v25  ;;  %4470 = vmatprep.subr.bf16.mxu0 %v4091_v6  ;;  %v4087_v56 = vpack.c.bf16 %v4075_v40, %v4073_v31  ;;  %v4074_v17 = vmul.f32 %v4055_v60, %v13722_v28 }
 0x848   : > { %4471 = vmatpush2.bf16.msra.mxu0 %v4090_v58  ;;  %v4199_v16 = vsel %vm910_vm7, %v11303_v19, %v11341_v23  ;;  %v4219_v0 = vmul.f32 %v4207_v20, %v13725_v25  ;;  %v4069_v9 = vmul.f32 %v4060_v52, %v13723_v46  ;;  %v4232_v11 = vpack.c.bf16 %v4222_v44, %v4220_v38  ;;  %v6436_v52 = vld [vmem:[%s13029_s1 + $0x23c] ss:$20 sps:$4 sm:$0xff]  }
 0x849   : > { %v4234_v37 = vpack.c.bf16 %v4226_v27, %v4224_v57  ;;  %v4039_v21 = vpop.permute.xlu0 %4038  ;;  %4472 = vmatprep.subr.bf16.mxu0 %v4089_v50  ;;  %v4235_v45 = vpack.c.bf16 %v4227_v1, %v4225_v32  ;;  %v4165_v34 = vpop.permute.xlu1 %4164  ;;  %v6425_v57 = vld [vmem:[%s13029_s1 + $0x25c] ss:$20 sps:$4 sm:$0xff]   ;;  %v4086_v58 = vpack.c.bf16 %v4074_v17, %v4072_v3  ;;  %v4216_v26 = vmul.f32 %v4198_v12, %v13724_v53  ;;  %v6432_v3 = vld [vmem:[%s13029_s1 + $0x214] ss:$20 sps:$4 sm:$0xff]  }
 0x84a   : > { %v4061_v4 = vsel %vm738_vm6, %v4039_v21, %v11371_v29  ;;  %v4053_v32 = vsel %vm738_vm6, %v11371_v29, %v4039_v21  ;;  %v4052_v29 = vsel %vm738_vm6, %v4021_v15, %v4037_v8  ;;  %v4218_v19 = vmul.f32 %v4199_v16, %v13724_v53  ;;  %v6427_v15 = vld [vmem:[%s13029_s1 + $0x258] ss:$20 sps:$4 sm:$0xff]   ;;  %v6434_v12 = vld [vmem:[%s13029_s1 + $0x210] ss:$20 sps:$4 sm:$0xff]  }
 0x84b   : > { %v4071_v39 = vmul.f32 %v4061_v4, %v13723_v46  ;;  %4426 = vmatmul.mubr.bf16.gmra.mxu1 %v6424_v13  ;;  %4527 = vmatprep.subr.bf16.mxu1 %v4235_v45  ;;  %v4070_v6 = vmul.f32 %v4053_v32, %v13722_v28  ;;  %v4068_v31 = vmul.f32 %v4052_v29, %v13722_v28  ;;  %v13726_v21 = vmov 0   ;;  %v6431_v45 = vld [vmem:[%s13029_s1 + $0x1f0] ss:$20 sps:$4 sm:$0xff]   ;;  %v6435_v4 = vld [vmem:[%s13029_s1 + $0x218] ss:$20 sps:$4 sm:$0xff]  }
 0x84c   : > { %4473 = vmatpush2.bf16.msra.mxu0 %v4088_v54  ;;  %4528 = vmatpush1.bf16.msra.mxu1 %v4234_v37  ;;  %v4231_v54 = vpack.c.bf16 %v4219_v0, %v4217_v14  ;;  %v4230_v60 = vpack.c.bf16 %v4218_v19, %v4216_v26  ;;  %v6442_v14 = vld [vmem:[%s13029_s1 + $0x260] ss:$20 sps:$4 sm:$0xff]   ;;  %v6443_v32 = vld [vmem:[%s13029_s1 + $0x268] ss:$20 sps:$4 sm:$0xff]  }
 0x84d   : > { %v4167_v2 = vpop.permute.xlu0 %4166  ;;  %4529 = vmatprep.subr.bf16.mxu1 %v4233_v10  ;;  %4474 = vmatprep.subr.bf16.mxu0 %v4087_v56  ;;  %v4181_v61 = vpop.permute.xlu1 %4180  ;;  %v4085_v23 = vpack.c.bf16 %v4071_v39, %v4069_v9  ;;  %v4084_v27 = vpack.c.bf16 %v4070_v6, %v4068_v31  ;;  %v6428_v10 = vld [vmem:[%s13029_s1 + $0x1e8] ss:$20 sps:$4 sm:$0xff]   ;;  %v6440_v56 = vld [vmem:[%s13029_s1 + $0x264] ss:$20 sps:$4 sm:$0xff]  }
 0x84e   : > { %4435 = vmatprep.mubr.bf16.mxu1 %v6425_v57  ;;  %v4196_v33 = vsel %vm910_vm7, %v4165_v34, %v4181_v61  ;;  %v4204_v59 = vsel %vm910_vm7, %v4181_v61, %v4165_v34  ;;  %v6438_v34 = vld [vmem:[%s13029_s1 + $0x238] ss:$20 sps:$4 sm:$0xff]   ;;  %v6439_v57 = vld [vmem:[%s13029_s1 + $0x240] ss:$20 sps:$4 sm:$0xff]  }
 0x84f   : > { %v4212_v13 = vmul.f32 %v4196_v33, %v13724_v53  ;;  %v4213_v40 = vmul.f32 %v4204_v59, %v13725_v25 }
 0x850   : > { %4475 = vmatpush2.bf16.msra.mxu0 %v4086_v58  ;;  %4530 = vmatpush1.bf16.msra.mxu1 %v4232_v11 }
 0x851   : > { %v4183_v8 = vpop.permute.xlu0 %4182  ;;  %4476 = vmatprep.subr.bf16.mxu0 %v4085_v23  ;;  %4531 = vmatprep.subr.bf16.mxu1 %v4231_v54 }
 0x852   : > { %v4197_v1 = vsel %vm910_vm7, %v4167_v2, %v4183_v8  ;;  %v4205_v50 = vsel %vm910_vm7, %v4183_v8, %v4167_v2 }
 0x853   : > { %v4214_v38 = vmul.f32 %v4197_v1, %v13724_v53  ;;  %v4215_v22 = vmul.f32 %v4205_v50, %v13725_v25  ;;  %4436 = vmatmul.mubr.bf16.gmra.mxu1 %v6427_v15 }
 0x854   : > { %4477 = vmatpush2.bf16.msra.mxu0 %v4084_v27  ;;  %4532 = vmatpush1.bf16.msra.mxu1 %v4230_v60 }
 0x855   : > { %v4228_v20 = vpack.c.bf16 %v4214_v38, %v4212_v13  ;;  %v4229_v37 = vpack.c.bf16 %v4215_v22, %v4213_v40  ;;  %4551 = vmatprep.mubr.bf16.mxu1 %v13726_v21 }
 0x857   : > { %4479 = vmatmul.mubr.bf16.vlgmr.msra.gmra.mxu0 %v6428_v10  ;;  %4533 = vmatprep.subr.bf16.mxu1 %v4229_v37 }
 0x858   : > { %4534 = vmatpush1.bf16.msra.mxu1 %v4228_v20  ;;  %4488 = vmatprep.mubr.bf16.mxu0 %v6432_v3 }
 0x85a   : > { %v11559_v39 = vpop.permute.xlu1 %4633 }
 0x85b   : > { %6217 = vmatmul.mubr.msk.bf16.vlgmr.msra.gmra.mxu1 %vm1088_vm8, %v6431_v45 }
 0x85c   : > { %4561 = vmatprep.mubr.bf16.mxu1 %v13726_v21 }
 0x85e   : > { %v11561_v44 = vpop.permute.xlu0 %4638  ;;  %v11563_v17 = vpop.permute.xlu1 %4698 }
 0x85f   : > { %4489 = vmatmul.mubr.bf16.gmra.mxu0 %v6434_v12 }
 0x860   : > { %4498 = vmatprep.mubr.bf16.mxu0 %v6436_v52 }
 0x862   : > { %v11565_v29 = vpop.permute.xlu0 %4703  ;;  %v11567_v2 = vpop.permute.xlu1 %4623 }
 0x863   : > { %6218 = vmatmul.mubr.msk.bf16.gmra.mxu1 %vm1088_vm8, %v6435_v4 }
 0x864   : > { %4571 = vmatprep.mubr.bf16.mxu1 %v13726_v21 }
 0x866   : > { %v11571_v26 = vpop.permute.xlu0 %4628  ;;  %v11575_v61 = vpop.permute.xlu1 %4688 }
 0x867   : > { %4499 = vmatmul.mubr.bf16.gmra.mxu0 %v6438_v34 }
 0x868   : > { %4508 = vmatprep.mubr.bf16.mxu0 %v6440_v56 }
 0x86a   : > { %v11581_v54 = vpop.permute.xlu0 %4693  ;;  %v11585_v31 = vpop.permute.xlu1 %4613 }
 0x86b   : > { %6219 = vmatmul.mubr.msk.bf16.gmra.mxu1 %vm1088_vm8, %v6439_v57 }
 0x86c   : > { %4581 = vmatprep.mubr.bf16.mxu1 %v13726_v21 }
 0x86e   : > { %v11591_v8 = vpop.permute.xlu0 %4618  ;;  %v11595_v27 = vpop.permute.xlu1 %4678 }
 0x86f   : > { %4509 = vmatmul.mubr.bf16.gmra.mxu0 %v6442_v14 }
 0x872   : > { %v11601_v13 = vpop.permute.xlu0 %4683  ;;  %v4604_v22 = vpop.permute.xlu1 %4603 }
 0x873   : > { %6220 = vmatmul.mubr.msk.bf16.gmra.mxu1 %vm1088_vm8, %v6443_v32 }
 0x876   : > { %v4609_v52 = vpop.permute.xlu0 %4608 }
 0x877   : > { %v4669_v57 = vpop.permute.xlu1 %4668 }
 0x87a   : > { %v4674_v30 = vpop.permute.xlu0 %4673 }
 0x8fb   : > { %v4407_v16 = vpop.f32.mrf.mxu1 }
 0x8fd   : > { %v4409_v0 = vpop.f32.mrf.mxu1 }
 0x8ff   : > { %v4411_v9 = vpop.f32.mrf.mxu1 }
 0x901   : > { %v4413_v11 = vpop.f32.mrf.mxu1 }
 0x903   : > { %v11569_v58 = vpop.f32.mrf.mxu1 }
 0x905   : > { %v11573_v6 = vpop.f32.mrf.mxu1 }
 0x907   : > { %v11577_v19 = vpop.f32.mrf.mxu1 }
 0x909   : > { %v11579_v23 = vpop.f32.mrf.mxu1 }
 0x90b   : > { %v11583_v15 = vpop.f32.mrf.mxu1 }
 0x90d   : > { %v11587_v33 = vpop.f32.mrf.mxu1 }
 0x90f   : > { %v11589_v59 = vpop.f32.mrf.mxu1 }
 0x911   : > { %v11593_v60 = vpop.f32.mrf.mxu1 }
 0x913   : > { %v11597_v1 = vpop.f32.mrf.mxu1 }
 0x915   : > { %v11599_v50 = vpop.f32.mrf.mxu1 }
 0x917   : > { %v11603_v40 = vpop.f32.mrf.mxu1  ;;  %v4480_v38 = vpop.f32.mrf.mxu0 }
 0x918   : > { %v4481_v20 = vadd.f32 %v4480_v38, %v4407_v16 }
 0x919   : > { %v11605_v10 = vpop.f32.mrf.mxu1  ;;  %v4482_v3 = vpop.f32.mrf.mxu0 }
 0x91a   : > { %v4483_v38 = vadd.f32 %v4482_v3, %v4409_v0 }
 0x91b   : > { %v4484_v37 = vpop.f32.mrf.mxu0  ;;  %v4553_v45 = vpop.f32.mrf.mxu1 }
 0x91c   : > { %v4554_v12 = vadd.f32 %v4553_v45, %v4481_v20  ;;  %v4485_v34 = vadd.f32 %v4484_v37, %v4411_v9 }
 0x91d   : > { %v4555_v4 = vpop.f32.mrf.mxu1  ;;  %v4486_v9 = vpop.f32.mrf.mxu0 }
 0x91e   : > { %v4641_v56 = vmul.f32 %v4604_v22, %v4554_v12  ;;  %v4556_v20 = vadd.f32 %v4555_v4, %v4483_v38  ;;  %v4487_v45 = vadd.f32 %v4486_v9, %v4413_v11 }
 0x91f   : > { %v4557_v14 = vpop.f32.mrf.mxu1  ;;  %v4490_v11 = vpop.f32.mrf.mxu0 }
 0x920   : > { %v4706_v32 = vadd.f32 %v4669_v57, %v4641_v56  ;;  %v4558_v47 = vadd.f32 %v4557_v14, %v4485_v34  ;;  %v4491_v56 = vadd.f32 %v4490_v11, %v11569_v58 }
 0x921   : > { %v4559_v37 = vpop.f32.mrf.mxu1 }
 0x922   : > { %v11607_v55 = vmax.f32 %v4706_v32, 0.0  ;;  %v4643_v35 = vmul.f32 %v4609_v52, %v4558_v47  ;;  %v4642_v47 = vmul.f32 %v4604_v22, %v4556_v20  ;;  %v4492_v22 = vpop.f32.mrf.mxu0 }
 0x923   : > { %v4563_v4 = vpop.f32.mrf.mxu1 }
 0x924   : > { %v4708_v21 = vadd.f32 %v4674_v30, %v4643_v35  ;;  %4810 = vrot.lane.b32.xlu1 %v11607_v55, %s6485_s27  ;;  %v4560_v35 = vadd.f32 %v4559_v37, %v4487_v45  ;;  %v4707_v0 = vadd.f32 %v4669_v57, %v4642_v47  ;;  %v4494_v57 = vpop.f32.mrf.mxu0 }
 0x925   : > { %v4565_v34 = vpop.f32.mrf.mxu1  ;;  %v4495_v32 = vadd.f32 %v4494_v57, %v11577_v19 }
 0x926   : > { %v11611_v16 = vmax.f32 %v4708_v21, 0.0  ;;  %v4644_v21 = vmul.f32 %v4609_v52, %v4560_v35  ;;  %v11629_v12 = vmax.f32 %v4707_v0, 0.0  ;;  %v4493_v35 = vadd.f32 %v4492_v22, %v11573_v6  ;;  %v4496_v47 = vpop.f32.mrf.mxu0 }
 0x927   : > { %v4567_v14 = vpop.f32.mrf.mxu1  ;;  %v4497_v11 = vadd.f32 %v4496_v47, %v11579_v23 }
 0x928   : > { %4812 = vrot.lane.b32.xlu0 %v11611_v16, %s6485_s27  ;;  %5034 = vrot.lane.b32.xlu1 %v11607_v55, %s6487_s29  ;;  %v4709_v3 = vadd.f32 %v4674_v30, %v4644_v21  ;;  %v4564_v30 = vadd.f32 %v4563_v4, %v4491_v56  ;;  %v4568_v38 = vadd.f32 %v4567_v14, %v4495_v32 }
 0x929   : > { %v4566_v21 = vadd.f32 %v4565_v34, %v4493_v35  ;;  %v4569_v0 = vpop.f32.mrf.mxu1 }
 0x92a   : > { %v11635_v52 = vmax.f32 %v4709_v3, 0.0  ;;  %v4645_v9 = vmul.f32 %v11585_v31, %v4564_v30  ;;  %v4647_v58 = vmul.f32 %v11591_v8, %v4568_v38  ;;  %v4570_v3 = vadd.f32 %v4569_v0, %v4497_v11 }
 0x92b   : > { %v4646_v4 = vmul.f32 %v11585_v31, %v4566_v21  ;;  %v4500_v31 = vpop.f32.mrf.mxu0 }
 0x92c   : > { %5036 = vrot.lane.b32.xlu0 %v11611_v16, %s6487_s29  ;;  %4738 = vrot.lane.b32.xlu1 %v11607_v55, %s6486_s28  ;;  %v4710_v20 = vadd.f32 %v11595_v27, %v4645_v9  ;;  %v4712_v19 = vadd.f32 %v11601_v13, %v4647_v58  ;;  %v4648_v6 = vmul.f32 %v11591_v8, %v4570_v3 }
 0x92d   : > { %v4711_v22 = vadd.f32 %v11595_v27, %v4646_v4  ;;  %v4573_v27 = vpop.f32.mrf.mxu1  ;;  %v4502_v56 = vpop.f32.mrf.mxu0  ;;  %v4501_v57 = vadd.f32 %v4500_v31, %v11583_v15 }
 0x92e   : > { %v11659_v37 = vmax.f32 %v4710_v20, 0.0  ;;  %v11665_v45 = vmax.f32 %v4712_v19, 0.0  ;;  %v4713_v23 = vadd.f32 %v11601_v13, %v4648_v6  ;;  %v4503_v47 = vadd.f32 %v4502_v56, %v11587_v33 }
 0x92f   : > { %v11693_v34 = vmax.f32 %v4711_v22, 0.0  ;;  %v4575_v13 = vpop.f32.mrf.mxu1  ;;  %v4504_v30 = vpop.f32.mrf.mxu0  ;;  %v4574_v14 = vadd.f32 %v4573_v27, %v4501_v57 }
 0x930   : > { %4740 = vrot.lane.b32.xlu0 %v11611_v16, %s6486_s28  ;;  %4954 = vrot.lane.b32.xlu1 %v11607_v55, %s6488_s30  ;;  %13727 = vst [vmem:[#allocation60_spill] sm:$0xff] %v11659_v37  ;;  %13728 = vst [vmem:[#allocation14_spill] sm:$0xff] %v11665_v45  ;;  %v11699_v8 = vmax.f32 %v4713_v23, 0.0  ;;  %v4505_v38 = vadd.f32 %v4504_v30, %v11589_v59  ;;  %v4576_v0 = vadd.f32 %v4575_v13, %v4503_v47 }
 0x931   : > { %13729 = vst [vmem:[#allocation15_spill] sm:$0xff] %v11693_v34  ;;  %v4577_v32 = vpop.f32.mrf.mxu1  ;;  %v4649_v58 = vmul.f32 %v11567_v2, %v4574_v14  ;;  %v4506_v21 = vpop.f32.mrf.mxu0 }
 0x932   : > { %13730 = vst [vmem:[#allocation16_spill] sm:$0xff] %v11699_v8  ;;  %v4578_v9 = vadd.f32 %v4577_v32, %v4505_v38  ;;  %v4507_v3 = vadd.f32 %v4506_v21, %v11593_v60  ;;  %v4650_v6 = vmul.f32 %v11567_v2, %v4576_v0 }
 0x933   : > { %v4714_v20 = vadd.f32 %v11575_v61, %v4649_v58  ;;  %v4579_v11 = vpop.f32.mrf.mxu1  ;;  %v4510_v2 = vpop.f32.mrf.mxu0 }
 0x934   : > { %4956 = vrot.lane.b32.xlu0 %v11611_v16, %s6488_s30  ;;  %5178 = vrot.lane.b32.xlu1 %v11607_v55, %s6490_s12  ;;  %v4651_v15 = vmul.f32 %v11571_v26, %v4578_v9  ;;  %v4580_v4 = vadd.f32 %v4579_v11, %v4507_v3  ;;  %v4715_v22 = vadd.f32 %v11575_v61, %v4650_v6 }
 0x935   : > { %v11727_v19 = vmax.f32 %v4714_v20, 0.0  ;;  %v4583_v31 = vpop.f32.mrf.mxu1  ;;  %v4512_v27 = vpop.f32.mrf.mxu0  ;;  %v4511_v57 = vadd.f32 %v4510_v2, %v11597_v1 }
 0x936   : > { %v4716_v59 = vadd.f32 %v11581_v54, %v4651_v15  ;;  %v4652_v33 = vmul.f32 %v11571_v26, %v4580_v4  ;;  %v11761_v23 = vmax.f32 %v4715_v22, 0.0 }
 0x937   : > { %13731 = vst [vmem:[#allocation17_spill] sm:$0xff] %v11727_v19  ;;  %v4585_v56 = vpop.f32.mrf.mxu1  ;;  %v4514_v30 = vpop.f32.mrf.mxu0  ;;  %v4584_v32 = vadd.f32 %v4583_v31, %v4511_v57  ;;  %v4513_v57 = vadd.f32 %v4512_v27, %v11599_v50 }
 0x938   : > { %5180 = vrot.lane.b32.xlu0 %v11611_v16, %s6490_s12  ;;  %4826 = vrot.lane.b32.xlu1 %v11629_v12, %s6485_s27  ;;  %v11733_v35 = vmax.f32 %v4716_v59, 0.0  ;;  %v4717_v60 = vadd.f32 %v11581_v54, %v4652_v33  ;;  %13733 = vst [vmem:[#allocation19_spill] sm:$0xff] %v11761_v23  ;;  %v4515_v58 = vadd.f32 %v4514_v30, %v11603_v40 }
 0x939   : > { %v4587_v38 = vpop.f32.mrf.mxu1  ;;  %v4653_v20 = vmul.f32 %v11559_v39, %v4584_v32  ;;  %v4516_v30 = vpop.f32.mrf.mxu0 }
 0x93a   : > { %13732 = vst [vmem:[#allocation18_spill] sm:$0xff] %v11733_v35  ;;  %v11767_v26 = vmax.f32 %v4717_v60, 0.0  ;;  %v4588_v15 = vadd.f32 %v4587_v38, %v4515_v58  ;;  %v4586_v38 = vadd.f32 %v4585_v56, %v4513_v57 }
 0x93b   : > { %v4718_v21 = vadd.f32 %v11563_v17, %v4653_v20  ;;  %v4589_v58 = vpop.f32.mrf.mxu1  ;;  %v4517_v20 = vadd.f32 %v4516_v30, %v11605_v10 }
 0x93c   : > { %4828 = vrot.lane.b32.xlu0 %v11635_v52, %s6485_s27  ;;  %5050 = vrot.lane.b32.xlu1 %v11629_v12, %s6487_s29  ;;  %13734 = vst [vmem:[#allocation20_spill] sm:$0xff] %v11767_v26  ;;  %v4655_v40 = vmul.f32 %v11561_v44, %v4588_v15  ;;  %v4654_v27 = vmul.f32 %v11559_v39, %v4586_v38 }
 0x93d   : > { %v11815_v4 = vmax.f32 %v4718_v21, 0.0 }
 0x93e   : > { %v4720_v11 = vadd.f32 %v11565_v29, %v4655_v40  ;;  %v4590_v40 = vadd.f32 %v4589_v58, %v4517_v20 }
 0x93f   : > { %13741 = vst [vmem:[#allocation27_spill] sm:$0xff] %v11815_v4 }
 0x940   : > { %5052 = vrot.lane.b32.xlu0 %v11635_v52, %s6487_s29  ;;  %4754 = vrot.lane.b32.xlu1 %v11629_v12, %s6486_s28  ;;  %v11823_v33 = vmax.f32 %v4720_v11, 0.0  ;;  %v4656_v10 = vmul.f32 %v11561_v44, %v4590_v40  ;;  %v4719_v11 = vadd.f32 %v11563_v17, %v4654_v27 }
 0x942   : > { %13742 = vst [vmem:[#allocation30_spill] sm:$0xff] %v11823_v33  ;;  %v4721_v39 = vadd.f32 %v11565_v29, %v4656_v10  ;;  %v11873_v38 = vmax.f32 %v4719_v11, 0.0 }
 0x944   : > { %4756 = vrot.lane.b32.xlu0 %v11635_v52, %s6486_s28  ;;  %4970 = vrot.lane.b32.xlu1 %v11629_v12, %s6488_s30  ;;  %13749 = vst [vmem:[#allocation75_spill] sm:$0xff] %v11873_v38  ;;  %v11881_v44 = vmax.f32 %v4721_v39, 0.0 }
 0x948   : > { %4972 = vrot.lane.b32.xlu0 %v11635_v52, %s6488_s30  ;;  %5194 = vrot.lane.b32.xlu1 %v11629_v12, %s6490_s12 }
 0x94c   : > { %5196 = vrot.lane.b32.xlu0 %v11635_v52, %s6490_s12  ;;  %4814 = vrot.lane.b32.xlu1 %v11659_v37, %s6485_s27 }
 0x950   : > { %4816 = vrot.lane.b32.xlu0 %v11665_v45, %s6485_s27  ;;  %5038 = vrot.lane.b32.xlu1 %v11659_v37, %s6487_s29 }
 0x954   : > { %5040 = vrot.lane.b32.xlu0 %v11665_v45, %s6487_s29  ;;  %4742 = vrot.lane.b32.xlu1 %v11659_v37, %s6486_s28 }
 0x958   : > { %4744 = vrot.lane.b32.xlu0 %v11665_v45, %s6486_s28  ;;  %4958 = vrot.lane.b32.xlu1 %v11659_v37, %s6488_s30 }
 0x95c   : > { %4960 = vrot.lane.b32.xlu0 %v11665_v45, %s6488_s30  ;;  %5182 = vrot.lane.b32.xlu1 %v11659_v37, %s6490_s12 }
 0x960   : > { %5184 = vrot.lane.b32.xlu0 %v11665_v45, %s6490_s12  ;;  %4886 = vrot.lane.b32.xlu1 %v11659_v37, %s6489_s9 }
 0x964   : > { %4888 = vrot.lane.b32.xlu0 %v11665_v45, %s6489_s9  ;;  %4830 = vrot.lane.b32.xlu1 %v11693_v34, %s6485_s27 }
 0x968   : > { %4832 = vrot.lane.b32.xlu0 %v11699_v8, %s6485_s27  ;;  %5054 = vrot.lane.b32.xlu1 %v11693_v34, %s6487_s29 }
 0x96c   : > { %5056 = vrot.lane.b32.xlu0 %v11699_v8, %s6487_s29  ;;  %4758 = vrot.lane.b32.xlu1 %v11693_v34, %s6486_s28 }
 0x970   : > { %4760 = vrot.lane.b32.xlu0 %v11699_v8, %s6486_s28  ;;  %4974 = vrot.lane.b32.xlu1 %v11693_v34, %s6488_s30 }
 0x974   : > { %4976 = vrot.lane.b32.xlu0 %v11699_v8, %s6488_s30  ;;  %5198 = vrot.lane.b32.xlu1 %v11693_v34, %s6490_s12 }
 0x978   : > { %5200 = vrot.lane.b32.xlu0 %v11699_v8, %s6490_s12  ;;  %4902 = vrot.lane.b32.xlu1 %v11693_v34, %s6489_s9 }
 0x97c   : > { %4904 = vrot.lane.b32.xlu0 %v11699_v8, %s6489_s9  ;;  %4818 = vrot.lane.b32.xlu1 %v11727_v19, %s6485_s27 }
 0x980   : > { %4820 = vrot.lane.b32.xlu0 %v11733_v35, %s6485_s27  ;;  %5042 = vrot.lane.b32.xlu1 %v11727_v19, %s6487_s29 }
 0x984   : > { %5044 = vrot.lane.b32.xlu0 %v11733_v35, %s6487_s29  ;;  %4746 = vrot.lane.b32.xlu1 %v11727_v19, %s6486_s28 }
 0x988   : > { %4748 = vrot.lane.b32.xlu0 %v11733_v35, %s6486_s28  ;;  %4962 = vrot.lane.b32.xlu1 %v11727_v19, %s6488_s30 }
 0x98c   : > { %4964 = vrot.lane.b32.xlu0 %v11733_v35, %s6488_s30  ;;  %5186 = vrot.lane.b32.xlu1 %v11727_v19, %s6490_s12 }
 0x990   : > { %5188 = vrot.lane.b32.xlu0 %v11733_v35, %s6490_s12  ;;  %4890 = vrot.lane.b32.xlu1 %v11727_v19, %s6489_s9 }
 0x994   : > { %4892 = vrot.lane.b32.xlu0 %v11733_v35, %s6489_s9  ;;  %4834 = vrot.lane.b32.xlu1 %v11761_v23, %s6485_s27 }
 0x996   : > { %v11769_v61 = vpop.permute.xlu1 %4810 }
 0x998   : > { %4836 = vrot.lane.b32.xlu0 %v11767_v26, %s6485_s27  ;;  %5058 = vrot.lane.b32.xlu1 %v11761_v23, %s6487_s29 }
 0x99a   : > { %v11775_v54 = vpop.permute.xlu0 %4812  ;;  %v11777_v13 = vpop.permute.xlu1 %5034 }
 0x99c   : > { %5060 = vrot.lane.b32.xlu0 %v11767_v26, %s6487_s29  ;;  %4762 = vrot.lane.b32.xlu1 %v11761_v23, %s6486_s28 }
 0x99e   : > { %v11784_v14 = vpop.permute.xlu0 %5036  ;;  %v11786_v9 = vpop.permute.xlu1 %4738 }
 0x99f   : > { %13735 = vst [vmem:[#allocation21_spill] sm:$0xff] %v11786_v9 }
 0x9a0   : > { %4764 = vrot.lane.b32.xlu0 %v11767_v26, %s6486_s28  ;;  %4978 = vrot.lane.b32.xlu1 %v11761_v23, %s6488_s30 }
 0x9a2   : > { %v11793_v1 = vpop.permute.xlu0 %4740  ;;  %v11796_v59 = vpop.permute.xlu1 %4954 }
 0x9a3   : > { %13736 = vst [vmem:[#allocation22_spill] sm:$0xff] %v11793_v1  ;;  %13737 = vst [vmem:[#allocation23_spill] sm:$0xff] %v11796_v59  ;;  %v6451_v1 = vld [vmem:[%s13029_s1 + $0x28c] ss:$20 sps:$4 sm:$0xff]  }
 0x9a4   : > { %4980 = vrot.lane.b32.xlu0 %v11767_v26, %s6488_s30  ;;  %5202 = vrot.lane.b32.xlu1 %v11761_v23, %s6490_s12 }
 0x9a5   : > { %5564 = vmatprep.mubr.bf16.mxu1 %v6451_v1 }
 0x9a6   : > { %v11803_v47 = vpop.permute.xlu0 %4956  ;;  %v11806_v0 = vpop.permute.xlu1 %5178 }
 0x9a7   : > { %13738 = vst [vmem:[#allocation24_spill] sm:$0xff] %v11803_v47  ;;  %13739 = vst [vmem:[#allocation25_spill] sm:$0xff] %v11806_v0 }
 0x9a8   : > { %5204 = vrot.lane.b32.xlu0 %v11767_v26, %s6490_s12  ;;  %4906 = vrot.lane.b32.xlu1 %v11761_v23, %s6489_s9 }
 0x9aa   : > { %v11813_v3 = vpop.permute.xlu0 %5180  ;;  %v11817_v6 = vpop.permute.xlu1 %4826 }
 0x9ab   : > { %13740 = vst [vmem:[#allocation26_spill] sm:$0xff] %v11813_v3 }
 0x9ac   : > { %4908 = vrot.lane.b32.xlu0 %v11767_v26, %s6489_s9  ;;  %4822 = vrot.lane.b32.xlu1 %v11815_v4, %s6485_s27 }
 0x9ae   : > { %v11825_v22 = vpop.permute.xlu0 %4828  ;;  %v11827_v60 = vpop.permute.xlu1 %5050 }
 0x9b0   : > { %4824 = vrot.lane.b32.xlu0 %v11823_v33, %s6485_s27  ;;  %5046 = vrot.lane.b32.xlu1 %v11815_v4, %s6487_s29 }
 0x9b2   : > { %v11833_v2 = vpop.permute.xlu0 %5052  ;;  %v11835_v31 = vpop.permute.xlu1 %4754 }
 0x9b3   : > { %13743 = vst [vmem:[#allocation31_spill] sm:$0xff] %v11835_v31 }
 0x9b4   : > { %5048 = vrot.lane.b32.xlu0 %v11823_v33, %s6487_s29  ;;  %4750 = vrot.lane.b32.xlu1 %v11815_v4, %s6486_s28 }
 0x9b6   : > { %v11842_v32 = vpop.permute.xlu0 %4756  ;;  %v11844_v15 = vpop.permute.xlu1 %4970 }
 0x9b7   : > { %13744 = vst [vmem:[#allocation34_spill] sm:$0xff] %v11842_v32  ;;  %13745 = vst [vmem:[#allocation82_spill] sm:$0xff] %v11844_v15 }
 0x9b8   : > { %4752 = vrot.lane.b32.xlu0 %v11823_v33, %s6486_s28  ;;  %4966 = vrot.lane.b32.xlu1 %v11815_v4, %s6488_s30 }
 0x9ba   : > { %v11851_v50 = vpop.permute.xlu0 %4972  ;;  %v11854_v21 = vpop.permute.xlu1 %5194 }
 0x9bb   : > { %13746 = vst [vmem:[#allocation70_spill] sm:$0xff] %v11851_v50  ;;  %13747 = vst [vmem:[#allocation56_spill] sm:$0xff] %v11854_v21  ;;  %v6446_v50 = vld [vmem:[%s13029_s1 + $0x284] ss:$20 sps:$4 sm:$0xff]  }
 0x9bc   : > { %4968 = vrot.lane.b32.xlu0 %v11823_v33, %s6488_s30  ;;  %5190 = vrot.lane.b32.xlu1 %v11815_v4, %s6490_s12 }
 0x9bd   : > { %5491 = vmatprep.mubr.bf16.mxu0 %v6446_v50 }
 0x9be   : > { %v11861_v56 = vpop.permute.xlu0 %5196  ;;  %v11864_v57 = vpop.permute.xlu1 %4814 }
 0x9bf   : > { %13748 = vst [vmem:[#allocation40_spill] sm:$0xff] %v11861_v56 }
 0x9c0   : > { %5192 = vrot.lane.b32.xlu0 %v11823_v33, %s6490_s12  ;;  %4894 = vrot.lane.b32.xlu1 %v11815_v4, %s6489_s9 }
 0x9c2   : > { %v11871_v30 = vpop.permute.xlu0 %4816  ;;  %v11875_v58 = vpop.permute.xlu1 %5038 }
 0x9c4   : > { %4896 = vrot.lane.b32.xlu0 %v11823_v33, %s6489_s9  ;;  %4838 = vrot.lane.b32.xlu1 %v11873_v38, %s6485_s27 }
 0x9c6   : > { %v11883_v17 = vpop.permute.xlu0 %5040  ;;  %v11885_v20 = vpop.permute.xlu1 %4742 }
 0x9c7   : > { %13750 = vst [vmem:[#allocation32_spill] sm:$0xff] %v11885_v20 }
 0x9c8   : > { %4840 = vrot.lane.b32.xlu0 %v11881_v44, %s6485_s27  ;;  %5118 = vrot.lane.b32.xlu1 %v11815_v4, %s6491_s17  ;;  %s6013_s27 = sshll.u32 %s13876_s22, 1 }
 0x9ca   : > { %v11891_v29 = vpop.permute.xlu0 %4744  ;;  %v11893_v40 = vpop.permute.xlu1 %4958 }
 0x9cb   : > { %13751 = vst [vmem:[#allocation64_spill] sm:$0xff] %v11891_v29  ;;  %13752 = vst [vmem:[#allocation43_spill] sm:$0xff] %v11893_v40 }
 0x9cc   : > { %5120 = vrot.lane.b32.xlu0 %v11823_v33, %s6491_s17  ;;  %5062 = vrot.lane.b32.xlu1 %v11873_v38, %s6487_s29 }
 0x9ce   : > { %v11899_v27 = vpop.permute.xlu0 %4960  ;;  %v11901_v10 = vpop.permute.xlu1 %5182 }
 0x9cf   : > { %13753 = vst [vmem:[#allocation46_spill] sm:$0xff] %v11899_v27  ;;  %13754 = vst [vmem:[#allocation80_spill] sm:$0xff] %v11901_v10 }
 0x9d0   : > { %5064 = vrot.lane.b32.xlu0 %v11881_v44, %s6487_s29  ;;  %4766 = vrot.lane.b32.xlu1 %v11873_v38, %s6486_s28 }
 0x9d2   : > { %v11907_v11 = vpop.permute.xlu0 %5184  ;;  %v11909_v39 = vpop.permute.xlu1 %4886 }
 0x9d3   : > { %13755 = vst [vmem:[#allocation45_spill] sm:$0xff] %v11907_v11  ;;  %13756 = vst [vmem:[#allocation58_spill] sm:$0xff] %v11909_v39 }
 0x9d4   : > { %4884 = vrot.lane.b32.xlu0 %v11611_v16, %s6489_s9  ;;  %4982 = vrot.lane.b32.xlu1 %v11873_v38, %s6488_s30 }
 0x9d6   : > { %v11915_v25 = vpop.permute.xlu0 %4888  ;;  %v11917_v53 = vpop.permute.xlu1 %4830 }
 0x9d7   : > { %13757 = vst [vmem:[#allocation33_spill] sm:$0xff] %v11915_v25 }
 0x9d8   : > { %4768 = vrot.lane.b32.xlu0 %v11881_v44, %s6486_s28  ;;  %5206 = vrot.lane.b32.xlu1 %v11873_v38, %s6490_s12 }
 0x9da   : > { %v11923_v46 = vpop.permute.xlu0 %4832  ;;  %v11925_v28 = vpop.permute.xlu1 %5054 }
 0x9dc   : > { %4900 = vrot.lane.b32.xlu0 %v11635_v52, %s6489_s9  ;;  %4910 = vrot.lane.b32.xlu1 %v11873_v38, %s6489_s9 }
 0x9de   : > { %v11931_v39 = vpop.permute.xlu0 %5056  ;;  %v11933_v25 = vpop.permute.xlu1 %4758 }
 0x9df   : > { %13758 = vst [vmem:[#allocation44_spill] sm:$0xff] %v11933_v25 }
 0x9e0   : > { %5116 = vrot.lane.b32.xlu0 %v11733_v35, %s6491_s17  ;;  %5134 = vrot.lane.b32.xlu1 %v11873_v38, %s6491_s17 }
 0x9e2   : > { %v11939_v10 = vpop.permute.xlu0 %4760  ;;  %v11941_v11 = vpop.permute.xlu1 %4974 }
 0x9e3   : > { %13759 = vst [vmem:[#allocation50_spill] sm:$0xff] %v11939_v10  ;;  %13760 = vst [vmem:[#allocation83_spill] sm:$0xff] %v11941_v11 }
 0x9e4   : > { %5132 = vrot.lane.b32.xlu0 %v11767_v26, %s6491_s17  ;;  %4882 = vrot.lane.b32.xlu1 %v11607_v55, %s6489_s9 }
 0x9e6   : > { %v11947_v3 = vpop.permute.xlu0 %4976  ;;  %v11949_v56 = vpop.permute.xlu1 %5198 }
 0x9e7   : > { %13761 = vst [vmem:[#allocation37_spill] sm:$0xff] %v11947_v3  ;;  %13762 = vst [vmem:[#allocation28_spill] sm:$0xff] %v11949_v56 }
 0x9e8   : > { %4984 = vrot.lane.b32.xlu0 %v11881_v44, %s6488_s30  ;;  %4898 = vrot.lane.b32.xlu1 %v11629_v12, %s6489_s9  ;;  %s249_s30 = scalar_lea.vmem %s13034_s6, %s6013_s27 }
 0x9ea   : > { %v11955_v40 = vpop.permute.xlu0 %5200  ;;  %v11957_v0 = vpop.permute.xlu1 %4902 }
 0x9eb   : > { %13763 = vst [vmem:[#allocation57_spill] sm:$0xff] %v11955_v40  ;;  %13764 = vst [vmem:[#allocation29_spill] sm:$0xff] %v11957_v0 }
 0x9ec   : > { %5112 = vrot.lane.b32.xlu0 %v11665_v45, %s6491_s17  ;;  %5114 = vrot.lane.b32.xlu1 %v11727_v19, %s6491_s17 }
 0x9ee   : > { %v11963_v11 = vpop.permute.xlu0 %4904  ;;  %v11965_v21 = vpop.permute.xlu1 %4818 }
 0x9ef   : > { %13765 = vst [vmem:[#allocation67_spill] sm:$0xff] %v11963_v11 }
 0x9f0   : > { %5208 = vrot.lane.b32.xlu0 %v11881_v44, %s6490_s12  ;;  %5130 = vrot.lane.b32.xlu1 %v11761_v23, %s6491_s17 }
 0x9f2   : > { %v11971_v56 = vpop.permute.xlu0 %4820  ;;  %v11973_v40 = vpop.permute.xlu1 %5042 }
 0x9f4   : > { %5128 = vrot.lane.b32.xlu0 %v11699_v8, %s6491_s17  ;;  %5110 = vrot.lane.b32.xlu1 %v11659_v37, %s6491_s17 }
 0x9f6   : > { %v11979_v0 = vpop.permute.xlu0 %5044  ;;  %v11981_v11 = vpop.permute.xlu1 %4746 }
 0x9f8   : > { %4912 = vrot.lane.b32.xlu0 %v11881_v44, %s6489_s9  ;;  %5126 = vrot.lane.b32.xlu1 %v11693_v34, %s6491_s17 }
 0x9fa   : > { %v11987_v27 = vpop.permute.xlu0 %4748  ;;  %v4963_v3 = vpop.permute.xlu1 %4962 }
 0x9fc   : > { %5108 = vrot.lane.b32.xlu0 %v11611_v16, %s6491_s17  ;;  %5106 = vrot.lane.b32.xlu1 %v11607_v55, %s6491_s17 }
 0x9fe   : > { %v4965_v47 = vpop.permute.xlu0 %4964  ;;  %v5187_v15 = vpop.permute.xlu1 %5186 }
 0xa00   : > { %5136 = vrot.lane.b32.xlu0 %v11881_v44, %s6491_s17  ;;  %5122 = vrot.lane.b32.xlu1 %v11629_v12, %s6491_s17 }
 0xa02   : > { %v5189_v59 = vpop.permute.xlu0 %5188  ;;  %v4891_v9 = vpop.permute.xlu1 %4890 }
 0xa04   : > { %5124 = vrot.lane.b32.xlu0 %v11635_v52, %s6491_s17  ;;  %5262 = vrot.lane.b32.xlu1 %v11815_v4, %s6492_s20 }
 0xa06   : > { %v4893_v31 = vpop.permute.xlu0 %4892  ;;  %v12007_v32 = vpop.permute.xlu1 %4834 }
 0xa08   : > { %5264 = vrot.lane.b32.xlu0 %v11823_v33, %s6492_s20  ;;  %5278 = vrot.lane.b32.xlu1 %v11873_v38, %s6492_s20 }
 0xa0a   : > { %v12013_v50 = vpop.permute.xlu0 %4836  ;;  %v12015_v20 = vpop.permute.xlu1 %5058 }
 0xa0c   : > { %5260 = vrot.lane.b32.xlu0 %v11733_v35, %s6492_s20  ;;  %5258 = vrot.lane.b32.xlu1 %v11727_v19, %s6492_s20 }
 0xa0e   : > { %v12021_v4 = vpop.permute.xlu0 %5060  ;;  %v12023_v25 = vpop.permute.xlu1 %4762 }
 0xa10   : > { %5276 = vrot.lane.b32.xlu0 %v11767_v26, %s6492_s20  ;;  %5274 = vrot.lane.b32.xlu1 %v11761_v23, %s6492_s20 }
 0xa12   : > { %v12029_v1 = vpop.permute.xlu0 %4764  ;;  %v4979_v33 = vpop.permute.xlu1 %4978 }
 0xa13   : > { %v4990_v38 = vsel %vm558_vm3, %v4963_v3, %v4979_v33  ;;  %v4998_v35 = vsel %vm558_vm3, %v4979_v33, %v4963_v3 }
 0xa14   : > { %5256 = vrot.lane.b32.xlu0 %v11665_v45, %s6492_s20  ;;  %5254 = vrot.lane.b32.xlu1 %v11659_v37, %s6492_s20  ;;  %v12040_v26 = vmul.f32 %v4998_v35, %v13669_v7  ;;  %v12043_v23 = vmul.f32 %v4990_v38, %v13667_v36 }
 0xa16   : > { %v4981_v19 = vpop.permute.xlu0 %4980  ;;  %13766 = vst [vmem:[#allocation42_spill] sm:$0xff] %v12040_v26  ;;  %13767 = vst [vmem:[#allocation74_spill] sm:$0xff] %v12043_v23  ;;  %v5203_v3 = vpop.permute.xlu1 %5202 }
 0xa17   : > { %v4991_v29 = vsel %vm558_vm3, %v4965_v47, %v4981_v19  ;;  %v4999_v10 = vsel %vm558_vm3, %v4981_v19, %v4965_v47  ;;  %v5214_v35 = vsel %vm824_vm5, %v5187_v15, %v5203_v3  ;;  %v5222_v38 = vsel %vm824_vm5, %v5203_v3, %v5187_v15 }
 0xa18   : > { %v12050_v33 = vmul.f32 %v4999_v10, %v13669_v7  ;;  %v12053_v45 = vmul.f32 %v4991_v29, %v13667_v36  ;;  %5280 = vrot.lane.b32.xlu0 %v11881_v44, %s6492_s20  ;;  %5270 = vrot.lane.b32.xlu1 %v11693_v34, %s6492_s20  ;;  %v12068_v10 = vmul.f32 %v5214_v35, %v13717_v48 }
 0xa19   : > { %v12071_v37 = vmul.f32 %v5222_v38, %v13715_v51 }
 0xa1a   : > { %13768 = vst [vmem:[#allocation62_spill] sm:$0xff] %v12050_v33  ;;  %13769 = vst [vmem:[#allocation81_spill] sm:$0xff] %v12053_v45  ;;  %v5205_v47 = vpop.permute.xlu0 %5204  ;;  %v4907_v34 = vpop.permute.xlu1 %4906 }
 0xa1b   : > { %13770 = vst [vmem:[#allocation36_spill] sm:$0xff] %v12068_v10  ;;  %13771 = vst [vmem:[#allocation35_spill] sm:$0xff] %v12071_v37  ;;  %v5215_v15 = vsel %vm824_vm5, %v5189_v59, %v5205_v47  ;;  %v5223_v3 = vsel %vm824_vm5, %v5205_v47, %v5189_v59  ;;  %v4918_v35 = vsel %vm472_vm4, %v4891_v9, %v4907_v34 }
 0xa1c   : > { %v12078_v36 = vmul.f32 %v5215_v15, %v13717_v48  ;;  %v12081_v19 = vmul.f32 %v5223_v3, %v13715_v51  ;;  %v4926_v38 = vsel %vm472_vm4, %v4907_v34, %v4891_v9  ;;  %5272 = vrot.lane.b32.xlu0 %v11699_v8, %s6492_s20  ;;  %5250 = vrot.lane.b32.xlu1 %v11607_v55, %s6492_s20 }
 0xa1d   : > { %v12100_v9 = vmul.f32 %v4926_v38, %v13691_v5  ;;  %v12103_v26 = vmul.f32 %v4918_v35, %v13689_v41  ;;  %v6285_v35 = vld [vmem:[%s13030_s2 + $0x100] sm:$0xff]  ;;  %v4842_v37 = vsel %vm386_vm0, %v11769_v61, %v11817_v6  ;;  %v5074_v51 = vsel %vm652_vm2, %v11827_v60, %v11777_v13 }
 0xa1e   : > { %13772 = vst [vmem:[#allocation61_spill] sm:$0xff] %v12078_v36  ;;  %13773 = vst [vmem:[#allocation76_spill] sm:$0xff] %v12081_v19  ;;  %v4909_v47 = vpop.permute.xlu0 %4908  ;;  %v4823_v34 = vpop.permute.xlu1 %4822  ;;  %v6289_v36 = vld [vmem:[%s13030_s2 + $0x120] sm:$0xff] }
 0xa1f   : > { %v4919_v3 = vsel %vm472_vm4, %v4893_v31, %v4909_v47  ;;  %v4927_v29 = vsel %vm472_vm4, %v4909_v47, %v4893_v31  ;;  %13774 = vst [vmem:[#allocation54_spill] sm:$0xff] %v12100_v9  ;;  %13775 = vst [vmem:[#allocation55_spill] sm:$0xff] %v12103_v26  ;;  %v6287_v31 = vld [vmem:[%s13030_s2 + $0x110] sm:$0xff] }
 0xa20   : > { %v12106_v33 = vmul.f32 %v4927_v29, %v13691_v5  ;;  %v12109_v59 = vmul.f32 %v4919_v3, %v13689_v41  ;;  %5252 = vrot.lane.b32.xlu0 %v11611_v16, %s6492_s20  ;;  %5266 = vrot.lane.b32.xlu1 %v11629_v12, %s6492_s20  ;;  %v6286_v3 = vld [vmem:[%s13030_s2 + $0x108] sm:$0xff]  ;;  %v6293_v29 = vld [vmem:[%s13031_s3 + $0x100] sm:$0xff]  ;;  %v4851_v41 = vsel %vm386_vm0, %v11825_v22, %v11775_v54 }
 0xa21   : > { %v12186_v19 = vmul.f32 %v4851_v41, %v13526_v49  ;;  %v4847_v41 = vsel %vm386_vm0, %v11971_v56, %v12013_v50 }
 0xa22   : > { %13776 = vst [vmem:[#allocation71_spill] sm:$0xff] %v12106_v33  ;;  %13777 = vst [vmem:[#allocation41_spill] sm:$0xff] %v12109_v59  ;;  %v4825_v38 = vpop.permute.xlu0 %4824  ;;  %v12122_v47 = vpop.permute.xlu1 %5046  ;;  %v6288_v59 = vld [vmem:[%s13030_s2 + $0x118] sm:$0xff] }
 0xa24   : > { %5268 = vrot.lane.b32.xlu0 %v11635_v52, %s6492_s20  ;;  %5689 = vperm.xlu1 %6331, %v6285_v35   ;;  %v6294_v35 = vld [vmem:[%s13031_s3 + $0x108] sm:$0xff] }
 0xa26   : > { %v12129_v15 = vpop.permute.xlu0 %5048  ;;  %v12134_v9 = vpop.permute.xlu1 %4750 }
 0xa28   : > { %5694 = vperm.xlu0 %6330, %v6286_v3   ;;  %5699 = vperm.xlu1 %6331, %v6287_v31   ;;  %v6295_v31 = vld [vmem:[%s13031_s3 + $0x110] sm:$0xff] }
 0xa2a   : > { %v12139_v33 = vpop.permute.xlu0 %4752  ;;  %v12144_v26 = vpop.permute.xlu1 %4966 }
 0xa2c   : > { %5754 = vperm.xlu0 %6330, %v6293_v29   ;;  %5759 = vperm.xlu1 %6331, %v6294_v35   ;;  %v6296_v35 = vld [vmem:[%s13031_s3 + $0x118] sm:$0xff] }
 0xa2e   : > { %v12149_v3 = vpop.permute.xlu0 %4968  ;;  %v12154_v10 = vpop.permute.xlu1 %5190 }
 0xa2f   : > { %13778 = vst [vmem:[#allocation49_spill] sm:$0xff] %v12149_v3  ;;  %13779 = vst [vmem:[#allocation53_spill] sm:$0xff] %v12154_v10 }
 0xa30   : > { %5704 = vperm.xlu0 %6330, %v6288_v59   ;;  %5764 = vperm.xlu1 %6331, %v6295_v31   ;;  %v4850_v59 = vsel %vm386_vm0, %v11817_v6, %v11769_v61  ;;  %v6290_v31 = vld [vmem:[%s13030_s2 + $0x128] sm:$0xff] }
 0xa31   : > { %v12198_v6 = vmul.f32 %v4850_v59, %v13526_v49  ;;  %v5840_v59 = vld [vmem:[%s13033_s5] sm:$0xff] }
 0xa32   : > { %v12159_v29 = vpop.permute.xlu0 %5192  ;;  %v12168_v5 = vpop.permute.xlu1 %4894 }
 0xa33   : > { %13780 = vst [vmem:[#allocation48_spill] sm:$0xff] %v12159_v29  ;;  %13781 = vst [vmem:[#allocation39_spill] sm:$0xff] %v12168_v5 }
 0xa34   : > { %5709 = vperm.xlu0 %6330, %v6289_v36   ;;  %5769 = vperm.xlu1 %6331, %v6296_v35   ;;  %v4843_v36 = vsel %vm386_vm0, %v11775_v54, %v11825_v22  ;;  %v6297_v35 = vld [vmem:[%s13031_s3 + $0x120] sm:$0xff]  ;;  %v12205_v54 = vmul.f32 %v4842_v37, %v6727_v24  ;;  %v12220_v37 = vmul.f32 %v5074_v51, %v6909_v62 }
 0xa35   : > { %v12208_v22 = vmul.f32 %v4843_v36, %v6727_v24  ;;  %v4845_v36 = vsel %vm386_vm0, %v11871_v30, %v11923_v46  ;;  %v4855_v51 = vsel %vm386_vm0, %v12013_v50, %v11971_v56  ;;  %v4844_v56 = vsel %vm386_vm0, %v11864_v57, %v11917_v53 }
 0xa36   : > { %v12188_v5 = vpop.permute.xlu0 %4896  ;;  %v4839_v61 = vpop.permute.xlu1 %4838  ;;  %v4852_v50 = vsel %vm386_vm0, %v11917_v53, %v11864_v57  ;;  %v6298_v53 = vld [vmem:[%s13031_s3 + $0x128] sm:$0xff] }
 0xa37   : > { %13782 = vst [vmem:[#allocation84_spill] sm:$0xff] %v12188_v5  ;;  %v4848_v5 = vsel %vm386_vm0, %v4823_v34, %v4839_v61  ;;  %v4856_v23 = vsel %vm386_vm0, %v4839_v61, %v4823_v34  ;;  %v4846_v34 = vsel %vm386_vm0, %v11965_v21, %v12007_v32  ;;  %v5841_v61 = vld [vmem:[%s13033_s5 + $0x8] sm:$0xff] }
 0xa38   : > { %5714 = vperm.xlu0 %6330, %v6290_v31   ;;  %5774 = vperm.xlu1 %6331, %v6297_v35   ;;  %v4869_v31 = vmul.f32 %v4847_v41, %v6727_v24  ;;  %v4870_v10 = vmul.f32 %v4856_v23, %v13526_v49  ;;  %v4871_v8 = vmul.f32 %v4848_v5, %v6727_v24  ;;  %v6291_v5 = vld [vmem:[%s13030_s2 + $0x130] sm:$0xff] }
 0xa39   : > { %v4854_v23 = vsel %vm386_vm0, %v12007_v32, %v11965_v21  ;;  %v5075_v32 = vsel %vm652_vm2, %v11833_v2, %v11784_v14  ;;  %v4868_v21 = vmul.f32 %v4855_v51, %v13526_v49 }
 0xa3a   : > { %v4841_v35 = vpop.permute.xlu0 %4840  ;;  %v12242_v48 = vpop.permute.xlu1 %5118 }
 0xa3b   : > { %v4849_v45 = vsel %vm386_vm0, %v4825_v38, %v4841_v35  ;;  %v4857_v29 = vsel %vm386_vm0, %v4841_v35, %v4825_v38  ;;  %v4865_v38 = vmul.f32 %v4845_v36, %v6727_v24  ;;  %v12276_v36 = vsel %vm652_vm2, %v11784_v14, %v11833_v2  ;;  %v5842_v2 = vld [vmem:[%s13033_s5 + $0x10] sm:$0xff] }
 0xa3c   : > { %v4872_v7 = vmul.f32 %v4857_v29, %v13526_v49  ;;  %v4873_v3 = vmul.f32 %v4849_v45, %v6727_v24  ;;  %5850 = vperm.xlu0 %6330, %v5840_v59   ;;  %5855 = vperm.xlu1 %6331, %v5841_v61   ;;  %v4875_v45 = vpack.c.bf16 %v12208_v22, %v12205_v54 }
 0xa3d   : > { %v4867_v29 = vmul.f32 %v4846_v34, %v6727_v24  ;;  %v4866_v35 = vmul.f32 %v4854_v23, %v13526_v49 }
 0xa3e   : > { %v4880_v41 = vpack.c.bf16 %v4872_v7, %v4870_v10  ;;  %v12267_v59 = vpop.permute.xlu0 %5120  ;;  %v4881_v57 = vpack.c.bf16 %v4873_v3, %v4871_v8  ;;  %v4853_v7 = vsel %vm386_vm0, %v11923_v46, %v11871_v30  ;;  %v5063_v10 = vpop.permute.xlu1 %5062  ;;  %v4862_v8 = vmul.f32 %v4852_v50, %v13526_v49 }
 0xa3f   : > { %v4863_v3 = vmul.f32 %v4844_v56, %v6727_v24  ;;  %v4879_v34 = vpack.c.bf16 %v4869_v31, %v4867_v29  ;;  %v5072_v14 = vsel %vm652_vm2, %v12122_v47, %v5063_v10  ;;  %v5080_v46 = vsel %vm652_vm2, %v5063_v10, %v12122_v47  ;;  %v6292_v47 = vld [vmem:[%s13030_s2 + $0x138] sm:$0xff] }
 0xa40   : > { %5719 = vperm.xlu0 %6330, %v6291_v5   ;;  %5459 = vmatprep.subr.bf16.mxu0 %v4881_v57  ;;  %v4864_v24 = vmul.f32 %v4853_v7, %v13526_v49  ;;  %v5078_v30 = vsel %vm652_vm2, %v12015_v20, %v11973_v40  ;;  %v5079_v31 = vsel %vm652_vm2, %v12021_v4, %v11979_v0  ;;  %v6299_v57 = vld [vmem:[%s13031_s3 + $0x130] sm:$0xff] }
 0xa41   : > { %5779 = vperm.xlu1 %6331, %v6298_v53   ;;  %5460 = vmatpush1.bf16.msra.mxu0 %v4880_v41  ;;  %v4877_v51 = vpack.c.bf16 %v4865_v38, %v4863_v3  ;;  %v4878_v56 = vpack.c.bf16 %v4868_v21, %v4866_v35  ;;  %v5071_v49 = vsel %vm652_vm2, %v11979_v0, %v12021_v4 }
 0xa42   : > { %v5065_v61 = vpop.permute.xlu0 %5064  ;;  %5461 = vmatprep.subr.bf16.mxu0 %v4879_v34  ;;  %v4767_v23 = vpop.permute.xlu1 %4766  ;;  %v5094_v29 = vmul.f32 %v5072_v14, %v6912_v63  ;;  %v5095_v41 = vmul.f32 %v5080_v46, %v6909_v62  ;;  %v5077_v0 = vsel %vm652_vm2, %v11931_v39, %v11883_v17  ;;  %v5070_v4 = vsel %vm652_vm2, %v11973_v40, %v12015_v20  ;;  %v5843_v20 = vld [vmem:[%s13033_s5 + $0x18] sm:$0xff] }
 0xa43   : > { %v5073_v50 = vsel %vm652_vm2, %v12129_v15, %v5065_v61  ;;  %v5081_v5 = vsel %vm652_vm2, %v5065_v61, %v12129_v15  ;;  %v5093_v15 = vmul.f32 %v5079_v31, %v6909_v62  ;;  %v12338_v7 = vmul.f32 %v5075_v32, %v6909_v62 }
 0xa44   : > { %v5096_v38 = vmul.f32 %v5073_v50, %v6912_v63  ;;  %v5097_v53 = vmul.f32 %v5081_v5, %v6909_v62  ;;  %5860 = vperm.xlu0 %6330, %v5842_v2   ;;  %v5076_v21 = vsel %vm652_vm2, %v11925_v28, %v11875_v58  ;;  %v4876_v34 = vpack.c.bf16 %v4864_v24, %v4862_v8 }
 0xa45   : > { %5724 = vperm.xlu1 %6331, %v6292_v47   ;;  %5462 = vmatpush1.bf16.msra.mxu0 %v4878_v56  ;;  %v5069_v32 = vsel %vm652_vm2, %v11883_v17, %v11931_v39  ;;  %v5091_v35 = vmul.f32 %v5078_v30, %v6909_v62  ;;  %v5092_v14 = vmul.f32 %v5071_v49, %v6912_v63 }
 0xa46   : > { %v5104_v10 = vpack.c.bf16 %v5096_v38, %v5094_v29  ;;  %v12344_v3 = vpop.permute.xlu0 %4884  ;;  %5463 = vmatprep.subr.bf16.mxu0 %v4877_v51  ;;  %v5105_v40 = vpack.c.bf16 %v5097_v53, %v5095_v41  ;;  %v12355_v46 = vpop.permute.xlu1 %4982  ;;  %v5068_v2 = vsel %vm652_vm2, %v11875_v58, %v11925_v28  ;;  %v5089_v31 = vmul.f32 %v5077_v0, %v6909_v62  ;;  %v6300_v28 = vld [vmem:[%s13031_s3 + $0x138] sm:$0xff]  ;;  %v5845_v38 = vld [vmem:[%s13033_s5 + $0x28] sm:$0xff]  ;;  %v13784_v0 = vld [vmem:[#allocation50_spill] sm:$0xff] }
 0xa47   : > { %v5090_v8 = vmul.f32 %v5070_v4, %v6912_v63  ;;  %v4776_v17 = vsel %vm301_vm1, %v12134_v9, %v4767_v23  ;;  %v4784_v39 = vsel %vm301_vm1, %v4767_v23, %v12134_v9  ;;  %v5103_v24 = vpack.c.bf16 %v5093_v15, %v5091_v35  ;;  %v5844_v9 = vld [vmem:[%s13033_s5 + $0x20] sm:$0xff]  ;;  %v13785_v4 = vld [vmem:[#allocation64_spill] sm:$0xff] }
 0xa48   : > { %5784 = vperm.xlu0 %6330, %v6299_v57   ;;  %5532 = vmatprep.subr.bf16.mxu1 %v5105_v40  ;;  %v5087_v58 = vmul.f32 %v5076_v21, %v6909_v62  ;;  %v5088_v30 = vmul.f32 %v5069_v32, %v6912_v63  ;;  %v4775_v61 = vsel %vm301_vm1, %v11987_v27, %v12029_v1  ;;  %v13786_v32 = vld [vmem:[#allocation44_spill] sm:$0xff] }
 0xa49   : > { %5865 = vperm.xlu1 %6331, %v5843_v20   ;;  %5464 = vmatpush1.bf16.msra.mxu0 %v4876_v34  ;;  %v5102_v51 = vpack.c.bf16 %v5092_v14, %v5090_v8  ;;  %v4774_v62 = vsel %vm301_vm1, %v11981_v11, %v12023_v25  ;;  %v4798_v22 = vmul.f32 %v4784_v39, %v6819_v42  ;;  %v13787_v35 = vld [vmem:[#allocation32_spill] sm:$0xff]  ;;  %v13788_v8 = vld [vmem:[#allocation34_spill] sm:$0xff] }
 0xa4a   : > { %5533 = vmatpush1.bf16.msra.mxu1 %v5104_v10  ;;  %v4769_v47 = vpop.permute.xlu0 %4768  ;;  %5465 = vmatprep.subr.bf16.mxu0 %v4875_v45  ;;  %v12394_v54 = vpop.permute.xlu1 %5206  ;;  %v4799_v45 = vmul.f32 %v4776_v17, %v6822_v43  ;;  %v4783_v23 = vsel %vm301_vm1, %v12029_v1, %v11987_v27  ;;  %v4797_v29 = vmul.f32 %v4775_v61, %v6822_v43  ;;  %v13789_v17 = vld [vmem:[#allocation22_spill] sm:$0xff] }
 0xa4b   : > { %v4777_v56 = vsel %vm301_vm1, %v12139_v33, %v4769_v47  ;;  %v4785_v49 = vsel %vm301_vm1, %v4769_v47, %v12139_v33  ;;  %5534 = vmatprep.subr.bf16.mxu1 %v5103_v24  ;;  %v13783_v33 = vpack.c.bf16 %v12186_v19, %v12198_v6  ;;  %v5101_v41 = vpack.c.bf16 %v5089_v31, %v5087_v58  ;;  %v5846_v19 = vld [vmem:[%s13033_s5 + $0x30] sm:$0xff]  ;;  %v13790_v24 = vld [vmem:[#allocation31_spill] sm:$0xff] }
 0xa4c   : > { %v4800_v50 = vmul.f32 %v4785_v49, %v6819_v42  ;;  %v4801_v5 = vmul.f32 %v4777_v56, %v6822_v43  ;;  %5789 = vperm.xlu0 %6330, %v6300_v28   ;;  %v5086_v53 = vmul.f32 %v5068_v2, %v6912_v63  ;;  %v4773_v15 = vsel %vm301_vm1, %v13785_v4, %v13784_v0  ;;  %v5847_v2 = vld [vmem:[%s13033_s5 + $0x38] sm:$0xff] }
 0xa4d   : > { %5870 = vperm.xlu1 %6331, %v5844_v9   ;;  %5466 = vmatpush1.bf16.msra.mxu0 %v13783_v33  ;;  %v5066_v57 = vsel %vm652_vm2, %v11777_v13, %v11827_v60  ;;  %v5084_v21 = vmul.f32 %v12276_v36, %v6912_v63  ;;  %v4782_v10 = vsel %vm301_vm1, %v12023_v25, %v11981_v11  ;;  %v13791_v28 = vld [vmem:[#allocation21_spill] sm:$0xff] }
 0xa4e   : > { %v4808_v27 = vpack.c.bf16 %v4800_v50, %v4798_v22  ;;  %5535 = vmatpush1.bf16.msra.mxu1 %v5102_v51  ;;  %v12416_v1 = vpop.permute.xlu0 %4900  ;;  %v4809_v6 = vpack.c.bf16 %v4801_v5, %v4799_v45  ;;  %v4795_v20 = vmul.f32 %v4774_v62, %v6822_v43  ;;  %v12432_v40 = vpop.permute.xlu1 %4910  ;;  %v5100_v34 = vpack.c.bf16 %v5088_v30, %v5086_v53  ;;  %v13792_v22 = vld [vmem:[#allocation75_spill] sm:$0xff]  ;;  %v13794_v53 = vld [vmem:[#allocation30_spill] sm:$0xff] }
 0xa4f   : > { %5536 = vmatprep.subr.bf16.mxu1 %v5101_v41  ;;  %v4772_v14 = vsel %vm301_vm1, %v13787_v35, %v13786_v32  ;;  %v4796_v13 = vmul.f32 %v4783_v23, %v6819_v42  ;;  %v5099_v60 = vpack.c.bf16 %v12338_v7, %v12220_v37  ;;  %v4781_v25 = vsel %vm301_vm1, %v13784_v0, %v13785_v4  ;;  %v13795_v4 = vld [vmem:[#allocation19_spill] sm:$0xff] }
 0xa50   : > { %5875 = vperm.xlu0 %6330, %v5845_v38   ;;  %v4793_v11 = vmul.f32 %v4773_v15, %v6822_v43  ;;  %5467 = vmatprep.subr.bf16.mxu0 %v4809_v6  ;;  %v4807_v36 = vpack.c.bf16 %v4797_v29, %v4795_v20  ;;  %v5082_v31 = vmul.f32 %v5066_v57, %v6912_v63  ;;  %v13793_v38 = vld [vmem:[#allocation27_spill] sm:$0xff]  ;;  %v13796_v15 = vld [vmem:[#allocation20_spill] sm:$0xff]  ;;  %v13798_v20 = vld [vmem:[#allocation82_spill] sm:$0xff] }
 0xa51   : > { %5880 = vperm.xlu1 %6331, %v5846_v19   ;;  %v4771_v37 = vsel %vm301_vm1, %v13789_v17, %v13788_v8  ;;  %v4794_v7 = vmul.f32 %v4782_v10, %v6819_v42  ;;  %5468 = vmatpush1.bf16.msra.mxu0 %v4808_v27  ;;  %v4770_v58 = vsel %vm301_vm1, %v13791_v28, %v13790_v24  ;;  %v13797_v10 = vld [vmem:[#allocation23_spill] sm:$0xff] }
 0xa52   : > { %5537 = vmatpush1.bf16.msra.mxu1 %v5100_v34  ;;  %v12455_v39 = vpop.permute.xlu0 %5116  ;;  %v4780_v63 = vsel %vm301_vm1, %v13786_v32, %v13787_v35  ;;  %v4791_v30 = vmul.f32 %v4772_v14, %v6822_v43  ;;  %5469 = vmatprep.subr.bf16.mxu0 %v4807_v36  ;;  %v12466_v61 = vpop.permute.xlu1 %5134  ;;  %v5098_v47 = vpack.c.bf16 %v5084_v21, %v5082_v31  ;;  %v13800_v35 = vld [vmem:[#allocation18_spill] sm:$0xff]  ;;  %v13802_v36 = vld [vmem:[#allocation4_spill] sm:$0xff]  ;;  %v13803_v31 = vld [vmem:[#allocation5_spill] sm:$0xff] }
 0xa53   : > { %5538 = vmatprep.subr.bf16.mxu1 %v5099_v60  ;;  %v4779_v9 = vsel %vm301_vm1, %v13788_v8, %v13789_v17  ;;  %v4792_v51 = vmul.f32 %v4781_v25, %v6819_v42  ;;  %v4806_v62 = vpack.c.bf16 %v4796_v13, %v4794_v7  ;;  %v4789_v56 = vmul.f32 %v4771_v37, %v6822_v43  ;;  %v13801_v25 = vld [vmem:[#allocation49_spill] sm:$0xff]  ;;  %v13804_v37 = vld [vmem:[#allocation70_spill] sm:$0xff]  ;;  %v13805_v7 = vld [vmem:[#allocation24_spill] sm:$0xff] }
 0xa54   : > { %5885 = vperm.xlu0 %6330, %v5847_v2   ;;  %v4805_v49 = vpack.c.bf16 %v4793_v11, %v4791_v30  ;;  %v5033_v45 = vpack.c.bf16 %v11881_v44, %v13792_v22  ;;  %v4778_v50 = vsel %vm301_vm1, %v13790_v24, %v13791_v28  ;;  %v4790_v5 = vmul.f32 %v4780_v63, %v6819_v42  ;;  %v13807_v63 = vld [vmem:[#allocation16_spill] sm:$0xff] }
 0xa55   : > { %5470 = vmatpush1.bf16.msra.mxu0 %v4806_v62  ;;  %v4787_v29 = vmul.f32 %v4770_v58, %v6822_v43  ;;  %v4788_v33 = vmul.f32 %v4779_v9, %v6819_v42  ;;  %v5032_v0 = vpack.c.bf16 %v13794_v53, %v13793_v38  ;;  %v5031_v27 = vpack.c.bf16 %v13796_v15, %v13795_v4  ;;  %v13806_v58 = vld [vmem:[#allocation15_spill] sm:$0xff]  ;;  %v13809_v9 = vld [vmem:[#allocation46_spill] sm:$0xff]  ;;  %v13814_v53 = vld [vmem:[#allocation60_spill] sm:$0xff] }
 0xa56   : > { %5539 = vmatpush1.bf16.msra.mxu1 %v5098_v47  ;;  %v12481_v23 = vpop.permute.xlu0 %5132  ;;  %5471 = vmatprep.subr.bf16.mxu0 %v4805_v49  ;;  %v12485_v41 = vpop.permute.xlu1 %4882  ;;  %v4804_v44 = vpack.c.bf16 %v4792_v51, %v4790_v5  ;;  %v5026_v19 = vpack.c.bf16 %v11611_v16, %v11607_v55  ;;  %v4786_v6 = vmul.f32 %v4778_v50, %v6819_v42  ;;  %v13799_v42 = vld [vmem:[#allocation17_spill] sm:$0xff] }
 0xa57   : > { %5540 = vmatprep.subr.bf16.mxu1 %v5033_v45  ;;  %v4992_v43 = vsel %vm558_vm3, %v12144_v26, %v12355_v46  ;;  %v5000_v57 = vsel %vm558_vm3, %v12355_v46, %v12144_v26  ;;  %v4803_v21 = vpack.c.bf16 %v4789_v56, %v4787_v29  ;;  %v4994_v34 = vsel %vm558_vm3, %v13798_v20, %v13797_v10  ;;  %v13808_v47 = vld [vmem:[#allocation37_spill] sm:$0xff]  ;;  %v13810_v45 = vld [vmem:[#allocation56_spill] sm:$0xff]  ;;  %v13812_v29 = vld [vmem:[#allocation83_spill] sm:$0xff] }
 0xa58   : > { %v5030_v14 = vpack.c.bf16 %v13800_v35, %v13799_v42  ;;  %v5027_v13 = vpack.c.bf16 %v11635_v52, %v11629_v12  ;;  %v4802_v60 = vpack.c.bf16 %v4788_v33, %v4786_v6  ;;  %v5014_v2 = vmul.f32 %v5000_v57, %v13802_v36  ;;  %v13811_v50 = vld [vmem:[#allocation25_spill] sm:$0xff]  ;;  %v13813_v33 = vld [vmem:[#allocation43_spill] sm:$0xff] }
 0xa59   : > { %5472 = vmatpush1.bf16.msra.mxu0 %v4804_v44  ;;  %v5015_v8 = vmul.f32 %v4992_v43, %v13803_v31  ;;  %v4986_v52 = vsel %vm558_vm3, %v13797_v10, %v13798_v20  ;;  %v4987_v24 = vsel %vm558_vm3, %v13805_v7, %v13804_v37  ;;  %v4995_v28 = vsel %vm558_vm3, %v13804_v37, %v13805_v7  ;;  %v13816_v10 = vld [vmem:[#allocation53_spill] sm:$0xff] }
 0xa5a   : > { %5541 = vmatpush1.bf16.msra.mxu1 %v5032_v0  ;;  %v4985_v32 = vpop.permute.xlu0 %4984  ;;  %5473 = vmatprep.subr.bf16.mxu0 %v4803_v21  ;;  %v12516_v11 = vpop.permute.xlu1 %4898  ;;  %v5029_v30 = vpack.c.bf16 %v13807_v63, %v13806_v58  ;;  %v4989_v51 = vsel %vm558_vm3, %v13809_v9, %v13808_v47  ;;  %v12543_v22 = vmul.f32 %v4994_v34, %v13802_v36  ;;  %v13815_v0 = vld [vmem:[#allocation14_spill] sm:$0xff] }
 0xa5b   : > { %v4993_v26 = vsel %vm558_vm3, %v13801_v25, %v4985_v32  ;;  %v5001_v46 = vsel %vm558_vm3, %v4985_v32, %v13801_v25  ;;  %5542 = vmatprep.subr.bf16.mxu1 %v5031_v27  ;;  %v5210_v5 = vsel %vm824_vm5, %v13811_v50, %v13810_v45  ;;  %v4988_v44 = vsel %vm558_vm3, %v13813_v33, %v13812_v29  ;;  %v13817_v32 = vld [vmem:[#allocation8_spill] sm:$0xff]  ;;  %v13824_v58 = vld [vmem:[#allocation26_spill] sm:$0xff] }
 0xa5c   : > { %v5016_v17 = vmul.f32 %v5001_v46, %v13802_v36  ;;  %v5017_v12 = vmul.f32 %v4993_v26, %v13803_v31  ;;  %v5028_v4 = vpack.c.bf16 %v13815_v0, %v13814_v53  ;;  %v5003_v15 = vmul.f32 %v4986_v52, %v13803_v31  ;;  %v13818_v26 = vld [vmem:[#allocation48_spill] sm:$0xff]  ;;  %v13822_v52 = vld [vmem:[#allocation9_spill] sm:$0xff] }
 0xa5d   : > { %5474 = vmatpush1.bf16.msra.mxu0 %v4802_v60  ;;  %v12559_v27 = vmul.f32 %v4995_v28, %v13802_v36  ;;  %v5005_v6 = vmul.f32 %v4987_v24, %v13803_v31  ;;  %v4997_v43 = vsel %vm558_vm3, %v13808_v47, %v13809_v9  ;;  %v5218_v57 = vsel %vm824_vm5, %v13810_v45, %v13811_v50  ;;  %v13823_v28 = vld [vmem:[#allocation40_spill] sm:$0xff]  ;;  %v13825_v9 = vld [vmem:[#allocation45_spill] sm:$0xff]  ;;  %v13827_v45 = vld [vmem:[#allocation62_spill] sm:$0xff] }
 0xa5e   : > { %v5024_v62 = vpack.c.bf16 %v5016_v17, %v5014_v2  ;;  %5543 = vmatpush1.bf16.msra.mxu1 %v5030_v14  ;;  %v12540_v56 = vpop.permute.xlu0 %5112  ;;  %v5025_v49 = vpack.c.bf16 %v5017_v12, %v5015_v8  ;;  %v12553_v38 = vpop.permute.xlu1 %5114  ;;  %v5009_v21 = vmul.f32 %v4989_v51, %v13803_v31  ;;  %v5216_v20 = vsel %vm824_vm5, %v13816_v10, %v12394_v54  ;;  %v13819_v2 = vld [vmem:[#allocation81_spill] sm:$0xff]  ;;  %v13820_v8 = vld [vmem:[#allocation74_spill] sm:$0xff]  ;;  %v13830_v53 = vld [vmem:[#allocation80_spill] sm:$0xff] }
 0xa5f   : > { %5544 = vmatprep.subr.bf16.mxu1 %v5029_v30  ;;  %v5224_v34 = vsel %vm824_vm5, %v12394_v54, %v13816_v10  ;;  %v12580_v42 = vmul.f32 %v5210_v5, %v13817_v32  ;;  %v4996_v35 = vsel %vm558_vm3, %v13812_v29, %v13813_v33  ;;  %v5007_v14 = vmul.f32 %v4988_v44, %v13803_v31  ;;  %v13826_v51 = vld [vmem:[#allocation57_spill] sm:$0xff]  ;;  %v13828_v50 = vld [vmem:[#allocation42_spill] sm:$0xff]  ;;  %v13831_v0 = vld [vmem:[#allocation28_spill] sm:$0xff] }
 0xa60   : > { %5475 = vmatprep.subr.bf16.mxu0 %v5025_v49  ;;  %v5008_v25 = vmul.f32 %v4997_v43, %v13802_v36  ;;  %v13821_v17 = vpack.c.bf16 %v13819_v2, %v13820_v8  ;;  %v5238_v31 = vmul.f32 %v5216_v20, %v13817_v32  ;;  %v5239_v37 = vmul.f32 %v5224_v34, %v13822_v52  ;;  %v13832_v10 = vld [vmem:[#allocation39_spill] sm:$0xff]  ;;  %v13837_v2 = vld [vmem:[#allocation84_spill] sm:$0xff] }
 0xa61   : > { %5476 = vmatpush2.bf16.msra.mxu0 %v5024_v62  ;;  %v5211_v63 = vsel %vm824_vm5, %v13824_v58, %v13823_v28  ;;  %v5006_v30 = vmul.f32 %v4996_v35, %v13802_v36  ;;  %v5021_v47 = vpack.c.bf16 %v5009_v21, %v5007_v14  ;;  %v5221_v62 = vsel %vm824_vm5, %v13826_v51, %v13825_v9  ;;  %v13834_v14 = vld [vmem:[#allocation33_spill] sm:$0xff] }
 0xa62   : > { %5545 = vmatpush1.bf16.msra.mxu1 %v5028_v4  ;;  %v5209_v60 = vpop.permute.xlu0 %5208  ;;  %5477 = vmatprep.subr.bf16.mxu0 %v13821_v17  ;;  %v12597_v12 = vpop.permute.xlu1 %5130  ;;  %v13829_v5 = vpack.c.bf16 %v13827_v45, %v13828_v50  ;;  %v5018_v36 = vpack.c.bf16 %v12559_v27, %v12543_v22  ;;  %v12627_v44 = vmul.f32 %v5218_v57, %v13822_v52  ;;  %v13843_v45 = vld [vmem:[#allocation61_spill] sm:$0xff]  ;;  %v13844_v50 = vld [vmem:[#allocation36_spill] sm:$0xff] }
 0xa63   : > { %v5217_v46 = vsel %vm824_vm5, %v13818_v26, %v5209_v60  ;;  %v5225_v54 = vsel %vm824_vm5, %v5209_v60, %v13818_v26  ;;  %5546 = vmatprep.subr.bf16.mxu1 %v5027_v13  ;;  %v5219_v13 = vsel %vm824_vm5, %v13823_v28, %v13824_v58  ;;  %v5220_v4 = vsel %vm824_vm5, %v13831_v0, %v13830_v53  ;;  %v13835_v26 = vld [vmem:[#allocation29_spill] sm:$0xff]  ;;  %v13842_v28 = vld [vmem:[#allocation7_spill] sm:$0xff] }
 0xa64   : > { %v5240_v7 = vmul.f32 %v5217_v46, %v13817_v32  ;;  %v5241_v24 = vmul.f32 %v5225_v54, %v13822_v52  ;;  %v5213_v55 = vsel %vm824_vm5, %v13825_v9, %v13826_v51  ;;  %v5229_v22 = vmul.f32 %v5219_v13, %v13822_v52  ;;  %v13836_v46 = vld [vmem:[#allocation58_spill] sm:$0xff] }
 0xa65   : > { %5478 = vmatpush2.bf16.msra.mxu0 %v13829_v5  ;;  %v5020_v27 = vpack.c.bf16 %v5008_v25, %v5006_v30  ;;  %v5019_v43 = vpack.c.bf16 %v5005_v6, %v5003_v15  ;;  %v5212_v57 = vsel %vm824_vm5, %v13830_v53, %v13831_v0  ;;  %v5233_v21 = vmul.f32 %v5221_v62, %v13822_v52  ;;  %v13833_v6 = vld [vmem:[#allocation67_spill] sm:$0xff] }
 0xa66   : > { %v5248_v49 = vpack.c.bf16 %v5240_v7, %v5238_v31  ;;  %5547 = vmatpush1.bf16.msra.mxu1 %v5026_v19  ;;  %v12622_v29 = vpop.permute.xlu0 %5128  ;;  %v5249_v33 = vpack.c.bf16 %v5241_v24, %v5239_v37  ;;  %5479 = vmatprep.subr.bf16.mxu0 %v5021_v47  ;;  %v12637_v16 = vpop.permute.xlu1 %5110  ;;  %v12640_v19 = vmul.f32 %v5211_v63, %v13817_v32  ;;  %v13838_v31 = vld [vmem:[#allocation76_spill] sm:$0xff]  ;;  %v13841_v7 = vld [vmem:[#allocation6_spill] sm:$0xff] }
 0xa67   : > { %v4920_v20 = vsel %vm472_vm4, %v13832_v10, %v12432_v40  ;;  %v4928_v34 = vsel %vm472_vm4, %v12432_v40, %v13832_v10  ;;  %v5231_v35 = vmul.f32 %v5220_v4, %v13822_v52  ;;  %v5232_v15 = vmul.f32 %v5213_v55, %v13817_v32  ;;  %v13839_v52 = vld [vmem:[#allocation35_spill] sm:$0xff] }
 0xa68   : > { %5548 = vmatprep.subr.bf16.mxu1 %v5249_v33  ;;  %v4917_v60 = vsel %vm472_vm4, %v13834_v14, %v13833_v6  ;;  %v4916_v54 = vsel %vm472_vm4, %v13836_v46, %v13835_v26  ;;  %v13840_v37 = vpack.c.bf16 %v13838_v31, %v13839_v52  ;;  %v4942_v24 = vmul.f32 %v4928_v34, %v13841_v7 }
 0xa69   : > { %5480 = vmatpush2.bf16.msra.mxu0 %v5020_v27  ;;  %v4943_v58 = vmul.f32 %v4920_v20, %v13842_v28  ;;  %v5230_v30 = vmul.f32 %v5212_v57, %v13817_v32  ;;  %v4924_v47 = vsel %vm472_vm4, %v13835_v26, %v13836_v46  ;;  %v4937_v9 = vmul.f32 %v4917_v60, %v13842_v28  ;;  %v13850_v60 = vld [vmem:[#allocation11_spill] sm:$0xff] }
 0xa6a   : > { %5549 = vmatpush2.bf16.msra.mxu1 %v5248_v49  ;;  %v4913_v25 = vpop.permute.xlu0 %4912  ;;  %5481 = vmatprep.subr.bf16.mxu0 %v5019_v43  ;;  %v12672_v17 = vpop.permute.xlu1 %5126  ;;  %v5245_v51 = vpack.c.bf16 %v5233_v21, %v5231_v35  ;;  %v4925_v62 = vsel %vm472_vm4, %v13833_v6, %v13834_v14  ;;  %v13845_v5 = vpack.c.bf16 %v13843_v45, %v13844_v50  ;;  %v13847_v35 = vld [vmem:[#allocation41_spill] sm:$0xff] }
 0xa6b   : > { %v4921_v40 = vsel %vm472_vm4, %v13837_v2, %v4913_v25  ;;  %v4929_v8 = vsel %vm472_vm4, %v4913_v25, %v13837_v2  ;;  %5550 = vmatprep.subr.bf16.mxu1 %v13840_v37  ;;  %v4935_v53 = vmul.f32 %v4916_v54, %v13842_v28  ;;  %v5242_v4 = vpack.c.bf16 %v12640_v19, %v12580_v42  ;;  %v13851_v37 = vld [vmem:[#allocation71_spill] sm:$0xff] }
 0xa6c   : > { %v4944_v63 = vmul.f32 %v4929_v8, %v13841_v7  ;;  %v4945_v13 = vmul.f32 %v4921_v40, %v13842_v28  ;;  %v5244_v55 = vpack.c.bf16 %v5232_v15, %v5230_v30  ;;  %v5243_v27 = vpack.c.bf16 %v5229_v22, %v12627_v44  ;;  %v13848_v15 = vld [vmem:[#allocation55_spill] sm:$0xff] }
 0xa6d   : > { %5482 = vmatpush2.bf16.msra.mxu0 %v5018_v36  ;;  %v5144_v36 = vsel %vm738_vm6, %v12242_v48, %v12466_v61  ;;  %v4934_v43 = vmul.f32 %v4924_v47, %v13841_v7  ;;  %v4936_v57 = vmul.f32 %v4925_v62, %v13841_v7  ;;  %v5152_v21 = vsel %vm738_vm6, %v12466_v61, %v12242_v48  ;;  %v13846_v48 = vld [vmem:[#allocation10_spill] sm:$0xff] }
 0xa6e   : > { %v4952_v49 = vpack.c.bf16 %v4944_v63, %v4942_v24  ;;  %5551 = vmatpush2.bf16.msra.mxu1 %v13845_v5  ;;  %v12694_v32 = vpop.permute.xlu0 %5108  ;;  %v4953_v33 = vpack.c.bf16 %v4945_v13, %v4943_v58  ;;  %v12697_v0 = vpop.permute.xlu1 %5106  ;;  %v4949_v10 = vpack.c.bf16 %v4937_v9, %v4935_v53  ;;  %v4915_v42 = vsel %vm472_vm4, %v12344_v3, %v12416_v1  ;;  %v13852_v24 = vld [vmem:[#allocation54_spill] sm:$0xff] }
 0xa6f   : > { %5552 = vmatprep.subr.bf16.mxu1 %v5245_v51  ;;  %v4914_v44 = vsel %vm472_vm4, %v12485_v41, %v12516_v11  ;;  %v5150_v19 = vsel %vm738_vm6, %v12597_v12, %v12553_v38  ;;  %v5166_v61 = vmul.f32 %v5144_v36, %v13846_v48  ;;  %v13849_v6 = vpack.c.bf16 %v13847_v35, %v13848_v15  ;;  %v6452_v35 = vld [vmem:[%s13029_s1 + $0x2a8] ss:$20 sps:$4 sm:$0xff]  }
 0xa70   : > { %5483 = vmatprep.subr.bf16.mxu0 %v4953_v33  ;;  %v5167_v25 = vmul.f32 %v5152_v21, %v13850_v60  ;;  %v5151_v26 = vsel %vm738_vm6, %v12481_v23, %v12455_v39  ;;  %v4931_v2 = vmul.f32 %v4914_v44, %v13842_v28  ;;  %v5142_v40 = vsel %vm738_vm6, %v12553_v38, %v12597_v12 }
 0xa71   : > { %5484 = vmatpush2.bf16.msra.mxu0 %v4952_v49  ;;  %v5163_v8 = vmul.f32 %v5150_v19, %v13850_v60  ;;  %v5148_v31 = vsel %vm738_vm6, %v12672_v17, %v12637_v16  ;;  %v13853_v58 = vpack.c.bf16 %v13851_v37, %v13852_v24  ;;  %v4923_v38 = vsel %vm472_vm4, %v12416_v1, %v12344_v3 }
 0xa72   : > { %5553 = vmatpush2.bf16.msra.mxu1 %v5244_v55  ;;  %v5137_v22 = vpop.permute.xlu0 %5136  ;;  %5485 = vmatprep.subr.bf16.mxu0 %v13849_v6  ;;  %v5123_v14 = vpop.permute.xlu1 %5122  ;;  %v4933_v12 = vmul.f32 %v4915_v42, %v13842_v28  ;;  %v5143_v63 = vsel %vm738_vm6, %v12455_v39, %v12481_v23  ;;  %v5165_v13 = vmul.f32 %v5151_v26, %v13850_v60  ;;  %v6455_v6 = vld [vmem:[%s13029_s1 + $0x2b4] ss:$20 sps:$4 sm:$0xff]  }
 0xa73   : > { %v5145_v20 = vsel %vm738_vm6, %v12267_v59, %v5137_v22  ;;  %v5153_v34 = vsel %vm738_vm6, %v5137_v22, %v12267_v59  ;;  %5554 = vmatprep.subr.bf16.mxu1 %v5243_v27  ;;  %v4922_v59 = vsel %vm472_vm4, %v12516_v11, %v12485_v41  ;;  %v4948_v47 = vpack.c.bf16 %v4936_v57, %v4934_v43  ;;  %v6447_v57 = vld [vmem:[%s13029_s1 + $0x2ac] ss:$20 sps:$4 sm:$0xff]  }
 0xa74   : > { %v5168_v46 = vmul.f32 %v5145_v20, %v13846_v48  ;;  %v5169_v54 = vmul.f32 %v5153_v34, %v13850_v60  ;;  %v4930_v9 = vmul.f32 %v4922_v59, %v13841_v7  ;;  %v5162_v51 = vmul.f32 %v5142_v40, %v13846_v48  ;;  %v13854_v59 = vld [vmem:[#allocation12_spill] sm:$0xff] }
 0xa75   : > { %5486 = vmatpush2.bf16.msra.mxu0 %v13853_v58  ;;  %v5149_v3 = vsel %vm738_vm6, %v12622_v29, %v12540_v56  ;;  %v5140_v1 = vsel %vm738_vm6, %v12637_v16, %v12672_v17  ;;  %v5159_v39 = vmul.f32 %v5148_v31, %v13850_v60  ;;  %v4947_v23 = vpack.c.bf16 %v4933_v12, %v4931_v2 }
 0xa76   : > { %v5176_v52 = vpack.c.bf16 %v5168_v46, %v5166_v61  ;;  %5555 = vmatpush2.bf16.msra.mxu1 %v5242_v4  ;;  %v5125_v41 = vpop.permute.xlu0 %5124  ;;  %v5177_v11 = vpack.c.bf16 %v5169_v54, %v5167_v25  ;;  %5487 = vmatprep.subr.bf16.mxu0 %v4949_v10  ;;  %v5263_v30 = vpop.permute.xlu1 %5262  ;;  %v5175_v28 = vpack.c.bf16 %v5165_v13, %v5163_v8  ;;  %v6458_v13 = vld [vmem:[%s13029_s1 + $0x2b0] ss:$20 sps:$4 sm:$0xff]  }
 0xa77   : > { %v4932_v62 = vmul.f32 %v4923_v38, %v13841_v7  ;;  %v5164_v49 = vmul.f32 %v5143_v63, %v13846_v48  ;;  %v5147_v45 = vsel %vm738_vm6, %v5125_v41, %v12694_v32  ;;  %v5141_v16 = vsel %vm738_vm6, %v12540_v56, %v12622_v29  ;;  %v6444_v29 = vld [vmem:[%s13029_s1 + $0x280] ss:$20 sps:$4 sm:$0xff]   ;;  %v6457_v63 = vld [vmem:[%s13029_s1 + $0x2d0] ss:$20 sps:$4 sm:$0xff]  }
 0xa78   : > { %5556 = vmatprep.subr.bf16.mxu1 %v5177_v11  ;;  %v5161_v17 = vmul.f32 %v5149_v3, %v13850_v60  ;;  %v5158_v53 = vmul.f32 %v5140_v1, %v13846_v48  ;;  %v5146_v4 = vsel %vm738_vm6, %v5123_v14, %v12697_v0  ;;  %v5139_v55 = vsel %vm738_vm6, %v12694_v32, %v5125_v41 }
 0xa79   : > { %5488 = vmatpush2.bf16.msra.mxu0 %v4948_v47  ;;  %v4946_v7 = vpack.c.bf16 %v4932_v62, %v4930_v9  ;;  %v5174_v33 = vpack.c.bf16 %v5164_v49, %v5162_v51  ;;  %v5157_v36 = vmul.f32 %v5147_v45, %v13850_v60  ;;  %v5160_v27 = vmul.f32 %v5141_v16, %v13846_v48  ;;  %v6459_v62 = vld [vmem:[%s13029_s1 + $0x2fc] ss:$20 sps:$4 sm:$0xff]  }
 0xa7a   : > { %5557 = vmatpush2.bf16.msra.mxu1 %v5176_v52  ;;  %v5265_v50 = vpop.permute.xlu0 %5264  ;;  %5489 = vmatprep.subr.bf16.mxu0 %v4947_v23  ;;  %v5279_v5 = vpop.permute.xlu1 %5278  ;;  %v5173_v56 = vpack.c.bf16 %v5161_v17, %v5159_v39  ;;  %v5138_v32 = vsel %vm738_vm6, %v12697_v0, %v5123_v14  ;;  %v5155_v21 = vmul.f32 %v5146_v4, %v13850_v60  ;;  %v6449_v0 = vld [vmem:[%s13029_s1 + $0x288] ss:$20 sps:$4 sm:$0xff]  }
 0xa7b   : > { %5558 = vmatprep.subr.bf16.mxu1 %v5175_v28  ;;  %v5172_v42 = vpack.c.bf16 %v5160_v27, %v5158_v53  ;;  %v5156_v44 = vmul.f32 %v5139_v55, %v13846_v48  ;;  %v5154_v22 = vmul.f32 %v5138_v32, %v13846_v48  ;;  %v6453_v48 = vld [vmem:[%s13029_s1 + $0x2d4] ss:$20 sps:$4 sm:$0xff]   ;;  %v5288_v60 = vsel %vm910_vm7, %v5263_v30, %v5279_v5  ;;  %v13855_v52 = vld [vmem:[#allocation13_spill] sm:$0xff] }
 0xa7c   : > { %v5171_v19 = vpack.c.bf16 %v5157_v36, %v5155_v21  ;;  %v5296_v25 = vsel %vm910_vm7, %v5279_v5, %v5263_v30  ;;  %v5310_v2 = vmul.f32 %v5288_v60, %v13854_v59  ;;  %v6461_v49 = vld [vmem:[%s13029_s1 + $0x2dc] ss:$20 sps:$4 sm:$0xff]   ;;  %v6464_v27 = vld [vmem:[%s13029_s1 + $0x2d8] ss:$20 sps:$4 sm:$0xff]  }
 0xa7d   : > { %5490 = vmatpush2.bf16.msra.mxu0 %v4946_v7  ;;  %v5170_v34 = vpack.c.bf16 %v5156_v44, %v5154_v22  ;;  %v5311_v37 = vmul.f32 %v5296_v25, %v13855_v52 }
 0xa7e   : > { %5559 = vmatpush2.bf16.msra.mxu1 %v5174_v33  ;;  %v5261_v43 = vpop.permute.xlu0 %5260  ;;  %v5259_v10 = vpop.permute.xlu1 %5258 }
 0xa7f   : > { %5560 = vmatprep.subr.bf16.mxu1 %v5173_v56 }
 0xa80   : > { %5492 = vmatmul.mubr.bf16.vlgmr.msra.gmra.mxu0 %v6444_v29  ;;  %v6463_v29 = vld [vmem:[%s13029_s1 + $0x2f8] ss:$20 sps:$4 sm:$0xff]  }
 0xa81   : > { %5501 = vmatprep.mubr.bf16.mxu0 %v6447_v57 }
 0xa82   : > { %5561 = vmatpush2.bf16.msra.mxu1 %v5172_v42  ;;  %v5277_v61 = vpop.permute.xlu0 %5276  ;;  %v5275_v20 = vpop.permute.xlu1 %5274 }
 0xa83   : > { %5562 = vmatprep.subr.bf16.mxu1 %v5171_v19  ;;  %v5295_v26 = vsel %vm910_vm7, %v5277_v61, %v5261_v43  ;;  %v5294_v46 = vsel %vm910_vm7, %v5275_v20, %v5259_v10  ;;  %v5287_v24 = vsel %vm910_vm7, %v5261_v43, %v5277_v61  ;;  %v5286_v38 = vsel %vm910_vm7, %v5259_v10, %v5275_v20  ;;  %v6465_v10 = vld [vmem:[%s13029_s1 + $0x304] ss:$20 sps:$4 sm:$0xff]  }
 0xa84   : > { %v5309_v11 = vmul.f32 %v5295_v26, %v13855_v52  ;;  %v5307_v12 = vmul.f32 %v5294_v46, %v13855_v52  ;;  %v5308_v51 = vmul.f32 %v5287_v24, %v13854_v59  ;;  %v5306_v39 = vmul.f32 %v5286_v38, %v13854_v59 }
 0xa85   : > { %v13856_v20 = vmov 0  }
 0xa86   : > { %5563 = vmatpush2.bf16.msra.mxu1 %v5170_v34  ;;  %v5257_v15 = vpop.permute.xlu0 %5256  ;;  %v5255_v14 = vpop.permute.xlu1 %5254  ;;  %v5318_v53 = vpack.c.bf16 %v5308_v51, %v5306_v39  ;;  %v6467_v34 = vld [vmem:[%s13029_s1 + $0x300] ss:$20 sps:$4 sm:$0xff]  }
 0xa88   : > { %5502 = vmatmul.mubr.bf16.gmra.mxu0 %v6452_v35  ;;  %v6469_v35 = vld [vmem:[%s13029_s1 + $0x2b8] ss:$20 sps:$4 sm:$0xff]  }
 0xa89   : > { %5565 = vmatmul.mubr.bf16.vlgmr.msra.gmra.mxu1 %v6449_v0  ;;  %5511 = vmatprep.mubr.bf16.mxu0 %v6453_v48  ;;  %v6468_v0 = vld [vmem:[%s13029_s1 + $0x290] ss:$20 sps:$4 sm:$0xff]   ;;  %v6471_v48 = vld [vmem:[%s13029_s1 + $0x308] ss:$20 sps:$4 sm:$0xff]  }
 0xa8a   : > { %v5281_v54 = vpop.permute.xlu0 %5280  ;;  %5574 = vmatprep.mubr.bf16.mxu1 %v6455_v6  ;;  %v5271_v31 = vpop.permute.xlu1 %5270 }
 0xa8b   : > { %v5289_v40 = vsel %vm910_vm7, %v5265_v50, %v5281_v54  ;;  %v5297_v8 = vsel %vm910_vm7, %v5281_v54, %v5265_v50  ;;  %v5292_v23 = vsel %vm910_vm7, %v5271_v31, %v5255_v14  ;;  %v5319_v50 = vpack.c.bf16 %v5309_v11, %v5307_v12 }
 0xa8c   : > { %v5312_v58 = vmul.f32 %v5289_v40, %v13854_v59  ;;  %v5313_v41 = vmul.f32 %v5297_v8, %v13855_v52  ;;  %v5284_v16 = vsel %vm910_vm7, %v5255_v14, %v5271_v31  ;;  %v5303_v5 = vmul.f32 %v5292_v23, %v13855_v52 }
 0xa8d   : > { %v5302_v4 = vmul.f32 %v5284_v16, %v13854_v59 }
 0xa8e   : > { %v5320_v30 = vpack.c.bf16 %v5312_v58, %v5310_v2  ;;  %v5273_v47 = vpop.permute.xlu0 %5272  ;;  %v5321_v9 = vpack.c.bf16 %v5313_v41, %v5311_v37  ;;  %v5251_v1 = vpop.permute.xlu1 %5250 }
 0xa8f   : > { %v5293_v3 = vsel %vm910_vm7, %v5273_v47, %v5257_v15  ;;  %v5285_v28 = vsel %vm910_vm7, %v5257_v15, %v5273_v47  ;;  %v6470_v15 = vld [vmem:[%s13029_s1 + $0x2e0] ss:$20 sps:$4 sm:$0xff]  }
 0xa90   : > { %5613 = vmatprep.subr.bf16.mxu0 %v5321_v9  ;;  %6304 = vmatprep.subr.bf16.mxu1 %v5321_v9  ;;  %v5305_v45 = vmul.f32 %v5293_v3, %v13855_v52  ;;  %v5304_v7 = vmul.f32 %v5285_v28, %v13854_v59 }
 0xa91   : > { %5512 = vmatmul.mubr.bf16.gmra.mxu0 %v6457_v63  ;;  %5575 = vmatmul.mubr.bf16.gmra.mxu1 %v6458_v13 }
 0xa92   : > { %5614 = vmatpush1.bf16.msra.mxu0 %v5320_v30  ;;  %6308 = vmatpush1.bf16.msra.mxu1 %v5320_v30  ;;  %v5253_v17 = vpop.permute.xlu0 %5252  ;;  %v5267_v33 = vpop.permute.xlu1 %5266  ;;  %v5317_v56 = vpack.c.bf16 %v5305_v45, %v5303_v5  ;;  %v5316_v57 = vpack.c.bf16 %v5304_v7, %v5302_v4 }
 0xa93   : > { %5615 = vmatprep.subr.bf16.mxu0 %v5319_v50  ;;  %6305 = vmatprep.subr.bf16.mxu1 %v5319_v50  ;;  %v5282_v55 = vsel %vm910_vm7, %v5251_v1, %v5267_v33  ;;  %v5290_v36 = vsel %vm910_vm7, %v5267_v33, %v5251_v1 }
 0xa94   : > { %5521 = vmatprep.mubr.bf16.mxu0 %v6459_v62  ;;  %5584 = vmatprep.mubr.bf16.mxu1 %v6461_v49  ;;  %v5298_v42 = vmul.f32 %v5282_v55, %v13854_v59  ;;  %v5299_v44 = vmul.f32 %v5290_v36, %v13855_v52 }
 0xa96   : > { %5616 = vmatpush1.bf16.msra.mxu0 %v5318_v53  ;;  %6309 = vmatpush1.bf16.msra.mxu1 %v5318_v53  ;;  %v5269_v43 = vpop.permute.xlu0 %5268 }
 0xa97   : > { %v5283_v32 = vsel %vm910_vm7, %v5253_v17, %v5269_v43  ;;  %v5291_v21 = vsel %vm910_vm7, %v5269_v43, %v5253_v17  ;;  %5617 = vmatprep.subr.bf16.mxu0 %v5317_v56  ;;  %6306 = vmatprep.subr.bf16.mxu1 %v5317_v56 }
 0xa98   : > { %v5300_v19 = vmul.f32 %v5283_v32, %v13854_v59  ;;  %v5301_v22 = vmul.f32 %v5291_v21, %v13855_v52 }
 0xa99   : > { %5522 = vmatmul.mubr.bf16.gmra.mxu0 %v6463_v29  ;;  %5585 = vmatmul.mubr.bf16.gmra.mxu1 %v6464_v27 }
 0xa9a   : > { %v5314_v61 = vpack.c.bf16 %v5300_v19, %v5298_v42  ;;  %5618 = vmatpush1.bf16.msra.mxu0 %v5316_v57  ;;  %6310 = vmatpush1.bf16.msra.mxu1 %v5316_v57  ;;  %v5315_v18 = vpack.c.bf16 %v5301_v22, %v5299_v44 }
 0xa9b   : > { %5637 = vmatprep.mubr.bf16.mxu0 %v13856_v20  ;;  %5594 = vmatprep.mubr.bf16.mxu1 %v6465_v10 }
 0xa9c   : > { %5619 = vmatprep.subr.bf16.mxu0 %v5315_v18  ;;  %6307 = vmatprep.subr.bf16.mxu1 %v5315_v18 }
 0xa9e   : > { %5620 = vmatpush1.bf16.msra.mxu0 %v5314_v61  ;;  %6311 = vmatpush1.bf16.msra.mxu1 %v5314_v61 }
 0xa9f   : > { %v5690_v6 = vpop.permute.xlu1 %5689 }
 0xaa1   : > { %5595 = vmatmul.mubr.bf16.gmra.mxu1 %v6467_v34  ;;  %6281 = vmatmul.mubr.msk.bf16.vlgmr.msra.gmra.mxu0 %vm1088_vm8, %v6468_v0 }
 0xaa2   : > { %5647 = vmatprep.mubr.bf16.mxu0 %v13856_v20  ;;  %5657 = vmatprep.mubr.bf16.mxu1 %v13856_v20 }
 0xaa3   : > { %v12914_v14 = vpop.permute.xlu0 %5694  ;;  %v12916_v60 = vpop.permute.xlu1 %5699 }
 0xaa7   : > { %v5755_v46 = vpop.permute.xlu0 %5754  ;;  %v12918_v59 = vpop.permute.xlu1 %5759 }
 0xaa9   : > { %6282 = vmatmul.mubr.msk.bf16.gmra.mxu0 %vm1088_vm8, %v6469_v35  ;;  %6283 = vmatmul.mubr.msk.bf16.vlgmr.msra.gmra.mxu1 %vm1088_vm8, %v6470_v15 }
 0xaaa   : > { %5667 = vmatprep.mubr.bf16.mxu1 %v13856_v20 }
 0xaab   : > { %v12920_v31 = vpop.permute.xlu0 %5704  ;;  %v12922_v24 = vpop.permute.xlu1 %5764 }
 0xaaf   : > { %v12924_v12 = vpop.permute.xlu0 %5709  ;;  %v12926_v30 = vpop.permute.xlu1 %5769 }
 0xab1   : > { %6284 = vmatmul.mubr.msk.bf16.gmra.mxu1 %vm1088_vm8, %v6471_v48 }
 0xab3   : > { %v12928_v1 = vpop.permute.xlu0 %5714  ;;  %v12930_v28 = vpop.permute.xlu1 %5774 }
 0xab7   : > { %v12932_v16 = vpop.permute.xlu0 %5850  ;;  %v12934_v7 = vpop.permute.xlu1 %5855 }
 0xabb   : > { %v12938_v56 = vpop.permute.xlu0 %5719 }
 0xabc   : > { %v12940_v32 = vpop.permute.xlu1 %5779 }
 0xb40   : > { %v5493_v25 = vpop.f32.mrf.mxu0 }
 0xb42   : > { %v5495_v26 = vpop.f32.mrf.mxu0 }
 0xb44   : > { %v5497_v54 = vpop.f32.mrf.mxu0 }
 0xb46   : > { %v5499_v2 = vpop.f32.mrf.mxu0 }
 0xb48   : > { %v5503_v40 = vpop.f32.mrf.mxu0 }
 0xb49   : > { %v5566_v8 = vpop.f32.mrf.mxu1 }
 0xb4a   : > { %v5505_v52 = vpop.f32.mrf.mxu0  ;;  %v5567_v4 = vadd.f32 %v5566_v8, %v5493_v25  ;;  %v12944_v25 = vpop.permute.xlu0 %5860  ;;  %v13857_v8 = vld [vmem:[#allocation3_spill] sm:$0xff] }
 0xb4b   : > { %v5568_v37 = vpop.f32.mrf.mxu1 }
 0xb4c   : > { %v5507_v58 = vpop.f32.mrf.mxu0  ;;  %v5569_v29 = vadd.f32 %v5568_v37, %v5495_v26 }
 0xb4d   : > { %v5570_v41 = vpop.f32.mrf.mxu1 }
 0xb4e   : > { %v5509_v11 = vpop.f32.mrf.mxu0  ;;  %v5571_v21 = vadd.f32 %v5570_v41, %v5497_v54 }
 0xb4f   : > { %v5572_v38 = vpop.f32.mrf.mxu1 }
 0xb50   : > { %v5573_v20 = vadd.f32 %v5572_v38, %v5499_v2  ;;  %v13858_v38 = vld [vmem:[#allocation77_spill] sm:$0xff] }
 0xb51   : > { %v5513_v63 = vpop.f32.mrf.mxu0  ;;  %v5576_v13 = vpop.f32.mrf.mxu1 }
 0xb52   : > { %v5577_v34 = vadd.f32 %v5576_v13, %v5503_v40 }
 0xb53   : > { %v5515_v47 = vpop.f32.mrf.mxu0  ;;  %v5578_v9 = vpop.f32.mrf.mxu1 }
 0xb54   : > { %v5579_v0 = vadd.f32 %v5578_v9, %v5505_v52  ;;  %v12950_v52 = vpop.permute.xlu1 %5724 }
 0xb55   : > { %v5517_v51 = vpop.f32.mrf.mxu0  ;;  %v5580_v3 = vpop.f32.mrf.mxu1 }
 0xb56   : > { %v5581_v35 = vadd.f32 %v5580_v3, %v5507_v58 }
 0xb57   : > { %v5519_v39 = vpop.f32.mrf.mxu0  ;;  %v5582_v23 = vpop.f32.mrf.mxu1 }
 0xb58   : > { %v12946_v26 = vadd.f32 %v5582_v23, %v5509_v11 }
 0xb59   : > { %v5523_v62 = vpop.f32.mrf.mxu0  ;;  %v5586_v49 = vpop.f32.mrf.mxu1 }
 0xb5b   : > { %v5525_v45 = vpop.f32.mrf.mxu0  ;;  %v5588_v50 = vpop.f32.mrf.mxu1 }
 0xb5d   : > { %v5527_v17 = vpop.f32.mrf.mxu0  ;;  %v5590_v5 = vpop.f32.mrf.mxu1 }
 0xb5f   : > { %v12936_v33 = vpop.f32.mrf.mxu0  ;;  %v5592_v53 = vpop.f32.mrf.mxu1 }
 0xb60   : > { %v12952_v58 = vadd.f32 %v5592_v53, %v5519_v39 }
 0xb61   : > { %v5596_v55 = vpop.f32.mrf.mxu1  ;;  %v5639_v36 = vpop.f32.mrf.mxu0 }
 0xb62   : > { %v5640_v27 = vadd.f32 %v5639_v36, %v5567_v4  ;;  %v5587_v4 = vadd.f32 %v5586_v49, %v5513_v63  ;;  %v5589_v36 = vadd.f32 %v5588_v50, %v5515_v47  ;;  %v12956_v3 = vadd.f32 %v5596_v55, %v5523_v62 }
 0xb63   : > { %v5598_v43 = vpop.f32.mrf.mxu1  ;;  %v5641_v57 = vpop.f32.mrf.mxu0 }
 0xb64   : > { %v5727_v10 = vmul.f32 %v5690_v6, %v5640_v27  ;;  %v5642_v42 = vadd.f32 %v5641_v57, %v5569_v29 }
 0xb65   : > { %v5600_v44 = vpop.f32.mrf.mxu1  ;;  %v5643_v19 = vpop.f32.mrf.mxu0 }
 0xb66   : > { %v5792_v22 = vadd.f32 %v5755_v46, %v5727_v10  ;;  %v5728_v61 = vmul.f32 %v5690_v6, %v5642_v42  ;;  %v5644_v18 = vadd.f32 %v5643_v19, %v5571_v21  ;;  %v5591_v6 = vadd.f32 %v5590_v5, %v5517_v51  ;;  %v13859_v5 = vld [vmem:[#allocation65_spill] sm:$0xff]  ;;  %v12968_v19 = vpop.permute.xlu0 %5784 }
 0xb67   : > { %v12942_v15 = vpop.f32.mrf.mxu1  ;;  %v5645_v48 = vpop.f32.mrf.mxu0  ;;  %v12961_v50 = vadd.f32 %v5600_v44, %v5527_v17  ;;  %v13860_v17 = vld [vmem:[#allocation78_spill] sm:$0xff] }
 0xb68   : > { %v5808_v54 = vadd.f32 %v5792_v22, %v13857_v8  ;;  %v5793_v37 = vadd.f32 %v5755_v46, %v5728_v61  ;;  %v5729_v41 = vmul.f32 %v12914_v14, %v5644_v18  ;;  %v5646_v29 = vadd.f32 %v5645_v48, %v5573_v20  ;;  %v12974_v20 = vpop.permute.xlu1 %5865 }
 0xb69   : > { %v5649_v2 = vpop.f32.mrf.mxu0  ;;  %v5659_v40 = vpop.f32.mrf.mxu1  ;;  %v12958_v46 = vadd.f32 %v5598_v43, %v5525_v45 }
 0xb6a   : > { %v5809_v13 = vadd.f32 %v5793_v37, %v13858_v38  ;;  %v5794_v11 = vadd.f32 %v12918_v59, %v5729_v41  ;;  %v5650_v9 = vadd.f32 %v5649_v2, %v5577_v34  ;;  %v5730_v63 = vmul.f32 %v12914_v14, %v5646_v29  ;;  %v13862_v37 = vld [vmem:[#allocation47_spill] sm:$0xff] }
 0xb6b   : > { %v5660_v47 = vadd.f32 %v5659_v40, %v5587_v4  ;;  %v5651_v51 = vpop.f32.mrf.mxu0  ;;  %v5661_v23 = vpop.f32.mrf.mxu1  ;;  %v5824_v49 = vmax.f32 %v5808_v54, 0.0 }
 0xb6c   : > { %v5810_v39 = vadd.f32 %v5794_v11, %v13859_v5  ;;  %v5731_v53 = vmul.f32 %v12916_v60, %v5650_v9  ;;  %v5795_v27 = vadd.f32 %v12918_v59, %v5730_v63  ;;  %v5652_v62 = vadd.f32 %v5651_v51, %v5579_v0  ;;  %v13861_v0 = vld [vmem:[#allocation72_spill] sm:$0xff]  ;;  %v13863_v9 = vld [vmem:[#allocation79_spill] sm:$0xff]  ;;  %v5790_v5 = vpop.permute.xlu0 %5789 }
 0xb6d   : > { %v5735_v57 = vmul.f32 %v12924_v12, %v5660_v47  ;;  %v5662_v55 = vadd.f32 %v5661_v23, %v5589_v36  ;;  %v5653_v45 = vpop.f32.mrf.mxu0  ;;  %v5663_v43 = vpop.f32.mrf.mxu1  ;;  %v5825_v21 = vmax.f32 %v5809_v13, 0.0 }
 0xb6e   : > { %v5826_v14 = vmax.f32 %v5810_v39, 0.0  ;;  %v5796_v10 = vadd.f32 %v12922_v24, %v5731_v53  ;;  %v5654_v42 = vadd.f32 %v5653_v45, %v5581_v35  ;;  %v5811_v44 = vadd.f32 %v5795_v27, %v13860_v17  ;;  %v13865_v27 = vld [vmem:[#allocation52_spill] sm:$0xff] }
 0xb6f   : > { %v5800_v22 = vadd.f32 %v12930_v28, %v5735_v57  ;;  %v5732_v61 = vmul.f32 %v12916_v60, %v5652_v62  ;;  %v5736_v59 = vmul.f32 %v12924_v12, %v5662_v55  ;;  %v5665_v18 = vpop.f32.mrf.mxu1  ;;  %v5664_v35 = vadd.f32 %v5663_v43, %v5591_v6  ;;  %v5655_v60 = vpop.f32.mrf.mxu0  ;;  %v13866_v43 = vld [vmem:[#allocation51_spill] sm:$0xff] }
 0xb70   : > { %v5890_v34 = vmul.f32 %v12934_v7, %v5826_v14  ;;  %v5812_v48 = vadd.f32 %v5796_v10, %v13861_v0  ;;  %v5733_v8 = vmul.f32 %v12920_v31, %v5654_v42  ;;  %v5827_v54 = vmax.f32 %v5811_v44, 0.0  ;;  %v5871_v62 = vpop.permute.xlu1 %5870 }
 0xb71   : > { %v5816_v41 = vadd.f32 %v5800_v22, %v13862_v37  ;;  %v5797_v4 = vadd.f32 %v12922_v24, %v5732_v61  ;;  %v5801_v36 = vadd.f32 %v12930_v28, %v5736_v59  ;;  %v5669_v29 = vpop.f32.mrf.mxu1  ;;  %v5888_v12 = vmul.f32 %v12932_v16, %v5824_v49  ;;  %v13864_v28 = vld [vmem:[#allocation66_spill] sm:$0xff] }
 0xb72   : > { %v5828_v2 = vmax.f32 %v5812_v48, 0.0  ;;  %v5798_v40 = vadd.f32 %v12926_v30, %v5733_v8  ;;  %v5737_v38 = vmul.f32 %v12928_v1, %v5664_v35  ;;  %v5889_v13 = vmul.f32 %v12932_v16, %v5825_v21  ;;  %v5876_v35 = vpop.permute.xlu0 %5875 }
 0xb73   : > { %v5891_v6 = vmul.f32 %v12934_v7, %v5827_v54  ;;  %v5832_v11 = vmax.f32 %v5816_v41, 0.0  ;;  %v5813_v63 = vadd.f32 %v5797_v4, %v13863_v9  ;;  %v5671_v47 = vpop.f32.mrf.mxu1  ;;  %v5656_v49 = vadd.f32 %v5655_v60, %v12946_v26  ;;  %v13869_v60 = vld [vmem:[#allocation69_spill] sm:$0xff]  ;;  %v13871_v9 = vld [vmem:[#allocation63_spill] sm:$0xff] }
 0xb74   : > { %v5892_v24 = vmul.f32 %v12944_v25, %v5828_v2  ;;  %v5814_v51 = vadd.f32 %v5798_v40, %v13864_v28  ;;  %v5802_v23 = vadd.f32 %v12940_v32, %v5737_v38  ;;  %v5904_v39 = vadd.f32 %v5890_v34, %v5888_v12  ;;  %v13870_v38 = vld [vmem:[#allocation73_spill] sm:$0xff] }
 0xb75   : > { %v5603_v53 = vadd.f32 %v12942_v15, %v12936_v33  ;;  %v5917_v16 = vadd.f32 %v5891_v6, %v5889_v13  ;;  %v5817_v7 = vadd.f32 %v5801_v36, %v13865_v27  ;;  %v5673_v57 = vpop.f32.mrf.mxu1  ;;  %v5829_v55 = vmax.f32 %v5813_v63, 0.0  ;;  %v13868_v36 = vld [vmem:[#allocation38_spill] sm:$0xff] }
 0xb76   : > { %v5830_v45 = vmax.f32 %v5814_v51, 0.0  ;;  %v5818_v21 = vadd.f32 %v5802_v23, %v13866_v43  ;;  %v5734_v14 = vmul.f32 %v12920_v31, %v5656_v49  ;;  %v5905_v10 = vadd.f32 %v5904_v39, %v5892_v24  ;;  %v5881_v24 = vpop.permute.xlu1 %5880  ;;  %v13872_v39 = vld [vmem:[#allocation68_spill] sm:$0xff] }
 0xb77   : > { %v5896_v42 = vmul.f32 %v5871_v62, %v5832_v11  ;;  %v5666_v26 = vadd.f32 %v5665_v18, %v12952_v58  ;;  %v5670_v17 = vadd.f32 %v5669_v29, %v12956_v3  ;;  %v5672_v22 = vadd.f32 %v5671_v47, %v12958_v46  ;;  %v5675_v61 = vpop.f32.mrf.mxu1  ;;  %v13867_v18 = vld [vmem:[#allocation59_spill] sm:$0xff] }
 0xb78   : > { %v5894_v44 = vmul.f32 %v12974_v20, %v5830_v45  ;;  %v5834_v33 = vmax.f32 %v5818_v21, 0.0  ;;  %v5799_v15 = vadd.f32 %v12926_v30, %v5734_v14  ;;  %v5833_v59 = vmax.f32 %v5817_v7, 0.0 }
 0xb79   : > { %v5738_v34 = vmul.f32 %v12928_v1, %v5666_v26  ;;  %v5739_v0 = vmul.f32 %v12938_v56, %v5670_v17  ;;  %v5674_v31 = vadd.f32 %v5673_v57, %v12961_v50  ;;  %v5893_v48 = vmul.f32 %v12944_v25, %v5829_v55 }
 0xb7a   : > { %v5906_v58 = vadd.f32 %v5905_v10, %v5894_v44  ;;  %v5815_v3 = vadd.f32 %v5799_v15, %v13867_v18  ;;  %v5740_v8 = vmul.f32 %v12938_v56, %v5672_v22  ;;  %v5676_v37 = vadd.f32 %v5675_v61, %v5603_v53 }
 0xb7b   : > { %v5803_v30 = vadd.f32 %v12940_v32, %v5738_v34  ;;  %v5804_v46 = vadd.f32 %v12968_v19, %v5739_v0  ;;  %v5741_v54 = vmul.f32 %v12950_v52, %v5674_v31  ;;  %v5898_v1 = vmul.f32 %v5876_v35, %v5834_v33 }
 0xb7c   : > { %v5907_v41 = vadd.f32 %v5906_v58, %v5896_v42  ;;  %v5831_v4 = vmax.f32 %v5815_v3, 0.0  ;;  %v5805_v50 = vadd.f32 %v12968_v19, %v5740_v8  ;;  %v5742_v56 = vmul.f32 %v12950_v52, %v5676_v37  ;;  %v5886_v52 = vpop.permute.xlu0 %5885  ;;  %v13873_v58 = vld [vmem:[#allocation2_spill] sm:$0xff] }
 0xb7d   : > { %v5819_v25 = vadd.f32 %v5803_v30, %v13868_v36  ;;  %v5820_v29 = vadd.f32 %v5804_v46, %v13869_v60  ;;  %v5806_v12 = vadd.f32 %v5790_v5, %v5741_v54  ;;  %v5918_v2 = vadd.f32 %v5917_v16, %v5893_v48 }
 0xb7e   : > { %v5908_v40 = vadd.f32 %v5907_v41, %v5898_v1  ;;  %v5895_v32 = vmul.f32 %v12974_v20, %v5831_v4  ;;  %v5821_v13 = vadd.f32 %v5805_v50, %v13870_v38  ;;  %v5807_v47 = vadd.f32 %v5790_v5, %v5742_v56 }
 0xb7f   : > { %v5835_v6 = vmax.f32 %v5819_v25, 0.0  ;;  %v5836_v11 = vmax.f32 %v5820_v29, 0.0  ;;  %v5822_v63 = vadd.f32 %v5806_v12, %v13871_v9  ;;  %v5897_v19 = vmul.f32 %v5871_v62, %v5833_v59 }
 0xb80   : > { %v5919_v28 = vadd.f32 %v5918_v2, %v5895_v32  ;;  %v5837_v51 = vmax.f32 %v5821_v13, 0.0  ;;  %v5823_v53 = vadd.f32 %v5807_v47, %v13872_v39  ;;  %v6494_v44 = vmov 1966171168  }
 0xb81   : > { %v5900_v23 = vmul.f32 %v5881_v24, %v5836_v11  ;;  %v5838_v49 = vmax.f32 %v5822_v63, 0.0  ;;  %v5899_v16 = vmul.f32 %v5876_v35, %v5835_v6  ;;  %v5934_v33 = vunpack.c.l.s4 %v6494_v44 }
 0xb82   : > { %v5920_v27 = vadd.f32 %v5919_v28, %v5897_v19  ;;  %v5839_v57 = vmax.f32 %v5823_v53, 0.0  ;;  %v5901_v45 = vmul.f32 %v5881_v24, %v5837_v51  ;;  %v13874_v35 = vlaneseq }
 0xb83   : > { %v5909_v7 = vadd.f32 %v5908_v40, %v5900_v23  ;;  %v5902_v20 = vmul.f32 %v5886_v52, %v5838_v49  ;;  %v5935_v34 = vunpack.c.0.s8 %v5934_v33 }
 0xb84   : > { %v5921_v55 = vadd.f32 %v5920_v27, %v5899_v16  ;;  %v5903_v21 = vmul.f32 %v5886_v52, %v5839_v57  ;;  %vm5950_vm9 = vcmp.lt.s32.totalorder %v13874_v35, 256 }
 0xb85   : > { %v5910_v43 = vadd.f32 %v5909_v7, %v5902_v20  ;;  %v5938_v18 = vsub.s32 %v5935_v34, %v13873_v58 }
 0xb86   : > { %v5922_v14 = vadd.f32 %v5921_v55, %v5901_v45 }
 0xb87   : > { %v5911_v5 = vrot.slane %v5910_v43, 4 }
 0xb88   : > { %v5923_v10 = vadd.f32 %v5922_v14, %v5903_v21 }
 0xb89   : > { %v5912_v62 = vadd.f32 %v5911_v5, %v5910_v43 }
 0xb8a   : > { %v5924_v42 = vrot.slane %v5923_v10, 4 }
 0xb8b   : > { %v5913_v26 = vrot.slane %v5912_v62, 2 }
 0xb8c   : > { %v5925_v17 = vadd.f32 %v5924_v42, %v5923_v10 }
 0xb8d   : > { %v5914_v15 = vadd.f32 %v5913_v26, %v5912_v62 }
 0xb8e   : > { %v5926_v22 = vrot.slane %v5925_v17, 2 }
 0xb8f   : > { %v5915_v61 = vrot.slane %v5914_v15, 1 }
 0xb90   : > { %v5927_v59 = vadd.f32 %v5926_v22, %v5925_v17 }
 0xb91   : > { %v5916_v31 = vadd.f32 %v5915_v61, %v5914_v15 }
 0xb92   : > { %v5928_v0 = vrot.slane %v5927_v59, 1 }
 0xb94   : > { %v5929_v48 = vadd.f32 %v5928_v0, %v5927_v59 }
 0xb96   : > { %v5932_v3 = vcombine.low %v5916_v31, %v5929_v48 }
 0xb98   : > { %v5939_v8 = vrot.slane %v5932_v3, %v5938_v18 }
 0xb9a   : > { %v5946_v30 = vrot.slane %v5939_v8, %v5938_v18 }
 0xb9c   : > { %5952 = vst.msk [vmem:[%s249_s30] sm:$0x3] %vm5950_vm9, %v5946_v30 }
 0xb9d PF: > { %s16_s21 = sadd.s32 1, %s6483_s21  }
 0xb9e   : > { %p13_p4 = scmp.ge.s32.totalorder %s16_s21, 4  }
 0xba0   :  { %15 = sbr.rel (!%p13_p4) target bundleno = 1 (0x1), region = 93 }

</bundles_post_ra>
